<compile_context>
chip_gen: v6e
topology: v6e:2x2x1
jax: 0.10.0
libtpu: 0.0.40
codegen_flags: <defaults>
</compile_context>

<pallas_src>
import functools

import jax
import jax.numpy as jnp
from jax import lax
from jax.experimental import pallas as pl
from jax.experimental.pallas import tpu as pltpu

FC1_WEIGHT_DTYPE = jnp.bfloat16   # float32 for exact parity with the f32 reference

_CONV_K1, _CONV_S1 = 5, 4         # conv1 kernel / stride
_CONV_K2, _CONV_S2 = 5, 2         # conv2 kernel / stride
_K1_PAD = 128                     # conv1 im2col K (=100) zero-padded to a lane tile
_FC1_GROUP = 4                    # conv2 positions per fc1 partial GEMM (4*32 = 128 lanes)


# ---------------------------------------------------------------------------
# Fused kernel: conv1 + conv2 + flatten + (y) + fc1 + fc2, single grid step.
# ---------------------------------------------------------------------------
def _fused_dqn_kernel(*refs, batch, n_pos, n_k2, c_mid, oc2, add_y):
    if add_y:
        (p_ref, w1_ref, b1_ref, w2_ref, b2_ref, y_ref,
         wf1c_ref, wf1y_ref, bf1_ref, wf2_ref, bf2_ref, out_ref) = refs
    else:
        (p_ref, w1_ref, b1_ref, w2_ref, b2_ref,
         wf1c_ref, bf1_ref, wf2_ref, bf2_ref, out_ref) = refs

    rows = n_pos * batch                     # 72 at B=2 (multiple of 8 -> aligned slices)
    w1 = w1_ref[...]                         # (128, 16)
    b1 = b1_ref[...]                         # (1, 16)

    # relu(conv1) + conv2 fused: accumulate the conv2 GEMM over the 25 kernel
    # positions.  Patch chunk k2 holds, for every conv2 output position p and batch b,
    # the conv1 im2col patch of the conv1 position that (kh2, kw2)=k2 points at.
    acc2 = jnp.zeros((rows, oc2), jnp.float32)
    for k2 in range(n_k2):
        patch = p_ref[pl.ds(k2 * rows, rows), :]                        # (72, 128)
        h1 = jnp.dot(patch, w1, preferred_element_type=jnp.float32) + b1
        h1 = jnp.maximum(h1, 0.0)                                       # relu(conv1)
        w2_k = w2_ref[pl.ds(k2 * c_mid, c_mid), :]                      # (16, 32)
        acc2 = acc2 + jnp.dot(h1, w2_k, preferred_element_type=jnp.float32)
    h2 = jnp.maximum(acc2 + b2_ref[...], 0.0)                           # (72, 32), rows (p, b)

    # fc1: accumulate over groups of 4 conv2 positions.  Each group builds a
    # lane-dense (batch, 128) LHS by concatenating four (batch, 32) row blocks of h2
    # (no flatten scratch, no masked narrow stores, no sublane->lane reshape).  The
    # NCHW flatten order is already folded into wf1c's row permutation at prep time.
    n_groups = wf1c_ref.shape[0]
    group = wf1c_ref.shape[1] // oc2
    n_hidden = bf1_ref.shape[1]
    acc_fc = jnp.zeros((batch, n_hidden), jnp.float32)
    for g in range(n_groups):
        blocks = [h2[(g * group + q) * batch:(g * group + q + 1) * batch, :]
                  for q in range(group)]
        lhs = jnp.concatenate(blocks, axis=1)                           # (batch, 128) f32
        wg = wf1c_ref[g].astype(jnp.float32)                            # (128, 256)
        acc_fc = acc_fc + jnp.dot(lhs, wg, preferred_element_type=jnp.float32)
    if add_y:
        acc_fc = acc_fc + jnp.dot(y_ref[...], wf1y_ref[...].astype(jnp.float32),
                                  preferred_element_type=jnp.float32)
    h3 = jnp.maximum(acc_fc + bf1_ref[...], 0.0)                        # relu(fc1)

    out = jnp.dot(h3, wf2_ref[...], preferred_element_type=jnp.float32) + bf2_ref[...]
    out_ref[...] = out.astype(out_ref.dtype)


def _zero_index_map(i, *, ndim):
    return (0,) * ndim


# ---------------------------------------------------------------------------
# XLA glue: composite im2col (pure layout plumbing on the 128 KB input).
# ---------------------------------------------------------------------------
def _im2col_nhwc(x_nhwc, k, s):
    """x (B,H,W,C) -> (patches (B,OH,OW,k*k*C), OH, OW); feature order (kh, kw, c)."""
    B, H, W, C = x_nhwc.shape
    OH = (H - k) // s + 1
    OW = (W - k) // s + 1
    cols = [x_nhwc[:, i:i + s * (OH - 1) + 1:s, j:j + s * (OW - 1) + 1:s, :]
            for i in range(k) for j in range(k)]
    return jnp.concatenate(cols, axis=-1), OH, OW


# ---------------------------------------------------------------------------
# Parameters: PyTorch-layout init + one-time kernel-layout preparation.
# ---------------------------------------------------------------------------
def init_params(key, activate_additional):
    """PyTorch-layout parameters (Conv2d: (OC,C,KH,KW); Linear: (out,in))."""
    ks = jax.random.split(key, 8)
    fc1_in = 1200 if activate_additional else 1152

    def u(k, shape, fan_in):
        bound = 1.0 / float(fan_in) ** 0.5
        return jax.random.uniform(k, shape, jnp.float32, -bound, bound)

    return {
        "conv1_w": u(ks[0], (16, 4, 5, 5), 4 * 5 * 5),
        "conv1_b": u(ks[1], (16,), 4 * 5 * 5),
        "conv2_w": u(ks[2], (32, 16, 5, 5), 16 * 5 * 5),
        "conv2_b": u(ks[3], (32,), 16 * 5 * 5),
        "fc1_w":   u(ks[4], (256, fc1_in), fc1_in),
        "fc1_b":   u(ks[5], (256,), fc1_in),
        "fc2_w":   u(ks[6], (4, 256), 256),   # fc2 out hard-coded to 4, as in the source
        "fc2_b":   u(ks[7], (4,), 256),
    }


def prepare_params(params, activate_additional, n_additional=48):
    """One-time re-layout of PyTorch-layout params into the kernel layout."""
    oc1 = params["conv1_w"].shape[0]
    oc2 = params["conv2_w"].shape[0]
    cin = params["conv1_w"].shape[1]
    kh1, kw1 = params["conv1_w"].shape[2:]
    k1_raw = kh1 * kw1 * cin
    assert k1_raw <= _K1_PAD

    # conv weights -> (k*k*Cin, OC) GEMM layout, rows ordered (kh, kw, c) like im2col.
    w1 = params["conv1_w"].transpose(2, 3, 1, 0).reshape(k1_raw, oc1)
    w1 = jnp.pad(w1, ((0, _K1_PAD - k1_raw), (0, 0)))                  # (128, 16)
    w2 = params["conv2_w"].transpose(2, 3, 1, 0).reshape(-1, oc2)      # (400, 32)

    fc1 = params["fc1_w"]                                              # (256, fc1_in)
    n_hidden, fc1_in = fc1.shape
    n_y = n_additional if activate_additional else 0
    n_conv = fc1_in - n_y
    assert n_conv % oc2 == 0
    n_pos = n_conv // oc2                                              # 36 (6x6)
    assert n_pos % _FC1_GROUP == 0

    # Fold PyTorch's NCHW .view(B,-1) flatten (flat index = oc*n_pos + p) into a
    # permutation of fc1's weight rows, grouped 4 positions / 128 lanes per block.
    wf1c = (fc1[:, :n_conv]
            .reshape(n_hidden, oc2, n_pos)                             # [n, oc, p]
            .transpose(2, 1, 0)                                        # [p, oc, n]
            .reshape(n_pos // _FC1_GROUP, _FC1_GROUP * oc2, n_hidden)) # (9, 128, 256)

    out = {
        "w1": w1, "b1": params["conv1_b"].reshape(1, -1),
        "w2": w2, "b2": params["conv2_b"].reshape(1, -1),
        "wf1c": wf1c.astype(FC1_WEIGHT_DTYPE),
        "bf1": params["fc1_b"].reshape(1, -1),
        "wf2": params["fc2_w"].T,
        "bf2": params["fc2_b"].reshape(1, -1),
    }
    if activate_additional:
        out["wf1y"] = fc1[:, n_conv:].T.astype(FC1_WEIGHT_DTYPE)       # (48, 256)
    return out


# ---------------------------------------------------------------------------
# Forward pass: one pallas_call.
# ---------------------------------------------------------------------------
def dqn_other_forward(kparams, x, y, *, activate_additional):
    """x: (B, 4, H, W) NCHW float32; y: (B, 48) (used iff activate_additional)."""
    B = x.shape[0]
    k1p, c_mid = kparams["w1"].shape
    oc2 = kparams["w2"].shape[1]
    n_k2 = kparams["w2"].shape[0] // c_mid
    n_out = kparams["wf2"].shape[1]

    # Composite im2col: for every conv2 output position p2 and every conv2 kernel
    # offset k2=(kh2,kw2), the conv1 patch of the conv1 position that k2 points at.
    # Rows ordered (k2, p2, b) so every in-kernel slice is contiguous and aligned.
    x_nhwc = jnp.transpose(x, (0, 2, 3, 1))
    p1, oh1, ow1 = _im2col_nhwc(x_nhwc, k=_CONV_K1, s=_CONV_S1)        # (B,15,15,100)
    p1 = jnp.pad(p1, ((0, 0), (0, 0), (0, 0), (0, k1p - p1.shape[-1])))
    p2, oh2, ow2 = _im2col_nhwc(p1, k=_CONV_K2, s=_CONV_S2)            # (B,6,6,25*128)
    n_pos = oh2 * ow2
    assert n_k2 == _CONV_K2 * _CONV_K2
    group = kparams["wf1c"].shape[1] // oc2
    assert kparams["wf1c"].shape[0] * group == n_pos, (
        "fc1 weight permutation was prepared for a different conv2 spatial size")
    patches = (p2.reshape(B, n_pos, n_k2, k1p)
                 .transpose(2, 1, 0, 3)                                # (25, 36, B, 128)
                 .reshape(n_k2 * n_pos * B, k1p))                      # (1800, 128)

    inputs = [patches, kparams["w1"], kparams["b1"], kparams["w2"], kparams["b2"]]
    if activate_additional:
        inputs.append(y)
    inputs.append(kparams["wf1c"])
    if activate_additional:
        inputs.append(kparams["wf1y"])
    inputs += [kparams["bf1"], kparams["wf2"], kparams["bf2"]]

    def _full_spec(a):
        return pl.BlockSpec(a.shape, functools.partial(_zero_index_map, ndim=a.ndim))

    kernel = functools.partial(
        _fused_dqn_kernel, batch=B, n_pos=n_pos, n_k2=n_k2,
        c_mid=c_mid, oc2=oc2, add_y=activate_additional)

    # NOTE: at B=2 a single grid step is optimal (total VMEM ~1.6 MB).  When batch
    # grows, tile the (k2*p*b) row dim in multiples of 8 on a "parallel" grid axis
    # (uses v7x's 2nd TensorCore, keeps VMEM flat under v5e's 16 MiB scoped default).
    return pl.pallas_call(
        kernel,
        out_shape=jax.ShapeDtypeStruct((B, n_out), jnp.float32),
        grid=(1,),
        in_specs=[_full_spec(a) for a in inputs],
        out_specs=pl.BlockSpec((B, n_out), lambda i: (0, 0)),
        compiler_params=pltpu.CompilerParams(dimension_semantics=("arbitrary",)),
    )(*inputs)


# ---------------------------------------------------------------------------
# Pure-JAX reference (f32), faithful to the PyTorch module, for validation.
# ---------------------------------------------------------------------------
def _reference_forward(params, x, y, activate_additional):
    dn = ("NCHW", "OIHW", "NCHW")
    h = lax.conv_general_dilated(x, params["conv1_w"], (_CONV_S1, _CONV_S1),
                                 "VALID", dimension_numbers=dn)
    h = jnp.maximum(h + params["conv1_b"].reshape(1, -1, 1, 1), 0.0)
    h = lax.conv_general_dilated(h, params["conv2_w"], (_CONV_S2, _CONV_S2),
                                 "VALID", dimension_numbers=dn)
    h = jnp.maximum(h + params["conv2_b"].reshape(1, -1, 1, 1), 0.0)
    flat = h.reshape(h.shape[0], -1)
    if activate_additional:
        flat = jnp.concatenate([flat, y.reshape(flat.shape[0], -1)], axis=1)
    h = jnp.maximum(flat @ params["fc1_w"].T + params["fc1_b"], 0.0)
    return h @ params["fc2_w"].T + params["fc2_b"]


if __name__ == "__main__":
    activate_additional = True
    key = jax.random.PRNGKey(0)
    kx, ky, kp = jax.random.split(key, 3)

    # 64x64 input -> conv1(k5,s4): 15x15 -> conv2(k5,s2): 6x6 -> 32*36 = 1152 conv
    # features (+48 from y when activateAdditional) -> fc1(256) -> fc2(4).
    x = jax.random.normal(kx, (2, 4, 64, 64), jnp.float32)
    y = jax.random.normal(ky, (2, 48), jnp.float32)

    params_pt = init_params(kp, activate_additional)            # PyTorch layout
    kparams = prepare_params(params_pt, activate_additional)    # one-time kernel layout

    fwd = jax.jit(functools.partial(dqn_other_forward,
                                    activate_additional=activate_additional))
    out = fwd(kparams, x, y)
    jax.block_until_ready(out)
    assert out.shape == (2, 4) and out.dtype == jnp.float32

    # Loose tolerance: the only intended deviation is bf16 rounding of the fc1 weight
    # (~1e-3 abs); a layout/permutation bug would show up as an O(1) error.
    ref = _reference_forward(params_pt, x, y, activate_additional)
    max_err = float(jnp.max(jnp.abs(out - ref)))
    assert max_err < 5e-2, f"kernel/reference mismatch: max abs err = {max_err}"
    print("KERNEL_OK")
</pallas_src>

<mosaic_0001>
module attributes {stable_mosaic.version = 11 : i64} {
  func.func @_fused_dqn_kernel(%arg0: i32, %arg1: memref<1800x128xf32, #tpu.memory_space<vmem>>, %arg2: memref<128x16xf32, #tpu.memory_space<vmem>>, %arg3: memref<1x16xf32, #tpu.memory_space<vmem>>, %arg4: memref<400x32xf32, #tpu.memory_space<vmem>>, %arg5: memref<1x32xf32, #tpu.memory_space<vmem>>, %arg6: memref<2x48xf32, #tpu.memory_space<vmem>>, %arg7: memref<9x128x256xbf16, #tpu.memory_space<vmem>>, %arg8: memref<48x256xbf16, #tpu.memory_space<vmem>>, %arg9: memref<1x256xf32, #tpu.memory_space<vmem>>, %arg10: memref<256x4xf32, #tpu.memory_space<vmem>>, %arg11: memref<1x4xf32, #tpu.memory_space<vmem>>, %arg12: memref<2x4xf32, #tpu.memory_space<vmem>>) attributes {dimension_semantics = [#tpu.dimension_semantics<arbitrary>], iteration_bounds = array<i64: 1>, scalar_prefetch = 0 : i64, scratch_operands = 0 : i64, tpu.core_type = #tpu.core_type<tc>, window_params = [{pipeline_mode = #tpu.pipeline_mode<synchronous>, transform_indices = @transform_0, window_bounds = array<i64: 1800, 128>}, {pipeline_mode = #tpu.pipeline_mode<synchronous>, transform_indices = @transform_1, window_bounds = array<i64: 128, 16>}, {pipeline_mode = #tpu.pipeline_mode<synchronous>, transform_indices = @transform_2, window_bounds = array<i64: 1, 16>}, {pipeline_mode = #tpu.pipeline_mode<synchronous>, transform_indices = @transform_3, window_bounds = array<i64: 400, 32>}, {pipeline_mode = #tpu.pipeline_mode<synchronous>, transform_indices = @transform_4, window_bounds = array<i64: 1, 32>}, {pipeline_mode = #tpu.pipeline_mode<synchronous>, transform_indices = @transform_5, window_bounds = array<i64: 2, 48>}, {pipeline_mode = #tpu.pipeline_mode<synchronous>, transform_indices = @transform_6, window_bounds = array<i64: 9, 128, 256>}, {pipeline_mode = #tpu.pipeline_mode<synchronous>, transform_indices = @transform_7, window_bounds = array<i64: 48, 256>}, {pipeline_mode = #tpu.pipeline_mode<synchronous>, transform_indices = @transform_8, window_bounds = array<i64: 1, 256>}, {pipeline_mode = #tpu.pipeline_mode<synchronous>, transform_indices = @transform_9, window_bounds = array<i64: 256, 4>}, {pipeline_mode = #tpu.pipeline_mode<synchronous>, transform_indices = @transform_10, window_bounds = array<i64: 1, 4>}, {pipeline_mode = #tpu.pipeline_mode<synchronous>, transform_indices = @transform_11, window_bounds = array<i64: 2, 4>}]} {
    %c0 = arith.constant 0 : index
    %c0_0 = arith.constant 0 : index
    %0 = vector.load %arg2[%c0, %c0_0] : memref<128x16xf32, #tpu.memory_space<vmem>>, vector<128x16xf32>
    %c0_1 = arith.constant 0 : index
    %c0_2 = arith.constant 0 : index
    %1 = vector.load %arg3[%c0_1, %c0_2] : memref<1x16xf32, #tpu.memory_space<vmem>>, vector<1x16xf32>
    %cst = arith.constant 0.000000e+00 : f32
    %2 = vector.broadcast %cst : f32 to vector<72x32xf32>
    %c0_3 = arith.constant 0 : index
    %c0_4 = arith.constant 0 : index
    %3 = vector.load %arg1[%c0_3, %c0_4] : memref<1800x128xf32, #tpu.memory_space<vmem>>, vector<72x128xf32>
    %cst_5 = arith.constant dense<0.000000e+00> : vector<72x16xf32>
    %4 = tpu.matmul %3, %0, %cst_5 {dimension_numbers = #tpu.dot_dimension_numbers<[1], [0], [0], [1], [0, 0, 1, 1], [], []>} : vector<72x128xf32>, vector<128x16xf32>, vector<72x16xf32> -> vector<72x16xf32>
    %5 = vector.broadcast %1 : vector<1x16xf32> to vector<72x16xf32>
    %6 = arith.addf %4, %5 : vector<72x16xf32>
    %cst_6 = arith.constant 0.000000e+00 : f32
    %7 = vector.broadcast %cst_6 : f32 to vector<72x16xf32>
    %8 = arith.maximumf %6, %7 : vector<72x16xf32>
    %c0_7 = arith.constant 0 : index
    %c0_8 = arith.constant 0 : index
    %9 = vector.load %arg4[%c0_7, %c0_8] : memref<400x32xf32, #tpu.memory_space<vmem>>, vector<16x32xf32>
    %cst_9 = arith.constant dense<0.000000e+00> : vector<72x32xf32>
    %10 = tpu.matmul %8, %9, %cst_9 {dimension_numbers = #tpu.dot_dimension_numbers<[1], [0], [0], [1], [0, 0, 1, 1], [], []>} : vector<72x16xf32>, vector<16x32xf32>, vector<72x32xf32> -> vector<72x32xf32>
    %11 = arith.addf %2, %10 : vector<72x32xf32>
    %c72 = arith.constant 72 : index
    %c0_10 = arith.constant 0 : index
    %12 = vector.load %arg1[%c72, %c0_10] : memref<1800x128xf32, #tpu.memory_space<vmem>>, vector<72x128xf32>
    %cst_11 = arith.constant dense<0.000000e+00> : vector<72x16xf32>
    %13 = tpu.matmul %12, %0, %cst_11 {dimension_numbers = #tpu.dot_dimension_numbers<[1], [0], [0], [1], [0, 0, 1, 1], [], []>} : vector<72x128xf32>, vector<128x16xf32>, vector<72x16xf32> -> vector<72x16xf32>
    %14 = vector.broadcast %1 : vector<1x16xf32> to vector<72x16xf32>
    %15 = arith.addf %13, %14 : vector<72x16xf32>
    %cst_12 = arith.constant 0.000000e+00 : f32
    %16 = vector.broadcast %cst_12 : f32 to vector<72x16xf32>
    %17 = arith.maximumf %15, %16 : vector<72x16xf32>
    %c16 = arith.constant 16 : index
    %c0_13 = arith.constant 0 : index
    %18 = vector.load %arg4[%c16, %c0_13] : memref<400x32xf32, #tpu.memory_space<vmem>>, vector<16x32xf32>
    %cst_14 = arith.constant dense<0.000000e+00> : vector<72x32xf32>
    %19 = tpu.matmul %17, %18, %cst_14 {dimension_numbers = #tpu.dot_dimension_numbers<[1], [0], [0], [1], [0, 0, 1, 1], [], []>} : vector<72x16xf32>, vector<16x32xf32>, vector<72x32xf32> -> vector<72x32xf32>
    %20 = arith.addf %11, %19 : vector<72x32xf32>
    %c144 = arith.constant 144 : index
    %c0_15 = arith.constant 0 : index
    %21 = vector.load %arg1[%c144, %c0_15] : memref<1800x128xf32, #tpu.memory_space<vmem>>, vector<72x128xf32>
    %cst_16 = arith.constant dense<0.000000e+00> : vector<72x16xf32>
    %22 = tpu.matmul %21, %0, %cst_16 {dimension_numbers = #tpu.dot_dimension_numbers<[1], [0], [0], [1], [0, 0, 1, 1], [], []>} : vector<72x128xf32>, vector<128x16xf32>, vector<72x16xf32> -> vector<72x16xf32>
    %23 = vector.broadcast %1 : vector<1x16xf32> to vector<72x16xf32>
    %24 = arith.addf %22, %23 : vector<72x16xf32>
    %cst_17 = arith.constant 0.000000e+00 : f32
    %25 = vector.broadcast %cst_17 : f32 to vector<72x16xf32>
    %26 = arith.maximumf %24, %25 : vector<72x16xf32>
    %c32 = arith.constant 32 : index
    %c0_18 = arith.constant 0 : index
    %27 = vector.load %arg4[%c32, %c0_18] : memref<400x32xf32, #tpu.memory_space<vmem>>, vector<16x32xf32>
    %cst_19 = arith.constant dense<0.000000e+00> : vector<72x32xf32>
    %28 = tpu.matmul %26, %27, %cst_19 {dimension_numbers = #tpu.dot_dimension_numbers<[1], [0], [0], [1], [0, 0, 1, 1], [], []>} : vector<72x16xf32>, vector<16x32xf32>, vector<72x32xf32> -> vector<72x32xf32>
    %29 = arith.addf %20, %28 : vector<72x32xf32>
    %c216 = arith.constant 216 : index
    %c0_20 = arith.constant 0 : index
    %30 = vector.load %arg1[%c216, %c0_20] : memref<1800x128xf32, #tpu.memory_space<vmem>>, vector<72x128xf32>
    %cst_21 = arith.constant dense<0.000000e+00> : vector<72x16xf32>
    %31 = tpu.matmul %30, %0, %cst_21 {dimension_numbers = #tpu.dot_dimension_numbers<[1], [0], [0], [1], [0, 0, 1, 1], [], []>} : vector<72x128xf32>, vector<128x16xf32>, vector<72x16xf32> -> vector<72x16xf32>
    %32 = vector.broadcast %1 : vector<1x16xf32> to vector<72x16xf32>
    %33 = arith.addf %31, %32 : vector<72x16xf32>
    %cst_22 = arith.constant 0.000000e+00 : f32
    %34 = vector.broadcast %cst_22 : f32 to vector<72x16xf32>
    %35 = arith.maximumf %33, %34 : vector<72x16xf32>
    %c48 = arith.constant 48 : index
    %c0_23 = arith.constant 0 : index
    %36 = vector.load %arg4[%c48, %c0_23] : memref<400x32xf32, #tpu.memory_space<vmem>>, vector<16x32xf32>
    %cst_24 = arith.constant dense<0.000000e+00> : vector<72x32xf32>
    %37 = tpu.matmul %35, %36, %cst_24 {dimension_numbers = #tpu.dot_dimension_numbers<[1], [0], [0], [1], [0, 0, 1, 1], [], []>} : vector<72x16xf32>, vector<16x32xf32>, vector<72x32xf32> -> vector<72x32xf32>
    %38 = arith.addf %29, %37 : vector<72x32xf32>
    %c288 = arith.constant 288 : index
    %c0_25 = arith.constant 0 : index
    %39 = vector.load %arg1[%c288, %c0_25] : memref<1800x128xf32, #tpu.memory_space<vmem>>, vector<72x128xf32>
    %cst_26 = arith.constant dense<0.000000e+00> : vector<72x16xf32>
    %40 = tpu.matmul %39, %0, %cst_26 {dimension_numbers = #tpu.dot_dimension_numbers<[1], [0], [0], [1], [0, 0, 1, 1], [], []>} : vector<72x128xf32>, vector<128x16xf32>, vector<72x16xf32> -> vector<72x16xf32>
    %41 = vector.broadcast %1 : vector<1x16xf32> to vector<72x16xf32>
    %42 = arith.addf %40, %41 : vector<72x16xf32>
    %cst_27 = arith.constant 0.000000e+00 : f32
    %43 = vector.broadcast %cst_27 : f32 to vector<72x16xf32>
    %44 = arith.maximumf %42, %43 : vector<72x16xf32>
    %c64 = arith.constant 64 : index
    %c0_28 = arith.constant 0 : index
    %45 = vector.load %arg4[%c64, %c0_28] : memref<400x32xf32, #tpu.memory_space<vmem>>, vector<16x32xf32>
    %cst_29 = arith.constant dense<0.000000e+00> : vector<72x32xf32>
    %46 = tpu.matmul %44, %45, %cst_29 {dimension_numbers = #tpu.dot_dimension_numbers<[1], [0], [0], [1], [0, 0, 1, 1], [], []>} : vector<72x16xf32>, vector<16x32xf32>, vector<72x32xf32> -> vector<72x32xf32>
    %47 = arith.addf %38, %46 : vector<72x32xf32>
    %c360 = arith.constant 360 : index
    %c0_30 = arith.constant 0 : index
    %48 = vector.load %arg1[%c360, %c0_30] : memref<1800x128xf32, #tpu.memory_space<vmem>>, vector<72x128xf32>
    %cst_31 = arith.constant dense<0.000000e+00> : vector<72x16xf32>
    %49 = tpu.matmul %48, %0, %cst_31 {dimension_numbers = #tpu.dot_dimension_numbers<[1], [0], [0], [1], [0, 0, 1, 1], [], []>} : vector<72x128xf32>, vector<128x16xf32>, vector<72x16xf32> -> vector<72x16xf32>
    %50 = vector.broadcast %1 : vector<1x16xf32> to vector<72x16xf32>
    %51 = arith.addf %49, %50 : vector<72x16xf32>
    %cst_32 = arith.constant 0.000000e+00 : f32
    %52 = vector.broadcast %cst_32 : f32 to vector<72x16xf32>
    %53 = arith.maximumf %51, %52 : vector<72x16xf32>
    %c80 = arith.constant 80 : index
    %c0_33 = arith.constant 0 : index
    %54 = vector.load %arg4[%c80, %c0_33] : memref<400x32xf32, #tpu.memory_space<vmem>>, vector<16x32xf32>
    %cst_34 = arith.constant dense<0.000000e+00> : vector<72x32xf32>
    %55 = tpu.matmul %53, %54, %cst_34 {dimension_numbers = #tpu.dot_dimension_numbers<[1], [0], [0], [1], [0, 0, 1, 1], [], []>} : vector<72x16xf32>, vector<16x32xf32>, vector<72x32xf32> -> vector<72x32xf32>
    %56 = arith.addf %47, %55 : vector<72x32xf32>
    %c432 = arith.constant 432 : index
    %c0_35 = arith.constant 0 : index
    %57 = vector.load %arg1[%c432, %c0_35] : memref<1800x128xf32, #tpu.memory_space<vmem>>, vector<72x128xf32>
    %cst_36 = arith.constant dense<0.000000e+00> : vector<72x16xf32>
    %58 = tpu.matmul %57, %0, %cst_36 {dimension_numbers = #tpu.dot_dimension_numbers<[1], [0], [0], [1], [0, 0, 1, 1], [], []>} : vector<72x128xf32>, vector<128x16xf32>, vector<72x16xf32> -> vector<72x16xf32>
    %59 = vector.broadcast %1 : vector<1x16xf32> to vector<72x16xf32>
    %60 = arith.addf %58, %59 : vector<72x16xf32>
    %cst_37 = arith.constant 0.000000e+00 : f32
    %61 = vector.broadcast %cst_37 : f32 to vector<72x16xf32>
    %62 = arith.maximumf %60, %61 : vector<72x16xf32>
    %c96 = arith.constant 96 : index
    %c0_38 = arith.constant 0 : index
    %63 = vector.load %arg4[%c96, %c0_38] : memref<400x32xf32, #tpu.memory_space<vmem>>, vector<16x32xf32>
    %cst_39 = arith.constant dense<0.000000e+00> : vector<72x32xf32>
    %64 = tpu.matmul %62, %63, %cst_39 {dimension_numbers = #tpu.dot_dimension_numbers<[1], [0], [0], [1], [0, 0, 1, 1], [], []>} : vector<72x16xf32>, vector<16x32xf32>, vector<72x32xf32> -> vector<72x32xf32>
    %65 = arith.addf %56, %64 : vector<72x32xf32>
    %c504 = arith.constant 504 : index
    %c0_40 = arith.constant 0 : index
    %66 = vector.load %arg1[%c504, %c0_40] : memref<1800x128xf32, #tpu.memory_space<vmem>>, vector<72x128xf32>
    %cst_41 = arith.constant dense<0.000000e+00> : vector<72x16xf32>
    %67 = tpu.matmul %66, %0, %cst_41 {dimension_numbers = #tpu.dot_dimension_numbers<[1], [0], [0], [1], [0, 0, 1, 1], [], []>} : vector<72x128xf32>, vector<128x16xf32>, vector<72x16xf32> -> vector<72x16xf32>
    %68 = vector.broadcast %1 : vector<1x16xf32> to vector<72x16xf32>
    %69 = arith.addf %67, %68 : vector<72x16xf32>
    %cst_42 = arith.constant 0.000000e+00 : f32
    %70 = vector.broadcast %cst_42 : f32 to vector<72x16xf32>
    %71 = arith.maximumf %69, %70 : vector<72x16xf32>
    %c112 = arith.constant 112 : index
    %c0_43 = arith.constant 0 : index
    %72 = vector.load %arg4[%c112, %c0_43] : memref<400x32xf32, #tpu.memory_space<vmem>>, vector<16x32xf32>
    %cst_44 = arith.constant dense<0.000000e+00> : vector<72x32xf32>
    %73 = tpu.matmul %71, %72, %cst_44 {dimension_numbers = #tpu.dot_dimension_numbers<[1], [0], [0], [1], [0, 0, 1, 1], [], []>} : vector<72x16xf32>, vector<16x32xf32>, vector<72x32xf32> -> vector<72x32xf32>
    %74 = arith.addf %65, %73 : vector<72x32xf32>
    %c576 = arith.constant 576 : index
    %c0_45 = arith.constant 0 : index
    %75 = vector.load %arg1[%c576, %c0_45] : memref<1800x128xf32, #tpu.memory_space<vmem>>, vector<72x128xf32>
    %cst_46 = arith.constant dense<0.000000e+00> : vector<72x16xf32>
    %76 = tpu.matmul %75, %0, %cst_46 {dimension_numbers = #tpu.dot_dimension_numbers<[1], [0], [0], [1], [0, 0, 1, 1], [], []>} : vector<72x128xf32>, vector<128x16xf32>, vector<72x16xf32> -> vector<72x16xf32>
    %77 = vector.broadcast %1 : vector<1x16xf32> to vector<72x16xf32>
    %78 = arith.addf %76, %77 : vector<72x16xf32>
    %cst_47 = arith.constant 0.000000e+00 : f32
    %79 = vector.broadcast %cst_47 : f32 to vector<72x16xf32>
    %80 = arith.maximumf %78, %79 : vector<72x16xf32>
    %c128 = arith.constant 128 : index
    %c0_48 = arith.constant 0 : index
    %81 = vector.load %arg4[%c128, %c0_48] : memref<400x32xf32, #tpu.memory_space<vmem>>, vector<16x32xf32>
    %cst_49 = arith.constant dense<0.000000e+00> : vector<72x32xf32>
    %82 = tpu.matmul %80, %81, %cst_49 {dimension_numbers = #tpu.dot_dimension_numbers<[1], [0], [0], [1], [0, 0, 1, 1], [], []>} : vector<72x16xf32>, vector<16x32xf32>, vector<72x32xf32> -> vector<72x32xf32>
    %83 = arith.addf %74, %82 : vector<72x32xf32>
    %c648 = arith.constant 648 : index
    %c0_50 = arith.constant 0 : index
    %84 = vector.load %arg1[%c648, %c0_50] : memref<1800x128xf32, #tpu.memory_space<vmem>>, vector<72x128xf32>
    %cst_51 = arith.constant dense<0.000000e+00> : vector<72x16xf32>
    %85 = tpu.matmul %84, %0, %cst_51 {dimension_numbers = #tpu.dot_dimension_numbers<[1], [0], [0], [1], [0, 0, 1, 1], [], []>} : vector<72x128xf32>, vector<128x16xf32>, vector<72x16xf32> -> vector<72x16xf32>
    %86 = vector.broadcast %1 : vector<1x16xf32> to vector<72x16xf32>
    %87 = arith.addf %85, %86 : vector<72x16xf32>
    %cst_52 = arith.constant 0.000000e+00 : f32
    %88 = vector.broadcast %cst_52 : f32 to vector<72x16xf32>
    %89 = arith.maximumf %87, %88 : vector<72x16xf32>
    %c144_53 = arith.constant 144 : index
    %c0_54 = arith.constant 0 : index
    %90 = vector.load %arg4[%c144_53, %c0_54] : memref<400x32xf32, #tpu.memory_space<vmem>>, vector<16x32xf32>
    %cst_55 = arith.constant dense<0.000000e+00> : vector<72x32xf32>
    %91 = tpu.matmul %89, %90, %cst_55 {dimension_numbers = #tpu.dot_dimension_numbers<[1], [0], [0], [1], [0, 0, 1, 1], [], []>} : vector<72x16xf32>, vector<16x32xf32>, vector<72x32xf32> -> vector<72x32xf32>
    %92 = arith.addf %83, %91 : vector<72x32xf32>
    %c720 = arith.constant 720 : index
    %c0_56 = arith.constant 0 : index
    %93 = vector.load %arg1[%c720, %c0_56] : memref<1800x128xf32, #tpu.memory_space<vmem>>, vector<72x128xf32>
    %cst_57 = arith.constant dense<0.000000e+00> : vector<72x16xf32>
    %94 = tpu.matmul %93, %0, %cst_57 {dimension_numbers = #tpu.dot_dimension_numbers<[1], [0], [0], [1], [0, 0, 1, 1], [], []>} : vector<72x128xf32>, vector<128x16xf32>, vector<72x16xf32> -> vector<72x16xf32>
    %95 = vector.broadcast %1 : vector<1x16xf32> to vector<72x16xf32>
    %96 = arith.addf %94, %95 : vector<72x16xf32>
    %cst_58 = arith.constant 0.000000e+00 : f32
    %97 = vector.broadcast %cst_58 : f32 to vector<72x16xf32>
    %98 = arith.maximumf %96, %97 : vector<72x16xf32>
    %c160 = arith.constant 160 : index
    %c0_59 = arith.constant 0 : index
    %99 = vector.load %arg4[%c160, %c0_59] : memref<400x32xf32, #tpu.memory_space<vmem>>, vector<16x32xf32>
    %cst_60 = arith.constant dense<0.000000e+00> : vector<72x32xf32>
    %100 = tpu.matmul %98, %99, %cst_60 {dimension_numbers = #tpu.dot_dimension_numbers<[1], [0], [0], [1], [0, 0, 1, 1], [], []>} : vector<72x16xf32>, vector<16x32xf32>, vector<72x32xf32> -> vector<72x32xf32>
    %101 = arith.addf %92, %100 : vector<72x32xf32>
    %c792 = arith.constant 792 : index
    %c0_61 = arith.constant 0 : index
    %102 = vector.load %arg1[%c792, %c0_61] : memref<1800x128xf32, #tpu.memory_space<vmem>>, vector<72x128xf32>
    %cst_62 = arith.constant dense<0.000000e+00> : vector<72x16xf32>
    %103 = tpu.matmul %102, %0, %cst_62 {dimension_numbers = #tpu.dot_dimension_numbers<[1], [0], [0], [1], [0, 0, 1, 1], [], []>} : vector<72x128xf32>, vector<128x16xf32>, vector<72x16xf32> -> vector<72x16xf32>
    %104 = vector.broadcast %1 : vector<1x16xf32> to vector<72x16xf32>
    %105 = arith.addf %103, %104 : vector<72x16xf32>
    %cst_63 = arith.constant 0.000000e+00 : f32
    %106 = vector.broadcast %cst_63 : f32 to vector<72x16xf32>
    %107 = arith.maximumf %105, %106 : vector<72x16xf32>
    %c176 = arith.constant 176 : index
    %c0_64 = arith.constant 0 : index
    %108 = vector.load %arg4[%c176, %c0_64] : memref<400x32xf32, #tpu.memory_space<vmem>>, vector<16x32xf32>
    %cst_65 = arith.constant dense<0.000000e+00> : vector<72x32xf32>
    %109 = tpu.matmul %107, %108, %cst_65 {dimension_numbers = #tpu.dot_dimension_numbers<[1], [0], [0], [1], [0, 0, 1, 1], [], []>} : vector<72x16xf32>, vector<16x32xf32>, vector<72x32xf32> -> vector<72x32xf32>
    %110 = arith.addf %101, %109 : vector<72x32xf32>
    %c864 = arith.constant 864 : index
    %c0_66 = arith.constant 0 : index
    %111 = vector.load %arg1[%c864, %c0_66] : memref<1800x128xf32, #tpu.memory_space<vmem>>, vector<72x128xf32>
    %cst_67 = arith.constant dense<0.000000e+00> : vector<72x16xf32>
    %112 = tpu.matmul %111, %0, %cst_67 {dimension_numbers = #tpu.dot_dimension_numbers<[1], [0], [0], [1], [0, 0, 1, 1], [], []>} : vector<72x128xf32>, vector<128x16xf32>, vector<72x16xf32> -> vector<72x16xf32>
    %113 = vector.broadcast %1 : vector<1x16xf32> to vector<72x16xf32>
    %114 = arith.addf %112, %113 : vector<72x16xf32>
    %cst_68 = arith.constant 0.000000e+00 : f32
    %115 = vector.broadcast %cst_68 : f32 to vector<72x16xf32>
    %116 = arith.maximumf %114, %115 : vector<72x16xf32>
    %c192 = arith.constant 192 : index
    %c0_69 = arith.constant 0 : index
    %117 = vector.load %arg4[%c192, %c0_69] : memref<400x32xf32, #tpu.memory_space<vmem>>, vector<16x32xf32>
    %cst_70 = arith.constant dense<0.000000e+00> : vector<72x32xf32>
    %118 = tpu.matmul %116, %117, %cst_70 {dimension_numbers = #tpu.dot_dimension_numbers<[1], [0], [0], [1], [0, 0, 1, 1], [], []>} : vector<72x16xf32>, vector<16x32xf32>, vector<72x32xf32> -> vector<72x32xf32>
    %119 = arith.addf %110, %118 : vector<72x32xf32>
    %c936 = arith.constant 936 : index
    %c0_71 = arith.constant 0 : index
    %120 = vector.load %arg1[%c936, %c0_71] : memref<1800x128xf32, #tpu.memory_space<vmem>>, vector<72x128xf32>
    %cst_72 = arith.constant dense<0.000000e+00> : vector<72x16xf32>
    %121 = tpu.matmul %120, %0, %cst_72 {dimension_numbers = #tpu.dot_dimension_numbers<[1], [0], [0], [1], [0, 0, 1, 1], [], []>} : vector<72x128xf32>, vector<128x16xf32>, vector<72x16xf32> -> vector<72x16xf32>
    %122 = vector.broadcast %1 : vector<1x16xf32> to vector<72x16xf32>
    %123 = arith.addf %121, %122 : vector<72x16xf32>
    %cst_73 = arith.constant 0.000000e+00 : f32
    %124 = vector.broadcast %cst_73 : f32 to vector<72x16xf32>
    %125 = arith.maximumf %123, %124 : vector<72x16xf32>
    %c208 = arith.constant 208 : index
    %c0_74 = arith.constant 0 : index
    %126 = vector.load %arg4[%c208, %c0_74] : memref<400x32xf32, #tpu.memory_space<vmem>>, vector<16x32xf32>
    %cst_75 = arith.constant dense<0.000000e+00> : vector<72x32xf32>
    %127 = tpu.matmul %125, %126, %cst_75 {dimension_numbers = #tpu.dot_dimension_numbers<[1], [0], [0], [1], [0, 0, 1, 1], [], []>} : vector<72x16xf32>, vector<16x32xf32>, vector<72x32xf32> -> vector<72x32xf32>
    %128 = arith.addf %119, %127 : vector<72x32xf32>
    %c1008 = arith.constant 1008 : index
    %c0_76 = arith.constant 0 : index
    %129 = vector.load %arg1[%c1008, %c0_76] : memref<1800x128xf32, #tpu.memory_space<vmem>>, vector<72x128xf32>
    %cst_77 = arith.constant dense<0.000000e+00> : vector<72x16xf32>
    %130 = tpu.matmul %129, %0, %cst_77 {dimension_numbers = #tpu.dot_dimension_numbers<[1], [0], [0], [1], [0, 0, 1, 1], [], []>} : vector<72x128xf32>, vector<128x16xf32>, vector<72x16xf32> -> vector<72x16xf32>
    %131 = vector.broadcast %1 : vector<1x16xf32> to vector<72x16xf32>
    %132 = arith.addf %130, %131 : vector<72x16xf32>
    %cst_78 = arith.constant 0.000000e+00 : f32
    %133 = vector.broadcast %cst_78 : f32 to vector<72x16xf32>
    %134 = arith.maximumf %132, %133 : vector<72x16xf32>
    %c224 = arith.constant 224 : index
    %c0_79 = arith.constant 0 : index
    %135 = vector.load %arg4[%c224, %c0_79] : memref<400x32xf32, #tpu.memory_space<vmem>>, vector<16x32xf32>
    %cst_80 = arith.constant dense<0.000000e+00> : vector<72x32xf32>
    %136 = tpu.matmul %134, %135, %cst_80 {dimension_numbers = #tpu.dot_dimension_numbers<[1], [0], [0], [1], [0, 0, 1, 1], [], []>} : vector<72x16xf32>, vector<16x32xf32>, vector<72x32xf32> -> vector<72x32xf32>
    %137 = arith.addf %128, %136 : vector<72x32xf32>
    %c1080 = arith.constant 1080 : index
    %c0_81 = arith.constant 0 : index
    %138 = vector.load %arg1[%c1080, %c0_81] : memref<1800x128xf32, #tpu.memory_space<vmem>>, vector<72x128xf32>
    %cst_82 = arith.constant dense<0.000000e+00> : vector<72x16xf32>
    %139 = tpu.matmul %138, %0, %cst_82 {dimension_numbers = #tpu.dot_dimension_numbers<[1], [0], [0], [1], [0, 0, 1, 1], [], []>} : vector<72x128xf32>, vector<128x16xf32>, vector<72x16xf32> -> vector<72x16xf32>
    %140 = vector.broadcast %1 : vector<1x16xf32> to vector<72x16xf32>
    %141 = arith.addf %139, %140 : vector<72x16xf32>
    %cst_83 = arith.constant 0.000000e+00 : f32
    %142 = vector.broadcast %cst_83 : f32 to vector<72x16xf32>
    %143 = arith.maximumf %141, %142 : vector<72x16xf32>
    %c240 = arith.constant 240 : index
    %c0_84 = arith.constant 0 : index
    %144 = vector.load %arg4[%c240, %c0_84] : memref<400x32xf32, #tpu.memory_space<vmem>>, vector<16x32xf32>
    %cst_85 = arith.constant dense<0.000000e+00> : vector<72x32xf32>
    %145 = tpu.matmul %143, %144, %cst_85 {dimension_numbers = #tpu.dot_dimension_numbers<[1], [0], [0], [1], [0, 0, 1, 1], [], []>} : vector<72x16xf32>, vector<16x32xf32>, vector<72x32xf32> -> vector<72x32xf32>
    %146 = arith.addf %137, %145 : vector<72x32xf32>
    %c1152 = arith.constant 1152 : index
    %c0_86 = arith.constant 0 : index
    %147 = vector.load %arg1[%c1152, %c0_86] : memref<1800x128xf32, #tpu.memory_space<vmem>>, vector<72x128xf32>
    %cst_87 = arith.constant dense<0.000000e+00> : vector<72x16xf32>
    %148 = tpu.matmul %147, %0, %cst_87 {dimension_numbers = #tpu.dot_dimension_numbers<[1], [0], [0], [1], [0, 0, 1, 1], [], []>} : vector<72x128xf32>, vector<128x16xf32>, vector<72x16xf32> -> vector<72x16xf32>
    %149 = vector.broadcast %1 : vector<1x16xf32> to vector<72x16xf32>
    %150 = arith.addf %148, %149 : vector<72x16xf32>
    %cst_88 = arith.constant 0.000000e+00 : f32
    %151 = vector.broadcast %cst_88 : f32 to vector<72x16xf32>
    %152 = arith.maximumf %150, %151 : vector<72x16xf32>
    %c256 = arith.constant 256 : index
    %c0_89 = arith.constant 0 : index
    %153 = vector.load %arg4[%c256, %c0_89] : memref<400x32xf32, #tpu.memory_space<vmem>>, vector<16x32xf32>
    %cst_90 = arith.constant dense<0.000000e+00> : vector<72x32xf32>
    %154 = tpu.matmul %152, %153, %cst_90 {dimension_numbers = #tpu.dot_dimension_numbers<[1], [0], [0], [1], [0, 0, 1, 1], [], []>} : vector<72x16xf32>, vector<16x32xf32>, vector<72x32xf32> -> vector<72x32xf32>
    %155 = arith.addf %146, %154 : vector<72x32xf32>
    %c1224 = arith.constant 1224 : index
    %c0_91 = arith.constant 0 : index
    %156 = vector.load %arg1[%c1224, %c0_91] : memref<1800x128xf32, #tpu.memory_space<vmem>>, vector<72x128xf32>
    %cst_92 = arith.constant dense<0.000000e+00> : vector<72x16xf32>
    %157 = tpu.matmul %156, %0, %cst_92 {dimension_numbers = #tpu.dot_dimension_numbers<[1], [0], [0], [1], [0, 0, 1, 1], [], []>} : vector<72x128xf32>, vector<128x16xf32>, vector<72x16xf32> -> vector<72x16xf32>
    %158 = vector.broadcast %1 : vector<1x16xf32> to vector<72x16xf32>
    %159 = arith.addf %157, %158 : vector<72x16xf32>
    %cst_93 = arith.constant 0.000000e+00 : f32
    %160 = vector.broadcast %cst_93 : f32 to vector<72x16xf32>
    %161 = arith.maximumf %159, %160 : vector<72x16xf32>
    %c272 = arith.constant 272 : index
    %c0_94 = arith.constant 0 : index
    %162 = vector.load %arg4[%c272, %c0_94] : memref<400x32xf32, #tpu.memory_space<vmem>>, vector<16x32xf32>
    %cst_95 = arith.constant dense<0.000000e+00> : vector<72x32xf32>
    %163 = tpu.matmul %161, %162, %cst_95 {dimension_numbers = #tpu.dot_dimension_numbers<[1], [0], [0], [1], [0, 0, 1, 1], [], []>} : vector<72x16xf32>, vector<16x32xf32>, vector<72x32xf32> -> vector<72x32xf32>
    %164 = arith.addf %155, %163 : vector<72x32xf32>
    %c1296 = arith.constant 1296 : index
    %c0_96 = arith.constant 0 : index
    %165 = vector.load %arg1[%c1296, %c0_96] : memref<1800x128xf32, #tpu.memory_space<vmem>>, vector<72x128xf32>
    %cst_97 = arith.constant dense<0.000000e+00> : vector<72x16xf32>
    %166 = tpu.matmul %165, %0, %cst_97 {dimension_numbers = #tpu.dot_dimension_numbers<[1], [0], [0], [1], [0, 0, 1, 1], [], []>} : vector<72x128xf32>, vector<128x16xf32>, vector<72x16xf32> -> vector<72x16xf32>
    %167 = vector.broadcast %1 : vector<1x16xf32> to vector<72x16xf32>
    %168 = arith.addf %166, %167 : vector<72x16xf32>
    %cst_98 = arith.constant 0.000000e+00 : f32
    %169 = vector.broadcast %cst_98 : f32 to vector<72x16xf32>
    %170 = arith.maximumf %168, %169 : vector<72x16xf32>
    %c288_99 = arith.constant 288 : index
    %c0_100 = arith.constant 0 : index
    %171 = vector.load %arg4[%c288_99, %c0_100] : memref<400x32xf32, #tpu.memory_space<vmem>>, vector<16x32xf32>
    %cst_101 = arith.constant dense<0.000000e+00> : vector<72x32xf32>
    %172 = tpu.matmul %170, %171, %cst_101 {dimension_numbers = #tpu.dot_dimension_numbers<[1], [0], [0], [1], [0, 0, 1, 1], [], []>} : vector<72x16xf32>, vector<16x32xf32>, vector<72x32xf32> -> vector<72x32xf32>
    %173 = arith.addf %164, %172 : vector<72x32xf32>
    %c1368 = arith.constant 1368 : index
    %c0_102 = arith.constant 0 : index
    %174 = vector.load %arg1[%c1368, %c0_102] : memref<1800x128xf32, #tpu.memory_space<vmem>>, vector<72x128xf32>
    %cst_103 = arith.constant dense<0.000000e+00> : vector<72x16xf32>
    %175 = tpu.matmul %174, %0, %cst_103 {dimension_numbers = #tpu.dot_dimension_numbers<[1], [0], [0], [1], [0, 0, 1, 1], [], []>} : vector<72x128xf32>, vector<128x16xf32>, vector<72x16xf32> -> vector<72x16xf32>
    %176 = vector.broadcast %1 : vector<1x16xf32> to vector<72x16xf32>
    %177 = arith.addf %175, %176 : vector<72x16xf32>
    %cst_104 = arith.constant 0.000000e+00 : f32
    %178 = vector.broadcast %cst_104 : f32 to vector<72x16xf32>
    %179 = arith.maximumf %177, %178 : vector<72x16xf32>
    %c304 = arith.constant 304 : index
    %c0_105 = arith.constant 0 : index
    %180 = vector.load %arg4[%c304, %c0_105] : memref<400x32xf32, #tpu.memory_space<vmem>>, vector<16x32xf32>
    %cst_106 = arith.constant dense<0.000000e+00> : vector<72x32xf32>
    %181 = tpu.matmul %179, %180, %cst_106 {dimension_numbers = #tpu.dot_dimension_numbers<[1], [0], [0], [1], [0, 0, 1, 1], [], []>} : vector<72x16xf32>, vector<16x32xf32>, vector<72x32xf32> -> vector<72x32xf32>
    %182 = arith.addf %173, %181 : vector<72x32xf32>
    %c1440 = arith.constant 1440 : index
    %c0_107 = arith.constant 0 : index
    %183 = vector.load %arg1[%c1440, %c0_107] : memref<1800x128xf32, #tpu.memory_space<vmem>>, vector<72x128xf32>
    %cst_108 = arith.constant dense<0.000000e+00> : vector<72x16xf32>
    %184 = tpu.matmul %183, %0, %cst_108 {dimension_numbers = #tpu.dot_dimension_numbers<[1], [0], [0], [1], [0, 0, 1, 1], [], []>} : vector<72x128xf32>, vector<128x16xf32>, vector<72x16xf32> -> vector<72x16xf32>
    %185 = vector.broadcast %1 : vector<1x16xf32> to vector<72x16xf32>
    %186 = arith.addf %184, %185 : vector<72x16xf32>
    %cst_109 = arith.constant 0.000000e+00 : f32
    %187 = vector.broadcast %cst_109 : f32 to vector<72x16xf32>
    %188 = arith.maximumf %186, %187 : vector<72x16xf32>
    %c320 = arith.constant 320 : index
    %c0_110 = arith.constant 0 : index
    %189 = vector.load %arg4[%c320, %c0_110] : memref<400x32xf32, #tpu.memory_space<vmem>>, vector<16x32xf32>
    %cst_111 = arith.constant dense<0.000000e+00> : vector<72x32xf32>
    %190 = tpu.matmul %188, %189, %cst_111 {dimension_numbers = #tpu.dot_dimension_numbers<[1], [0], [0], [1], [0, 0, 1, 1], [], []>} : vector<72x16xf32>, vector<16x32xf32>, vector<72x32xf32> -> vector<72x32xf32>
    %191 = arith.addf %182, %190 : vector<72x32xf32>
    %c1512 = arith.constant 1512 : index
    %c0_112 = arith.constant 0 : index
    %192 = vector.load %arg1[%c1512, %c0_112] : memref<1800x128xf32, #tpu.memory_space<vmem>>, vector<72x128xf32>
    %cst_113 = arith.constant dense<0.000000e+00> : vector<72x16xf32>
    %193 = tpu.matmul %192, %0, %cst_113 {dimension_numbers = #tpu.dot_dimension_numbers<[1], [0], [0], [1], [0, 0, 1, 1], [], []>} : vector<72x128xf32>, vector<128x16xf32>, vector<72x16xf32> -> vector<72x16xf32>
    %194 = vector.broadcast %1 : vector<1x16xf32> to vector<72x16xf32>
    %195 = arith.addf %193, %194 : vector<72x16xf32>
    %cst_114 = arith.constant 0.000000e+00 : f32
    %196 = vector.broadcast %cst_114 : f32 to vector<72x16xf32>
    %197 = arith.maximumf %195, %196 : vector<72x16xf32>
    %c336 = arith.constant 336 : index
    %c0_115 = arith.constant 0 : index
    %198 = vector.load %arg4[%c336, %c0_115] : memref<400x32xf32, #tpu.memory_space<vmem>>, vector<16x32xf32>
    %cst_116 = arith.constant dense<0.000000e+00> : vector<72x32xf32>
    %199 = tpu.matmul %197, %198, %cst_116 {dimension_numbers = #tpu.dot_dimension_numbers<[1], [0], [0], [1], [0, 0, 1, 1], [], []>} : vector<72x16xf32>, vector<16x32xf32>, vector<72x32xf32> -> vector<72x32xf32>
    %200 = arith.addf %191, %199 : vector<72x32xf32>
    %c1584 = arith.constant 1584 : index
    %c0_117 = arith.constant 0 : index
    %201 = vector.load %arg1[%c1584, %c0_117] : memref<1800x128xf32, #tpu.memory_space<vmem>>, vector<72x128xf32>
    %cst_118 = arith.constant dense<0.000000e+00> : vector<72x16xf32>
    %202 = tpu.matmul %201, %0, %cst_118 {dimension_numbers = #tpu.dot_dimension_numbers<[1], [0], [0], [1], [0, 0, 1, 1], [], []>} : vector<72x128xf32>, vector<128x16xf32>, vector<72x16xf32> -> vector<72x16xf32>
    %203 = vector.broadcast %1 : vector<1x16xf32> to vector<72x16xf32>
    %204 = arith.addf %202, %203 : vector<72x16xf32>
    %cst_119 = arith.constant 0.000000e+00 : f32
    %205 = vector.broadcast %cst_119 : f32 to vector<72x16xf32>
    %206 = arith.maximumf %204, %205 : vector<72x16xf32>
    %c352 = arith.constant 352 : index
    %c0_120 = arith.constant 0 : index
    %207 = vector.load %arg4[%c352, %c0_120] : memref<400x32xf32, #tpu.memory_space<vmem>>, vector<16x32xf32>
    %cst_121 = arith.constant dense<0.000000e+00> : vector<72x32xf32>
    %208 = tpu.matmul %206, %207, %cst_121 {dimension_numbers = #tpu.dot_dimension_numbers<[1], [0], [0], [1], [0, 0, 1, 1], [], []>} : vector<72x16xf32>, vector<16x32xf32>, vector<72x32xf32> -> vector<72x32xf32>
    %209 = arith.addf %200, %208 : vector<72x32xf32>
    %c1656 = arith.constant 1656 : index
    %c0_122 = arith.constant 0 : index
    %210 = vector.load %arg1[%c1656, %c0_122] : memref<1800x128xf32, #tpu.memory_space<vmem>>, vector<72x128xf32>
    %cst_123 = arith.constant dense<0.000000e+00> : vector<72x16xf32>
    %211 = tpu.matmul %210, %0, %cst_123 {dimension_numbers = #tpu.dot_dimension_numbers<[1], [0], [0], [1], [0, 0, 1, 1], [], []>} : vector<72x128xf32>, vector<128x16xf32>, vector<72x16xf32> -> vector<72x16xf32>
    %212 = vector.broadcast %1 : vector<1x16xf32> to vector<72x16xf32>
    %213 = arith.addf %211, %212 : vector<72x16xf32>
    %cst_124 = arith.constant 0.000000e+00 : f32
    %214 = vector.broadcast %cst_124 : f32 to vector<72x16xf32>
    %215 = arith.maximumf %213, %214 : vector<72x16xf32>
    %c368 = arith.constant 368 : index
    %c0_125 = arith.constant 0 : index
    %216 = vector.load %arg4[%c368, %c0_125] : memref<400x32xf32, #tpu.memory_space<vmem>>, vector<16x32xf32>
    %cst_126 = arith.constant dense<0.000000e+00> : vector<72x32xf32>
    %217 = tpu.matmul %215, %216, %cst_126 {dimension_numbers = #tpu.dot_dimension_numbers<[1], [0], [0], [1], [0, 0, 1, 1], [], []>} : vector<72x16xf32>, vector<16x32xf32>, vector<72x32xf32> -> vector<72x32xf32>
    %218 = arith.addf %209, %217 : vector<72x32xf32>
    %c1728 = arith.constant 1728 : index
    %c0_127 = arith.constant 0 : index
    %219 = vector.load %arg1[%c1728, %c0_127] : memref<1800x128xf32, #tpu.memory_space<vmem>>, vector<72x128xf32>
    %cst_128 = arith.constant dense<0.000000e+00> : vector<72x16xf32>
    %220 = tpu.matmul %219, %0, %cst_128 {dimension_numbers = #tpu.dot_dimension_numbers<[1], [0], [0], [1], [0, 0, 1, 1], [], []>} : vector<72x128xf32>, vector<128x16xf32>, vector<72x16xf32> -> vector<72x16xf32>
    %221 = vector.broadcast %1 : vector<1x16xf32> to vector<72x16xf32>
    %222 = arith.addf %220, %221 : vector<72x16xf32>
    %cst_129 = arith.constant 0.000000e+00 : f32
    %223 = vector.broadcast %cst_129 : f32 to vector<72x16xf32>
    %224 = arith.maximumf %222, %223 : vector<72x16xf32>
    %c384 = arith.constant 384 : index
    %c0_130 = arith.constant 0 : index
    %225 = vector.load %arg4[%c384, %c0_130] : memref<400x32xf32, #tpu.memory_space<vmem>>, vector<16x32xf32>
    %cst_131 = arith.constant dense<0.000000e+00> : vector<72x32xf32>
    %226 = tpu.matmul %224, %225, %cst_131 {dimension_numbers = #tpu.dot_dimension_numbers<[1], [0], [0], [1], [0, 0, 1, 1], [], []>} : vector<72x16xf32>, vector<16x32xf32>, vector<72x32xf32> -> vector<72x32xf32>
    %227 = arith.addf %218, %226 : vector<72x32xf32>
    %c0_132 = arith.constant 0 : index
    %c0_133 = arith.constant 0 : index
    %228 = vector.load %arg5[%c0_132, %c0_133] : memref<1x32xf32, #tpu.memory_space<vmem>>, vector<1x32xf32>
    %229 = vector.broadcast %228 : vector<1x32xf32> to vector<72x32xf32>
    %230 = arith.addf %227, %229 : vector<72x32xf32>
    %cst_134 = arith.constant 0.000000e+00 : f32
    %231 = vector.broadcast %cst_134 : f32 to vector<72x32xf32>
    %232 = arith.maximumf %230, %231 : vector<72x32xf32>
    %cst_135 = arith.constant 0.000000e+00 : f32
    %233 = vector.broadcast %cst_135 : f32 to vector<2x256xf32>
    %234 = vector.extract_strided_slice %232 {offsets = [0, 0], sizes = [2, 32], strides = [1, 1]} : vector<72x32xf32> to vector<2x32xf32>
    %235 = vector.extract_strided_slice %232 {offsets = [2, 0], sizes = [2, 32], strides = [1, 1]} : vector<72x32xf32> to vector<2x32xf32>
    %236 = vector.extract_strided_slice %232 {offsets = [4, 0], sizes = [2, 32], strides = [1, 1]} : vector<72x32xf32> to vector<2x32xf32>
    %237 = vector.extract_strided_slice %232 {offsets = [6, 0], sizes = [2, 32], strides = [1, 1]} : vector<72x32xf32> to vector<2x32xf32>
    %238 = tpu.concatenate %234, %235, %236, %237 in 1 : vector<2x32xf32>, vector<2x32xf32>, vector<2x32xf32>, vector<2x32xf32> -> vector<2x128xf32>
    %c0_136 = arith.constant 0 : index
    %c0_137 = arith.constant 0 : index
    %c0_138 = arith.constant 0 : index
    %239 = vector.load %arg7[%c0_136, %c0_137, %c0_138] : memref<9x128x256xbf16, #tpu.memory_space<vmem>>, vector<1x128x256xbf16>
    %240 = vector.shape_cast %239 : vector<1x128x256xbf16> to vector<128x256xbf16>
    %241 = arith.extf %240 : vector<128x256xbf16> to vector<128x256xf32>
    %cst_139 = arith.constant dense<0.000000e+00> : vector<2x256xf32>
    %242 = tpu.matmul %238, %241, %cst_139 {dimension_numbers = #tpu.dot_dimension_numbers<[1], [0], [0], [1], [0, 0, 1, 1], [], []>} : vector<2x128xf32>, vector<128x256xf32>, vector<2x256xf32> -> vector<2x256xf32>
    %243 = arith.addf %233, %242 : vector<2x256xf32>
    %244 = vector.extract_strided_slice %232 {offsets = [8, 0], sizes = [2, 32], strides = [1, 1]} : vector<72x32xf32> to vector<2x32xf32>
    %245 = vector.extract_strided_slice %232 {offsets = [10, 0], sizes = [2, 32], strides = [1, 1]} : vector<72x32xf32> to vector<2x32xf32>
    %246 = vector.extract_strided_slice %232 {offsets = [12, 0], sizes = [2, 32], strides = [1, 1]} : vector<72x32xf32> to vector<2x32xf32>
    %247 = vector.extract_strided_slice %232 {offsets = [14, 0], sizes = [2, 32], strides = [1, 1]} : vector<72x32xf32> to vector<2x32xf32>
    %248 = tpu.concatenate %244, %245, %246, %247 in 1 : vector<2x32xf32>, vector<2x32xf32>, vector<2x32xf32>, vector<2x32xf32> -> vector<2x128xf32>
    %c1 = arith.constant 1 : index
    %c0_140 = arith.constant 0 : index
    %c0_141 = arith.constant 0 : index
    %249 = vector.load %arg7[%c1, %c0_140, %c0_141] : memref<9x128x256xbf16, #tpu.memory_space<vmem>>, vector<1x128x256xbf16>
    %250 = vector.shape_cast %249 : vector<1x128x256xbf16> to vector<128x256xbf16>
    %251 = arith.extf %250 : vector<128x256xbf16> to vector<128x256xf32>
    %cst_142 = arith.constant dense<0.000000e+00> : vector<2x256xf32>
    %252 = tpu.matmul %248, %251, %cst_142 {dimension_numbers = #tpu.dot_dimension_numbers<[1], [0], [0], [1], [0, 0, 1, 1], [], []>} : vector<2x128xf32>, vector<128x256xf32>, vector<2x256xf32> -> vector<2x256xf32>
    %253 = arith.addf %243, %252 : vector<2x256xf32>
    %254 = vector.extract_strided_slice %232 {offsets = [16, 0], sizes = [2, 32], strides = [1, 1]} : vector<72x32xf32> to vector<2x32xf32>
    %255 = vector.extract_strided_slice %232 {offsets = [18, 0], sizes = [2, 32], strides = [1, 1]} : vector<72x32xf32> to vector<2x32xf32>
    %256 = vector.extract_strided_slice %232 {offsets = [20, 0], sizes = [2, 32], strides = [1, 1]} : vector<72x32xf32> to vector<2x32xf32>
    %257 = vector.extract_strided_slice %232 {offsets = [22, 0], sizes = [2, 32], strides = [1, 1]} : vector<72x32xf32> to vector<2x32xf32>
    %258 = tpu.concatenate %254, %255, %256, %257 in 1 : vector<2x32xf32>, vector<2x32xf32>, vector<2x32xf32>, vector<2x32xf32> -> vector<2x128xf32>
    %c2 = arith.constant 2 : index
    %c0_143 = arith.constant 0 : index
    %c0_144 = arith.constant 0 : index
    %259 = vector.load %arg7[%c2, %c0_143, %c0_144] : memref<9x128x256xbf16, #tpu.memory_space<vmem>>, vector<1x128x256xbf16>
    %260 = vector.shape_cast %259 : vector<1x128x256xbf16> to vector<128x256xbf16>
    %261 = arith.extf %260 : vector<128x256xbf16> to vector<128x256xf32>
    %cst_145 = arith.constant dense<0.000000e+00> : vector<2x256xf32>
    %262 = tpu.matmul %258, %261, %cst_145 {dimension_numbers = #tpu.dot_dimension_numbers<[1], [0], [0], [1], [0, 0, 1, 1], [], []>} : vector<2x128xf32>, vector<128x256xf32>, vector<2x256xf32> -> vector<2x256xf32>
    %263 = arith.addf %253, %262 : vector<2x256xf32>
    %264 = vector.extract_strided_slice %232 {offsets = [24, 0], sizes = [2, 32], strides = [1, 1]} : vector<72x32xf32> to vector<2x32xf32>
    %265 = vector.extract_strided_slice %232 {offsets = [26, 0], sizes = [2, 32], strides = [1, 1]} : vector<72x32xf32> to vector<2x32xf32>
    %266 = vector.extract_strided_slice %232 {offsets = [28, 0], sizes = [2, 32], strides = [1, 1]} : vector<72x32xf32> to vector<2x32xf32>
    %267 = vector.extract_strided_slice %232 {offsets = [30, 0], sizes = [2, 32], strides = [1, 1]} : vector<72x32xf32> to vector<2x32xf32>
    %268 = tpu.concatenate %264, %265, %266, %267 in 1 : vector<2x32xf32>, vector<2x32xf32>, vector<2x32xf32>, vector<2x32xf32> -> vector<2x128xf32>
    %c3 = arith.constant 3 : index
    %c0_146 = arith.constant 0 : index
    %c0_147 = arith.constant 0 : index
    %269 = vector.load %arg7[%c3, %c0_146, %c0_147] : memref<9x128x256xbf16, #tpu.memory_space<vmem>>, vector<1x128x256xbf16>
    %270 = vector.shape_cast %269 : vector<1x128x256xbf16> to vector<128x256xbf16>
    %271 = arith.extf %270 : vector<128x256xbf16> to vector<128x256xf32>
    %cst_148 = arith.constant dense<0.000000e+00> : vector<2x256xf32>
    %272 = tpu.matmul %268, %271, %cst_148 {dimension_numbers = #tpu.dot_dimension_numbers<[1], [0], [0], [1], [0, 0, 1, 1], [], []>} : vector<2x128xf32>, vector<128x256xf32>, vector<2x256xf32> -> vector<2x256xf32>
    %273 = arith.addf %263, %272 : vector<2x256xf32>
    %274 = vector.extract_strided_slice %232 {offsets = [32, 0], sizes = [2, 32], strides = [1, 1]} : vector<72x32xf32> to vector<2x32xf32>
    %275 = vector.extract_strided_slice %232 {offsets = [34, 0], sizes = [2, 32], strides = [1, 1]} : vector<72x32xf32> to vector<2x32xf32>
    %276 = vector.extract_strided_slice %232 {offsets = [36, 0], sizes = [2, 32], strides = [1, 1]} : vector<72x32xf32> to vector<2x32xf32>
    %277 = vector.extract_strided_slice %232 {offsets = [38, 0], sizes = [2, 32], strides = [1, 1]} : vector<72x32xf32> to vector<2x32xf32>
    %278 = tpu.concatenate %274, %275, %276, %277 in 1 : vector<2x32xf32>, vector<2x32xf32>, vector<2x32xf32>, vector<2x32xf32> -> vector<2x128xf32>
    %c4 = arith.constant 4 : index
    %c0_149 = arith.constant 0 : index
    %c0_150 = arith.constant 0 : index
    %279 = vector.load %arg7[%c4, %c0_149, %c0_150] : memref<9x128x256xbf16, #tpu.memory_space<vmem>>, vector<1x128x256xbf16>
    %280 = vector.shape_cast %279 : vector<1x128x256xbf16> to vector<128x256xbf16>
    %281 = arith.extf %280 : vector<128x256xbf16> to vector<128x256xf32>
    %cst_151 = arith.constant dense<0.000000e+00> : vector<2x256xf32>
    %282 = tpu.matmul %278, %281, %cst_151 {dimension_numbers = #tpu.dot_dimension_numbers<[1], [0], [0], [1], [0, 0, 1, 1], [], []>} : vector<2x128xf32>, vector<128x256xf32>, vector<2x256xf32> -> vector<2x256xf32>
    %283 = arith.addf %273, %282 : vector<2x256xf32>
    %284 = vector.extract_strided_slice %232 {offsets = [40, 0], sizes = [2, 32], strides = [1, 1]} : vector<72x32xf32> to vector<2x32xf32>
    %285 = vector.extract_strided_slice %232 {offsets = [42, 0], sizes = [2, 32], strides = [1, 1]} : vector<72x32xf32> to vector<2x32xf32>
    %286 = vector.extract_strided_slice %232 {offsets = [44, 0], sizes = [2, 32], strides = [1, 1]} : vector<72x32xf32> to vector<2x32xf32>
    %287 = vector.extract_strided_slice %232 {offsets = [46, 0], sizes = [2, 32], strides = [1, 1]} : vector<72x32xf32> to vector<2x32xf32>
    %288 = tpu.concatenate %284, %285, %286, %287 in 1 : vector<2x32xf32>, vector<2x32xf32>, vector<2x32xf32>, vector<2x32xf32> -> vector<2x128xf32>
    %c5 = arith.constant 5 : index
    %c0_152 = arith.constant 0 : index
    %c0_153 = arith.constant 0 : index
    %289 = vector.load %arg7[%c5, %c0_152, %c0_153] : memref<9x128x256xbf16, #tpu.memory_space<vmem>>, vector<1x128x256xbf16>
    %290 = vector.shape_cast %289 : vector<1x128x256xbf16> to vector<128x256xbf16>
    %291 = arith.extf %290 : vector<128x256xbf16> to vector<128x256xf32>
    %cst_154 = arith.constant dense<0.000000e+00> : vector<2x256xf32>
    %292 = tpu.matmul %288, %291, %cst_154 {dimension_numbers = #tpu.dot_dimension_numbers<[1], [0], [0], [1], [0, 0, 1, 1], [], []>} : vector<2x128xf32>, vector<128x256xf32>, vector<2x256xf32> -> vector<2x256xf32>
    %293 = arith.addf %283, %292 : vector<2x256xf32>
    %294 = vector.extract_strided_slice %232 {offsets = [48, 0], sizes = [2, 32], strides = [1, 1]} : vector<72x32xf32> to vector<2x32xf32>
    %295 = vector.extract_strided_slice %232 {offsets = [50, 0], sizes = [2, 32], strides = [1, 1]} : vector<72x32xf32> to vector<2x32xf32>
    %296 = vector.extract_strided_slice %232 {offsets = [52, 0], sizes = [2, 32], strides = [1, 1]} : vector<72x32xf32> to vector<2x32xf32>
    %297 = vector.extract_strided_slice %232 {offsets = [54, 0], sizes = [2, 32], strides = [1, 1]} : vector<72x32xf32> to vector<2x32xf32>
    %298 = tpu.concatenate %294, %295, %296, %297 in 1 : vector<2x32xf32>, vector<2x32xf32>, vector<2x32xf32>, vector<2x32xf32> -> vector<2x128xf32>
    %c6 = arith.constant 6 : index
    %c0_155 = arith.constant 0 : index
    %c0_156 = arith.constant 0 : index
    %299 = vector.load %arg7[%c6, %c0_155, %c0_156] : memref<9x128x256xbf16, #tpu.memory_space<vmem>>, vector<1x128x256xbf16>
    %300 = vector.shape_cast %299 : vector<1x128x256xbf16> to vector<128x256xbf16>
    %301 = arith.extf %300 : vector<128x256xbf16> to vector<128x256xf32>
    %cst_157 = arith.constant dense<0.000000e+00> : vector<2x256xf32>
    %302 = tpu.matmul %298, %301, %cst_157 {dimension_numbers = #tpu.dot_dimension_numbers<[1], [0], [0], [1], [0, 0, 1, 1], [], []>} : vector<2x128xf32>, vector<128x256xf32>, vector<2x256xf32> -> vector<2x256xf32>
    %303 = arith.addf %293, %302 : vector<2x256xf32>
    %304 = vector.extract_strided_slice %232 {offsets = [56, 0], sizes = [2, 32], strides = [1, 1]} : vector<72x32xf32> to vector<2x32xf32>
    %305 = vector.extract_strided_slice %232 {offsets = [58, 0], sizes = [2, 32], strides = [1, 1]} : vector<72x32xf32> to vector<2x32xf32>
    %306 = vector.extract_strided_slice %232 {offsets = [60, 0], sizes = [2, 32], strides = [1, 1]} : vector<72x32xf32> to vector<2x32xf32>
    %307 = vector.extract_strided_slice %232 {offsets = [62, 0], sizes = [2, 32], strides = [1, 1]} : vector<72x32xf32> to vector<2x32xf32>
    %308 = tpu.concatenate %304, %305, %306, %307 in 1 : vector<2x32xf32>, vector<2x32xf32>, vector<2x32xf32>, vector<2x32xf32> -> vector<2x128xf32>
    %c7 = arith.constant 7 : index
    %c0_158 = arith.constant 0 : index
    %c0_159 = arith.constant 0 : index
    %309 = vector.load %arg7[%c7, %c0_158, %c0_159] : memref<9x128x256xbf16, #tpu.memory_space<vmem>>, vector<1x128x256xbf16>
    %310 = vector.shape_cast %309 : vector<1x128x256xbf16> to vector<128x256xbf16>
    %311 = arith.extf %310 : vector<128x256xbf16> to vector<128x256xf32>
    %cst_160 = arith.constant dense<0.000000e+00> : vector<2x256xf32>
    %312 = tpu.matmul %308, %311, %cst_160 {dimension_numbers = #tpu.dot_dimension_numbers<[1], [0], [0], [1], [0, 0, 1, 1], [], []>} : vector<2x128xf32>, vector<128x256xf32>, vector<2x256xf32> -> vector<2x256xf32>
    %313 = arith.addf %303, %312 : vector<2x256xf32>
    %314 = vector.extract_strided_slice %232 {offsets = [64, 0], sizes = [2, 32], strides = [1, 1]} : vector<72x32xf32> to vector<2x32xf32>
    %315 = vector.extract_strided_slice %232 {offsets = [66, 0], sizes = [2, 32], strides = [1, 1]} : vector<72x32xf32> to vector<2x32xf32>
    %316 = vector.extract_strided_slice %232 {offsets = [68, 0], sizes = [2, 32], strides = [1, 1]} : vector<72x32xf32> to vector<2x32xf32>
    %317 = vector.extract_strided_slice %232 {offsets = [70, 0], sizes = [2, 32], strides = [1, 1]} : vector<72x32xf32> to vector<2x32xf32>
    %318 = tpu.concatenate %314, %315, %316, %317 in 1 : vector<2x32xf32>, vector<2x32xf32>, vector<2x32xf32>, vector<2x32xf32> -> vector<2x128xf32>
    %c8 = arith.constant 8 : index
    %c0_161 = arith.constant 0 : index
    %c0_162 = arith.constant 0 : index
    %319 = vector.load %arg7[%c8, %c0_161, %c0_162] : memref<9x128x256xbf16, #tpu.memory_space<vmem>>, vector<1x128x256xbf16>
    %320 = vector.shape_cast %319 : vector<1x128x256xbf16> to vector<128x256xbf16>
    %321 = arith.extf %320 : vector<128x256xbf16> to vector<128x256xf32>
    %cst_163 = arith.constant dense<0.000000e+00> : vector<2x256xf32>
    %322 = tpu.matmul %318, %321, %cst_163 {dimension_numbers = #tpu.dot_dimension_numbers<[1], [0], [0], [1], [0, 0, 1, 1], [], []>} : vector<2x128xf32>, vector<128x256xf32>, vector<2x256xf32> -> vector<2x256xf32>
    %323 = arith.addf %313, %322 : vector<2x256xf32>
    %c0_164 = arith.constant 0 : index
    %c0_165 = arith.constant 0 : index
    %324 = vector.load %arg6[%c0_164, %c0_165] : memref<2x48xf32, #tpu.memory_space<vmem>>, vector<2x48xf32>
    %c0_166 = arith.constant 0 : index
    %c0_167 = arith.constant 0 : index
    %325 = vector.load %arg8[%c0_166, %c0_167] : memref<48x256xbf16, #tpu.memory_space<vmem>>, vector<48x256xbf16>
    %326 = arith.extf %325 : vector<48x256xbf16> to vector<48x256xf32>
    %cst_168 = arith.constant dense<0.000000e+00> : vector<2x256xf32>
    %327 = tpu.matmul %324, %326, %cst_168 {dimension_numbers = #tpu.dot_dimension_numbers<[1], [0], [0], [1], [0, 0, 1, 1], [], []>} : vector<2x48xf32>, vector<48x256xf32>, vector<2x256xf32> -> vector<2x256xf32>
    %328 = arith.addf %323, %327 : vector<2x256xf32>
    %c0_169 = arith.constant 0 : index
    %c0_170 = arith.constant 0 : index
    %329 = vector.load %arg9[%c0_169, %c0_170] : memref<1x256xf32, #tpu.memory_space<vmem>>, vector<1x256xf32>
    %330 = vector.broadcast %329 : vector<1x256xf32> to vector<2x256xf32>
    %331 = arith.addf %328, %330 : vector<2x256xf32>
    %cst_171 = arith.constant 0.000000e+00 : f32
    %332 = vector.broadcast %cst_171 : f32 to vector<2x256xf32>
    %333 = arith.maximumf %331, %332 : vector<2x256xf32>
    %c0_172 = arith.constant 0 : index
    %c0_173 = arith.constant 0 : index
    %334 = vector.load %arg10[%c0_172, %c0_173] : memref<256x4xf32, #tpu.memory_space<vmem>>, vector<256x4xf32>
    %cst_174 = arith.constant dense<0.000000e+00> : vector<2x4xf32>
    %335 = tpu.matmul %333, %334, %cst_174 {dimension_numbers = #tpu.dot_dimension_numbers<[1], [0], [0], [1], [0, 0, 1, 1], [], []>} : vector<2x256xf32>, vector<256x4xf32>, vector<2x4xf32> -> vector<2x4xf32>
    %c0_175 = arith.constant 0 : index
    %c0_176 = arith.constant 0 : index
    %336 = vector.load %arg11[%c0_175, %c0_176] : memref<1x4xf32, #tpu.memory_space<vmem>>, vector<1x4xf32>
    %337 = vector.broadcast %336 : vector<1x4xf32> to vector<2x4xf32>
    %338 = arith.addf %335, %337 : vector<2x4xf32>
    %c0_177 = arith.constant 0 : index
    %c0_178 = arith.constant 0 : index
    %339 = vector.load %arg12[%c0_177, %c0_178] : memref<2x4xf32, #tpu.memory_space<vmem>>, vector<2x4xf32>
    tpu.vector_store %arg12[%c0_177, %c0_178], %338 {strides = array<i32>} : memref<2x4xf32, #tpu.memory_space<vmem>>, vector<2x4xf32>,
    return
  }
  func.func @transform_0(%arg0: i32) -> (i32, i32) {
    %c0_i32 = arith.constant 0 : i32
    %c0_i32_0 = arith.constant 0 : i32
    %c0_i32_1 = arith.constant 0 : i32
    return %c0_i32, %c0_i32_0 : i32, i32
  }
  func.func @transform_1(%arg0: i32) -> (i32, i32) {
    %c0_i32 = arith.constant 0 : i32
    %c0_i32_0 = arith.constant 0 : i32
    %c0_i32_1 = arith.constant 0 : i32
    return %c0_i32, %c0_i32_0 : i32, i32
  }
  func.func @transform_2(%arg0: i32) -> (i32, i32) {
    %c0_i32 = arith.constant 0 : i32
    %c0_i32_0 = arith.constant 0 : i32
    %c0_i32_1 = arith.constant 0 : i32
    return %c0_i32, %c0_i32_0 : i32, i32
  }
  func.func @transform_3(%arg0: i32) -> (i32, i32) {
    %c0_i32 = arith.constant 0 : i32
    %c0_i32_0 = arith.constant 0 : i32
    %c0_i32_1 = arith.constant 0 : i32
    return %c0_i32, %c0_i32_0 : i32, i32
  }
  func.func @transform_4(%arg0: i32) -> (i32, i32) {
    %c0_i32 = arith.constant 0 : i32
    %c0_i32_0 = arith.constant 0 : i32
    %c0_i32_1 = arith.constant 0 : i32
    return %c0_i32, %c0_i32_0 : i32, i32
  }
  func.func @transform_5(%arg0: i32) -> (i32, i32) {
    %c0_i32 = arith.constant 0 : i32
    %c0_i32_0 = arith.constant 0 : i32
    %c0_i32_1 = arith.constant 0 : i32
    return %c0_i32, %c0_i32_0 : i32, i32
  }
  func.func @transform_6(%arg0: i32) -> (i32, i32, i32) {
    %c0_i32 = arith.constant 0 : i32
    %c0_i32_0 = arith.constant 0 : i32
    %c0_i32_1 = arith.constant 0 : i32
    %c0_i32_2 = arith.constant 0 : i32
    return %c0_i32, %c0_i32_0, %c0_i32_1 : i32, i32, i32
  }
  func.func @transform_7(%arg0: i32) -> (i32, i32) {
    %c0_i32 = arith.constant 0 : i32
    %c0_i32_0 = arith.constant 0 : i32
    %c0_i32_1 = arith.constant 0 : i32
    return %c0_i32, %c0_i32_0 : i32, i32
  }
  func.func @transform_8(%arg0: i32) -> (i32, i32) {
    %c0_i32 = arith.constant 0 : i32
    %c0_i32_0 = arith.constant 0 : i32
    %c0_i32_1 = arith.constant 0 : i32
    return %c0_i32, %c0_i32_0 : i32, i32
  }
  func.func @transform_9(%arg0: i32) -> (i32, i32) {
    %c0_i32 = arith.constant 0 : i32
    %c0_i32_0 = arith.constant 0 : i32
    %c0_i32_1 = arith.constant 0 : i32
    return %c0_i32, %c0_i32_0 : i32, i32
  }
  func.func @transform_10(%arg0: i32) -> (i32, i32) {
    %c0_i32 = arith.constant 0 : i32
    %c0_i32_0 = arith.constant 0 : i32
    %c0_i32_1 = arith.constant 0 : i32
    return %c0_i32, %c0_i32_0 : i32, i32
  }
  func.func @transform_11(%arg0: i32) -> (i32, i32) {
    %c0_i32 = arith.constant 0 : i32
    %c0_i32_0 = arith.constant 0 : i32
    %c0_i32_1 = arith.constant 0 : i32
    return %c0_i32, %c0_i32_0 : i32, i32
  }
}

</mosaic_0001>

<bundles_post_ra>
// kernel: dqn_other_forward.1
= control target key start
LH: loop header
LB: loop body
LE: loop exit
PB: predicated region body
PF: predicated region fallthrough
CT: control target
= control target key end

     0   :  { %v12135_v1 = vmov 0.0   ;;  %vm12136_vm0 = vmmov 0   ;;  %s17023_s0 = inlined_call_operand.vmem [shape: f32[1800,128], index: 0, kind: input, shape index: {}]   ;;  %s17024_s1 = inlined_call_operand.vmem [shape: f32[128,16], index: 1, kind: input, shape index: {}]   ;;  %s17025_s2 = inlined_call_operand.vmem [shape: f32[1,16], index: 2, kind: input, shape index: {}]   ;;  %s17026_s3 = inlined_call_operand.vmem [shape: f32[400,32], index: 3, kind: input, shape index: {}]   ;;  %s17027_s4 = inlined_call_operand.vmem [shape: f32[1,32], index: 4, kind: input, shape index: {}]   ;;  %s17028_s5 = inlined_call_operand.vmem [shape: f32[2,48], index: 5, kind: input, shape index: {}]   ;;  %s17029_s6 = inlined_call_operand.vmem [shape: bf16[9,128,256], index: 6, kind: input, shape index: {}]   ;;  %s17030_s7 = inlined_call_operand.vmem [shape: bf16[48,256], index: 7, kind: input, shape index: {}]   ;;  %s17031_s8 = inlined_call_operand.vmem [shape: f32[1,256], index: 8, kind: input, shape index: {}]   ;;  %s17032_s9 = inlined_call_operand.vmem [shape: f32[256,4], index: 9, kind: input, shape index: {}]   ;;  %s17033_s10 = inlined_call_operand.vmem [shape: f32[1,4], index: 10, kind: input, shape index: {}]   ;;  %s17034_s11 = inlined_call_operand.hbm [shape: f32[2,4], index: 11, kind: output, shape index: {}]  }
   0x1   :  { %v12204_v0 = vld [vmem:[%s17024_s1 + $0x78] sm:$0xff]  ;;  %9739 = vmatprep.subr.mxu0 %v12135_v1  ;;  %v12210_v2 = vld [vmem:[%s17024_s1 + $0x70] sm:$0xff]  ;;  %9771 = vmatprep.mubr.msk.f32.mxu0 %vm12136_vm0, %v12135_v1  ;;  %v12220_v3 = vld [vmem:[%s17024_s1 + $0x68] sm:$0xff] }
   0x2   :  { %9740 = vmatpush3.msra.mxu0 %v12204_v0  ;;  %11989 = vmatprep.subr.mxu1 %v12135_v1  ;;  %v12229_v4 = vld [vmem:[%s17024_s1 + $0x60] sm:$0xff]  ;;  %v12238_v5 = vld [vmem:[%s17024_s1 + $0x58] sm:$0xff]  ;;  %v12247_v6 = vld [vmem:[%s17024_s1 + $0x50] sm:$0xff] }
   0x3   :  { %9741 = vmatprep.subr.mxu0 %v12135_v1  ;;  %12005 = vmatpush3.msra.mxu1 %v12204_v0  ;;  %v12256_v7 = vld [vmem:[%s17024_s1 + $0x48] sm:$0xff] }
   0x4   :  { %9742 = vmatpush3.msra.mxu0 %v12210_v2  ;;  %11990 = vmatprep.subr.mxu1 %v12135_v1 }
   0x5   :  { %9743 = vmatprep.subr.mxu0 %v12135_v1  ;;  %12006 = vmatpush3.msra.mxu1 %v12210_v2 }
   0x6   :  { %9744 = vmatpush3.msra.mxu0 %v12220_v3  ;;  %11991 = vmatprep.subr.mxu1 %v12135_v1 }
   0x7   :  { %9745 = vmatprep.subr.mxu0 %v12135_v1  ;;  %12007 = vmatpush3.msra.mxu1 %v12220_v3 }
   0x8   :  { %9746 = vmatpush3.msra.mxu0 %v12229_v4  ;;  %11992 = vmatprep.subr.mxu1 %v12135_v1 }
   0x9   :  { %9747 = vmatprep.subr.mxu0 %v12135_v1  ;;  %12008 = vmatpush3.msra.mxu1 %v12229_v4 }
   0xa   :  { %9748 = vmatpush3.msra.mxu0 %v12238_v5  ;;  %11993 = vmatprep.subr.mxu1 %v12135_v1 }
   0xb   :  { %9749 = vmatprep.subr.mxu0 %v12135_v1  ;;  %12009 = vmatpush3.msra.mxu1 %v12238_v5 }
   0xc   :  { %16 = vsyncpa [#allocation3], 0  ;;  %9750 = vmatpush3.msra.mxu0 %v12247_v6  ;;  %11994 = vmatprep.subr.mxu1 %v12135_v1  ;;  %v12265_v8 = vld [vmem:[%s17024_s1 + $0x40] sm:$0xff]  ;;  %v12274_v9 = vld [vmem:[%s17024_s1 + $0x38] sm:$0xff]  ;;  %vm322_vm1 = vcmask 130048   ;;  %s12138_s28 = smov 32  }
   0xd   :  { %9751 = vmatprep.subr.mxu0 %v12135_v1  ;;  %12010 = vmatpush3.msra.mxu1 %v12247_v6  ;;  %v12283_v10 = vld [vmem:[%s17024_s1 + $0x30] sm:$0xff]  ;;  %v12292_v11 = vld [vmem:[%s17024_s1 + $0x28] sm:$0xff]  ;;  %v12301_v12 = vld [vmem:[%s17024_s1 + $0x20] sm:$0xff]  ;;  %s12139_s29 = smov 64   ;;  %vm6983_vm2 = vcmask 261120   ;;  %vm6985_vm3 = vcmask 523264  }
   0xe   :  { %9752 = vmatpush3.msra.mxu0 %v12256_v7  ;;  %11995 = vmatprep.subr.mxu1 %v12135_v1  ;;  %v12310_v13 = vld [vmem:[%s17024_s1 + $0x18] sm:$0xff]  ;;  %v12319_v14 = vld [vmem:[%s17024_s1 + $0x10] sm:$0xff]  ;;  %v12328_v15 = vld [vmem:[%s17024_s1 + $0x8] sm:$0xff]  ;;  %vm6987_vm4 = vcmask 785408   ;;  %vm8229_vm5 = vcmask 392192   ;;  %s12140_s13 = smov [#allocation2]  }
   0xf   :  { %9753 = vmatprep.subr.mxu0 %v12135_v1  ;;  %12011 = vmatpush3.msra.mxu1 %v12256_v7  ;;  %v12337_v16 = vld [vmem:[%s17024_s1] sm:$0xff]  ;;  %v57_v18 = vld [vmem:[%s17023_s0 + $0x8] sm:$0xff]  ;;  %v193_v19 = vld [vmem:[%s17023_s0 + $0x50] sm:$0xff]  ;;  %s8439_s14 = sshll.u32 %s12140_s13, 4  ;;  %vm8431_vm6 = vcmask 25600   ;;  %s8440_s14 = int_to_ptr.vmem [resolvable:$true] %s8439_s14 }
  0x10   :  { %9754 = vmatpush3.msra.mxu0 %v12265_v8  ;;  %11996 = vmatprep.subr.mxu1 %v12135_v1  ;;  %v56_v17 = vld [vmem:[%s17023_s0] sm:$0xff]  ;;  %v58_v20 = vld [vmem:[%s17023_s0 + $0x10] sm:$0xff]  ;;  %v194_v21 = vld [vmem:[%s17023_s0 + $0x58] sm:$0xff]  ;;  %p12118_p1 = scmp.lt.s32.totalorder %s8440_s14, %s8440_s14 }
  0x11   :  { %9755 = vmatprep.subr.mxu0 %v12135_v1  ;;  %12012 = vmatpush3.msra.mxu1 %v12265_v8  ;;  %v59_v22 = vld [vmem:[%s17023_s0 + $0x18] sm:$0xff]  ;;  %v195_v23 = vld [vmem:[%s17023_s0 + $0x60] sm:$0xff]  ;;  %v196_v25 = vld [vmem:[%s17023_s0 + $0x68] sm:$0xff] }
  0x12   :  { %9756 = vmatpush3.msra.mxu0 %v12274_v9  ;;  %11997 = vmatprep.subr.mxu1 %v12135_v1  ;;  %v60_v24 = vld [vmem:[%s17023_s0 + $0x20] sm:$0xff]  ;;  %v61_v26 = vld [vmem:[%s17023_s0 + $0x28] sm:$0xff]  ;;  %v197_v27 = vld [vmem:[%s17023_s0 + $0x70] sm:$0xff] }
  0x13   :  { %9757 = vmatprep.subr.mxu0 %v12135_v1  ;;  %12013 = vmatpush3.msra.mxu1 %v12274_v9  ;;  %v62_v28 = vld [vmem:[%s17023_s0 + $0x30] sm:$0xff]  ;;  %v198_v29 = vld [vmem:[%s17023_s0 + $0x78] sm:$0xff]  ;;  %v199_v31 = vld [vmem:[%s17023_s0 + $0x80] sm:$0xff] }
  0x14   :  { %9758 = vmatpush3.msra.mxu0 %v12283_v10  ;;  %11998 = vmatprep.subr.mxu1 %v12135_v1  ;;  %v63_v30 = vld [vmem:[%s17023_s0 + $0x38] sm:$0xff]  ;;  %v64_v32 = vld [vmem:[%s17023_s0 + $0x40] sm:$0xff]  ;;  %v200_v33 = vld [vmem:[%s17023_s0 + $0x88] sm:$0xff] }
  0x15   :  { %9759 = vmatprep.subr.mxu0 %v12135_v1  ;;  %12014 = vmatpush3.msra.mxu1 %v12283_v10  ;;  %v192_v34 = vld [vmem:[%s17023_s0 + $0x48] sm:$0xff]  ;;  %v190_v36 = vld [vmem:[%s17026_s3] sm:$0xff]  ;;  %v321_v37 = vld [vmem:[%s17026_s3 + $0x18] sm:$0xff] }
  0x16   :  { %9760 = vmatpush3.msra.mxu0 %v12292_v11  ;;  %11999 = vmatprep.subr.mxu1 %v12135_v1  ;;  %v191_v35 = vld [vmem:[%s17026_s3 + $0x8] sm:$0xff]  ;;  %v320_v38 = vld [vmem:[%s17026_s3 + $0x10] sm:$0xff]  ;;  %v12492_v39 = vld [vmem:[%s17025_s2] ss:$0 sm:$0xff] }
  0x17   :  { %9761 = vmatprep.subr.mxu0 %v12135_v1  ;;  %12015 = vmatpush3.msra.mxu1 %v12292_v11 }
  0x18   :  { %9762 = vmatpush3.msra.mxu0 %v12301_v12  ;;  %12000 = vmatprep.subr.mxu1 %v12135_v1 }
  0x19   :  { %9763 = vmatprep.subr.mxu0 %v12135_v1  ;;  %12016 = vmatpush3.msra.mxu1 %v12301_v12 }
  0x1a   :  { %9764 = vmatpush3.msra.mxu0 %v12310_v13  ;;  %12001 = vmatprep.subr.mxu1 %v12135_v1 }
  0x1b   :  { %9765 = vmatprep.subr.mxu0 %v12135_v1  ;;  %12017 = vmatpush3.msra.mxu1 %v12310_v13 }
  0x1c   :  { %9766 = vmatpush3.msra.mxu0 %v12319_v14  ;;  %12002 = vmatprep.subr.mxu1 %v12135_v1 }
  0x1d   :  { %9767 = vmatprep.subr.mxu0 %v12135_v1  ;;  %12018 = vmatpush3.msra.mxu1 %v12319_v14 }
  0x1e   :  { %9768 = vmatpush3.msra.mxu0 %v12328_v15  ;;  %12003 = vmatprep.subr.mxu1 %v12135_v1 }
  0x1f   :  { %9769 = vmatprep.subr.mxu0 %v12135_v1  ;;  %12019 = vmatpush3.msra.mxu1 %v12328_v15 }
  0x20   :  { %9770 = vmatpush3.msra.mxu0 %v12337_v16  ;;  %12004 = vmatprep.subr.mxu1 %v12135_v1 }
  0x21   :  { %9772 = vmatmul.mubr.f32.vlgmr.msra.gmra.mxu0 %v56_v17  ;;  %9798 = vmatprep.subr.mxu0 %v12135_v1 }
  0x22   :  { %9799 = vmatpush3.msra.mxu0 %v12204_v0  ;;  %9774 = vmatprep.mubr.msk.f32.mxu0 %vm12136_vm0, %v12135_v1 }
  0x23   :  { %9800 = vmatprep.subr.mxu0 %v12135_v1  ;;  %12020 = vmatpush3.msra.mxu1 %v12337_v16 }
  0x24   :  { %9801 = vmatpush3.msra.mxu0 %v12210_v2  ;;  %9833 = vmatprep.mubr.msk.f32.mxu1 %vm12136_vm0, %v12135_v1 }
  0x25   :  { %9775 = vmatmul.mubr.f32.gmra.mxu0 %v57_v18  ;;  %9802 = vmatprep.subr.mxu0 %v12135_v1 }
  0x26   :  { %9803 = vmatpush3.msra.mxu0 %v12220_v3  ;;  %9777 = vmatprep.mubr.msk.f32.mxu0 %vm12136_vm0, %v12135_v1 }
  0x27   :  { %9804 = vmatprep.subr.mxu0 %v12135_v1  ;;  %9834 = vmatmul.mubr.f32.vlgmr.msra.gmra.mxu1 %v193_v19 }
  0x28   :  { %9805 = vmatpush3.msra.mxu0 %v12229_v4  ;;  %9836 = vmatprep.mubr.msk.f32.mxu1 %vm12136_vm0, %v12135_v1 }
  0x29   :  { %9778 = vmatmul.mubr.f32.gmra.mxu0 %v58_v20  ;;  %9806 = vmatprep.subr.mxu0 %v12135_v1 }
  0x2a   :  { %9807 = vmatpush3.msra.mxu0 %v12238_v5  ;;  %9780 = vmatprep.mubr.msk.f32.mxu0 %vm12136_vm0, %v12135_v1 }
  0x2b   :  { %9808 = vmatprep.subr.mxu0 %v12135_v1  ;;  %9837 = vmatmul.mubr.f32.gmra.mxu1 %v194_v21 }
  0x2c   :  { %9809 = vmatpush3.msra.mxu0 %v12247_v6  ;;  %9839 = vmatprep.mubr.msk.f32.mxu1 %vm12136_vm0, %v12135_v1 }
  0x2d   :  { %9781 = vmatmul.mubr.f32.gmra.mxu0 %v59_v22  ;;  %9810 = vmatprep.subr.mxu0 %v12135_v1 }
  0x2e   :  { %9783 = vmatprep.mubr.msk.f32.mxu0 %vm12136_vm0, %v12135_v1  ;;  %9811 = vmatpush3.msra.mxu0 %v12256_v7 }
  0x2f   :  { %9812 = vmatprep.subr.mxu0 %v12135_v1  ;;  %9840 = vmatmul.mubr.f32.gmra.mxu1 %v195_v23 }
  0x30   :  { %9813 = vmatpush3.msra.mxu0 %v12265_v8  ;;  %9842 = vmatprep.mubr.msk.f32.mxu1 %vm12136_vm0, %v12135_v1 }
  0x31   :  { %9784 = vmatmul.mubr.f32.gmra.mxu0 %v60_v24  ;;  %9814 = vmatprep.subr.mxu0 %v12135_v1 }
  0x32   :  { %9786 = vmatprep.mubr.msk.f32.mxu0 %vm12136_vm0, %v12135_v1  ;;  %9815 = vmatpush3.msra.mxu0 %v12274_v9 }
  0x33   :  { %9816 = vmatprep.subr.mxu0 %v12135_v1  ;;  %9843 = vmatmul.mubr.f32.gmra.mxu1 %v196_v25 }
  0x34   :  { %9817 = vmatpush3.msra.mxu0 %v12283_v10  ;;  %9845 = vmatprep.mubr.msk.f32.mxu1 %vm12136_vm0, %v12135_v1 }
  0x35   :  { %9787 = vmatmul.mubr.f32.gmra.mxu0 %v61_v26  ;;  %9818 = vmatprep.subr.mxu0 %v12135_v1 }
  0x36   :  { %9789 = vmatprep.mubr.msk.f32.mxu0 %vm12136_vm0, %v12135_v1  ;;  %9819 = vmatpush3.msra.mxu0 %v12292_v11 }
  0x37   :  { %9820 = vmatprep.subr.mxu0 %v12135_v1  ;;  %9846 = vmatmul.mubr.f32.gmra.mxu1 %v197_v27 }
  0x38   :  { %9821 = vmatpush3.msra.mxu0 %v12301_v12  ;;  %9848 = vmatprep.mubr.msk.f32.mxu1 %vm12136_vm0, %v12135_v1 }
  0x39   :  { %9790 = vmatmul.mubr.f32.gmra.mxu0 %v62_v28  ;;  %9822 = vmatprep.subr.mxu0 %v12135_v1 }
  0x3a   :  { %9792 = vmatprep.mubr.msk.f32.mxu0 %vm12136_vm0, %v12135_v1  ;;  %9823 = vmatpush3.msra.mxu0 %v12310_v13 }
  0x3b   :  { %9824 = vmatprep.subr.mxu0 %v12135_v1  ;;  %9849 = vmatmul.mubr.f32.gmra.mxu1 %v198_v29 }
  0x3c   :  { %9825 = vmatpush3.msra.mxu0 %v12319_v14  ;;  %9851 = vmatprep.mubr.msk.f32.mxu1 %vm12136_vm0, %v12135_v1 }
  0x3d   :  { %9793 = vmatmul.mubr.f32.gmra.mxu0 %v63_v30  ;;  %9826 = vmatprep.subr.mxu0 %v12135_v1 }
  0x3e   :  { %9795 = vmatprep.mubr.msk.f32.mxu0 %vm12136_vm0, %v12135_v1  ;;  %9827 = vmatpush3.msra.mxu0 %v12328_v15 }
  0x3f   :  { %9828 = vmatprep.subr.mxu0 %v12135_v1  ;;  %9852 = vmatmul.mubr.f32.gmra.mxu1 %v199_v31 }
  0x40   :  { %9829 = vmatpush3.msra.mxu0 %v12337_v16  ;;  %9854 = vmatprep.mubr.msk.f32.mxu1 %vm12136_vm0, %v12135_v1 }
  0x41   :  { %9796 = vmatmul.mubr.f32.gmra.mxu0 %v64_v32  ;;  %9888 = vmatprep.subr.mxu1 %v12135_v1 }
  0x42   :  { %9830 = vmatprep.mubr.msk.f32.mxu0 %vm12136_vm0, %v12135_v1  ;;  %9857 = vmatprep.subr.mxu0 %v12135_v1 }
  0x43   :  { %9855 = vmatmul.mubr.f32.gmra.mxu1 %v200_v33 }
  0x44   :  { %9892 = vmatprep.mubr.msk.f32.mxu1 %vm12136_vm0, %v12135_v1  ;;  %9889 = vmatpush3.msra.mxu1 %v191_v35 }
  0x45   :  { %9831 = vmatmul.mubr.f32.vlgmr.msra.gmra.mxu0 %v192_v34  ;;  %9890 = vmatprep.subr.mxu1 %v12135_v1 }
  0x46   :  { %9861 = vmatprep.mubr.msk.f32.mxu0 %vm12136_vm0, %v12135_v1  ;;  %9891 = vmatpush3.msra.mxu1 %v190_v36 }
  0x47   :  { %9978 = vmatprep.subr.mxu1 %v12135_v1  ;;  %9858 = vmatpush3.msra.mxu0 %v321_v37 }
  0x48   :  { %9859 = vmatprep.subr.mxu0 %v12135_v1 }
  0x49   :  { %9860 = vmatpush3.msra.mxu0 %v320_v38 }
  0x4a   :  { %9919 = vmatprep.subr.mxu0 %v12135_v1 }
  0xe1   :  { %v137_v40 = vpop.f32.mrf.mxu0 }
  0xe2   :  { %v138_v41 = vadd.f32 %v12492_v39, %v137_v40 }
  0xe3   :  { %v9773_v42 = vpop.f32.mrf.mxu0 }
  0xe4   :  { %v181_v43 = vmax.f32 %v138_v41, 0.0 }
  0xe5   :  { %v142_v44 = vpop.f32.mrf.mxu0 }
  0xe6   :  { %v143_v45 = vadd.f32 %v12492_v39, %v142_v44  ;;  %9893 = vmatmul.mubr.msk.f32.vlgmr.msra.gmra.mxu1 %vm322_vm1, %v181_v43 }
  0xe7   :  { %v9776_v46 = vpop.f32.mrf.mxu0  ;;  %9895 = vmatprep.mubr.msk.f32.mxu1 %vm12136_vm0, %v12135_v1  ;;  %v272_v47 = vpop.f32.mrf.mxu1 }
  0xe8   :  { %v182_v48 = vmax.f32 %v143_v45, 0.0 }
  0xe9   :  { %v147_v49 = vpop.f32.mrf.mxu0  ;;  %v9835_v50 = vpop.f32.mrf.mxu1 }
  0xea   :  { %v148_v51 = vadd.f32 %v12492_v39, %v147_v49  ;;  %9896 = vmatmul.mubr.msk.f32.gmra.mxu1 %vm322_vm1, %v182_v48  ;;  %v273_v49 = vadd.f32 %v12492_v39, %v272_v47 }
  0xeb   :  { %v9779_v52 = vpop.f32.mrf.mxu0  ;;  %9898 = vmatprep.mubr.msk.f32.mxu1 %vm12136_vm0, %v12135_v1  ;;  %v277_v53 = vpop.f32.mrf.mxu1 }
  0xec   :  { %v183_v54 = vmax.f32 %v148_v51, 0.0  ;;  %v312_v52 = vmax.f32 %v273_v49, 0.0  ;;  %v1426_v49 = vld [vmem:[%s17023_s0 + $0x170] sm:$0xff] }
  0xed   :  { %v152_v55 = vpop.f32.mrf.mxu0  ;;  %v9838_v56 = vpop.f32.mrf.mxu1 }
  0xee   :  { %v153_v57 = vadd.f32 %v12492_v39, %v152_v55  ;;  %9899 = vmatmul.mubr.msk.f32.gmra.mxu1 %vm322_vm1, %v183_v54  ;;  %v278_v54 = vadd.f32 %v12492_v39, %v277_v53 }
  0xef   :  { %v9782_v58 = vpop.f32.mrf.mxu0  ;;  %9901 = vmatprep.mubr.msk.f32.mxu1 %vm12136_vm0, %v12135_v1  ;;  %v282_v59 = vpop.f32.mrf.mxu1 }
  0xf0   :  { %v184_v60 = vmax.f32 %v153_v57, 0.0  ;;  %v313_v47 = vmax.f32 %v278_v54, 0.0  ;;  %v283_v55 = vadd.f32 %v12492_v39, %v282_v59 }
  0xf1   :  { %v157_v61 = vpop.f32.mrf.mxu0  ;;  %v9841_v62 = vpop.f32.mrf.mxu1 }
  0xf2   :  { %v158_v63 = vadd.f32 %v12492_v39, %v157_v61  ;;  %9902 = vmatmul.mubr.msk.f32.gmra.mxu1 %vm322_vm1, %v184_v60  ;;  %v314_v53 = vmax.f32 %v283_v55, 0.0  ;;  %v1433_v55 = vld [vmem:[%s17023_s0 + $0x1a8] sm:$0xff] }
  0xf3   :  { %v9785_v17 = vpop.f32.mrf.mxu0  ;;  %9904 = vmatprep.mubr.msk.f32.mxu1 %vm12136_vm0, %v12135_v1  ;;  %v287_v18 = vpop.f32.mrf.mxu1 }
  0xf4   :  { %v185_v19 = vmax.f32 %v158_v63, 0.0  ;;  %v288_v56 = vadd.f32 %v12492_v39, %v287_v18 }
  0xf5   :  { %v162_v20 = vpop.f32.mrf.mxu0  ;;  %v9844_v21 = vpop.f32.mrf.mxu1 }
  0xf6   :  { %v163_v22 = vadd.f32 %v12492_v39, %v162_v20  ;;  %9905 = vmatmul.mubr.msk.f32.gmra.mxu1 %vm322_vm1, %v185_v19  ;;  %v315_v57 = vmax.f32 %v288_v56, 0.0  ;;  %v598_v19 = vld [vmem:[%s17023_s0 + $0x98] sm:$0xff]  ;;  %v599_v20 = vld [vmem:[%s17023_s0 + $0xa0] sm:$0xff]  ;;  %v600_v21 = vld [vmem:[%s17023_s0 + $0xa8] sm:$0xff] }
  0xf7   :  { %v9788_v23 = vpop.f32.mrf.mxu0  ;;  %9907 = vmatprep.mubr.msk.f32.mxu1 %vm12136_vm0, %v12135_v1  ;;  %v292_v24 = vpop.f32.mrf.mxu1 }
  0xf8   :  { %v186_v25 = vmax.f32 %v163_v22, 0.0  ;;  %v293_v58 = vadd.f32 %v12492_v39, %v292_v24  ;;  %v601_v22 = vld [vmem:[%s17023_s0 + $0xb0] sm:$0xff]  ;;  %v602_v23 = vld [vmem:[%s17023_s0 + $0xb8] sm:$0xff]  ;;  %v603_v24 = vld [vmem:[%s17023_s0 + $0xc0] sm:$0xff] }
  0xf9   :  { %v167_v26 = vpop.f32.mrf.mxu0  ;;  %v9847_v27 = vpop.f32.mrf.mxu1 }
  0xfa   :  { %v168_v28 = vadd.f32 %v12492_v39, %v167_v26  ;;  %9908 = vmatmul.mubr.msk.f32.gmra.mxu1 %vm322_vm1, %v186_v25  ;;  %v316_v59 = vmax.f32 %v293_v58, 0.0  ;;  %v604_v25 = vld [vmem:[%s17023_s0 + $0xc8] sm:$0xff]  ;;  %v605_v26 = vld [vmem:[%s17023_s0 + $0xd0] sm:$0xff]  ;;  %v873_v27 = vld [vmem:[%s17023_s0 + $0xd8] sm:$0xff] }
  0xfb   :  { %v9791_v29 = vpop.f32.mrf.mxu0  ;;  %9910 = vmatprep.mubr.msk.f32.mxu1 %vm12136_vm0, %v12135_v1  ;;  %v297_v30 = vpop.f32.mrf.mxu1 }
  0xfc   :  { %v187_v31 = vmax.f32 %v168_v28, 0.0  ;;  %v298_v60 = vadd.f32 %v12492_v39, %v297_v30  ;;  %v726_v28 = vld [vmem:[%s17026_s3 + $0x28] sm:$0xff]  ;;  %v874_v29 = vld [vmem:[%s17023_s0 + $0xe0] sm:$0xff] }
  0xfd   :  { %v172_v32 = vpop.f32.mrf.mxu0  ;;  %v9850_v33 = vpop.f32.mrf.mxu1  ;;  %9979 = vmatpush3.msra.mxu1 %v726_v28  ;;  %v875_v30 = vld [vmem:[%s17023_s0 + $0xe8] sm:$0xff] }
  0xfe   :  { %v173_v34 = vadd.f32 %v12492_v39, %v172_v32  ;;  %9911 = vmatmul.mubr.msk.f32.gmra.mxu1 %vm322_vm1, %v187_v31  ;;  %v317_v61 = vmax.f32 %v298_v60, 0.0  ;;  %9980 = vmatprep.subr.mxu1 %v12135_v1  ;;  %v876_v31 = vld [vmem:[%s17023_s0 + $0xf0] sm:$0xff]  ;;  %v877_v32 = vld [vmem:[%s17023_s0 + $0xf8] sm:$0xff]  ;;  %v878_v33 = vld [vmem:[%s17023_s0 + $0x100] sm:$0xff] }
  0xff   :  { %v9794_v35 = vpop.f32.mrf.mxu0  ;;  %9913 = vmatprep.mubr.msk.f32.mxu1 %vm12136_vm0, %v12135_v1  ;;  %v302_v36 = vpop.f32.mrf.mxu1  ;;  %v12955_v60 = vld [vmem:[%s17024_s1 + $0x68] sm:$0xff] }
 0x100   :  { %v188_v37 = vmax.f32 %v173_v34, 0.0  ;;  %v303_v62 = vadd.f32 %v12492_v39, %v302_v36  ;;  %v725_v34 = vld [vmem:[%s17026_s3 + $0x20] sm:$0xff]  ;;  %v879_v35 = vld [vmem:[%s17023_s0 + $0x108] sm:$0xff]  ;;  %v880_v36 = vld [vmem:[%s17023_s0 + $0x110] sm:$0xff] }
 0x101   :  { %v177_v38 = vpop.f32.mrf.mxu0  ;;  %v9853_v40 = vpop.f32.mrf.mxu1  ;;  %9981 = vmatpush3.msra.mxu1 %v725_v34 }
 0x102   :  { %v178_v41 = vadd.f32 %v12492_v39, %v177_v38  ;;  %9914 = vmatmul.mubr.msk.f32.gmra.mxu1 %vm322_vm1, %v188_v37  ;;  %v318_v63 = vmax.f32 %v303_v62, 0.0  ;;  %10068 = vmatprep.subr.mxu1 %v12135_v1  ;;  %v881_v37 = vld [vmem:[%s17023_s0 + $0x118] sm:$0xff]  ;;  %v1149_v38 = vld [vmem:[%s17023_s0 + $0x120] sm:$0xff]  ;;  %v1150_v40 = vld [vmem:[%s17023_s0 + $0x128] sm:$0xff] }
 0x103   :  { %v9797_v42 = vpop.f32.mrf.mxu0  ;;  %9916 = vmatprep.mubr.msk.f32.mxu1 %vm12136_vm0, %v12135_v1  ;;  %v307_v43 = vpop.f32.mrf.mxu1 }
 0x104   :  { %v189_v44 = vmax.f32 %v178_v41, 0.0  ;;  %v308_v17 = vadd.f32 %v12492_v39, %v307_v43  ;;  %v1151_v41 = vld [vmem:[%s17023_s0 + $0x130] sm:$0xff]  ;;  %v1153_v42 = vld [vmem:[%s17023_s0 + $0x140] sm:$0xff]  ;;  %v1154_v43 = vld [vmem:[%s17023_s0 + $0x148] sm:$0xff] }
 0x105   :  { %v267_v45 = vpop.f32.mrf.mxu0  ;;  %v9856_v46 = vpop.f32.mrf.mxu1 }
 0x106   :  { %v268_v48 = vadd.f32 %v12492_v39, %v267_v45  ;;  %9917 = vmatmul.mubr.msk.f32.gmra.mxu1 %vm322_vm1, %v189_v44  ;;  %v319_v18 = vmax.f32 %v308_v17, 0.0  ;;  %v597_v39 = vld [vmem:[%s17023_s0 + $0x90] sm:$0xff]  ;;  %v1156_v45 = vld [vmem:[%s17023_s0 + $0x158] sm:$0xff]  ;;  %v1157_v46 = vld [vmem:[%s17023_s0 + $0x160] sm:$0xff] }
 0x107   :  { %v9832_v50 = vpop.f32.mrf.mxu0  ;;  %9982 = vmatprep.mubr.msk.f32.mxu1 %vm12136_vm0, %v12135_v1  ;;  %v1155_v44 = vld [vmem:[%s17023_s0 + $0x150] sm:$0xff] }
 0x108   :  { %v311_v51 = vmax.f32 %v268_v48, 0.0  ;;  %v1425_v48 = vld [vmem:[%s17023_s0 + $0x168] sm:$0xff]  ;;  %v12850_v50 = vld [vmem:[%s17024_s1 + $0x70] sm:$0xff] }
 0x10a   :  { %9862 = vmatmul.mubr.msk.f32.vlgmr.msra.gmra.mxu0 %vm322_vm1, %v311_v51 }
 0x10b   :  { %9920 = vmatpush3.msra.mxu0 %v12204_v0  ;;  %9864 = vmatprep.mubr.msk.f32.mxu0 %vm12136_vm0, %v12135_v1 }
 0x10c   :  { %9921 = vmatprep.subr.mxu0 %v12135_v1 }
 0x10d   :  { %9922 = vmatpush3.msra.mxu0 %v12210_v2 }
 0x10e   :  { %9865 = vmatmul.mubr.msk.f32.gmra.mxu0 %vm322_vm1, %v312_v52  ;;  %9923 = vmatprep.subr.mxu0 %v12135_v1 }
 0x10f   :  { %9924 = vmatpush3.msra.mxu0 %v12220_v3  ;;  %9867 = vmatprep.mubr.msk.f32.mxu0 %vm12136_vm0, %v12135_v1 }
 0x110   :  { %9925 = vmatprep.subr.mxu0 %v12135_v1 }
 0x111   :  { %9926 = vmatpush3.msra.mxu0 %v12229_v4 }
 0x112   :  { %9868 = vmatmul.mubr.msk.f32.gmra.mxu0 %vm322_vm1, %v313_v47  ;;  %9927 = vmatprep.subr.mxu0 %v12135_v1  ;;  %v1432_v47 = vld [vmem:[%s17023_s0 + $0x1a0] sm:$0xff] }
 0x113   :  { %9928 = vmatpush3.msra.mxu0 %v12238_v5  ;;  %9870 = vmatprep.mubr.msk.f32.mxu0 %vm12136_vm0, %v12135_v1 }
 0x114   :  { %9929 = vmatprep.subr.mxu0 %v12135_v1 }
 0x115   :  { %9930 = vmatpush3.msra.mxu0 %v12247_v6 }
 0x116   :  { %9871 = vmatmul.mubr.msk.f32.gmra.mxu0 %vm322_vm1, %v314_v53  ;;  %9931 = vmatprep.subr.mxu0 %v12135_v1  ;;  %v1701_v53 = vld [vmem:[%s17023_s0 + $0x1b0] sm:$0xff] }
 0x117   :  { %9873 = vmatprep.mubr.msk.f32.mxu0 %vm12136_vm0, %v12135_v1  ;;  %9932 = vmatpush3.msra.mxu0 %v12256_v7 }
 0x118   :  { %9933 = vmatprep.subr.mxu0 %v12135_v1 }
 0x119   :  { %9934 = vmatpush3.msra.mxu0 %v12265_v8 }
 0x11a   :  { %9874 = vmatmul.mubr.msk.f32.gmra.mxu0 %vm322_vm1, %v315_v57  ;;  %9935 = vmatprep.subr.mxu0 %v12135_v1 }
 0x11b   :  { %9876 = vmatprep.mubr.msk.f32.mxu0 %vm12136_vm0, %v12135_v1  ;;  %9936 = vmatpush3.msra.mxu0 %v12274_v9 }
 0x11c   :  { %9937 = vmatprep.subr.mxu0 %v12135_v1 }
 0x11d   :  { %9938 = vmatpush3.msra.mxu0 %v12283_v10 }
 0x11e   :  { %9877 = vmatmul.mubr.msk.f32.gmra.mxu0 %vm322_vm1, %v316_v59  ;;  %9939 = vmatprep.subr.mxu0 %v12135_v1 }
 0x11f   :  { %9879 = vmatprep.mubr.msk.f32.mxu0 %vm12136_vm0, %v12135_v1  ;;  %9940 = vmatpush3.msra.mxu0 %v12292_v11 }
 0x120   :  { %9941 = vmatprep.subr.mxu0 %v12135_v1 }
 0x121   :  { %9942 = vmatpush3.msra.mxu0 %v12301_v12 }
 0x122   :  { %9880 = vmatmul.mubr.msk.f32.gmra.mxu0 %vm322_vm1, %v317_v61  ;;  %9943 = vmatprep.subr.mxu0 %v12135_v1  ;;  %v1703_v61 = vld [vmem:[%s17023_s0 + $0x1c0] sm:$0xff] }
 0x123   :  { %9882 = vmatprep.mubr.msk.f32.mxu0 %vm12136_vm0, %v12135_v1  ;;  %9944 = vmatpush3.msra.mxu0 %v12310_v13 }
 0x124   :  { %9945 = vmatprep.subr.mxu0 %v12135_v1 }
 0x125   :  { %9946 = vmatpush3.msra.mxu0 %v12319_v14 }
 0x126   :  { %9883 = vmatmul.mubr.msk.f32.gmra.mxu0 %vm322_vm1, %v318_v63  ;;  %9947 = vmatprep.subr.mxu0 %v12135_v1  ;;  %v12967_v63 = vld [vmem:[%s17024_s1 + $0x60] sm:$0xff] }
 0x127   :  { %9885 = vmatprep.mubr.msk.f32.mxu0 %vm12136_vm0, %v12135_v1  ;;  %9948 = vmatpush3.msra.mxu0 %v12328_v15 }
 0x128   :  { %9949 = vmatprep.subr.mxu0 %v12135_v1 }
 0x129   :  { %9950 = vmatpush3.msra.mxu0 %v12337_v16 }
 0x12a   :  { %9886 = vmatmul.mubr.msk.f32.gmra.mxu0 %vm322_vm1, %v319_v18  ;;  %10009 = vmatprep.subr.mxu0 %v12135_v1  ;;  %v12976_v18 = vld [vmem:[%s17024_s1 + $0x58] sm:$0xff] }
 0x12b   :  { %9951 = vmatprep.mubr.msk.f32.mxu0 %vm12136_vm0, %v12135_v1 }
 0x12e   :  { %9952 = vmatmul.mubr.f32.vlgmr.msra.gmra.mxu0 %v597_v39  ;;  %v1704_v39 = vld [vmem:[%s17023_s0 + $0x1c8] sm:$0xff] }
 0x12f   :  { %10010 = vmatpush3.msra.mxu0 %v12204_v0  ;;  %9954 = vmatprep.mubr.msk.f32.mxu0 %vm12136_vm0, %v12135_v1 }
 0x130   :  { %10011 = vmatprep.subr.mxu0 %v12135_v1 }
 0x131   :  { %10012 = vmatpush3.msra.mxu0 %v12210_v2 }
 0x132   :  { %9955 = vmatmul.mubr.f32.gmra.mxu0 %v598_v19  ;;  %10013 = vmatprep.subr.mxu0 %v12135_v1 }
 0x133   :  { %10014 = vmatpush3.msra.mxu0 %v12220_v3  ;;  %9957 = vmatprep.mubr.msk.f32.mxu0 %vm12136_vm0, %v12135_v1 }
 0x134   :  { %10015 = vmatprep.subr.mxu0 %v12135_v1 }
 0x135   :  { %10016 = vmatpush3.msra.mxu0 %v12229_v4 }
 0x136   :  { %9958 = vmatmul.mubr.f32.gmra.mxu0 %v599_v20  ;;  %10017 = vmatprep.subr.mxu0 %v12135_v1  ;;  %v12988_v20 = vld [vmem:[%s17024_s1 + $0x50] sm:$0xff] }
 0x137   :  { %10018 = vmatpush3.msra.mxu0 %v12238_v5  ;;  %9960 = vmatprep.mubr.msk.f32.mxu0 %vm12136_vm0, %v12135_v1 }
 0x138   :  { %10019 = vmatprep.subr.mxu0 %v12135_v1 }
 0x139   :  { %10020 = vmatpush3.msra.mxu0 %v12247_v6 }
 0x13a   :  { %9961 = vmatmul.mubr.f32.gmra.mxu0 %v600_v21  ;;  %10021 = vmatprep.subr.mxu0 %v12135_v1 }
 0x13b   :  { %9963 = vmatprep.mubr.msk.f32.mxu0 %vm12136_vm0, %v12135_v1  ;;  %10022 = vmatpush3.msra.mxu0 %v12256_v7 }
 0x13c   :  { %10023 = vmatprep.subr.mxu0 %v12135_v1 }
 0x13d   :  { %10024 = vmatpush3.msra.mxu0 %v12265_v8 }
 0x13e   :  { %9964 = vmatmul.mubr.f32.gmra.mxu0 %v601_v22  ;;  %10025 = vmatprep.subr.mxu0 %v12135_v1 }
 0x13f   :  { %9966 = vmatprep.mubr.msk.f32.mxu0 %vm12136_vm0, %v12135_v1  ;;  %10026 = vmatpush3.msra.mxu0 %v12274_v9 }
 0x140   :  { %10027 = vmatprep.subr.mxu0 %v12135_v1 }
 0x141   :  { %10028 = vmatpush3.msra.mxu0 %v12283_v10 }
 0x142   :  { %9967 = vmatmul.mubr.f32.gmra.mxu0 %v602_v23  ;;  %10029 = vmatprep.subr.mxu0 %v12135_v1  ;;  %v13000_v23 = vld [vmem:[%s17024_s1 + $0x48] sm:$0xff] }
 0x143   :  { %9969 = vmatprep.mubr.msk.f32.mxu0 %vm12136_vm0, %v12135_v1  ;;  %10030 = vmatpush3.msra.mxu0 %v12292_v11 }
 0x144   :  { %10031 = vmatprep.subr.mxu0 %v12135_v1 }
 0x145   :  { %10032 = vmatpush3.msra.mxu0 %v12301_v12 }
 0x146   :  { %9970 = vmatmul.mubr.f32.gmra.mxu0 %v603_v24  ;;  %10033 = vmatprep.subr.mxu0 %v12135_v1  ;;  %v1705_v24 = vld [vmem:[%s17023_s0 + $0x1d0] sm:$0xff] }
 0x147   :  { %9972 = vmatprep.mubr.msk.f32.mxu0 %vm12136_vm0, %v12135_v1  ;;  %10034 = vmatpush3.msra.mxu0 %v12310_v13 }
 0x148   :  { %10035 = vmatprep.subr.mxu0 %v12135_v1 }
 0x149   :  { %10036 = vmatpush3.msra.mxu0 %v12319_v14 }
 0x14a   :  { %9973 = vmatmul.mubr.f32.gmra.mxu0 %v604_v25  ;;  %10037 = vmatprep.subr.mxu0 %v12135_v1 }
 0x14b   :  { %9975 = vmatprep.mubr.msk.f32.mxu0 %vm12136_vm0, %v12135_v1  ;;  %10038 = vmatpush3.msra.mxu0 %v12328_v15 }
 0x14c   :  { %10039 = vmatprep.subr.mxu0 %v12135_v1 }
 0x14d   :  { %10040 = vmatpush3.msra.mxu0 %v12337_v16 }
 0x14e   :  { %9976 = vmatmul.mubr.f32.gmra.mxu0 %v605_v26  ;;  %10099 = vmatprep.subr.mxu0 %v12135_v1  ;;  %v13010_v26 = vld [vmem:[%s17024_s1 + $0x40] sm:$0xff] }
 0x14f   :  { %10041 = vmatprep.mubr.msk.f32.mxu0 %vm12136_vm0, %v12135_v1 }
 0x152   :  { %10042 = vmatmul.mubr.f32.vlgmr.msra.gmra.mxu0 %v873_v27 }
 0x153   :  { %10100 = vmatpush3.msra.mxu0 %v12204_v0  ;;  %10044 = vmatprep.mubr.msk.f32.mxu0 %vm12136_vm0, %v12135_v1 }
 0x154   :  { %10101 = vmatprep.subr.mxu0 %v12135_v1 }
 0x155   :  { %10102 = vmatpush3.msra.mxu0 %v12210_v2 }
 0x156   :  { %10045 = vmatmul.mubr.f32.gmra.mxu0 %v874_v29  ;;  %10103 = vmatprep.subr.mxu0 %v12135_v1  ;;  %v13022_v29 = vld [vmem:[%s17024_s1 + $0x38] sm:$0xff] }
 0x157   :  { %10104 = vmatpush3.msra.mxu0 %v12220_v3  ;;  %10047 = vmatprep.mubr.msk.f32.mxu0 %vm12136_vm0, %v12135_v1 }
 0x158   :  { %10105 = vmatprep.subr.mxu0 %v12135_v1 }
 0x159   :  { %10106 = vmatpush3.msra.mxu0 %v12229_v4 }
 0x15a   :  { %10048 = vmatmul.mubr.f32.gmra.mxu0 %v875_v30  ;;  %10107 = vmatprep.subr.mxu0 %v12135_v1  ;;  %v1706_v30 = vld [vmem:[%s17023_s0 + $0x1d8] sm:$0xff] }
 0x15b   :  { %10108 = vmatpush3.msra.mxu0 %v12238_v5  ;;  %10050 = vmatprep.mubr.msk.f32.mxu0 %vm12136_vm0, %v12135_v1 }
 0x15c   :  { %10109 = vmatprep.subr.mxu0 %v12135_v1 }
 0x15d   :  { %10110 = vmatpush3.msra.mxu0 %v12247_v6 }
 0x15e   :  { %10051 = vmatmul.mubr.f32.gmra.mxu0 %v876_v31  ;;  %10111 = vmatprep.subr.mxu0 %v12135_v1 }
 0x15f   :  { %10053 = vmatprep.mubr.msk.f32.mxu0 %vm12136_vm0, %v12135_v1  ;;  %10112 = vmatpush3.msra.mxu0 %v12256_v7 }
 0x160   :  { %10113 = vmatprep.subr.mxu0 %v12135_v1 }
 0x161   :  { %10114 = vmatpush3.msra.mxu0 %v12265_v8 }
 0x162   :  { %10054 = vmatmul.mubr.f32.gmra.mxu0 %v877_v32  ;;  %10115 = vmatprep.subr.mxu0 %v12135_v1  ;;  %v13032_v32 = vld [vmem:[%s17024_s1 + $0x30] sm:$0xff] }
 0x163   :  { %10056 = vmatprep.mubr.msk.f32.mxu0 %vm12136_vm0, %v12135_v1  ;;  %10116 = vmatpush3.msra.mxu0 %v12274_v9 }
 0x164   :  { %10117 = vmatprep.subr.mxu0 %v12135_v1 }
 0x165   :  { %10118 = vmatpush3.msra.mxu0 %v12283_v10 }
 0x166   :  { %10057 = vmatmul.mubr.f32.gmra.mxu0 %v878_v33  ;;  %10119 = vmatprep.subr.mxu0 %v12135_v1 }
 0x167   :  { %10059 = vmatprep.mubr.msk.f32.mxu0 %vm12136_vm0, %v12135_v1  ;;  %10120 = vmatpush3.msra.mxu0 %v12292_v11 }
 0x168   :  { %10121 = vmatprep.subr.mxu0 %v12135_v1 }
 0x169   :  { %10122 = vmatpush3.msra.mxu0 %v12301_v12 }
 0x16a   :  { %10060 = vmatmul.mubr.f32.gmra.mxu0 %v879_v35  ;;  %10123 = vmatprep.subr.mxu0 %v12135_v1  ;;  %v1707_v35 = vld [vmem:[%s17023_s0 + $0x1e0] sm:$0xff] }
 0x16b   :  { %10062 = vmatprep.mubr.msk.f32.mxu0 %vm12136_vm0, %v12135_v1  ;;  %10124 = vmatpush3.msra.mxu0 %v12310_v13 }
 0x16c   :  { %10125 = vmatprep.subr.mxu0 %v12135_v1 }
 0x16d   :  { %10126 = vmatpush3.msra.mxu0 %v12319_v14 }
 0x16e   :  { %10063 = vmatmul.mubr.f32.gmra.mxu0 %v880_v36  ;;  %10127 = vmatprep.subr.mxu0 %v12135_v1  ;;  %v13047_v36 = vld [vmem:[%s17024_s1 + $0x28] sm:$0xff] }
 0x16f   :  { %10065 = vmatprep.mubr.msk.f32.mxu0 %vm12136_vm0, %v12135_v1  ;;  %10128 = vmatpush3.msra.mxu0 %v12328_v15 }
 0x170   :  { %10129 = vmatprep.subr.mxu0 %v12135_v1 }
 0x171   :  { %10130 = vmatpush3.msra.mxu0 %v12337_v16 }
 0x172   :  { %10066 = vmatmul.mubr.f32.gmra.mxu0 %v881_v37  ;;  %10189 = vmatprep.subr.mxu0 %v12135_v1 }
 0x173   :  { %10131 = vmatprep.mubr.msk.f32.mxu0 %vm12136_vm0, %v12135_v1 }
 0x176   :  { %10132 = vmatmul.mubr.f32.vlgmr.msra.gmra.mxu0 %v1149_v38  ;;  %v13054_v38 = vld [vmem:[%s17024_s1 + $0x20] sm:$0xff] }
 0x177   :  { %10190 = vmatpush3.msra.mxu0 %v12204_v0  ;;  %10134 = vmatprep.mubr.msk.f32.mxu0 %vm12136_vm0, %v12135_v1 }
 0x178   :  { %10191 = vmatprep.subr.mxu0 %v12135_v1 }
 0x179   :  { %10192 = vmatpush3.msra.mxu0 %v12210_v2  ;;  %v1152_v2 = vld [vmem:[%s17023_s0 + $0x138] sm:$0xff] }
 0x17a   :  { %10135 = vmatmul.mubr.f32.gmra.mxu0 %v1150_v40  ;;  %10193 = vmatprep.subr.mxu0 %v12135_v1 }
 0x17b   :  { %10194 = vmatpush3.msra.mxu0 %v12220_v3  ;;  %10137 = vmatprep.mubr.msk.f32.mxu0 %vm12136_vm0, %v12135_v1 }
 0x17c   :  { %10195 = vmatprep.subr.mxu0 %v12135_v1 }
 0x17d   :  { %10196 = vmatpush3.msra.mxu0 %v12229_v4 }
 0x17e   :  { %10138 = vmatmul.mubr.f32.gmra.mxu0 %v1151_v41  ;;  %10197 = vmatprep.subr.mxu0 %v12135_v1 }
 0x17f   :  { %10198 = vmatpush3.msra.mxu0 %v12238_v5  ;;  %10140 = vmatprep.mubr.msk.f32.mxu0 %vm12136_vm0, %v12135_v1 }
 0x180   :  { %10199 = vmatprep.subr.mxu0 %v12135_v1 }
 0x181   :  { %10200 = vmatpush3.msra.mxu0 %v12247_v6 }
 0x182   :  { %10141 = vmatmul.mubr.f32.gmra.mxu0 %v1152_v2  ;;  %10201 = vmatprep.subr.mxu0 %v12135_v1  ;;  %v1708_v2 = vld [vmem:[%s17023_s0 + $0x1e8] sm:$0xff] }
 0x183   :  { %10143 = vmatprep.mubr.msk.f32.mxu0 %vm12136_vm0, %v12135_v1  ;;  %10202 = vmatpush3.msra.mxu0 %v12256_v7 }
 0x184   :  { %10203 = vmatprep.subr.mxu0 %v12135_v1 }
 0x185   :  { %10204 = vmatpush3.msra.mxu0 %v12265_v8 }
 0x186   :  { %10144 = vmatmul.mubr.f32.gmra.mxu0 %v1153_v42  ;;  %10205 = vmatprep.subr.mxu0 %v12135_v1  ;;  %v13069_v42 = vld [vmem:[%s17024_s1 + $0x18] sm:$0xff] }
 0x187   :  { %10146 = vmatprep.mubr.msk.f32.mxu0 %vm12136_vm0, %v12135_v1  ;;  %10206 = vmatpush3.msra.mxu0 %v12274_v9 }
 0x188   :  { %10207 = vmatprep.subr.mxu0 %v12135_v1 }
 0x189   :  { %10208 = vmatpush3.msra.mxu0 %v12283_v10 }
 0x18a   :  { %10147 = vmatmul.mubr.f32.gmra.mxu0 %v1154_v43  ;;  %10209 = vmatprep.subr.mxu0 %v12135_v1 }
 0x18b   :  { %10149 = vmatprep.mubr.msk.f32.mxu0 %vm12136_vm0, %v12135_v1  ;;  %10210 = vmatpush3.msra.mxu0 %v12292_v11 }
 0x18c   :  { %10211 = vmatprep.subr.mxu0 %v12135_v1 }
 0x18d   :  { %10212 = vmatpush3.msra.mxu0 %v12301_v12 }
 0x18e   :  { %10150 = vmatmul.mubr.f32.gmra.mxu0 %v1155_v44  ;;  %10213 = vmatprep.subr.mxu0 %v12135_v1  ;;  %v13076_v44 = vld [vmem:[%s17024_s1 + $0x10] sm:$0xff] }
 0x18f   :  { %10152 = vmatprep.mubr.msk.f32.mxu0 %vm12136_vm0, %v12135_v1  ;;  %10214 = vmatpush3.msra.mxu0 %v12310_v13 }
 0x190   :  { %10215 = vmatprep.subr.mxu0 %v12135_v1 }
 0x191   :  { %10216 = vmatpush3.msra.mxu0 %v12319_v14 }
 0x192   :  { %10153 = vmatmul.mubr.f32.gmra.mxu0 %v1156_v45  ;;  %10217 = vmatprep.subr.mxu0 %v12135_v1 }
 0x193   :  { %10155 = vmatprep.mubr.msk.f32.mxu0 %vm12136_vm0, %v12135_v1  ;;  %10218 = vmatpush3.msra.mxu0 %v12328_v15 }
 0x194   :  { %10219 = vmatprep.subr.mxu0 %v12135_v1 }
 0x195   :  { %10220 = vmatpush3.msra.mxu0 %v12337_v16 }
 0x196   :  { %10156 = vmatmul.mubr.f32.gmra.mxu0 %v1157_v46  ;;  %10279 = vmatprep.subr.mxu0 %v12135_v1 }
 0x197   :  { %10221 = vmatprep.mubr.msk.f32.mxu0 %vm12136_vm0, %v12135_v1 }
 0x19a   :  { %10222 = vmatmul.mubr.f32.vlgmr.msra.gmra.mxu0 %v1425_v48  ;;  %v1709_v48 = vld [vmem:[%s17023_s0 + $0x1f0] sm:$0xff] }
 0x19b   :  { %10280 = vmatpush3.msra.mxu0 %v12204_v0  ;;  %10224 = vmatprep.mubr.msk.f32.mxu0 %vm12136_vm0, %v12135_v1  ;;  %v1427_v0 = vld [vmem:[%s17023_s0 + $0x178] sm:$0xff] }
 0x19c   :  { %10281 = vmatprep.subr.mxu0 %v12135_v1 }
 0x19d   :  { %10282 = vmatpush3.msra.mxu0 %v12850_v50 }
 0x19e   :  { %10225 = vmatmul.mubr.f32.gmra.mxu0 %v1426_v49  ;;  %10283 = vmatprep.subr.mxu0 %v12135_v1  ;;  %v13091_v49 = vld [vmem:[%s17024_s1 + $0x8] sm:$0xff] }
 0x19f   :  { %10284 = vmatpush3.msra.mxu0 %v12220_v3  ;;  %10227 = vmatprep.mubr.msk.f32.mxu0 %vm12136_vm0, %v12135_v1  ;;  %v1428_v3 = vld [vmem:[%s17023_s0 + $0x180] sm:$0xff] }
 0x1a0   :  { %10285 = vmatprep.subr.mxu0 %v12135_v1 }
 0x1a1   :  { %10286 = vmatpush3.msra.mxu0 %v12229_v4  ;;  %v1429_v4 = vld [vmem:[%s17023_s0 + $0x188] sm:$0xff] }
 0x1a2   :  { %10228 = vmatmul.mubr.f32.gmra.mxu0 %v1427_v0  ;;  %10287 = vmatprep.subr.mxu0 %v12135_v1 }
 0x1a3   :  { %10288 = vmatpush3.msra.mxu0 %v12238_v5  ;;  %10230 = vmatprep.mubr.msk.f32.mxu0 %vm12136_vm0, %v12135_v1 }
 0x1a4   :  { %10289 = vmatprep.subr.mxu0 %v12135_v1 }
 0x1a5   :  { %10290 = vmatpush3.msra.mxu0 %v12247_v6 }
 0x1a6   :  { %v12871_v51 = vpop.f32.mrf.mxu1  ;;  %10231 = vmatmul.mubr.f32.gmra.mxu0 %v1428_v3  ;;  %10291 = vmatprep.subr.mxu0 %v12135_v1  ;;  %v13098_v3 = vld [vmem:[%s17024_s1] sm:$0xff] }
 0x1a7   :  { %10233 = vmatprep.mubr.msk.f32.mxu0 %vm12136_vm0, %v12135_v1  ;;  %10292 = vmatpush3.msra.mxu0 %v12256_v7  ;;  %v1430_v7 = vld [vmem:[%s17023_s0 + $0x190] sm:$0xff] }
 0x1a8   :  { %v9894_v5 = vpop.f32.mrf.mxu1  ;;  %10293 = vmatprep.subr.mxu0 %v12135_v1 }
 0x1a9   :  { %10294 = vmatpush3.msra.mxu0 %v12265_v8  ;;  %v1977_v5 = vld [vmem:[%s17023_s0 + $0x1f8] sm:$0xff] }
 0x1aa   :  { %v12882_v6 = vpop.f32.mrf.mxu1  ;;  %10234 = vmatmul.mubr.f32.gmra.mxu0 %v1429_v4  ;;  %10295 = vmatprep.subr.mxu0 %v12135_v1 }
 0x1ab   :  { %10236 = vmatprep.mubr.msk.f32.mxu0 %vm12136_vm0, %v12135_v1  ;;  %10296 = vmatpush3.msra.mxu0 %v12274_v9  ;;  %v1431_v9 = vld [vmem:[%s17023_s0 + $0x198] sm:$0xff] }
 0x1ac   :  { %v9897_v52 = vpop.f32.mrf.mxu1  ;;  %10297 = vmatprep.subr.mxu0 %v12135_v1 }
 0x1ad   :  { %10298 = vmatpush3.msra.mxu0 %v12283_v10 }
 0x1ae   :  { %v12893_v8 = vpop.f32.mrf.mxu1  ;;  %10237 = vmatmul.mubr.f32.gmra.mxu0 %v1430_v7  ;;  %10299 = vmatprep.subr.mxu0 %v12135_v1 }
 0x1af   :  { %10239 = vmatprep.mubr.msk.f32.mxu0 %vm12136_vm0, %v12135_v1  ;;  %10300 = vmatpush3.msra.mxu0 %v12292_v11 }
 0x1b0   :  { %v9900_v54 = vpop.f32.mrf.mxu1  ;;  %10301 = vmatprep.subr.mxu0 %v12135_v1 }
 0x1b1   :  { %10302 = vmatpush3.msra.mxu0 %v12301_v12 }
 0x1b2   :  { %v12904_v10 = vpop.f32.mrf.mxu1  ;;  %10240 = vmatmul.mubr.f32.gmra.mxu0 %v1431_v9  ;;  %10303 = vmatprep.subr.mxu0 %v12135_v1 }
 0x1b3   :  { %10242 = vmatprep.mubr.msk.f32.mxu0 %vm12136_vm0, %v12135_v1  ;;  %10304 = vmatpush3.msra.mxu0 %v12310_v13 }
 0x1b4   :  { %v9903_v11 = vpop.f32.mrf.mxu1  ;;  %10305 = vmatprep.subr.mxu0 %v12135_v1 }
 0x1b5   :  { %10306 = vmatpush3.msra.mxu0 %v12319_v14 }
 0x1b6   :  { %v12915_v12 = vpop.f32.mrf.mxu1  ;;  %10243 = vmatmul.mubr.f32.gmra.mxu0 %v1432_v47  ;;  %10307 = vmatprep.subr.mxu0 %v12135_v1  ;;  %v1979_v47 = vld [vmem:[%s17023_s0 + $0x208] sm:$0xff] }
 0x1b7   :  { %10245 = vmatprep.mubr.msk.f32.mxu0 %vm12136_vm0, %v12135_v1  ;;  %10308 = vmatpush3.msra.mxu0 %v12328_v15  ;;  %v12939_v15 = vld [vmem:[%s17024_s1 + $0x78] sm:$0xff] }
 0x1b8   :  { %v9906_v13 = vpop.f32.mrf.mxu1  ;;  %10309 = vmatprep.subr.mxu0 %v12135_v1 }
 0x1b9   :  { %10310 = vmatpush3.msra.mxu0 %v12337_v16  ;;  %v1702_v16 = vld [vmem:[%s17023_s0 + $0x1b8] sm:$0xff]  ;;  %v1980_v13 = vld [vmem:[%s17023_s0 + $0x210] sm:$0xff] }
 0x1ba   :  { %v12926_v14 = vpop.f32.mrf.mxu1  ;;  %10246 = vmatmul.mubr.f32.gmra.mxu0 %v1433_v55  ;;  %10369 = vmatprep.subr.mxu0 %v12135_v1 }
 0x1bb   :  { %10311 = vmatprep.mubr.msk.f32.mxu0 %vm12136_vm0, %v12135_v1 }
 0x1bc   :  { %v9909_v56 = vpop.f32.mrf.mxu1 }
 0x1bd   :  { %v13149_v56 = vld [vmem:[%s17025_s2] ss:$0 sm:$0xff] }
 0x1be   :  { %v12934_v57 = vpop.f32.mrf.mxu1  ;;  %10312 = vmatmul.mubr.f32.vlgmr.msra.gmra.mxu0 %v1701_v53 }
 0x1bf   :  { %10370 = vmatpush3.msra.mxu0 %v12939_v15  ;;  %10314 = vmatprep.mubr.msk.f32.mxu0 %vm12136_vm0, %v12135_v1 }
 0x1c0   :  { %v9912_v58 = vpop.f32.mrf.mxu1  ;;  %10371 = vmatprep.subr.mxu0 %v12135_v1 }
 0x1c1   :  { %10372 = vmatpush3.msra.mxu0 %v12850_v50 }
 0x1c2   :  { %v12949_v59 = vpop.f32.mrf.mxu1  ;;  %10315 = vmatmul.mubr.f32.gmra.mxu0 %v1702_v16  ;;  %10373 = vmatprep.subr.mxu0 %v12135_v1  ;;  %v1981_v16 = vld [vmem:[%s17023_s0 + $0x218] sm:$0xff] }
 0x1c3   :  { %10374 = vmatpush3.msra.mxu0 %v12955_v60  ;;  %10317 = vmatprep.mubr.msk.f32.mxu0 %vm12136_vm0, %v12135_v1 }
 0x1c4   :  { %v9915_v62 = vpop.f32.mrf.mxu1  ;;  %10375 = vmatprep.subr.mxu0 %v12135_v1 }
 0x1c5   :  { %10376 = vmatpush3.msra.mxu0 %v12967_v63 }
 0x1c6   :  { %v12970_v17 = vpop.f32.mrf.mxu1  ;;  %10318 = vmatmul.mubr.f32.gmra.mxu0 %v1703_v61  ;;  %10377 = vmatprep.subr.mxu0 %v12135_v1  ;;  %v1002_v61 = vld [vmem:[%s17026_s3 + $0x38] sm:$0xff] }
 0x1c7   :  { %10378 = vmatpush3.msra.mxu0 %v12976_v18  ;;  %10320 = vmatprep.mubr.msk.f32.mxu0 %vm12136_vm0, %v12135_v1 }
 0x1c8   :  { %v9918_v19 = vpop.f32.mrf.mxu1  ;;  %10379 = vmatprep.subr.mxu0 %v12135_v1 }
 0x1c9   :  { %10380 = vmatpush3.msra.mxu0 %v12988_v20 }
 0x1ca   :  { %v416_v21 = vpop.f32.mrf.mxu0  ;;  %10321 = vmatmul.mubr.f32.gmra.mxu0 %v1704_v39  ;;  %10381 = vmatprep.subr.mxu0 %v12135_v1  ;;  %v1982_v39 = vld [vmem:[%s17023_s0 + $0x220] sm:$0xff] }
 0x1cb   :  { %v12993_v22 = vadd.f32 %v12871_v51, %v416_v21  ;;  %10323 = vmatprep.mubr.msk.f32.mxu0 %vm12136_vm0, %v12135_v1  ;;  %10382 = vmatpush3.msra.mxu0 %v13000_v23 }
 0x1cc   :  { %v9863_v25 = vpop.f32.mrf.mxu0  ;;  %10383 = vmatprep.subr.mxu0 %v12135_v1 }
 0x1cd   :  { %10384 = vmatpush3.msra.mxu0 %v13010_v26 }
 0x1ce   :  { %v421_v27 = vpop.f32.mrf.mxu0  ;;  %10324 = vmatmul.mubr.f32.gmra.mxu0 %v1705_v24  ;;  %10385 = vmatprep.subr.mxu0 %v12135_v1 }
 0x1cf   :  { %v13015_v28 = vadd.f32 %v12882_v6, %v421_v27  ;;  %10326 = vmatprep.mubr.msk.f32.mxu0 %vm12136_vm0, %v12135_v1  ;;  %10386 = vmatpush3.msra.mxu0 %v13022_v29  ;;  %v1983_v27 = vld [vmem:[%s17023_s0 + $0x228] sm:$0xff] }
 0x1d0   :  { %v9866_v31 = vpop.f32.mrf.mxu0  ;;  %10387 = vmatprep.subr.mxu0 %v12135_v1 }
 0x1d1   :  { %10388 = vmatpush3.msra.mxu0 %v13032_v32 }
 0x1d2   :  { %v426_v33 = vpop.f32.mrf.mxu0  ;;  %10327 = vmatmul.mubr.f32.gmra.mxu0 %v1706_v30  ;;  %10389 = vmatprep.subr.mxu0 %v12135_v1 }
 0x1d3   :  { %v13037_v34 = vadd.f32 %v12893_v8, %v426_v33  ;;  %10329 = vmatprep.mubr.msk.f32.mxu0 %vm12136_vm0, %v12135_v1  ;;  %10390 = vmatpush3.msra.mxu0 %v13047_v36  ;;  %v1978_v8 = vld [vmem:[%s17023_s0 + $0x200] sm:$0xff] }
 0x1d4   :  { %v9869_v37 = vpop.f32.mrf.mxu0  ;;  %10391 = vmatprep.subr.mxu0 %v12135_v1 }
 0x1d5   :  { %10392 = vmatpush3.msra.mxu0 %v13054_v38  ;;  %v1984_v37 = vld [vmem:[%s17023_s0 + $0x230] sm:$0xff] }
 0x1d6   :  { %v431_v40 = vpop.f32.mrf.mxu0  ;;  %10330 = vmatmul.mubr.f32.gmra.mxu0 %v1707_v35  ;;  %10393 = vmatprep.subr.mxu0 %v12135_v1 }
 0x1d7   :  { %v13059_v41 = vadd.f32 %v12904_v10, %v431_v40  ;;  %10332 = vmatprep.mubr.msk.f32.mxu0 %vm12136_vm0, %v12135_v1  ;;  %10394 = vmatpush3.msra.mxu0 %v13069_v42 }
 0x1d8   :  { %v9872_v43 = vpop.f32.mrf.mxu0  ;;  %10395 = vmatprep.subr.mxu0 %v12135_v1 }
 0x1d9   :  { %10396 = vmatpush3.msra.mxu0 %v13076_v44 }
 0x1da   :  { %v436_v45 = vpop.f32.mrf.mxu0  ;;  %10333 = vmatmul.mubr.f32.gmra.mxu0 %v1708_v2  ;;  %10397 = vmatprep.subr.mxu0 %v12135_v1 }
 0x1db   :  { %v13081_v46 = vadd.f32 %v12915_v12, %v436_v45  ;;  %10335 = vmatprep.mubr.msk.f32.mxu0 %vm12136_vm0, %v12135_v1  ;;  %10398 = vmatpush3.msra.mxu0 %v13091_v49  ;;  %v1001_v45 = vld [vmem:[%s17026_s3 + $0x30] sm:$0xff] }
 0x1dc   :  { %v9875_v0 = vpop.f32.mrf.mxu0  ;;  %10399 = vmatprep.subr.mxu0 %v12135_v1 }
 0x1dd   :  { %10400 = vmatpush3.msra.mxu0 %v13098_v3  ;;  %v1985_v0 = vld [vmem:[%s17023_s0 + $0x238] sm:$0xff] }
 0x1de   :  { %v441_v51 = vpop.f32.mrf.mxu0  ;;  %10336 = vmatmul.mubr.f32.gmra.mxu0 %v1709_v48  ;;  %10459 = vmatprep.subr.mxu0 %v12135_v1 }
 0x1df   :  { %v13103_v4 = vadd.f32 %v12926_v14, %v441_v51  ;;  %10401 = vmatprep.mubr.msk.f32.mxu0 %vm12136_vm0, %v12135_v1 }
 0x1e0   :  { %v9878_v6 = vpop.f32.mrf.mxu0 }
 0x1e2   :  { %v446_v7 = vpop.f32.mrf.mxu0  ;;  %10402 = vmatmul.mubr.f32.vlgmr.msra.gmra.mxu0 %v1977_v5 }
 0x1e3   :  { %v13111_v52 = vadd.f32 %v12934_v57, %v446_v7  ;;  %10460 = vmatpush3.msra.mxu0 %v12939_v15  ;;  %10404 = vmatprep.mubr.msk.f32.mxu0 %vm12136_vm0, %v12135_v1 }
 0x1e4   :  { %v9881_v9 = vpop.f32.mrf.mxu0  ;;  %10461 = vmatprep.subr.mxu0 %v12135_v1 }
 0x1e5   :  { %10462 = vmatpush3.msra.mxu0 %v12850_v50 }
 0x1e6   :  { %v451_v54 = vpop.f32.mrf.mxu0  ;;  %10405 = vmatmul.mubr.f32.gmra.mxu0 %v1978_v8  ;;  %10463 = vmatprep.subr.mxu0 %v12135_v1  ;;  %v2253_v8 = vld [vmem:[%s17023_s0 + $0x240] sm:$0xff] }
 0x1e7   :  { %v13123_v10 = vadd.f32 %v12949_v59, %v451_v54  ;;  %10464 = vmatpush3.msra.mxu0 %v12955_v60  ;;  %10407 = vmatprep.mubr.msk.f32.mxu0 %vm12136_vm0, %v12135_v1 }
 0x1e8   :  { %v9884_v11 = vpop.f32.mrf.mxu0  ;;  %10465 = vmatprep.subr.mxu0 %v12135_v1 }
 0x1e9   :  { %10466 = vmatpush3.msra.mxu0 %v12967_v63 }
 0x1ea   :  { %v456_v12 = vpop.f32.mrf.mxu0  ;;  %10408 = vmatmul.mubr.f32.gmra.mxu0 %v1979_v47  ;;  %10467 = vmatprep.subr.mxu0 %v12135_v1 }
 0x1eb   :  { %v13135_v55 = vadd.f32 %v12970_v17, %v456_v12  ;;  %10468 = vmatpush3.msra.mxu0 %v12976_v18  ;;  %10410 = vmatprep.mubr.msk.f32.mxu0 %vm12136_vm0, %v12135_v1  ;;  %v2254_v12 = vld [vmem:[%s17023_s0 + $0x248] sm:$0xff] }
 0x1ec   :  { %v9887_v14 = vpop.f32.mrf.mxu0  ;;  %10469 = vmatprep.subr.mxu0 %v12135_v1 }
 0x1ed   :  { %10470 = vmatpush3.msra.mxu0 %v12988_v20 }
 0x1ee   :  { %v672_v53 = vpop.f32.mrf.mxu0  ;;  %10411 = vmatmul.mubr.f32.gmra.mxu0 %v1980_v13  ;;  %10471 = vmatprep.subr.mxu0 %v12135_v1 }
 0x1ef   :  { %v673_v57 = vadd.f32 %v13149_v56, %v672_v53  ;;  %10413 = vmatprep.mubr.msk.f32.mxu0 %vm12136_vm0, %v12135_v1  ;;  %10472 = vmatpush3.msra.mxu0 %v13000_v23 }
 0x1f0   :  { %v9953_v58 = vpop.f32.mrf.mxu0  ;;  %10473 = vmatprep.subr.mxu0 %v12135_v1 }
 0x1f1   :  { %v716_v59 = vmax.f32 %v673_v57, 0.0  ;;  %10474 = vmatpush3.msra.mxu0 %v13010_v26 }
 0x1f2   :  { %v677_v62 = vpop.f32.mrf.mxu0  ;;  %10414 = vmatmul.mubr.f32.gmra.mxu0 %v1981_v16  ;;  %10475 = vmatprep.subr.mxu0 %v12135_v1  ;;  %v2255_v16 = vld [vmem:[%s17023_s0 + $0x250] sm:$0xff] }
 0x1f3   :  { %v678_v17 = vadd.f32 %v13149_v56, %v677_v62  ;;  %9983 = vmatmul.mubr.msk.f32.vlgmr.msra.gmra.mxu1 %vm322_vm1, %v716_v59  ;;  %10416 = vmatprep.mubr.msk.f32.mxu0 %vm12136_vm0, %v12135_v1 }
 0x1f4   :  { %v9956_v19 = vpop.f32.mrf.mxu0  ;;  %10069 = vmatpush3.msra.mxu1 %v1002_v61  ;;  %10476 = vmatpush3.msra.mxu0 %v13022_v29 }
 0x1f5   :  { %v717_v21 = vmax.f32 %v678_v17, 0.0  ;;  %9985 = vmatprep.mubr.msk.f32.mxu1 %vm12136_vm0, %v12135_v1  ;;  %10477 = vmatprep.subr.mxu0 %v12135_v1  ;;  %v2256_v17 = vld [vmem:[%s17023_s0 + $0x258] sm:$0xff] }
 0x1f6   :  { %v682_v24 = vpop.f32.mrf.mxu0  ;;  %10417 = vmatmul.mubr.f32.gmra.mxu0 %v1982_v39  ;;  %10070 = vmatprep.subr.mxu1 %v12135_v1 }
 0x1f7   :  { %v683_v25 = vadd.f32 %v13149_v56, %v682_v24  ;;  %9986 = vmatmul.mubr.msk.f32.gmra.mxu1 %vm322_vm1, %v717_v21  ;;  %10478 = vmatpush3.msra.mxu0 %v13032_v32 }
 0x1f8   :  { %v9959_v30 = vpop.f32.mrf.mxu0  ;;  %10419 = vmatprep.mubr.msk.f32.mxu0 %vm12136_vm0, %v12135_v1  ;;  %10479 = vmatprep.subr.mxu0 %v12135_v1 }
 0x1f9   :  { %v718_v31 = vmax.f32 %v683_v25, 0.0  ;;  %9988 = vmatprep.mubr.msk.f32.mxu1 %vm12136_vm0, %v12135_v1  ;;  %10480 = vmatpush3.msra.mxu0 %v13047_v36  ;;  %v2257_v25 = vld [vmem:[%s17023_s0 + $0x260] sm:$0xff] }
 0x1fa   :  { %v687_v33 = vpop.f32.mrf.mxu0  ;;  %10420 = vmatmul.mubr.f32.gmra.mxu0 %v1983_v27  ;;  %10481 = vmatprep.subr.mxu0 %v12135_v1 }
 0x1fb   :  { %v688_v35 = vadd.f32 %v13149_v56, %v687_v33  ;;  %9989 = vmatmul.mubr.msk.f32.gmra.mxu1 %vm322_vm1, %v718_v31  ;;  %10482 = vmatpush3.msra.mxu0 %v13054_v38  ;;  %v1278_v31 = vld [vmem:[%s17026_s3 + $0x48] sm:$0xff] }
 0x1fc   :  { %v9962_v40 = vpop.f32.mrf.mxu0  ;;  %10422 = vmatprep.mubr.msk.f32.mxu0 %vm12136_vm0, %v12135_v1  ;;  %10483 = vmatprep.subr.mxu0 %v12135_v1 }
 0x1fd   :  { %v719_v2 = vmax.f32 %v688_v35, 0.0  ;;  %9991 = vmatprep.mubr.msk.f32.mxu1 %vm12136_vm0, %v12135_v1  ;;  %10484 = vmatpush3.msra.mxu0 %v13069_v42 }
 0x1fe   :  { %v692_v43 = vpop.f32.mrf.mxu0  ;;  %10423 = vmatmul.mubr.f32.gmra.mxu0 %v1984_v37  ;;  %10485 = vmatprep.subr.mxu0 %v12135_v1  ;;  %v2258_v37 = vld [vmem:[%s17023_s0 + $0x268] sm:$0xff] }
 0x1ff   :  { %v693_v48 = vadd.f32 %v13149_v56, %v692_v43  ;;  %9992 = vmatmul.mubr.msk.f32.gmra.mxu1 %vm322_vm1, %v719_v2  ;;  %10425 = vmatprep.mubr.msk.f32.mxu0 %vm12136_vm0, %v12135_v1 }
 0x200   :  { %v9965_v51 = vpop.f32.mrf.mxu0  ;;  %10486 = vmatpush3.msra.mxu0 %v13076_v44  ;;  %9994 = vmatprep.mubr.msk.f32.mxu1 %vm12136_vm0, %v12135_v1 }
 0x201   :  { %v720_v5 = vmax.f32 %v693_v48, 0.0  ;;  %10487 = vmatprep.subr.mxu0 %v12135_v1  ;;  %10071 = vmatpush3.msra.mxu1 %v1001_v45  ;;  %v2259_v48 = vld [vmem:[%s17023_s0 + $0x270] sm:$0xff] }
 0x202   :  { %v697_v6 = vpop.f32.mrf.mxu0  ;;  %10426 = vmatmul.mubr.f32.gmra.mxu0 %v1985_v0  ;;  %10158 = vmatprep.subr.mxu1 %v12135_v1 }
 0x203   :  { %v698_v7 = vadd.f32 %v13149_v56, %v697_v6  ;;  %9995 = vmatmul.mubr.msk.f32.gmra.mxu1 %vm322_vm1, %v720_v5  ;;  %10488 = vmatpush3.msra.mxu0 %v13091_v49 }
 0x204   :  { %v9968_v9 = vpop.f32.mrf.mxu0  ;;  %10489 = vmatprep.subr.mxu0 %v12135_v1  ;;  %10491 = vmatprep.mubr.msk.f32.mxu0 %vm12136_vm0, %v12135_v1 }
 0x205   :  { %v721_v54 = vmax.f32 %v698_v7, 0.0  ;;  %10490 = vmatpush3.msra.mxu0 %v13098_v3  ;;  %9997 = vmatprep.mubr.msk.f32.mxu1 %vm12136_vm0, %v12135_v1  ;;  %v2260_v7 = vld [vmem:[%s17023_s0 + $0x278] sm:$0xff] }
 0x206   :  { %v702_v47 = vpop.f32.mrf.mxu0  ;;  %10492 = vmatmul.mubr.f32.vlgmr.msra.gmra.mxu0 %v2253_v8  ;;  %10549 = vmatprep.subr.mxu0 %v12135_v1 }
 0x207   :  { %v703_v11 = vadd.f32 %v13149_v56, %v702_v47  ;;  %9998 = vmatmul.mubr.msk.f32.gmra.mxu1 %vm322_vm1, %v721_v54  ;;  %10550 = vmatpush3.msra.mxu0 %v12939_v15 }
 0x208   :  { %v9971_v13 = vpop.f32.mrf.mxu0  ;;  %10494 = vmatprep.mubr.msk.f32.mxu0 %vm12136_vm0, %v12135_v1  ;;  %10551 = vmatprep.subr.mxu0 %v12135_v1 }
 0x209   :  { %v722_v14 = vmax.f32 %v703_v11, 0.0  ;;  %10000 = vmatprep.mubr.msk.f32.mxu1 %vm12136_vm0, %v12135_v1  ;;  %10552 = vmatpush3.msra.mxu0 %v12850_v50  ;;  %v2261_v11 = vld [vmem:[%s17023_s0 + $0x280] sm:$0xff] }
 0x20a   :  { %v707_v53 = vpop.f32.mrf.mxu0  ;;  %10495 = vmatmul.mubr.f32.gmra.mxu0 %v2254_v12  ;;  %10553 = vmatprep.subr.mxu0 %v12135_v1 }
 0x20b   :  { %v708_v57 = vadd.f32 %v13149_v56, %v707_v53  ;;  %10001 = vmatmul.mubr.msk.f32.gmra.mxu1 %vm322_vm1, %v722_v14  ;;  %10554 = vmatpush3.msra.mxu0 %v12955_v60 }
 0x20c   :  { %v9974_v58 = vpop.f32.mrf.mxu0  ;;  %10497 = vmatprep.mubr.msk.f32.mxu0 %vm12136_vm0, %v12135_v1  ;;  %10555 = vmatprep.subr.mxu0 %v12135_v1 }
 0x20d   :  { %v723_v59 = vmax.f32 %v708_v57, 0.0  ;;  %10003 = vmatprep.mubr.msk.f32.mxu1 %vm12136_vm0, %v12135_v1  ;;  %10556 = vmatpush3.msra.mxu0 %v12967_v63  ;;  %v1277_v57 = vld [vmem:[%s17026_s3 + $0x40] sm:$0xff] }
 0x20e   :  { %v712_v61 = vpop.f32.mrf.mxu0  ;;  %10498 = vmatmul.mubr.f32.gmra.mxu0 %v2255_v16  ;;  %10557 = vmatprep.subr.mxu0 %v12135_v1  ;;  %v2529_v16 = vld [vmem:[%s17023_s0 + $0x288] sm:$0xff] }
 0x20f   :  { %v713_v62 = vadd.f32 %v13149_v56, %v712_v61  ;;  %10004 = vmatmul.mubr.msk.f32.gmra.mxu1 %vm322_vm1, %v723_v59  ;;  %10558 = vmatpush3.msra.mxu0 %v12976_v18 }
 0x210   :  { %v9977_v39 = vpop.f32.mrf.mxu0  ;;  %10500 = vmatprep.mubr.msk.f32.mxu0 %vm12136_vm0, %v12135_v1  ;;  %10006 = vmatprep.mubr.msk.f32.mxu1 %vm12136_vm0, %v12135_v1 }
 0x211   :  { %v724_v19 = vmax.f32 %v713_v62, 0.0  ;;  %10559 = vmatprep.subr.mxu0 %v12135_v1 }
 0x212   :  { %v948_v21 = vpop.f32.mrf.mxu0  ;;  %10501 = vmatmul.mubr.f32.gmra.mxu0 %v2256_v17  ;;  %v2530_v17 = vld [vmem:[%s17023_s0 + $0x290] sm:$0xff] }
 0x213   :  { %v949_v24 = vadd.f32 %v13149_v56, %v948_v21  ;;  %10007 = vmatmul.mubr.msk.f32.gmra.mxu1 %vm322_vm1, %v724_v19  ;;  %10560 = vmatpush3.msra.mxu0 %v12988_v20 }
 0x214   :  { %v10043_v27 = vpop.f32.mrf.mxu0  ;;  %10561 = vmatprep.subr.mxu0 %v12135_v1  ;;  %10503 = vmatprep.mubr.msk.f32.mxu0 %vm12136_vm0, %v12135_v1 }
 0x215   :  { %v992_v30 = vmax.f32 %v949_v24, 0.0  ;;  %10562 = vmatpush3.msra.mxu0 %v13000_v23  ;;  %10072 = vmatprep.mubr.msk.f32.mxu1 %vm12136_vm0, %v12135_v1 }
 0x216   :  { %v953_v33 = vpop.f32.mrf.mxu0  ;;  %10504 = vmatmul.mubr.f32.gmra.mxu0 %v2257_v25  ;;  %10563 = vmatprep.subr.mxu0 %v12135_v1  ;;  %v2531_v25 = vld [vmem:[%s17023_s0 + $0x298] sm:$0xff] }
 0x217   :  { %v954_v35 = vadd.f32 %v13149_v56, %v953_v33  ;;  %10073 = vmatmul.mubr.msk.f32.vlgmr.msra.gmra.mxu1 %vm322_vm1, %v992_v30  ;;  %10564 = vmatpush3.msra.mxu0 %v13010_v26 }
 0x218   :  { %v10046_v40 = vpop.f32.mrf.mxu0  ;;  %10159 = vmatpush3.msra.mxu1 %v1278_v31  ;;  %10565 = vmatprep.subr.mxu0 %v12135_v1 }
 0x219   :  { %v993_v2 = vmax.f32 %v954_v35, 0.0  ;;  %10506 = vmatprep.mubr.msk.f32.mxu0 %vm12136_vm0, %v12135_v1  ;;  %10566 = vmatpush3.msra.mxu0 %v13022_v29  ;;  %v2532_v35 = vld [vmem:[%s17023_s0 + $0x2a0] sm:$0xff] }
 0x21a   :  { %v958_v43 = vpop.f32.mrf.mxu0  ;;  %10075 = vmatprep.mubr.msk.f32.mxu1 %vm12136_vm0, %v12135_v1  ;;  %10507 = vmatmul.mubr.f32.gmra.mxu0 %v2258_v37 }
 0x21b   :  { %v959_v45 = vadd.f32 %v13149_v56, %v958_v43  ;;  %10076 = vmatmul.mubr.msk.f32.gmra.mxu1 %vm322_vm1, %v993_v2  ;;  %10567 = vmatprep.subr.mxu0 %v12135_v1 }
 0x21c   :  { %v10049_v0 = vpop.f32.mrf.mxu0  ;;  %10568 = vmatpush3.msra.mxu0 %v13032_v32  ;;  %10509 = vmatprep.mubr.msk.f32.mxu0 %vm12136_vm0, %v12135_v1 }
 0x21d   :  { %v994_v51 = vmax.f32 %v959_v45, 0.0  ;;  %10569 = vmatprep.subr.mxu0 %v12135_v1  ;;  %10078 = vmatprep.mubr.msk.f32.mxu1 %vm12136_vm0, %v12135_v1  ;;  %v2533_v45 = vld [vmem:[%s17023_s0 + $0x2a8] sm:$0xff] }
 0x21e   :  { %v963_v5 = vpop.f32.mrf.mxu0  ;;  %10510 = vmatmul.mubr.f32.gmra.mxu0 %v2259_v48  ;;  %10160 = vmatprep.subr.mxu1 %v12135_v1 }
 0x21f   :  { %v964_v6 = vadd.f32 %v13149_v56, %v963_v5  ;;  %10570 = vmatpush3.msra.mxu0 %v13047_v36  ;;  %10079 = vmatmul.mubr.msk.f32.gmra.mxu1 %vm322_vm1, %v994_v51  ;;  %v1554_v51 = vld [vmem:[%s17026_s3 + $0x58] sm:$0xff] }
 0x220   :  { %10571 = vmatprep.subr.mxu0 %v12135_v1  ;;  %v10052_v8 = vpop.f32.mrf.mxu0  ;;  %10512 = vmatprep.mubr.msk.f32.mxu0 %vm12136_vm0, %v12135_v1 }
 0x221   :  { %v995_v9 = vmax.f32 %v964_v6, 0.0  ;;  %10572 = vmatpush3.msra.mxu0 %v13054_v38  ;;  %10081 = vmatprep.mubr.msk.f32.mxu1 %vm12136_vm0, %v12135_v1 }
 0x222   :  { %10573 = vmatprep.subr.mxu0 %v12135_v1  ;;  %v968_v54 = vpop.f32.mrf.mxu0  ;;  %10513 = vmatmul.mubr.f32.gmra.mxu0 %v2260_v7  ;;  %v2534_v7 = vld [vmem:[%s17023_s0 + $0x2b0] sm:$0xff] }
 0x223   :  { %v969_v47 = vadd.f32 %v13149_v56, %v968_v54  ;;  %10574 = vmatpush3.msra.mxu0 %v13069_v42  ;;  %10082 = vmatmul.mubr.msk.f32.gmra.mxu1 %vm322_vm1, %v995_v9 }
 0x224   :  { %v10055_v12 = vpop.f32.mrf.mxu0  ;;  %10575 = vmatprep.subr.mxu0 %v12135_v1  ;;  %10515 = vmatprep.mubr.msk.f32.mxu0 %vm12136_vm0, %v12135_v1 }
 0x225   :  { %v996_v13 = vmax.f32 %v969_v47, 0.0  ;;  %10576 = vmatpush3.msra.mxu0 %v13076_v44  ;;  %10084 = vmatprep.mubr.msk.f32.mxu1 %vm12136_vm0, %v12135_v1 }
 0x226   :  { %v973_v14 = vpop.f32.mrf.mxu0  ;;  %10516 = vmatmul.mubr.f32.gmra.mxu0 %v2261_v11  ;;  %10577 = vmatprep.subr.mxu0 %v12135_v1  ;;  %v2535_v11 = vld [vmem:[%s17023_s0 + $0x2b8] sm:$0xff] }
 0x227   :  { %v974_v53 = vadd.f32 %v13149_v56, %v973_v14  ;;  %10085 = vmatmul.mubr.msk.f32.gmra.mxu1 %vm322_vm1, %v996_v13  ;;  %10578 = vmatpush3.msra.mxu0 %v13091_v49 }
 0x228   :  { %v10058_v58 = vpop.f32.mrf.mxu0  ;;  %10579 = vmatprep.subr.mxu0 %v12135_v1  ;;  %10581 = vmatprep.mubr.msk.f32.mxu0 %vm12136_vm0, %v12135_v1 }
 0x229   :  { %v997_v59 = vmax.f32 %v974_v53, 0.0  ;;  %10580 = vmatpush3.msra.mxu0 %v13098_v3  ;;  %10087 = vmatprep.mubr.msk.f32.mxu1 %vm12136_vm0, %v12135_v1 }
 0x22a   :  { %v978_v61 = vpop.f32.mrf.mxu0  ;;  %10161 = vmatpush3.msra.mxu1 %v1277_v57  ;;  %10582 = vmatmul.mubr.f32.vlgmr.msra.gmra.mxu0 %v2529_v16  ;;  %v2536_v57 = vld [vmem:[%s17023_s0 + $0x2c0] sm:$0xff] }
 0x22b   :  { %v979_v62 = vadd.f32 %v13149_v56, %v978_v61  ;;  %10639 = vmatprep.subr.mxu0 %v12135_v1  ;;  %10088 = vmatmul.mubr.msk.f32.gmra.mxu1 %vm322_vm1, %v997_v59 }
 0x22c   :  { %10640 = vmatpush3.msra.mxu0 %v12939_v15  ;;  %v10061_v39 = vpop.f32.mrf.mxu0  ;;  %10584 = vmatprep.mubr.msk.f32.mxu0 %vm12136_vm0, %v12135_v1 }
 0x22d   :  { %v998_v19 = vmax.f32 %v979_v62, 0.0  ;;  %10641 = vmatprep.subr.mxu0 %v12135_v1  ;;  %10090 = vmatprep.mubr.msk.f32.mxu1 %vm12136_vm0, %v12135_v1  ;;  %v2537_v62 = vld [vmem:[%s17023_s0 + $0x2c8] sm:$0xff] }
 0x22e   :  { %v983_v21 = vpop.f32.mrf.mxu0  ;;  %10585 = vmatmul.mubr.f32.gmra.mxu0 %v2530_v17  ;;  %10248 = vmatprep.subr.mxu1 %v12135_v1 }
 0x22f   :  { %v984_v24 = vadd.f32 %v13149_v56, %v983_v21  ;;  %10642 = vmatpush3.msra.mxu0 %v12850_v50  ;;  %10091 = vmatmul.mubr.msk.f32.gmra.mxu1 %vm322_vm1, %v998_v19 }
 0x230   :  { %10643 = vmatprep.subr.mxu0 %v12135_v1  ;;  %v10064_v27 = vpop.f32.mrf.mxu0  ;;  %10587 = vmatprep.mubr.msk.f32.mxu0 %vm12136_vm0, %v12135_v1 }
 0x231   :  { %v999_v30 = vmax.f32 %v984_v24, 0.0  ;;  %10644 = vmatpush3.msra.mxu0 %v12955_v60  ;;  %10093 = vmatprep.mubr.msk.f32.mxu1 %vm12136_vm0, %v12135_v1  ;;  %v1553_v24 = vld [vmem:[%s17026_s3 + $0x50] sm:$0xff] }
 0x232   :  { %10645 = vmatprep.subr.mxu0 %v12135_v1  ;;  %v988_v31 = vpop.f32.mrf.mxu0  ;;  %10588 = vmatmul.mubr.f32.gmra.mxu0 %v2531_v25  ;;  %v2805_v25 = vld [vmem:[%s17023_s0 + $0x2d0] sm:$0xff] }
 0x233   :  { %v989_v33 = vadd.f32 %v13149_v56, %v988_v31  ;;  %10646 = vmatpush3.msra.mxu0 %v12967_v63  ;;  %10094 = vmatmul.mubr.msk.f32.gmra.mxu1 %vm322_vm1, %v999_v30 }
 0x234   :  { %10647 = vmatprep.subr.mxu0 %v12135_v1  ;;  %v10067_v37 = vpop.f32.mrf.mxu0  ;;  %10590 = vmatprep.mubr.msk.f32.mxu0 %vm12136_vm0, %v12135_v1 }
 0x235   :  { %v1000_v40 = vmax.f32 %v989_v33, 0.0  ;;  %10648 = vmatpush3.msra.mxu0 %v12976_v18  ;;  %10096 = vmatprep.mubr.msk.f32.mxu1 %vm12136_vm0, %v12135_v1 }
 0x236   :  { %v1224_v2 = vpop.f32.mrf.mxu0  ;;  %10591 = vmatmul.mubr.f32.gmra.mxu0 %v2532_v35  ;;  %10649 = vmatprep.subr.mxu0 %v12135_v1  ;;  %v2806_v35 = vld [vmem:[%s17023_s0 + $0x2d8] sm:$0xff] }
 0x237   :  { %v1225_v43 = vadd.f32 %v13149_v56, %v1224_v2  ;;  %10097 = vmatmul.mubr.msk.f32.gmra.mxu1 %vm322_vm1, %v1000_v40  ;;  %10650 = vmatpush3.msra.mxu0 %v12988_v20 }
 0x238   :  { %v10133_v48 = vpop.f32.mrf.mxu0  ;;  %10651 = vmatprep.subr.mxu0 %v12135_v1  ;;  %10593 = vmatprep.mubr.msk.f32.mxu0 %vm12136_vm0, %v12135_v1 }
 0x239   :  { %v1268_v0 = vmax.f32 %v1225_v43, 0.0  ;;  %10652 = vmatpush3.msra.mxu0 %v13000_v23  ;;  %10162 = vmatprep.mubr.msk.f32.mxu1 %vm12136_vm0, %v12135_v1 }
 0x23a   :  { %v1229_v5 = vpop.f32.mrf.mxu0  ;;  %10594 = vmatmul.mubr.f32.gmra.mxu0 %v2533_v45  ;;  %10653 = vmatprep.subr.mxu0 %v12135_v1 }
 0x23b   :  { %v1230_v6 = vadd.f32 %v13149_v56, %v1229_v5  ;;  %10163 = vmatmul.mubr.msk.f32.vlgmr.msra.gmra.mxu1 %vm322_vm1, %v1268_v0  ;;  %10654 = vmatpush3.msra.mxu0 %v13010_v26 }
 0x23c   :  { %v10136_v8 = vpop.f32.mrf.mxu0  ;;  %10249 = vmatpush3.msra.mxu1 %v1554_v51  ;;  %10655 = vmatprep.subr.mxu0 %v12135_v1  ;;  %v2808_v51 = vld [vmem:[%s17023_s0 + $0x2e8] sm:$0xff] }
 0x23d   :  { %v1269_v9 = vmax.f32 %v1230_v6, 0.0  ;;  %10596 = vmatprep.mubr.msk.f32.mxu0 %vm12136_vm0, %v12135_v1  ;;  %10656 = vmatpush3.msra.mxu0 %v13022_v29 }
 0x23e   :  { %v1234_v54 = vpop.f32.mrf.mxu0  ;;  %10165 = vmatprep.mubr.msk.f32.mxu1 %vm12136_vm0, %v12135_v1  ;;  %10597 = vmatmul.mubr.f32.gmra.mxu0 %v2534_v7  ;;  %v2809_v7 = vld [vmem:[%s17023_s0 + $0x2f0] sm:$0xff] }
 0x23f   :  { %v1235_v47 = vadd.f32 %v13149_v56, %v1234_v54  ;;  %10166 = vmatmul.mubr.msk.f32.gmra.mxu1 %vm322_vm1, %v1269_v9  ;;  %10657 = vmatprep.subr.mxu0 %v12135_v1 }
 0x240   :  { %v10139_v12 = vpop.f32.mrf.mxu0  ;;  %10658 = vmatpush3.msra.mxu0 %v13032_v32  ;;  %10599 = vmatprep.mubr.msk.f32.mxu0 %vm12136_vm0, %v12135_v1 }
 0x241   :  { %v1270_v13 = vmax.f32 %v1235_v47, 0.0  ;;  %10659 = vmatprep.subr.mxu0 %v12135_v1  ;;  %10168 = vmatprep.mubr.msk.f32.mxu1 %vm12136_vm0, %v12135_v1 }
 0x242   :  { %v1239_v14 = vpop.f32.mrf.mxu0  ;;  %10600 = vmatmul.mubr.f32.gmra.mxu0 %v2535_v11  ;;  %10250 = vmatprep.subr.mxu1 %v12135_v1 }
 0x243   :  { %v1240_v53 = vadd.f32 %v13149_v56, %v1239_v14  ;;  %10660 = vmatpush3.msra.mxu0 %v13047_v36  ;;  %10169 = vmatmul.mubr.msk.f32.gmra.mxu1 %vm322_vm1, %v1270_v13  ;;  %v2811_v13 = vld [vmem:[%s17023_s0 + $0x300] sm:$0xff] }
 0x244   :  { %10661 = vmatprep.subr.mxu0 %v12135_v1  ;;  %v10142_v16 = vpop.f32.mrf.mxu0  ;;  %10602 = vmatprep.mubr.msk.f32.mxu0 %vm12136_vm0, %v12135_v1 }
 0x245   :  { %v1271_v58 = vmax.f32 %v1240_v53, 0.0  ;;  %10662 = vmatpush3.msra.mxu0 %v13054_v38  ;;  %10171 = vmatprep.mubr.msk.f32.mxu1 %vm12136_vm0, %v12135_v1 }
 0x246   :  { %10663 = vmatprep.subr.mxu0 %v12135_v1  ;;  %v1244_v59 = vpop.f32.mrf.mxu0  ;;  %10603 = vmatmul.mubr.f32.gmra.mxu0 %v2536_v57 }
 0x247   :  { %v1245_v61 = vadd.f32 %v13149_v56, %v1244_v59  ;;  %10664 = vmatpush3.msra.mxu0 %v13069_v42  ;;  %10172 = vmatmul.mubr.msk.f32.gmra.mxu1 %vm322_vm1, %v1271_v58 }
 0x248   :  { %v10145_v17 = vpop.f32.mrf.mxu0  ;;  %10665 = vmatprep.subr.mxu0 %v12135_v1  ;;  %10605 = vmatprep.mubr.msk.f32.mxu0 %vm12136_vm0, %v12135_v1 }
 0x249   :  { %v1272_v39 = vmax.f32 %v1245_v61, 0.0  ;;  %10666 = vmatpush3.msra.mxu0 %v13076_v44  ;;  %10174 = vmatprep.mubr.msk.f32.mxu1 %vm12136_vm0, %v12135_v1  ;;  %v2813_v61 = vld [vmem:[%s17023_s0 + $0x310] sm:$0xff] }
 0x24a   :  { %v1249_v19 = vpop.f32.mrf.mxu0  ;;  %10606 = vmatmul.mubr.f32.gmra.mxu0 %v2537_v62  ;;  %10667 = vmatprep.subr.mxu0 %v12135_v1 }
 0x24b   :  { %v1250_v21 = vadd.f32 %v13149_v56, %v1249_v19  ;;  %10175 = vmatmul.mubr.msk.f32.gmra.mxu1 %vm322_vm1, %v1272_v39  ;;  %10668 = vmatpush3.msra.mxu0 %v13091_v49  ;;  %v1829_v39 = vld [vmem:[%s17026_s3 + $0x60] sm:$0xff] }
 0x24c   :  { %v10148_v27 = vpop.f32.mrf.mxu0  ;;  %10669 = vmatprep.subr.mxu0 %v12135_v1  ;;  %10671 = vmatprep.mubr.msk.f32.mxu0 %vm12136_vm0, %v12135_v1 }
 0x24d   :  { %v1273_v30 = vmax.f32 %v1250_v21, 0.0  ;;  %10670 = vmatpush3.msra.mxu0 %v13098_v3  ;;  %10177 = vmatprep.mubr.msk.f32.mxu1 %vm12136_vm0, %v12135_v1 }
 0x24e   :  { %v1254_v31 = vpop.f32.mrf.mxu0  ;;  %10251 = vmatpush3.msra.mxu1 %v1553_v24  ;;  %10672 = vmatmul.mubr.f32.vlgmr.msra.gmra.mxu0 %v2805_v25  ;;  %v3082_v25 = vld [vmem:[%s17023_s0 + $0x320] sm:$0xff] }
 0x24f   :  { %v1255_v33 = vadd.f32 %v13149_v56, %v1254_v31  ;;  %10729 = vmatprep.subr.mxu0 %v12135_v1  ;;  %10178 = vmatmul.mubr.msk.f32.gmra.mxu1 %vm322_vm1, %v1273_v30 }
 0x250   :  { %10730 = vmatpush3.msra.mxu0 %v12939_v15  ;;  %v10151_v37 = vpop.f32.mrf.mxu0  ;;  %10674 = vmatprep.mubr.msk.f32.mxu0 %vm12136_vm0, %v12135_v1  ;;  %v2807_v15 = vld [vmem:[%s17023_s0 + $0x2e0] sm:$0xff] }
 0x251   :  { %v1274_v40 = vmax.f32 %v1255_v33, 0.0  ;;  %10731 = vmatprep.subr.mxu0 %v12135_v1  ;;  %10180 = vmatprep.mubr.msk.f32.mxu1 %vm12136_vm0, %v12135_v1  ;;  %v3083_v37 = vld [vmem:[%s17023_s0 + $0x328] sm:$0xff] }
 0x252   :  { %v1259_v2 = vpop.f32.mrf.mxu0  ;;  %10675 = vmatmul.mubr.f32.gmra.mxu0 %v2806_v35  ;;  %10338 = vmatprep.subr.mxu1 %v12135_v1  ;;  %v13613_v35 = vld [vmem:[%s17024_s1 + $0x70] sm:$0xff] }
 0x253   :  { %v1260_v43 = vadd.f32 %v13149_v56, %v1259_v2  ;;  %10732 = vmatpush3.msra.mxu0 %v12850_v50  ;;  %10181 = vmatmul.mubr.msk.f32.gmra.mxu1 %vm322_vm1, %v1274_v40 }
 0x254   :  { %10733 = vmatprep.subr.mxu0 %v12135_v1  ;;  %v10154_v45 = vpop.f32.mrf.mxu0  ;;  %10677 = vmatprep.mubr.msk.f32.mxu0 %vm12136_vm0, %v12135_v1 }
 0x255   :  { %v1275_v48 = vmax.f32 %v1260_v43, 0.0  ;;  %10734 = vmatpush3.msra.mxu0 %v12955_v60  ;;  %10183 = vmatprep.mubr.msk.f32.mxu1 %vm12136_vm0, %v12135_v1  ;;  %v13626_v43 = vld [vmem:[%s17024_s1 + $0x68] sm:$0xff] }
 0x256   :  { %10735 = vmatprep.subr.mxu0 %v12135_v1  ;;  %v1264_v50 = vpop.f32.mrf.mxu0  ;;  %10678 = vmatmul.mubr.f32.gmra.mxu0 %v2807_v15 }
 0x257   :  { %v1265_v0 = vadd.f32 %v13149_v56, %v1264_v50  ;;  %10736 = vmatpush3.msra.mxu0 %v12967_v63  ;;  %10184 = vmatmul.mubr.msk.f32.gmra.mxu1 %vm322_vm1, %v1275_v48  ;;  %v13636_v48 = vld [vmem:[%s17024_s1 + $0x60] sm:$0xff]  ;;  %v3084_v50 = vld [vmem:[%s17023_s0 + $0x330] sm:$0xff] }
 0x258   :  { %10737 = vmatprep.subr.mxu0 %v12135_v1  ;;  %v10157_v60 = vpop.f32.mrf.mxu0  ;;  %10680 = vmatprep.mubr.msk.f32.mxu0 %vm12136_vm0, %v12135_v1 }
 0x259   :  { %v1276_v5 = vmax.f32 %v1265_v0, 0.0  ;;  %10738 = vmatpush3.msra.mxu0 %v12976_v18  ;;  %10186 = vmatprep.mubr.msk.f32.mxu1 %vm12136_vm0, %v12135_v1  ;;  %v13649_v60 = vld [vmem:[%s17024_s1 + $0x58] sm:$0xff] }
 0x25a   :  { %v1500_v6 = vpop.f32.mrf.mxu0  ;;  %10681 = vmatmul.mubr.f32.gmra.mxu0 %v2808_v51  ;;  %10739 = vmatprep.subr.mxu0 %v12135_v1 }
 0x25b   :  { %v1501_v63 = vadd.f32 %v13149_v56, %v1500_v6  ;;  %10187 = vmatmul.mubr.msk.f32.gmra.mxu1 %vm322_vm1, %v1276_v5  ;;  %10740 = vmatpush3.msra.mxu0 %v12988_v20  ;;  %v1830_v20 = vld [vmem:[%s17026_s3 + $0x68] sm:$0xff] }
 0x25c   :  { %v10223_v8 = vpop.f32.mrf.mxu0  ;;  %10741 = vmatprep.subr.mxu0 %v12135_v1  ;;  %10683 = vmatprep.mubr.msk.f32.mxu0 %vm12136_vm0, %v12135_v1 }
 0x25d   :  { %v1544_v18 = vmax.f32 %v1501_v63, 0.0  ;;  %10742 = vmatpush3.msra.mxu0 %v13000_v23  ;;  %10252 = vmatprep.mubr.msk.f32.mxu1 %vm12136_vm0, %v12135_v1  ;;  %v2810_v23 = vld [vmem:[%s17023_s0 + $0x2f8] sm:$0xff]  ;;  %v13660_v63 = vld [vmem:[%s17024_s1 + $0x50] sm:$0xff] }
 0x25e   :  { %v1505_v9 = vpop.f32.mrf.mxu0  ;;  %10684 = vmatmul.mubr.f32.gmra.mxu0 %v2809_v7  ;;  %10743 = vmatprep.subr.mxu0 %v12135_v1  ;;  %v3085_v7 = vld [vmem:[%s17023_s0 + $0x338] sm:$0xff] }
 0x25f   :  { %v1506_v54 = vadd.f32 %v13149_v56, %v1505_v9  ;;  %10253 = vmatmul.mubr.msk.f32.vlgmr.msra.gmra.mxu1 %vm322_vm1, %v1544_v18  ;;  %10744 = vmatpush3.msra.mxu0 %v13010_v26  ;;  %v2106_v9 = vld [vmem:[%s17026_s3 + $0x78] sm:$0xff] }
 0x260   :  { %v10226_v47 = vpop.f32.mrf.mxu0  ;;  %10339 = vmatpush3.msra.mxu1 %v1830_v20  ;;  %10745 = vmatprep.subr.mxu0 %v12135_v1  ;;  %v13672_v20 = vld [vmem:[%s17024_s1 + $0x48] sm:$0xff] }
 0x261   :  { %v1545_v11 = vmax.f32 %v1506_v54, 0.0  ;;  %10686 = vmatprep.mubr.msk.f32.mxu0 %vm12136_vm0, %v12135_v1  ;;  %10746 = vmatpush3.msra.mxu0 %v13022_v29  ;;  %v13686_v47 = vld [vmem:[%s17024_s1 + $0x40] sm:$0xff] }
 0x262   :  { %v1510_v12 = vpop.f32.mrf.mxu0  ;;  %10255 = vmatprep.mubr.msk.f32.mxu1 %vm12136_vm0, %v12135_v1  ;;  %10687 = vmatmul.mubr.f32.gmra.mxu0 %v2810_v23 }
 0x263   :  { %v1511_v26 = vadd.f32 %v13149_v56, %v1510_v12  ;;  %10256 = vmatmul.mubr.msk.f32.gmra.mxu1 %vm322_vm1, %v1545_v11  ;;  %10747 = vmatprep.subr.mxu0 %v12135_v1  ;;  %v3086_v11 = vld [vmem:[%s17023_s0 + $0x340] sm:$0xff] }
 0x264   :  { %v10229_v14 = vpop.f32.mrf.mxu0  ;;  %10748 = vmatpush3.msra.mxu0 %v13032_v32  ;;  %10689 = vmatprep.mubr.msk.f32.mxu0 %vm12136_vm0, %v12135_v1  ;;  %v2812_v32 = vld [vmem:[%s17023_s0 + $0x308] sm:$0xff] }
 0x265   :  { %v1546_v29 = vmax.f32 %v1511_v26, 0.0  ;;  %10749 = vmatprep.subr.mxu0 %v12135_v1  ;;  %10258 = vmatprep.mubr.msk.f32.mxu1 %vm12136_vm0, %v12135_v1 }
 0x266   :  { %v1515_v53 = vpop.f32.mrf.mxu0  ;;  %10690 = vmatmul.mubr.f32.gmra.mxu0 %v2811_v13  ;;  %10340 = vmatprep.subr.mxu1 %v12135_v1  ;;  %v13698_v13 = vld [vmem:[%s17024_s1 + $0x38] sm:$0xff] }
 0x267   :  { %v1516_v57 = vadd.f32 %v13149_v56, %v1515_v53  ;;  %10750 = vmatpush3.msra.mxu0 %v13047_v36  ;;  %10259 = vmatmul.mubr.msk.f32.gmra.mxu1 %vm322_vm1, %v1546_v29  ;;  %v3087_v53 = vld [vmem:[%s17023_s0 + $0x348] sm:$0xff] }
 0x268   :  { %10751 = vmatprep.subr.mxu0 %v12135_v1  ;;  %v10232_v16 = vpop.f32.mrf.mxu0  ;;  %10692 = vmatprep.mubr.msk.f32.mxu0 %vm12136_vm0, %v12135_v1 }
 0x269   :  { %v1547_v58 = vmax.f32 %v1516_v57, 0.0  ;;  %10752 = vmatpush3.msra.mxu0 %v13054_v38  ;;  %10261 = vmatprep.mubr.msk.f32.mxu1 %vm12136_vm0, %v12135_v1 }
 0x26a   :  { %10753 = vmatprep.subr.mxu0 %v12135_v1  ;;  %v1520_v36 = vpop.f32.mrf.mxu0  ;;  %10693 = vmatmul.mubr.f32.gmra.mxu0 %v2812_v32  ;;  %v13712_v32 = vld [vmem:[%s17024_s1 + $0x30] sm:$0xff] }
 0x26b   :  { %v1521_v59 = vadd.f32 %v13149_v56, %v1520_v36  ;;  %10754 = vmatpush3.msra.mxu0 %v13069_v42  ;;  %10262 = vmatmul.mubr.msk.f32.gmra.mxu1 %vm322_vm1, %v1547_v58  ;;  %v13724_v58 = vld [vmem:[%s17025_s2] ss:$0 sm:$0xff] }
 0x26c   :  { %v10235_v62 = vpop.f32.mrf.mxu0  ;;  %10755 = vmatprep.subr.mxu0 %v12135_v1  ;;  %10695 = vmatprep.mubr.msk.f32.mxu0 %vm12136_vm0, %v12135_v1 }
 0x26d   :  { %v1548_v38 = vmax.f32 %v1521_v59, 0.0  ;;  %10756 = vmatpush3.msra.mxu0 %v13076_v44  ;;  %10264 = vmatprep.mubr.msk.f32.mxu1 %vm12136_vm0, %v12135_v1  ;;  %v3081_v44 = vld [vmem:[%s17023_s0 + $0x318] sm:$0xff]  ;;  %v13730_v59 = vld [vmem:[%s17024_s1 + $0x28] sm:$0xff] }
 0x26e   :  { %v1525_v17 = vpop.f32.mrf.mxu0  ;;  %10696 = vmatmul.mubr.f32.gmra.mxu0 %v2813_v61  ;;  %10757 = vmatprep.subr.mxu0 %v12135_v1  ;;  %v3088_v61 = vld [vmem:[%s17023_s0 + $0x350] sm:$0xff] }
 0x26f   :  { %v1526_v42 = vadd.f32 %v13149_v56, %v1525_v17  ;;  %10265 = vmatmul.mubr.msk.f32.gmra.mxu1 %vm322_vm1, %v1548_v38  ;;  %10758 = vmatpush3.msra.mxu0 %v13091_v49  ;;  %v13743_v17 = vld [vmem:[%s17024_s1 + $0x20] sm:$0xff] }
 0x270   :  { %v10238_v19 = vpop.f32.mrf.mxu0  ;;  %10759 = vmatprep.subr.mxu0 %v12135_v1  ;;  %10761 = vmatprep.mubr.msk.f32.mxu0 %vm12136_vm0, %v12135_v1 }
 0x271   :  { %v1549_v21 = vmax.f32 %v1526_v42, 0.0  ;;  %10760 = vmatpush3.msra.mxu0 %v13098_v3  ;;  %10267 = vmatprep.mubr.msk.f32.mxu1 %vm12136_vm0, %v12135_v1  ;;  %v13600_v3 = vld [vmem:[%s17024_s1 + $0x78] sm:$0xff] }
 0x272   :  { %v1530_v49 = vpop.f32.mrf.mxu0  ;;  %10341 = vmatpush3.msra.mxu1 %v1829_v39  ;;  %10762 = vmatmul.mubr.f32.vlgmr.msra.gmra.mxu0 %v3081_v44  ;;  %v13753_v44 = vld [vmem:[%s17024_s1 + $0x18] sm:$0xff] }
 0x273   :  { %v1531_v24 = vadd.f32 %v13149_v56, %v1530_v49  ;;  %10819 = vmatprep.subr.mxu0 %v12135_v1  ;;  %10268 = vmatmul.mubr.msk.f32.gmra.mxu1 %vm322_vm1, %v1549_v21  ;;  %v3089_v19 = vld [vmem:[%s17023_s0 + $0x358] sm:$0xff] }
 0x274   :  { %10820 = vmatpush3.msra.mxu0 %v13600_v3  ;;  %v10241_v27 = vpop.f32.mrf.mxu0  ;;  %10764 = vmatprep.mubr.msk.f32.mxu0 %vm12136_vm0, %v12135_v1 }
 0x275   :  { %v1550_v30 = vmax.f32 %v1531_v24, 0.0  ;;  %10821 = vmatprep.subr.mxu0 %v12135_v1  ;;  %10270 = vmatprep.mubr.msk.f32.mxu1 %vm12136_vm0, %v12135_v1  ;;  %v13766_v24 = vld [vmem:[%s17024_s1 + $0x10] sm:$0xff] }
 0x276   :  { %v1535_v31 = vpop.f32.mrf.mxu0  ;;  %10765 = vmatmul.mubr.f32.gmra.mxu0 %v3082_v25  ;;  %10428 = vmatprep.subr.mxu1 %v12135_v1 }
 0x277   :  { %v1536_v33 = vadd.f32 %v13149_v56, %v1535_v31  ;;  %10822 = vmatpush3.msra.mxu0 %v13613_v35  ;;  %10271 = vmatmul.mubr.msk.f32.gmra.mxu1 %vm322_vm1, %v1550_v30  ;;  %v13777_v30 = vld [vmem:[%s17024_s1 + $0x8] sm:$0xff]  ;;  %v2105_v31 = vld [vmem:[%s17026_s3 + $0x70] sm:$0xff] }
 0x278   :  { %10823 = vmatprep.subr.mxu0 %v12135_v1  ;;  %v10244_v40 = vpop.f32.mrf.mxu0  ;;  %10767 = vmatprep.mubr.msk.f32.mxu0 %vm12136_vm0, %v12135_v1 }
 0x279   :  { %v1551_v2 = vmax.f32 %v1536_v33, 0.0  ;;  %10824 = vmatpush3.msra.mxu0 %v13626_v43  ;;  %10273 = vmatprep.mubr.msk.f32.mxu1 %vm12136_vm0, %v12135_v1  ;;  %v3357_v33 = vld [vmem:[%s17023_s0 + $0x360] sm:$0xff] }
 0x27a   :  { %10825 = vmatprep.subr.mxu0 %v12135_v1  ;;  %v1540_v15 = vpop.f32.mrf.mxu0  ;;  %10768 = vmatmul.mubr.f32.gmra.mxu0 %v3083_v37 }
 0x27b   :  { %v1541_v45 = vadd.f32 %v13149_v56, %v1540_v15  ;;  %10826 = vmatpush3.msra.mxu0 %v13636_v48  ;;  %10274 = vmatmul.mubr.msk.f32.gmra.mxu1 %vm322_vm1, %v1551_v2  ;;  %v13792_v2 = vld [vmem:[%s17024_s1] sm:$0xff] }
 0x27c   :  { %10827 = vmatprep.subr.mxu0 %v12135_v1  ;;  %v10247_v0 = vpop.f32.mrf.mxu0  ;;  %10770 = vmatprep.mubr.msk.f32.mxu0 %vm12136_vm0, %v12135_v1 }
 0x27d   :  { %v1552_v51 = vmax.f32 %v1541_v45, 0.0  ;;  %10828 = vmatpush3.msra.mxu0 %v13649_v60  ;;  %10276 = vmatprep.mubr.msk.f32.mxu1 %vm12136_vm0, %v12135_v1 }
 0x27e   :  { %v1776_v5 = vpop.f32.mrf.mxu0  ;;  %10771 = vmatmul.mubr.f32.gmra.mxu0 %v3084_v50  ;;  %10829 = vmatprep.subr.mxu0 %v12135_v1  ;;  %v3358_v50 = vld [vmem:[%s17023_s0 + $0x368] sm:$0xff] }
 0x27f   :  { %v1777_v6 = vadd.f32 %v13149_v56, %v1776_v5  ;;  %10277 = vmatmul.mubr.msk.f32.gmra.mxu1 %vm322_vm1, %v1552_v51  ;;  %10830 = vmatpush3.msra.mxu0 %v13660_v63 }
 0x280   :  { %v10313_v8 = vpop.f32.mrf.mxu0  ;;  %10831 = vmatprep.subr.mxu0 %v12135_v1  ;;  %10773 = vmatprep.mubr.msk.f32.mxu0 %vm12136_vm0, %v12135_v1 }
 0x281   :  { %v1820_v18 = vmax.f32 %v1777_v6, 0.0  ;;  %10832 = vmatpush3.msra.mxu0 %v13672_v20  ;;  %10342 = vmatprep.mubr.msk.f32.mxu1 %vm12136_vm0, %v12135_v1 }
 0x282   :  { %v1781_v54 = vpop.f32.mrf.mxu0  ;;  %10774 = vmatmul.mubr.f32.gmra.mxu0 %v3085_v7  ;;  %10833 = vmatprep.subr.mxu0 %v12135_v1  ;;  %v3359_v7 = vld [vmem:[%s17023_s0 + $0x370] sm:$0xff] }
 0x283   :  { %v1782_v23 = vadd.f32 %v13149_v56, %v1781_v54  ;;  %10343 = vmatmul.mubr.msk.f32.vlgmr.msra.gmra.mxu1 %vm322_vm1, %v1820_v18  ;;  %10834 = vmatpush3.msra.mxu0 %v13686_v47 }
 0x284   :  { %v10316_v12 = vpop.f32.mrf.mxu0  ;;  %10429 = vmatpush3.msra.mxu1 %v2106_v9  ;;  %10835 = vmatprep.subr.mxu0 %v12135_v1 }
 0x285   :  { %v1821_v26 = vmax.f32 %v1782_v23, 0.0  ;;  %10776 = vmatprep.mubr.msk.f32.mxu0 %vm12136_vm0, %v12135_v1  ;;  %10836 = vmatpush3.msra.mxu0 %v13698_v13  ;;  %v3360_v23 = vld [vmem:[%s17023_s0 + $0x378] sm:$0xff] }
 0x286   :  { %v1786_v14 = vpop.f32.mrf.mxu0  ;;  %10345 = vmatprep.mubr.msk.f32.mxu1 %vm12136_vm0, %v12135_v1  ;;  %10777 = vmatmul.mubr.f32.gmra.mxu0 %v3086_v11 }
 0x287   :  { %v1787_v29 = vadd.f32 %v13149_v56, %v1786_v14  ;;  %10346 = vmatmul.mubr.msk.f32.gmra.mxu1 %vm322_vm1, %v1821_v26  ;;  %10837 = vmatprep.subr.mxu0 %v12135_v1 }
 0x288   :  { %v10319_v57 = vpop.f32.mrf.mxu0  ;;  %10838 = vmatpush3.msra.mxu0 %v13712_v32  ;;  %10779 = vmatprep.mubr.msk.f32.mxu0 %vm12136_vm0, %v12135_v1 }
 0x289   :  { %v1822_v56 = vmax.f32 %v1787_v29, 0.0  ;;  %10839 = vmatprep.subr.mxu0 %v12135_v1  ;;  %10348 = vmatprep.mubr.msk.f32.mxu1 %vm12136_vm0, %v12135_v1  ;;  %v3361_v29 = vld [vmem:[%s17023_s0 + $0x380] sm:$0xff] }
 0x28a   :  { %v1791_v16 = vpop.f32.mrf.mxu0  ;;  %10780 = vmatmul.mubr.f32.gmra.mxu0 %v3087_v53  ;;  %10430 = vmatprep.subr.mxu1 %v12135_v1 }
 0x28b   :  { %v1792_v36 = vadd.f32 %v13724_v58, %v1791_v16  ;;  %10840 = vmatpush3.msra.mxu0 %v13730_v59  ;;  %10349 = vmatmul.mubr.msk.f32.gmra.mxu1 %vm322_vm1, %v1822_v56  ;;  %v2382_v56 = vld [vmem:[%s17026_s3 + $0x88] sm:$0xff] }
 0x28c   :  { %10841 = vmatprep.subr.mxu0 %v12135_v1  ;;  %v10322_v62 = vpop.f32.mrf.mxu0  ;;  %10782 = vmatprep.mubr.msk.f32.mxu0 %vm12136_vm0, %v12135_v1 }
 0x28d   :  { %v1823_v38 = vmax.f32 %v1792_v36, 0.0  ;;  %10842 = vmatpush3.msra.mxu0 %v13743_v17  ;;  %10351 = vmatprep.mubr.msk.f32.mxu1 %vm12136_vm0, %v12135_v1 }
 0x28e   :  { %10843 = vmatprep.subr.mxu0 %v12135_v1  ;;  %v1796_v42 = vpop.f32.mrf.mxu0  ;;  %10783 = vmatmul.mubr.f32.gmra.mxu0 %v3088_v61  ;;  %v3362_v61 = vld [vmem:[%s17023_s0 + $0x388] sm:$0xff] }
 0x28f   :  { %v1797_v39 = vadd.f32 %v13724_v58, %v1796_v42  ;;  %10844 = vmatpush3.msra.mxu0 %v13753_v44  ;;  %10352 = vmatmul.mubr.msk.f32.gmra.mxu1 %vm322_vm1, %v1823_v38 }
 0x290   :  { %v10325_v21 = vpop.f32.mrf.mxu0  ;;  %10845 = vmatprep.subr.mxu0 %v12135_v1  ;;  %10785 = vmatprep.mubr.msk.f32.mxu0 %vm12136_vm0, %v12135_v1 }
 0x291   :  { %v1824_v49 = vmax.f32 %v1797_v39, 0.0  ;;  %10846 = vmatpush3.msra.mxu0 %v13766_v24  ;;  %10354 = vmatprep.mubr.msk.f32.mxu1 %vm12136_vm0, %v12135_v1 }
 0x292   :  { %v1801_v25 = vpop.f32.mrf.mxu0  ;;  %10786 = vmatmul.mubr.f32.gmra.mxu0 %v3089_v19  ;;  %10847 = vmatprep.subr.mxu0 %v12135_v1  ;;  %v3363_v19 = vld [vmem:[%s17023_s0 + $0x390] sm:$0xff] }
 0x293   :  { %v1802_v27 = vadd.f32 %v13724_v58, %v1801_v25  ;;  %10355 = vmatmul.mubr.msk.f32.gmra.mxu1 %vm322_vm1, %v1824_v49  ;;  %10848 = vmatpush3.msra.mxu0 %v13777_v30 }
 0x294   :  { %v10328_v37 = vpop.f32.mrf.mxu0  ;;  %10849 = vmatprep.subr.mxu0 %v12135_v1  ;;  %10851 = vmatprep.mubr.msk.f32.mxu0 %vm12136_vm0, %v12135_v1 }
 0x295   :  { %v1825_v40 = vmax.f32 %v1802_v27, 0.0  ;;  %10850 = vmatpush3.msra.mxu0 %v13792_v2  ;;  %10357 = vmatprep.mubr.msk.f32.mxu1 %vm12136_vm0, %v12135_v1 }
 0x296   :  { %v1806_v15 = vpop.f32.mrf.mxu0  ;;  %10431 = vmatpush3.msra.mxu1 %v2105_v31  ;;  %10852 = vmatmul.mubr.f32.vlgmr.msra.gmra.mxu0 %v3357_v33  ;;  %v3364_v31 = vld [vmem:[%s17023_s0 + $0x398] sm:$0xff] }
 0x297   :  { %v1807_v45 = vadd.f32 %v13724_v58, %v1806_v15  ;;  %10909 = vmatprep.subr.mxu0 %v12135_v1  ;;  %10358 = vmatmul.mubr.msk.f32.gmra.mxu1 %vm322_vm1, %v1825_v40 }
 0x298   :  { %10910 = vmatpush3.msra.mxu0 %v13600_v3  ;;  %v10331_v0 = vpop.f32.mrf.mxu0  ;;  %10854 = vmatprep.mubr.msk.f32.mxu0 %vm12136_vm0, %v12135_v1 }
 0x299   :  { %v1826_v51 = vmax.f32 %v1807_v45, 0.0  ;;  %10911 = vmatprep.subr.mxu0 %v12135_v1  ;;  %10360 = vmatprep.mubr.msk.f32.mxu1 %vm12136_vm0, %v12135_v1 }
 0x29a   :  { %v1811_v5 = vpop.f32.mrf.mxu0  ;;  %10855 = vmatmul.mubr.f32.gmra.mxu0 %v3358_v50  ;;  %10518 = vmatprep.subr.mxu1 %v12135_v1  ;;  %v3365_v50 = vld [vmem:[%s17023_s0 + $0x3a0] sm:$0xff] }
 0x29b   :  { %v1812_v6 = vadd.f32 %v13724_v58, %v1811_v5  ;;  %10912 = vmatpush3.msra.mxu0 %v13613_v35  ;;  %10361 = vmatmul.mubr.msk.f32.gmra.mxu1 %vm322_vm1, %v1826_v51 }
 0x29c   :  { %10913 = vmatprep.subr.mxu0 %v12135_v1  ;;  %v10334_v8 = vpop.f32.mrf.mxu0  ;;  %10857 = vmatprep.mubr.msk.f32.mxu0 %vm12136_vm0, %v12135_v1 }
 0x29d   :  { %v1827_v18 = vmax.f32 %v1812_v6, 0.0  ;;  %10914 = vmatpush3.msra.mxu0 %v13626_v43  ;;  %10363 = vmatprep.mubr.msk.f32.mxu1 %vm12136_vm0, %v12135_v1 }
 0x29e   :  { %10915 = vmatprep.subr.mxu0 %v12135_v1  ;;  %v1816_v9 = vpop.f32.mrf.mxu0  ;;  %10858 = vmatmul.mubr.f32.gmra.mxu0 %v3359_v7 }
 0x29f   :  { %v1817_v54 = vadd.f32 %v13724_v58, %v1816_v9  ;;  %10916 = vmatpush3.msra.mxu0 %v13636_v48  ;;  %10364 = vmatmul.mubr.msk.f32.gmra.mxu1 %vm322_vm1, %v1827_v18  ;;  %v2381_v18 = vld [vmem:[%s17026_s3 + $0x80] sm:$0xff]  ;;  %v3633_v9 = vld [vmem:[%s17023_s0 + $0x3a8] sm:$0xff] }
 0x2a0   :  { %10917 = vmatprep.subr.mxu0 %v12135_v1  ;;  %v10337_v11 = vpop.f32.mrf.mxu0  ;;  %10860 = vmatprep.mubr.msk.f32.mxu0 %vm12136_vm0, %v12135_v1 }
 0x2a1   :  { %v1828_v12 = vmax.f32 %v1817_v54, 0.0  ;;  %10918 = vmatpush3.msra.mxu0 %v13649_v60  ;;  %10366 = vmatprep.mubr.msk.f32.mxu1 %vm12136_vm0, %v12135_v1 }
 0x2a2   :  { %v2052_v26 = vpop.f32.mrf.mxu0  ;;  %10861 = vmatmul.mubr.f32.gmra.mxu0 %v3360_v23  ;;  %10919 = vmatprep.subr.mxu0 %v12135_v1 }
 0x2a3   :  { %v2053_v14 = vadd.f32 %v13724_v58, %v2052_v26  ;;  %10367 = vmatmul.mubr.msk.f32.gmra.mxu1 %vm322_vm1, %v1828_v12  ;;  %10920 = vmatpush3.msra.mxu0 %v13660_v63 }
 0x2a4   :  { %v10403_v53 = vpop.f32.mrf.mxu0  ;;  %10921 = vmatprep.subr.mxu0 %v12135_v1  ;;  %10863 = vmatprep.mubr.msk.f32.mxu0 %vm12136_vm0, %v12135_v1 }
 0x2a5   :  { %v2096_v57 = vmax.f32 %v2053_v14, 0.0  ;;  %10922 = vmatpush3.msra.mxu0 %v13672_v20  ;;  %10432 = vmatprep.mubr.msk.f32.mxu1 %vm12136_vm0, %v12135_v1 }
 0x2a6   :  { %v2057_v16 = vpop.f32.mrf.mxu0  ;;  %10864 = vmatmul.mubr.f32.gmra.mxu0 %v3361_v29  ;;  %10923 = vmatprep.subr.mxu0 %v12135_v1  ;;  %v3634_v29 = vld [vmem:[%s17023_s0 + $0x3b0] sm:$0xff] }
 0x2a7   :  { %v2058_v36 = vadd.f32 %v13724_v58, %v2057_v16  ;;  %10433 = vmatmul.mubr.msk.f32.vlgmr.msra.gmra.mxu1 %vm322_vm1, %v2096_v57  ;;  %10924 = vmatpush3.msra.mxu0 %v13686_v47 }
 0x2a8   :  { %v10406_v62 = vpop.f32.mrf.mxu0  ;;  %10519 = vmatpush3.msra.mxu1 %v2382_v56  ;;  %10925 = vmatprep.subr.mxu0 %v12135_v1 }
 0x2a9   :  { %v2097_v38 = vmax.f32 %v2058_v36, 0.0  ;;  %10866 = vmatprep.mubr.msk.f32.mxu0 %vm12136_vm0, %v12135_v1  ;;  %10926 = vmatpush3.msra.mxu0 %v13698_v13  ;;  %v3635_v62 = vld [vmem:[%s17023_s0 + $0x3b8] sm:$0xff] }
 0x2aa   :  { %v2062_v42 = vpop.f32.mrf.mxu0  ;;  %10435 = vmatprep.mubr.msk.f32.mxu1 %vm12136_vm0, %v12135_v1  ;;  %10867 = vmatmul.mubr.f32.gmra.mxu0 %v3362_v61 }
 0x2ab   :  { %v2063_v39 = vadd.f32 %v13724_v58, %v2062_v42  ;;  %10436 = vmatmul.mubr.msk.f32.gmra.mxu1 %vm322_vm1, %v2097_v38  ;;  %10927 = vmatprep.subr.mxu0 %v12135_v1 }
 0x2ac   :  { %v10409_v21 = vpop.f32.mrf.mxu0  ;;  %10928 = vmatpush3.msra.mxu0 %v13712_v32  ;;  %10869 = vmatprep.mubr.msk.f32.mxu0 %vm12136_vm0, %v12135_v1 }
 0x2ad   :  { %v2098_v49 = vmax.f32 %v2063_v39, 0.0  ;;  %10929 = vmatprep.subr.mxu0 %v12135_v1  ;;  %10438 = vmatprep.mubr.msk.f32.mxu1 %vm12136_vm0, %v12135_v1 }
 0x2ae   :  { %v2067_v25 = vpop.f32.mrf.mxu0  ;;  %10870 = vmatmul.mubr.f32.gmra.mxu0 %v3363_v19  ;;  %10520 = vmatprep.subr.mxu1 %v12135_v1 }
 0x2af   :  { %v2068_v27 = vadd.f32 %v13724_v58, %v2067_v25  ;;  %10930 = vmatpush3.msra.mxu0 %v13730_v59  ;;  %10439 = vmatmul.mubr.msk.f32.gmra.mxu1 %vm322_vm1, %v2098_v49  ;;  %v3636_v25 = vld [vmem:[%s17023_s0 + $0x3c0] sm:$0xff] }
 0x2b0   :  { %10931 = vmatprep.subr.mxu0 %v12135_v1  ;;  %v10412_v33 = vpop.f32.mrf.mxu0  ;;  %10872 = vmatprep.mubr.msk.f32.mxu0 %vm12136_vm0, %v12135_v1 }
 0x2b1   :  { %v2099_v37 = vmax.f32 %v2068_v27, 0.0  ;;  %10932 = vmatpush3.msra.mxu0 %v13743_v17  ;;  %10441 = vmatprep.mubr.msk.f32.mxu1 %vm12136_vm0, %v12135_v1 }
 0x2b2   :  { %10933 = vmatprep.subr.mxu0 %v12135_v1  ;;  %v2072_v40 = vpop.f32.mrf.mxu0  ;;  %10873 = vmatmul.mubr.f32.gmra.mxu0 %v3364_v31 }
 0x2b3   :  { %v2073_v15 = vadd.f32 %v13724_v58, %v2072_v40  ;;  %10934 = vmatpush3.msra.mxu0 %v13753_v44  ;;  %v820_v45 = vpop.f32.mrf.mxu1  ;;  %10442 = vmatmul.mubr.msk.f32.gmra.mxu1 %vm322_vm1, %v2099_v37 }
 0x2b4   :  { %v13897_v0 = vadd.f32 %v820_v45, %v12993_v22  ;;  %v10415_v51 = vpop.f32.mrf.mxu0  ;;  %10935 = vmatprep.subr.mxu0 %v12135_v1  ;;  %10875 = vmatprep.mubr.msk.f32.mxu0 %vm12136_vm0, %v12135_v1  ;;  %v3637_v45 = vld [vmem:[%s17023_s0 + $0x3c8] sm:$0xff] }
 0x2b5   :  { %v2100_v5 = vmax.f32 %v2073_v15, 0.0  ;;  %v9984_v6 = vpop.f32.mrf.mxu1  ;;  %10936 = vmatpush3.msra.mxu0 %v13766_v24  ;;  %10444 = vmatprep.mubr.msk.f32.mxu1 %vm12136_vm0, %v12135_v1 }
 0x2b6   :  { %v2077_v7 = vpop.f32.mrf.mxu0  ;;  %10876 = vmatmul.mubr.f32.gmra.mxu0 %v3365_v50  ;;  %10937 = vmatprep.subr.mxu0 %v12135_v1 }
 0x2b7   :  { %v2078_v22 = vadd.f32 %v13724_v58, %v2077_v7  ;;  %v825_v8 = vpop.f32.mrf.mxu1  ;;  %10445 = vmatmul.mubr.msk.f32.gmra.mxu1 %vm322_vm1, %v2100_v5  ;;  %10938 = vmatpush3.msra.mxu0 %v13777_v30  ;;  %v2658_v7 = vld [vmem:[%s17026_s3 + $0x98] sm:$0xff] }
 0x2b8   :  { %v13916_v54 = vadd.f32 %v825_v8, %v13015_v28  ;;  %v10418_v23 = vpop.f32.mrf.mxu0  ;;  %10939 = vmatprep.subr.mxu0 %v12135_v1  ;;  %10941 = vmatprep.mubr.msk.f32.mxu0 %vm12136_vm0, %v12135_v1 }
 0x2b9   :  { %v2101_v11 = vmax.f32 %v2078_v22, 0.0  ;;  %v9987_v12 = vpop.f32.mrf.mxu1  ;;  %10940 = vmatpush3.msra.mxu0 %v13792_v2  ;;  %10447 = vmatprep.mubr.msk.f32.mxu1 %vm12136_vm0, %v12135_v1 }
 0x2ba   :  { %v2082_v26 = vpop.f32.mrf.mxu0  ;;  %10521 = vmatpush3.msra.mxu1 %v2381_v18  ;;  %10942 = vmatmul.mubr.f32.vlgmr.msra.gmra.mxu0 %v3633_v9  ;;  %v3638_v18 = vld [vmem:[%s17023_s0 + $0x3d0] sm:$0xff] }
 0x2bb   :  { %v2083_v14 = vadd.f32 %v13724_v58, %v2082_v26  ;;  %10999 = vmatprep.subr.mxu0 %v12135_v1  ;;  %v830_v28 = vpop.f32.mrf.mxu1  ;;  %10448 = vmatmul.mubr.msk.f32.gmra.mxu1 %vm322_vm1, %v2101_v11 }
 0x2bc   :  { %v13931_v53 = vadd.f32 %v830_v28, %v13037_v34  ;;  %11000 = vmatpush3.msra.mxu0 %v13600_v3  ;;  %v10421_v57 = vpop.f32.mrf.mxu0  ;;  %10944 = vmatprep.mubr.msk.f32.mxu0 %vm12136_vm0, %v12135_v1  ;;  %v3639_v28 = vld [vmem:[%s17023_s0 + $0x3d8] sm:$0xff] }
 0x2bd   :  { %v2102_v56 = vmax.f32 %v2083_v14, 0.0  ;;  %v9990_v16 = vpop.f32.mrf.mxu1  ;;  %11001 = vmatprep.subr.mxu0 %v12135_v1  ;;  %10450 = vmatprep.mubr.msk.f32.mxu1 %vm12136_vm0, %v12135_v1 }
 0x2be   :  { %v2087_v36 = vpop.f32.mrf.mxu0  ;;  %10945 = vmatmul.mubr.f32.gmra.mxu0 %v3634_v29  ;;  %10608 = vmatprep.subr.mxu1 %v12135_v1 }
 0x2bf   :  { %v2088_v34 = vadd.f32 %v13724_v58, %v2087_v36  ;;  %11002 = vmatpush3.msra.mxu0 %v13613_v35  ;;  %v835_v61 = vpop.f32.mrf.mxu1  ;;  %10451 = vmatmul.mubr.msk.f32.gmra.mxu1 %vm322_vm1, %v2102_v56 }
 0x2c0   :  { %v13947_v38 = vadd.f32 %v835_v61, %v13059_v41  ;;  %11003 = vmatprep.subr.mxu0 %v12135_v1  ;;  %v10424_v42 = vpop.f32.mrf.mxu0  ;;  %10947 = vmatprep.mubr.msk.f32.mxu0 %vm12136_vm0, %v12135_v1  ;;  %v3640_v61 = vld [vmem:[%s17023_s0 + $0x3e0] sm:$0xff] }
 0x2c1   :  { %v2103_v39 = vmax.f32 %v2088_v34, 0.0  ;;  %11004 = vmatpush3.msra.mxu0 %v13626_v43  ;;  %v9993_v19 = vpop.f32.mrf.mxu1  ;;  %10453 = vmatprep.mubr.msk.f32.mxu1 %vm12136_vm0, %v12135_v1 }
 0x2c2   :  { %11005 = vmatprep.subr.mxu0 %v12135_v1  ;;  %v2092_v21 = vpop.f32.mrf.mxu0  ;;  %10948 = vmatmul.mubr.f32.gmra.mxu0 %v3635_v62 }
 0x2c3   :  { %v2093_v41 = vadd.f32 %v13724_v58, %v2092_v21  ;;  %11006 = vmatpush3.msra.mxu0 %v13636_v48  ;;  %v840_v49 = vpop.f32.mrf.mxu1  ;;  %10454 = vmatmul.mubr.msk.f32.gmra.mxu1 %vm322_vm1, %v2103_v39 }
 0x2c4   :  { %v13963_v27 = vadd.f32 %v840_v49, %v13081_v46  ;;  %11007 = vmatprep.subr.mxu0 %v12135_v1  ;;  %v10427_v31 = vpop.f32.mrf.mxu0  ;;  %10950 = vmatprep.mubr.msk.f32.mxu0 %vm12136_vm0, %v12135_v1  ;;  %v3641_v49 = vld [vmem:[%s17023_s0 + $0x3e8] sm:$0xff] }
 0x2c5   :  { %v2104_v33 = vmax.f32 %v2093_v41, 0.0  ;;  %11008 = vmatpush3.msra.mxu0 %v13649_v60  ;;  %v9996_v37 = vpop.f32.mrf.mxu1  ;;  %10456 = vmatprep.mubr.msk.f32.mxu1 %vm12136_vm0, %v12135_v1 }
 0x2c6   :  { %v2328_v40 = vpop.f32.mrf.mxu0  ;;  %10951 = vmatmul.mubr.f32.gmra.mxu0 %v3636_v25  ;;  %11009 = vmatprep.subr.mxu0 %v12135_v1 }
 0x2c7   :  { %v2329_v46 = vadd.f32 %v13724_v58, %v2328_v40  ;;  %v845_v15 = vpop.f32.mrf.mxu1  ;;  %10457 = vmatmul.mubr.msk.f32.gmra.mxu1 %vm322_vm1, %v2104_v33  ;;  %11010 = vmatpush3.msra.mxu0 %v13660_v63 }
 0x2c8   :  { %v13979_v50 = vadd.f32 %v845_v15, %v13103_v4  ;;  %v10493_v51 = vpop.f32.mrf.mxu0  ;;  %11011 = vmatprep.subr.mxu0 %v12135_v1  ;;  %10953 = vmatprep.mubr.msk.f32.mxu0 %vm12136_vm0, %v12135_v1  ;;  %v2657_v15 = vld [vmem:[%s17026_s3 + $0x90] sm:$0xff] }
 0x2c9   :  { %v2372_v5 = vmax.f32 %v2329_v46, 0.0  ;;  %v9999_v6 = vpop.f32.mrf.mxu1  ;;  %11012 = vmatpush3.msra.mxu0 %v13672_v20  ;;  %10522 = vmatprep.mubr.msk.f32.mxu1 %vm12136_vm0, %v12135_v1 }
 0x2ca   :  { %v2333_v22 = vpop.f32.mrf.mxu0  ;;  %10954 = vmatmul.mubr.f32.gmra.mxu0 %v3637_v45  ;;  %11013 = vmatprep.subr.mxu0 %v12135_v1  ;;  %v3909_v45 = vld [vmem:[%s17023_s0 + $0x3f0] sm:$0xff] }
 0x2cb   :  { %v2334_v4 = vadd.f32 %v13724_v58, %v2333_v22  ;;  %v850_v8 = vpop.f32.mrf.mxu1  ;;  %10523 = vmatmul.mubr.msk.f32.vlgmr.msra.gmra.mxu1 %vm322_vm1, %v2372_v5  ;;  %11014 = vmatpush3.msra.mxu0 %v13686_v47 }
 0x2cc   :  { %v13998_v9 = vadd.f32 %v850_v8, %v13111_v52  ;;  %v10496_v23 = vpop.f32.mrf.mxu0  ;;  %10609 = vmatpush3.msra.mxu1 %v2658_v7  ;;  %11015 = vmatprep.subr.mxu0 %v12135_v1  ;;  %v3910_v8 = vld [vmem:[%s17023_s0 + $0x3f8] sm:$0xff] }
 0x2cd   :  { %v2373_v11 = vmax.f32 %v2334_v4, 0.0  ;;  %v10002_v12 = vpop.f32.mrf.mxu1  ;;  %10956 = vmatprep.mubr.msk.f32.mxu0 %vm12136_vm0, %v12135_v1  ;;  %11016 = vmatpush3.msra.mxu0 %v13698_v13 }
 0x2ce   :  { %v2338_v26 = vpop.f32.mrf.mxu0  ;;  %10525 = vmatprep.mubr.msk.f32.mxu1 %vm12136_vm0, %v12135_v1  ;;  %10957 = vmatmul.mubr.f32.gmra.mxu0 %v3638_v18 }
 0x2cf   :  { %v2339_v14 = vadd.f32 %v13724_v58, %v2338_v26  ;;  %v855_v52 = vpop.f32.mrf.mxu1  ;;  %10526 = vmatmul.mubr.msk.f32.gmra.mxu1 %vm322_vm1, %v2373_v11  ;;  %11017 = vmatprep.subr.mxu0 %v12135_v1 }
 0x2d0   :  { %v14013_v29 = vadd.f32 %v855_v52, %v13123_v10  ;;  %v10499_v57 = vpop.f32.mrf.mxu0  ;;  %11018 = vmatpush3.msra.mxu0 %v13712_v32  ;;  %10959 = vmatprep.mubr.msk.f32.mxu0 %vm12136_vm0, %v12135_v1 }
 0x2d1   :  { %v2374_v56 = vmax.f32 %v2339_v14, 0.0  ;;  %v10005_v16 = vpop.f32.mrf.mxu1  ;;  %11019 = vmatprep.subr.mxu0 %v12135_v1  ;;  %10528 = vmatprep.mubr.msk.f32.mxu1 %vm12136_vm0, %v12135_v1  ;;  %v3911_v14 = vld [vmem:[%s17023_s0 + $0x400] sm:$0xff] }
 0x2d2   :  { %v2343_v36 = vpop.f32.mrf.mxu0  ;;  %10960 = vmatmul.mubr.f32.gmra.mxu0 %v3639_v28  ;;  %10610 = vmatprep.subr.mxu1 %v12135_v1 }
 0x2d3   :  { %v2344_v10 = vadd.f32 %v13724_v58, %v2343_v36  ;;  %11020 = vmatpush3.msra.mxu0 %v13730_v59  ;;  %v860_v34 = vpop.f32.mrf.mxu1  ;;  %10529 = vmatmul.mubr.msk.f32.gmra.mxu1 %vm322_vm1, %v2374_v56  ;;  %v3912_v36 = vld [vmem:[%s17023_s0 + $0x408] sm:$0xff] }
 0x2d4   :  { %v14029_v62 = vadd.f32 %v860_v34, %v13135_v55  ;;  %11021 = vmatprep.subr.mxu0 %v12135_v1  ;;  %v10502_v42 = vpop.f32.mrf.mxu0  ;;  %10962 = vmatprep.mubr.msk.f32.mxu0 %vm12136_vm0, %v12135_v1 }
 0x2d5   :  { %v2375_v39 = vmax.f32 %v2344_v10, 0.0  ;;  %11022 = vmatpush3.msra.mxu0 %v13743_v17  ;;  %v10008_v19 = vpop.f32.mrf.mxu1  ;;  %10531 = vmatprep.mubr.msk.f32.mxu1 %vm12136_vm0, %v12135_v1 }
 0x2d6   :  { %11023 = vmatprep.subr.mxu0 %v12135_v1  ;;  %v2348_v21 = vpop.f32.mrf.mxu0  ;;  %10963 = vmatmul.mubr.f32.gmra.mxu0 %v3640_v61 }
 0x2d7   :  { %v2349_v55 = vadd.f32 %v13724_v58, %v2348_v21  ;;  %11024 = vmatpush3.msra.mxu0 %v13753_v44  ;;  %v1096_v41 = vpop.f32.mrf.mxu1  ;;  %10532 = vmatmul.mubr.msk.f32.gmra.mxu1 %vm322_vm1, %v2375_v39  ;;  %v3913_v39 = vld [vmem:[%s17023_s0 + $0x410] sm:$0xff] }
 0x2d8   :  { %v14045_v25 = vadd.f32 %v1096_v41, %v13897_v0  ;;  %v10505_v31 = vpop.f32.mrf.mxu0  ;;  %11025 = vmatprep.subr.mxu0 %v12135_v1  ;;  %10965 = vmatprep.mubr.msk.f32.mxu0 %vm12136_vm0, %v12135_v1 }
 0x2d9   :  { %v2376_v33 = vmax.f32 %v2349_v55, 0.0  ;;  %v10074_v37 = vpop.f32.mrf.mxu1  ;;  %11026 = vmatpush3.msra.mxu0 %v13766_v24  ;;  %10534 = vmatprep.mubr.msk.f32.mxu1 %vm12136_vm0, %v12135_v1 }
 0x2da   :  { %v2353_v40 = vpop.f32.mrf.mxu0  ;;  %10966 = vmatmul.mubr.f32.gmra.mxu0 %v3641_v49  ;;  %11027 = vmatprep.subr.mxu0 %v12135_v1 }
 0x2db   :  { %v2354_v0 = vadd.f32 %v13724_v58, %v2353_v40  ;;  %v1101_v46 = vpop.f32.mrf.mxu1  ;;  %10535 = vmatmul.mubr.msk.f32.gmra.mxu1 %vm322_vm1, %v2376_v33  ;;  %11028 = vmatpush3.msra.mxu0 %v13777_v30 }
 0x2dc   :  { %v14064_v51 = vadd.f32 %v1101_v46, %v13916_v54  ;;  %v10508_v5 = vpop.f32.mrf.mxu0  ;;  %11029 = vmatprep.subr.mxu0 %v12135_v1  ;;  %11031 = vmatprep.mubr.msk.f32.mxu0 %vm12136_vm0, %v12135_v1  ;;  %v3915_v46 = vld [vmem:[%s17023_s0 + $0x420] sm:$0xff] }
 0x2dd   :  { %v2377_v6 = vmax.f32 %v2354_v0, 0.0  ;;  %v10077_v7 = vpop.f32.mrf.mxu1  ;;  %11030 = vmatpush3.msra.mxu0 %v13792_v2  ;;  %10537 = vmatprep.mubr.msk.f32.mxu1 %vm12136_vm0, %v12135_v1 }
 0x2de   :  { %v2358_v22 = vpop.f32.mrf.mxu0  ;;  %10611 = vmatpush3.msra.mxu1 %v2657_v15  ;;  %11032 = vmatmul.mubr.f32.vlgmr.msra.gmra.mxu0 %v3909_v45 }
 0x2df   :  { %v2359_v4 = vadd.f32 %v13724_v58, %v2358_v22  ;;  %11089 = vmatprep.subr.mxu0 %v12135_v1  ;;  %v1106_v54 = vpop.f32.mrf.mxu1  ;;  %10538 = vmatmul.mubr.msk.f32.gmra.mxu1 %vm322_vm1, %v2377_v6 }
 0x2e0   :  { %v14079_v18 = vadd.f32 %v1106_v54, %v13931_v53  ;;  %11090 = vmatpush3.msra.mxu0 %v13600_v3  ;;  %v10511_v23 = vpop.f32.mrf.mxu0  ;;  %11034 = vmatprep.mubr.msk.f32.mxu0 %vm12136_vm0, %v12135_v1 }
 0x2e1   :  { %v2378_v11 = vmax.f32 %v2359_v4, 0.0  ;;  %v10080_v12 = vpop.f32.mrf.mxu1  ;;  %11091 = vmatprep.subr.mxu0 %v12135_v1  ;;  %10540 = vmatprep.mubr.msk.f32.mxu1 %vm12136_vm0, %v12135_v1 }
 0x2e2   :  { %v2363_v26 = vpop.f32.mrf.mxu0  ;;  %11035 = vmatmul.mubr.f32.gmra.mxu0 %v3910_v8  ;;  %10698 = vmatprep.subr.mxu1 %v12135_v1 }
 0x2e3   :  { %v2364_v53 = vadd.f32 %v13724_v58, %v2363_v26  ;;  %11092 = vmatpush3.msra.mxu0 %v13613_v35  ;;  %v1111_v3 = vpop.f32.mrf.mxu1  ;;  %10541 = vmatmul.mubr.msk.f32.gmra.mxu1 %vm322_vm1, %v2378_v11  ;;  %v3917_v11 = vld [vmem:[%s17023_s0 + $0x430] sm:$0xff] }
 0x2e4   :  { %v14095_v52 = vadd.f32 %v1111_v3, %v13947_v38  ;;  %11093 = vmatprep.subr.mxu0 %v12135_v1  ;;  %v10514_v28 = vpop.f32.mrf.mxu0  ;;  %11037 = vmatprep.mubr.msk.f32.mxu0 %vm12136_vm0, %v12135_v1 }
 0x2e5   :  { %v2379_v57 = vmax.f32 %v2364_v53, 0.0  ;;  %11094 = vmatpush3.msra.mxu0 %v13626_v43  ;;  %v10083_v35 = vpop.f32.mrf.mxu1  ;;  %10543 = vmatprep.mubr.msk.f32.mxu1 %vm12136_vm0, %v12135_v1 }
 0x2e6   :  { %11095 = vmatprep.subr.mxu0 %v12135_v1  ;;  %v2368_v56 = vpop.f32.mrf.mxu0  ;;  %11038 = vmatmul.mubr.f32.gmra.mxu0 %v3911_v14  ;;  %v2933_v14 = vld [vmem:[%s17026_s3 + $0xa0] sm:$0xff] }
 0x2e7   :  { %v2369_v38 = vadd.f32 %v13724_v58, %v2368_v56  ;;  %11096 = vmatpush3.msra.mxu0 %v13636_v48  ;;  %v1116_v16 = vpop.f32.mrf.mxu1  ;;  %10544 = vmatmul.mubr.msk.f32.gmra.mxu1 %vm322_vm1, %v2379_v57 }
 0x2e8   :  { %v14111_v43 = vadd.f32 %v1116_v16, %v13963_v27  ;;  %11097 = vmatprep.subr.mxu0 %v12135_v1  ;;  %v10517_v10 = vpop.f32.mrf.mxu0  ;;  %11040 = vmatprep.mubr.msk.f32.mxu0 %vm12136_vm0, %v12135_v1  ;;  %v4186_v16 = vld [vmem:[%s17023_s0 + $0x440] sm:$0xff] }
 0x2e9   :  { %v2380_v34 = vmax.f32 %v2369_v38, 0.0  ;;  %11098 = vmatpush3.msra.mxu0 %v13649_v60  ;;  %v10086_v48 = vpop.f32.mrf.mxu1  ;;  %10546 = vmatprep.mubr.msk.f32.mxu1 %vm12136_vm0, %v12135_v1 }
 0x2ea   :  { %v2604_v61 = vpop.f32.mrf.mxu0  ;;  %11041 = vmatmul.mubr.f32.gmra.mxu0 %v3912_v36  ;;  %11099 = vmatprep.subr.mxu0 %v12135_v1 }
 0x2eb   :  { %v2605_v27 = vadd.f32 %v13724_v58, %v2604_v61  ;;  %v1121_v42 = vpop.f32.mrf.mxu1  ;;  %10547 = vmatmul.mubr.msk.f32.gmra.mxu1 %vm322_vm1, %v2380_v34  ;;  %11100 = vmatpush3.msra.mxu0 %v13660_v63  ;;  %v2934_v63 = vld [vmem:[%s17026_s3 + $0xa8] sm:$0xff] }
 0x2ec   :  { %v14127_v60 = vadd.f32 %v1121_v42, %v13979_v50  ;;  %v10583_v19 = vpop.f32.mrf.mxu0  ;;  %11101 = vmatprep.subr.mxu0 %v12135_v1  ;;  %11043 = vmatprep.mubr.msk.f32.mxu0 %vm12136_vm0, %v12135_v1 }
 0x2ed   :  { %v2648_v21 = vmax.f32 %v2605_v27, 0.0  ;;  %v10089_v55 = vpop.f32.mrf.mxu1  ;;  %11102 = vmatpush3.msra.mxu0 %v13672_v20  ;;  %10612 = vmatprep.mubr.msk.f32.mxu1 %vm12136_vm0, %v12135_v1  ;;  %v3914_v20 = vld [vmem:[%s17023_s0 + $0x418] sm:$0xff]  ;;  %v14245_v27 = vld [vmem:[%s17024_s1 + $0x70] sm:$0xff] }
 0x2ee   :  { %v2609_v41 = vpop.f32.mrf.mxu0  ;;  %11044 = vmatmul.mubr.f32.gmra.mxu0 %v3913_v39  ;;  %11103 = vmatprep.subr.mxu0 %v12135_v1  ;;  %v4187_v39 = vld [vmem:[%s17023_s0 + $0x448] sm:$0xff] }
 0x2ef   :  { %v2610_v50 = vadd.f32 %v13724_v58, %v2609_v41  ;;  %v1126_v49 = vpop.f32.mrf.mxu1  ;;  %10613 = vmatmul.mubr.msk.f32.vlgmr.msra.gmra.mxu1 %vm322_vm1, %v2648_v21  ;;  %11104 = vmatpush3.msra.mxu0 %v13686_v47 }
 0x2f0   :  { %v14146_v31 = vadd.f32 %v1126_v49, %v13998_v9  ;;  %v10586_v33 = vpop.f32.mrf.mxu0  ;;  %10699 = vmatpush3.msra.mxu1 %v2934_v63  ;;  %11105 = vmatprep.subr.mxu0 %v12135_v1  ;;  %v14261_v63 = vld [vmem:[%s17024_s1 + $0x68] sm:$0xff]  ;;  %v14271_v49 = vld [vmem:[%s17024_s1 + $0x60] sm:$0xff] }
 0x2f1   :  { %v2649_v37 = vmax.f32 %v2610_v50, 0.0  ;;  %v10092_v40 = vpop.f32.mrf.mxu1  ;;  %11046 = vmatprep.mubr.msk.f32.mxu0 %vm12136_vm0, %v12135_v1  ;;  %11106 = vmatpush3.msra.mxu0 %v13698_v13  ;;  %v4188_v33 = vld [vmem:[%s17023_s0 + $0x450] sm:$0xff] }
 0x2f2   :  { %v2614_v0 = vpop.f32.mrf.mxu0  ;;  %10615 = vmatprep.mubr.msk.f32.mxu1 %vm12136_vm0, %v12135_v1  ;;  %11047 = vmatmul.mubr.f32.gmra.mxu0 %v3914_v20 }
 0x2f3   :  { %v2615_v47 = vadd.f32 %v13724_v58, %v2614_v0  ;;  %v1131_v9 = vpop.f32.mrf.mxu1  ;;  %10616 = vmatmul.mubr.msk.f32.gmra.mxu1 %vm322_vm1, %v2649_v37  ;;  %11107 = vmatprep.subr.mxu0 %v12135_v1 }
 0x2f4   :  { %v14161_v15 = vadd.f32 %v1131_v9, %v14013_v29  ;;  %v10589_v13 = vpop.f32.mrf.mxu0  ;;  %11108 = vmatpush3.msra.mxu0 %v13712_v32  ;;  %11049 = vmatprep.mubr.msk.f32.mxu0 %vm12136_vm0, %v12135_v1  ;;  %v3916_v32 = vld [vmem:[%s17023_s0 + $0x428] sm:$0xff] }
 0x2f5   :  { %v2650_v45 = vmax.f32 %v2615_v47, 0.0  ;;  %v10095_v5 = vpop.f32.mrf.mxu1  ;;  %11109 = vmatprep.subr.mxu0 %v12135_v1  ;;  %10618 = vmatprep.mubr.msk.f32.mxu1 %vm12136_vm0, %v12135_v1  ;;  %v14287_v47 = vld [vmem:[%s17024_s1 + $0x58] sm:$0xff] }
 0x2f6   :  { %v2619_v6 = vpop.f32.mrf.mxu0  ;;  %11050 = vmatmul.mubr.f32.gmra.mxu0 %v3915_v46  ;;  %10700 = vmatprep.subr.mxu1 %v12135_v1  ;;  %v4189_v5 = vld [vmem:[%s17023_s0 + $0x458] sm:$0xff] }
 0x2f7   :  { %v2620_v29 = vadd.f32 %v13724_v58, %v2619_v6  ;;  %11110 = vmatpush3.msra.mxu0 %v13730_v59  ;;  %v1136_v7 = vpop.f32.mrf.mxu1  ;;  %10619 = vmatmul.mubr.msk.f32.gmra.mxu1 %vm322_vm1, %v2650_v45  ;;  %v14298_v45 = vld [vmem:[%s17024_s1 + $0x50] sm:$0xff] }
 0x2f8   :  { %v14177_v22 = vadd.f32 %v1136_v7, %v14029_v62  ;;  %11111 = vmatprep.subr.mxu0 %v12135_v1  ;;  %v10592_v4 = vpop.f32.mrf.mxu0  ;;  %11052 = vmatprep.mubr.msk.f32.mxu0 %vm12136_vm0, %v12135_v1 }
 0x2f9   :  { %v2651_v54 = vmax.f32 %v2620_v29, 0.0  ;;  %11112 = vmatpush3.msra.mxu0 %v13743_v17  ;;  %v10098_v59 = vpop.f32.mrf.mxu1  ;;  %10621 = vmatprep.mubr.msk.f32.mxu1 %vm12136_vm0, %v12135_v1 }
 0x2fa   :  { %11113 = vmatprep.subr.mxu0 %v12135_v1  ;;  %v2624_v8 = vpop.f32.mrf.mxu0  ;;  %11053 = vmatmul.mubr.f32.gmra.mxu0 %v3916_v32  ;;  %v14313_v32 = vld [vmem:[%s17024_s1 + $0x48] sm:$0xff] }
 0x2fb   :  { %v2625_v62 = vadd.f32 %v13724_v58, %v2624_v8  ;;  %11114 = vmatpush3.msra.mxu0 %v13753_v44  ;;  %v1372_v23 = vpop.f32.mrf.mxu1  ;;  %10622 = vmatmul.mubr.msk.f32.gmra.mxu1 %vm322_vm1, %v2651_v54  ;;  %v14325_v54 = vld [vmem:[%s17025_s2] ss:$0 sm:$0xff] }
 0x2fc   :  { %v14193_v17 = vadd.f32 %v1372_v23, %v14045_v25  ;;  %v10595_v12 = vpop.f32.mrf.mxu0  ;;  %11115 = vmatprep.subr.mxu0 %v12135_v1  ;;  %11055 = vmatprep.mubr.msk.f32.mxu0 %vm12136_vm0, %v12135_v1  ;;  %v4190_v23 = vld [vmem:[%s17023_s0 + $0x460] sm:$0xff] }
 0x2fd   :  { %v2652_v26 = vmax.f32 %v2625_v62, 0.0  ;;  %v10164_v53 = vpop.f32.mrf.mxu1  ;;  %11116 = vmatpush3.msra.mxu0 %v13766_v24  ;;  %10624 = vmatprep.mubr.msk.f32.mxu1 %vm12136_vm0, %v12135_v1  ;;  %v4185_v24 = vld [vmem:[%s17023_s0 + $0x438] sm:$0xff]  ;;  %v14332_v62 = vld [vmem:[%s17024_s1 + $0x40] sm:$0xff] }
 0x2fe   :  { %v2629_v44 = vpop.f32.mrf.mxu0  ;;  %11056 = vmatmul.mubr.f32.gmra.mxu0 %v3917_v11  ;;  %11117 = vmatprep.subr.mxu0 %v12135_v1 }
 0x2ff   :  { %v2630_v25 = vadd.f32 %v13724_v58, %v2629_v44  ;;  %v1377_v3 = vpop.f32.mrf.mxu1  ;;  %10625 = vmatmul.mubr.msk.f32.gmra.mxu1 %vm322_vm1, %v2652_v26  ;;  %11118 = vmatpush3.msra.mxu0 %v13777_v30  ;;  %v14347_v44 = vld [vmem:[%s17024_s1 + $0x38] sm:$0xff] }
 0x300   :  { %v14212_v28 = vadd.f32 %v1377_v3, %v14064_v51  ;;  %v10598_v57 = vpop.f32.mrf.mxu0  ;;  %11119 = vmatprep.subr.mxu0 %v12135_v1  ;;  %11121 = vmatprep.mubr.msk.f32.mxu0 %vm12136_vm0, %v12135_v1 }
 0x301   :  { %v2653_v35 = vmax.f32 %v2630_v25, 0.0  ;;  %v10167_v56 = vpop.f32.mrf.mxu1  ;;  %11120 = vmatpush3.msra.mxu0 %v13792_v2  ;;  %10627 = vmatprep.mubr.msk.f32.mxu1 %vm12136_vm0, %v12135_v1  ;;  %v14232_v2 = vld [vmem:[%s17024_s1 + $0x78] sm:$0xff] }
 0x302   :  { %v2634_v30 = vpop.f32.mrf.mxu0  ;;  %10701 = vmatpush3.msra.mxu1 %v2933_v14  ;;  %11122 = vmatmul.mubr.f32.vlgmr.msra.gmra.mxu0 %v4185_v24  ;;  %v4191_v14 = vld [vmem:[%s17023_s0 + $0x468] sm:$0xff] }
 0x303   :  { %v2635_v38 = vadd.f32 %v13724_v58, %v2634_v30  ;;  %11179 = vmatprep.subr.mxu0 %v12135_v1  ;;  %v1382_v51 = vpop.f32.mrf.mxu1  ;;  %10628 = vmatmul.mubr.msk.f32.gmra.mxu1 %vm322_vm1, %v2653_v35  ;;  %v14364_v35 = vld [vmem:[%s17024_s1 + $0x30] sm:$0xff] }
 0x304   :  { %v14227_v36 = vadd.f32 %v1382_v51, %v14079_v18  ;;  %11180 = vmatpush3.msra.mxu0 %v14232_v2  ;;  %v10601_v10 = vpop.f32.mrf.mxu0  ;;  %11124 = vmatprep.mubr.msk.f32.mxu0 %vm12136_vm0, %v12135_v1  ;;  %v14377_v51 = vld [vmem:[%s17024_s1 + $0x28] sm:$0xff] }
 0x305   :  { %v2654_v34 = vmax.f32 %v2635_v38, 0.0  ;;  %v10170_v48 = vpop.f32.mrf.mxu1  ;;  %11181 = vmatprep.subr.mxu0 %v12135_v1  ;;  %10630 = vmatprep.mubr.msk.f32.mxu1 %vm12136_vm0, %v12135_v1  ;;  %v4192_v10 = vld [vmem:[%s17023_s0 + $0x470] sm:$0xff] }
 0x306   :  { %v2639_v18 = vpop.f32.mrf.mxu0  ;;  %11125 = vmatmul.mubr.f32.gmra.mxu0 %v4186_v16  ;;  %10788 = vmatprep.subr.mxu1 %v12135_v1 }
 0x307   :  { %v2640_v61 = vadd.f32 %v13724_v58, %v2639_v18  ;;  %11182 = vmatpush3.msra.mxu0 %v14245_v27  ;;  %v1387_v42 = vpop.f32.mrf.mxu1  ;;  %10631 = vmatmul.mubr.msk.f32.gmra.mxu1 %vm322_vm1, %v2654_v34 }
 0x308   :  { %v14253_v19 = vadd.f32 %v1387_v42, %v14095_v52  ;;  %11183 = vmatprep.subr.mxu0 %v12135_v1  ;;  %v10604_v21 = vpop.f32.mrf.mxu0  ;;  %11127 = vmatprep.mubr.msk.f32.mxu0 %vm12136_vm0, %v12135_v1 }
 0x309   :  { %v2655_v55 = vmax.f32 %v2640_v61, 0.0  ;;  %11184 = vmatpush3.msra.mxu0 %v14261_v63  ;;  %v10173_v41 = vpop.f32.mrf.mxu1  ;;  %10633 = vmatprep.mubr.msk.f32.mxu1 %vm12136_vm0, %v12135_v1  ;;  %v14393_v61 = vld [vmem:[%s17024_s1 + $0x20] sm:$0xff]  ;;  %v14403_v21 = vld [vmem:[%s17024_s1 + $0x18] sm:$0xff] }
 0x30a   :  { %11185 = vmatprep.subr.mxu0 %v12135_v1  ;;  %v2644_v52 = vpop.f32.mrf.mxu0  ;;  %11128 = vmatmul.mubr.f32.gmra.mxu0 %v4187_v39  ;;  %v4193_v41 = vld [vmem:[%s17023_s0 + $0x478] sm:$0xff] }
 0x30b   :  { %v2645_v50 = vadd.f32 %v13724_v58, %v2644_v52  ;;  %11186 = vmatpush3.msra.mxu0 %v14271_v49  ;;  %v1392_v20 = vpop.f32.mrf.mxu1  ;;  %10634 = vmatmul.mubr.msk.f32.gmra.mxu1 %vm322_vm1, %v2655_v55 }
 0x30c   :  { %v14279_v37 = vadd.f32 %v1392_v20, %v14111_v43  ;;  %11187 = vmatprep.subr.mxu0 %v12135_v1  ;;  %v10607_v40 = vpop.f32.mrf.mxu0  ;;  %11130 = vmatprep.mubr.msk.f32.mxu0 %vm12136_vm0, %v12135_v1 }
 0x30d   :  { %v2656_v0 = vmax.f32 %v2645_v50, 0.0  ;;  %11188 = vmatpush3.msra.mxu0 %v14287_v47  ;;  %v10176_v9 = vpop.f32.mrf.mxu1  ;;  %10636 = vmatprep.mubr.msk.f32.mxu1 %vm12136_vm0, %v12135_v1  ;;  %v14419_v40 = vld [vmem:[%s17024_s1 + $0x10] sm:$0xff] }
 0x30e   :  { %v2880_v43 = vpop.f32.mrf.mxu0  ;;  %11131 = vmatmul.mubr.f32.gmra.mxu0 %v4188_v33  ;;  %11189 = vmatprep.subr.mxu0 %v12135_v1 }
 0x30f   :  { %v2881_v46 = vadd.f32 %v13724_v58, %v2880_v43  ;;  %v1397_v13 = vpop.f32.mrf.mxu1  ;;  %10637 = vmatmul.mubr.msk.f32.gmra.mxu1 %vm322_vm1, %v2656_v0  ;;  %11190 = vmatpush3.msra.mxu0 %v14298_v45  ;;  %v14430_v43 = vld [vmem:[%s17024_s1 + $0x8] sm:$0xff] }
 0x310   :  { %v14305_v6 = vadd.f32 %v1397_v13, %v14127_v60  ;;  %v10673_v29 = vpop.f32.mrf.mxu0  ;;  %11191 = vmatprep.subr.mxu0 %v12135_v1  ;;  %11133 = vmatprep.mubr.msk.f32.mxu0 %vm12136_vm0, %v12135_v1  ;;  %v3210_v60 = vld [vmem:[%s17026_s3 + $0xb8] sm:$0xff]  ;;  %v4461_v13 = vld [vmem:[%s17023_s0 + $0x480] sm:$0xff] }
 0x311   :  { %v2924_v58 = vmax.f32 %v2881_v46, 0.0  ;;  %v10179_v7 = vpop.f32.mrf.mxu1  ;;  %11192 = vmatpush3.msra.mxu0 %v14313_v32  ;;  %10702 = vmatprep.mubr.msk.f32.mxu1 %vm12136_vm0, %v12135_v1  ;;  %v3209_v46 = vld [vmem:[%s17026_s3 + $0xb0] sm:$0xff] }
 0x312   :  { %v2885_v4 = vpop.f32.mrf.mxu0  ;;  %11134 = vmatmul.mubr.f32.gmra.mxu0 %v4189_v5  ;;  %11193 = vmatprep.subr.mxu0 %v12135_v1 }
 0x313   :  { %v2886_v59 = vadd.f32 %v14325_v54, %v2885_v4  ;;  %v1402_v8 = vpop.f32.mrf.mxu1  ;;  %10703 = vmatmul.mubr.msk.f32.vlgmr.msra.gmra.mxu1 %vm322_vm1, %v2924_v58  ;;  %11194 = vmatpush3.msra.mxu0 %v14332_v62 }
 0x314   :  { %v14339_v11 = vadd.f32 %v1402_v8, %v14146_v31  ;;  %v10676_v12 = vpop.f32.mrf.mxu0  ;;  %10789 = vmatpush3.msra.mxu1 %v3210_v60  ;;  %11195 = vmatprep.subr.mxu0 %v12135_v1  ;;  %v14448_v60 = vld [vmem:[%s17024_s1] sm:$0xff]  ;;  %v4462_v8 = vld [vmem:[%s17023_s0 + $0x488] sm:$0xff] }
 0x315   :  { %v2925_v26 = vmax.f32 %v2886_v59, 0.0  ;;  %v10182_v53 = vpop.f32.mrf.mxu1  ;;  %11136 = vmatprep.mubr.msk.f32.mxu0 %vm12136_vm0, %v12135_v1  ;;  %11196 = vmatpush3.msra.mxu0 %v14347_v44 }
 0x316   :  { %v2890_v25 = vpop.f32.mrf.mxu0  ;;  %10705 = vmatprep.mubr.msk.f32.mxu1 %vm12136_vm0, %v12135_v1  ;;  %11137 = vmatmul.mubr.f32.gmra.mxu0 %v4190_v23 }
 0x317   :  { %v2891_v31 = vadd.f32 %v14325_v54, %v2890_v25  ;;  %v1407_v3 = vpop.f32.mrf.mxu1  ;;  %10706 = vmatmul.mubr.msk.f32.gmra.mxu1 %vm322_vm1, %v2925_v26  ;;  %11197 = vmatprep.subr.mxu0 %v12135_v1 }
 0x318   :  { %v14359_v24 = vadd.f32 %v1407_v3, %v14161_v15  ;;  %v10679_v57 = vpop.f32.mrf.mxu0  ;;  %11198 = vmatpush3.msra.mxu0 %v14364_v35  ;;  %11139 = vmatprep.mubr.msk.f32.mxu0 %vm12136_vm0, %v12135_v1  ;;  %v4463_v3 = vld [vmem:[%s17023_s0 + $0x490] sm:$0xff] }
 0x319   :  { %v2926_v56 = vmax.f32 %v2891_v31, 0.0  ;;  %v10185_v30 = vpop.f32.mrf.mxu1  ;;  %11199 = vmatprep.subr.mxu0 %v12135_v1  ;;  %10708 = vmatprep.mubr.msk.f32.mxu1 %vm12136_vm0, %v12135_v1 }
 0x31a   :  { %v2895_v15 = vpop.f32.mrf.mxu0  ;;  %11140 = vmatmul.mubr.f32.gmra.mxu0 %v4191_v14  ;;  %10790 = vmatprep.subr.mxu1 %v12135_v1 }
 0x31b   :  { %v2896_v38 = vadd.f32 %v14325_v54, %v2895_v15  ;;  %11200 = vmatpush3.msra.mxu0 %v14377_v51  ;;  %v1412_v16 = vpop.f32.mrf.mxu1  ;;  %10709 = vmatmul.mubr.msk.f32.gmra.mxu1 %vm322_vm1, %v2926_v56 }
 0x31c   :  { %v14385_v34 = vadd.f32 %v1412_v16, %v14177_v22  ;;  %11201 = vmatprep.subr.mxu0 %v12135_v1  ;;  %v10682_v48 = vpop.f32.mrf.mxu0  ;;  %11142 = vmatprep.mubr.msk.f32.mxu0 %vm12136_vm0, %v12135_v1  ;;  %v4464_v16 = vld [vmem:[%s17023_s0 + $0x498] sm:$0xff] }
 0x31d   :  { %v2927_v18 = vmax.f32 %v2896_v38, 0.0  ;;  %11202 = vmatpush3.msra.mxu0 %v14393_v61  ;;  %v10188_v42 = vpop.f32.mrf.mxu1  ;;  %10711 = vmatprep.mubr.msk.f32.mxu1 %vm12136_vm0, %v12135_v1 }
 0x31e   :  { %11203 = vmatprep.subr.mxu0 %v12135_v1  ;;  %v2900_v22 = vpop.f32.mrf.mxu0  ;;  %11143 = vmatmul.mubr.f32.gmra.mxu0 %v4192_v10 }
 0x31f   :  { %v2901_v39 = vadd.f32 %v14325_v54, %v2900_v22  ;;  %11204 = vmatpush3.msra.mxu0 %v14403_v21  ;;  %v1648_v55 = vpop.f32.mrf.mxu1  ;;  %10712 = vmatmul.mubr.msk.f32.gmra.mxu1 %vm322_vm1, %v2927_v18 }
 0x320   :  { %v14411_v52 = vadd.f32 %v1648_v55, %v14193_v17  ;;  %v10685_v50 = vpop.f32.mrf.mxu0  ;;  %11205 = vmatprep.subr.mxu0 %v12135_v1  ;;  %11145 = vmatprep.mubr.msk.f32.mxu0 %vm12136_vm0, %v12135_v1  ;;  %v4465_v55 = vld [vmem:[%s17023_s0 + $0x4a0] sm:$0xff] }
 0x321   :  { %v2928_v20 = vmax.f32 %v2901_v39, 0.0  ;;  %v10254_v33 = vpop.f32.mrf.mxu1  ;;  %11206 = vmatpush3.msra.mxu0 %v14419_v40  ;;  %10714 = vmatprep.mubr.msk.f32.mxu1 %vm12136_vm0, %v12135_v1 }
 0x322   :  { %v2905_v17 = vpop.f32.mrf.mxu0  ;;  %11146 = vmatmul.mubr.f32.gmra.mxu0 %v4193_v41  ;;  %11207 = vmatprep.subr.mxu0 %v12135_v1 }
 0x323   :  { %v2906_v0 = vadd.f32 %v14325_v54, %v2905_v17  ;;  %v1653_v9 = vpop.f32.mrf.mxu1  ;;  %10715 = vmatmul.mubr.msk.f32.gmra.mxu1 %vm322_vm1, %v2928_v20  ;;  %11208 = vmatpush3.msra.mxu0 %v14430_v43  ;;  %v3486_v17 = vld [vmem:[%s17026_s3 + $0xc8] sm:$0xff] }
 0x324   :  { %v14440_v5 = vadd.f32 %v1653_v9, %v14212_v28  ;;  %v10688_v29 = vpop.f32.mrf.mxu0  ;;  %11209 = vmatprep.subr.mxu0 %v12135_v1  ;;  %11211 = vmatprep.mubr.msk.f32.mxu0 %vm12136_vm0, %v12135_v1 }
 0x325   :  { %v2929_v58 = vmax.f32 %v2906_v0, 0.0  ;;  %v10257_v7 = vpop.f32.mrf.mxu1  ;;  %11210 = vmatpush3.msra.mxu0 %v14448_v60  ;;  %10717 = vmatprep.mubr.msk.f32.mxu1 %vm12136_vm0, %v12135_v1 }
 0x326   :  { %v2910_v28 = vpop.f32.mrf.mxu0  ;;  %10791 = vmatpush3.msra.mxu1 %v3209_v46  ;;  %11212 = vmatmul.mubr.f32.vlgmr.msra.gmra.mxu0 %v4461_v13  ;;  %v4466_v46 = vld [vmem:[%s17023_s0 + $0x4a8] sm:$0xff] }
 0x327   :  { %v2911_v4 = vadd.f32 %v14325_v54, %v2910_v28  ;;  %11269 = vmatprep.subr.mxu0 %v12135_v1  ;;  %v1658_v59 = vpop.f32.mrf.mxu1  ;;  %10718 = vmatmul.mubr.msk.f32.gmra.mxu1 %vm322_vm1, %v2929_v58 }
 0x328   :  { %v14460_v23 = vadd.f32 %v1658_v59, %v14227_v36  ;;  %11270 = vmatpush3.msra.mxu0 %v14232_v2  ;;  %v10691_v12 = vpop.f32.mrf.mxu0  ;;  %11214 = vmatprep.mubr.msk.f32.mxu0 %vm12136_vm0, %v12135_v1  ;;  %v4467_v59 = vld [vmem:[%s17023_s0 + $0x4b0] sm:$0xff] }
 0x329   :  { %v2930_v26 = vmax.f32 %v2911_v4, 0.0  ;;  %v10260_v53 = vpop.f32.mrf.mxu1  ;;  %11271 = vmatprep.subr.mxu0 %v12135_v1  ;;  %10720 = vmatprep.mubr.msk.f32.mxu1 %vm12136_vm0, %v12135_v1 }
 0x32a   :  { %v2915_v25 = vpop.f32.mrf.mxu0  ;;  %11215 = vmatmul.mubr.f32.gmra.mxu0 %v4462_v8  ;;  %10878 = vmatprep.subr.mxu1 %v12135_v1 }
 0x32b   :  { %v2916_v36 = vadd.f32 %v14325_v54, %v2915_v25  ;;  %11272 = vmatpush3.msra.mxu0 %v14245_v27  ;;  %v1663_v31 = vpop.f32.mrf.mxu1  ;;  %10721 = vmatmul.mubr.msk.f32.gmra.mxu1 %vm322_vm1, %v2930_v26 }
 0x32c   :  { %v14476_v14 = vadd.f32 %v1663_v31, %v14253_v19  ;;  %11273 = vmatprep.subr.mxu0 %v12135_v1  ;;  %v10694_v57 = vpop.f32.mrf.mxu0  ;;  %11217 = vmatprep.mubr.msk.f32.mxu0 %vm12136_vm0, %v12135_v1  ;;  %v4468_v31 = vld [vmem:[%s17023_s0 + $0x4b8] sm:$0xff] }
 0x32d   :  { %v2931_v56 = vmax.f32 %v2916_v36, 0.0  ;;  %11274 = vmatpush3.msra.mxu0 %v14261_v63  ;;  %v10263_v30 = vpop.f32.mrf.mxu1  ;;  %10723 = vmatprep.mubr.msk.f32.mxu1 %vm12136_vm0, %v12135_v1 }
 0x32e   :  { %11275 = vmatprep.subr.mxu0 %v12135_v1  ;;  %v2920_v15 = vpop.f32.mrf.mxu0  ;;  %11218 = vmatmul.mubr.f32.gmra.mxu0 %v4463_v3 }
 0x32f   :  { %v2921_v19 = vadd.f32 %v14325_v54, %v2920_v15  ;;  %11276 = vmatpush3.msra.mxu0 %v14271_v49  ;;  %v1668_v38 = vpop.f32.mrf.mxu1  ;;  %10724 = vmatmul.mubr.msk.f32.gmra.mxu1 %vm322_vm1, %v2931_v56 }
 0x330   :  { %v14492_v10 = vadd.f32 %v1668_v38, %v14279_v37  ;;  %11277 = vmatprep.subr.mxu0 %v12135_v1  ;;  %v10697_v48 = vpop.f32.mrf.mxu0  ;;  %11220 = vmatprep.mubr.msk.f32.mxu0 %vm12136_vm0, %v12135_v1  ;;  %v4469_v38 = vld [vmem:[%s17023_s0 + $0x4c0] sm:$0xff] }
 0x331   :  { %v2932_v18 = vmax.f32 %v2921_v19, 0.0  ;;  %11278 = vmatpush3.msra.mxu0 %v14287_v47  ;;  %v10266_v42 = vpop.f32.mrf.mxu1  ;;  %10726 = vmatprep.mubr.msk.f32.mxu1 %vm12136_vm0, %v12135_v1 }
 0x332   :  { %v3156_v22 = vpop.f32.mrf.mxu0  ;;  %11221 = vmatmul.mubr.f32.gmra.mxu0 %v4464_v16  ;;  %11279 = vmatprep.subr.mxu0 %v12135_v1 }
 0x333   :  { %v3157_v37 = vadd.f32 %v14325_v54, %v3156_v22  ;;  %v1673_v39 = vpop.f32.mrf.mxu1  ;;  %10727 = vmatmul.mubr.msk.f32.gmra.mxu1 %vm322_vm1, %v2932_v18  ;;  %11280 = vmatpush3.msra.mxu0 %v14298_v45 }
 0x334   :  { %v14508_v41 = vadd.f32 %v1673_v39, %v14305_v6  ;;  %v10763_v50 = vpop.f32.mrf.mxu0  ;;  %11281 = vmatprep.subr.mxu0 %v12135_v1  ;;  %11223 = vmatprep.mubr.msk.f32.mxu0 %vm12136_vm0, %v12135_v1  ;;  %v3485_v39 = vld [vmem:[%s17026_s3 + $0xc0] sm:$0xff] }
 0x335   :  { %v3200_v20 = vmax.f32 %v3157_v37, 0.0  ;;  %v10269_v33 = vpop.f32.mrf.mxu1  ;;  %11282 = vmatpush3.msra.mxu0 %v14313_v32  ;;  %10792 = vmatprep.mubr.msk.f32.mxu1 %vm12136_vm0, %v12135_v1 }
 0x336   :  { %v3161_v0 = vpop.f32.mrf.mxu0  ;;  %11224 = vmatmul.mubr.f32.gmra.mxu0 %v4465_v55  ;;  %11283 = vmatprep.subr.mxu0 %v12135_v1  ;;  %v4737_v55 = vld [vmem:[%s17023_s0 + $0x4c8] sm:$0xff] }
 0x337   :  { %v3162_v6 = vadd.f32 %v14325_v54, %v3161_v0  ;;  %v1678_v9 = vpop.f32.mrf.mxu1  ;;  %10793 = vmatmul.mubr.msk.f32.vlgmr.msra.gmra.mxu1 %vm322_vm1, %v3200_v20  ;;  %11284 = vmatpush3.msra.mxu0 %v14332_v62 }
 0x338   :  { %v14527_v13 = vadd.f32 %v1678_v9, %v14339_v11  ;;  %v10766_v29 = vpop.f32.mrf.mxu0  ;;  %10879 = vmatpush3.msra.mxu1 %v3486_v17  ;;  %11285 = vmatprep.subr.mxu0 %v12135_v1  ;;  %v4738_v9 = vld [vmem:[%s17023_s0 + $0x4d0] sm:$0xff] }
 0x339   :  { %v3201_v58 = vmax.f32 %v3162_v6, 0.0  ;;  %v10272_v7 = vpop.f32.mrf.mxu1  ;;  %11226 = vmatprep.mubr.msk.f32.mxu0 %vm12136_vm0, %v12135_v1  ;;  %11286 = vmatpush3.msra.mxu0 %v14347_v44 }
 0x33a   :  { %v3166_v28 = vpop.f32.mrf.mxu0  ;;  %10795 = vmatprep.mubr.msk.f32.mxu1 %vm12136_vm0, %v12135_v1  ;;  %11227 = vmatmul.mubr.f32.gmra.mxu0 %v4466_v46 }
 0x33b   :  { %v3167_v4 = vadd.f32 %v14325_v54, %v3166_v28  ;;  %v1683_v11 = vpop.f32.mrf.mxu1  ;;  %10796 = vmatmul.mubr.msk.f32.gmra.mxu1 %vm322_vm1, %v3201_v58  ;;  %11287 = vmatprep.subr.mxu0 %v12135_v1 }
 0x33c   :  { %v14542_v8 = vadd.f32 %v1683_v11, %v14359_v24  ;;  %v10769_v12 = vpop.f32.mrf.mxu0  ;;  %11288 = vmatpush3.msra.mxu0 %v14364_v35  ;;  %11229 = vmatprep.mubr.msk.f32.mxu0 %vm12136_vm0, %v12135_v1  ;;  %v4739_v11 = vld [vmem:[%s17023_s0 + $0x4d8] sm:$0xff] }
 0x33d   :  { %v3202_v26 = vmax.f32 %v3167_v4, 0.0  ;;  %v10275_v53 = vpop.f32.mrf.mxu1  ;;  %11289 = vmatprep.subr.mxu0 %v12135_v1  ;;  %10798 = vmatprep.mubr.msk.f32.mxu1 %vm12136_vm0, %v12135_v1 }
 0x33e   :  { %v3171_v25 = vpop.f32.mrf.mxu0  ;;  %11230 = vmatmul.mubr.f32.gmra.mxu0 %v4467_v59  ;;  %10880 = vmatprep.subr.mxu1 %v12135_v1 }
 0x33f   :  { %v3172_v24 = vadd.f32 %v14325_v54, %v3171_v25  ;;  %11290 = vmatpush3.msra.mxu0 %v14377_v51  ;;  %v1688_v36 = vpop.f32.mrf.mxu1  ;;  %10799 = vmatmul.mubr.msk.f32.gmra.mxu1 %vm322_vm1, %v3202_v26 }
 0x340   :  { %v14558_v3 = vadd.f32 %v1688_v36, %v14385_v34  ;;  %11291 = vmatprep.subr.mxu0 %v12135_v1  ;;  %v10772_v57 = vpop.f32.mrf.mxu0  ;;  %11232 = vmatprep.mubr.msk.f32.mxu0 %vm12136_vm0, %v12135_v1  ;;  %v4740_v36 = vld [vmem:[%s17023_s0 + $0x4e0] sm:$0xff] }
 0x341   :  { %v3203_v56 = vmax.f32 %v3172_v24, 0.0  ;;  %11292 = vmatpush3.msra.mxu0 %v14393_v61  ;;  %v10278_v30 = vpop.f32.mrf.mxu1  ;;  %10801 = vmatprep.mubr.msk.f32.mxu1 %vm12136_vm0, %v12135_v1 }
 0x342   :  { %11293 = vmatprep.subr.mxu0 %v12135_v1  ;;  %v3176_v15 = vpop.f32.mrf.mxu0  ;;  %11233 = vmatmul.mubr.f32.gmra.mxu0 %v4468_v31 }
 0x343   :  { %v3177_v34 = vadd.f32 %v14325_v54, %v3176_v15  ;;  %11294 = vmatpush3.msra.mxu0 %v14403_v21  ;;  %v1924_v19 = vpop.f32.mrf.mxu1  ;;  %10802 = vmatmul.mubr.msk.f32.gmra.mxu1 %vm322_vm1, %v3203_v56 }
 0x344   :  { %v14574_v16 = vadd.f32 %v1924_v19, %v14411_v52  ;;  %v10775_v48 = vpop.f32.mrf.mxu0  ;;  %11295 = vmatprep.subr.mxu0 %v12135_v1  ;;  %11235 = vmatprep.mubr.msk.f32.mxu0 %vm12136_vm0, %v12135_v1  ;;  %v4741_v19 = vld [vmem:[%s17023_s0 + $0x4e8] sm:$0xff] }
 0x345   :  { %v3204_v18 = vmax.f32 %v3177_v34, 0.0  ;;  %v10344_v42 = vpop.f32.mrf.mxu1  ;;  %11296 = vmatpush3.msra.mxu0 %v14419_v40  ;;  %10804 = vmatprep.mubr.msk.f32.mxu1 %vm12136_vm0, %v12135_v1 }
 0x346   :  { %v3181_v22 = vpop.f32.mrf.mxu0  ;;  %11236 = vmatmul.mubr.f32.gmra.mxu0 %v4469_v38  ;;  %11297 = vmatprep.subr.mxu0 %v12135_v1 }
 0x347   :  { %v3182_v52 = vadd.f32 %v14325_v54, %v3181_v22  ;;  %v1929_v37 = vpop.f32.mrf.mxu1  ;;  %10805 = vmatmul.mubr.msk.f32.gmra.mxu1 %vm322_vm1, %v3204_v18  ;;  %11298 = vmatpush3.msra.mxu0 %v14430_v43  ;;  %v3762_v22 = vld [vmem:[%s17026_s3 + $0xd8] sm:$0xff] }
 0x348   :  { %v14593_v50 = vadd.f32 %v1929_v37, %v14440_v5  ;;  %v10778_v20 = vpop.f32.mrf.mxu0  ;;  %11299 = vmatprep.subr.mxu0 %v12135_v1  ;;  %11301 = vmatprep.mubr.msk.f32.mxu0 %vm12136_vm0, %v12135_v1 }
 0x349   :  { %v3205_v33 = vmax.f32 %v3182_v52, 0.0  ;;  %v10347_v17 = vpop.f32.mrf.mxu1  ;;  %11300 = vmatpush3.msra.mxu0 %v14448_v60  ;;  %10807 = vmatprep.mubr.msk.f32.mxu1 %vm12136_vm0, %v12135_v1 }
 0x34a   :  { %v3186_v0 = vpop.f32.mrf.mxu0  ;;  %10881 = vmatpush3.msra.mxu1 %v3485_v39  ;;  %11302 = vmatmul.mubr.f32.vlgmr.msra.gmra.mxu0 %v4737_v55  ;;  %v4742_v39 = vld [vmem:[%s17023_s0 + $0x4f0] sm:$0xff] }
 0x34b   :  { %v3187_v6 = vadd.f32 %v14325_v54, %v3186_v0  ;;  %11359 = vmatprep.subr.mxu0 %v12135_v1  ;;  %v1934_v5 = vpop.f32.mrf.mxu1  ;;  %10808 = vmatmul.mubr.msk.f32.gmra.mxu1 %vm322_vm1, %v3205_v33 }
 0x34c   :  { %v14608_v46 = vadd.f32 %v1934_v5, %v14460_v23  ;;  %11360 = vmatpush3.msra.mxu0 %v14232_v2  ;;  %v10781_v29 = vpop.f32.mrf.mxu0  ;;  %11304 = vmatprep.mubr.msk.f32.mxu0 %vm12136_vm0, %v12135_v1  ;;  %v4743_v5 = vld [vmem:[%s17023_s0 + $0x4f8] sm:$0xff] }
 0x34d   :  { %v3206_v58 = vmax.f32 %v3187_v6, 0.0  ;;  %v10350_v7 = vpop.f32.mrf.mxu1  ;;  %11361 = vmatprep.subr.mxu0 %v12135_v1  ;;  %10810 = vmatprep.mubr.msk.f32.mxu1 %vm12136_vm0, %v12135_v1 }
 0x34e   :  { %v3191_v28 = vpop.f32.mrf.mxu0  ;;  %11305 = vmatmul.mubr.f32.gmra.mxu0 %v4738_v9  ;;  %10968 = vmatprep.subr.mxu1 %v12135_v1 }
 0x34f   :  { %v3192_v23 = vadd.f32 %v14325_v54, %v3191_v28  ;;  %11362 = vmatpush3.msra.mxu0 %v14245_v27  ;;  %v1939_v4 = vpop.f32.mrf.mxu1  ;;  %10811 = vmatmul.mubr.msk.f32.gmra.mxu1 %vm322_vm1, %v3206_v58 }
 0x350   :  { %v14624_v59 = vadd.f32 %v1939_v4, %v14476_v14  ;;  %11363 = vmatprep.subr.mxu0 %v12135_v1  ;;  %v10784_v12 = vpop.f32.mrf.mxu0  ;;  %11307 = vmatprep.mubr.msk.f32.mxu0 %vm12136_vm0, %v12135_v1  ;;  %v4744_v4 = vld [vmem:[%s17023_s0 + $0x500] sm:$0xff] }
 0x351   :  { %v3207_v26 = vmax.f32 %v3192_v23, 0.0  ;;  %11364 = vmatpush3.msra.mxu0 %v14261_v63  ;;  %v10353_v53 = vpop.f32.mrf.mxu1  ;;  %10813 = vmatprep.mubr.msk.f32.mxu1 %vm12136_vm0, %v12135_v1 }
 0x352   :  { %11365 = vmatprep.subr.mxu0 %v12135_v1  ;;  %v3196_v25 = vpop.f32.mrf.mxu0  ;;  %11308 = vmatmul.mubr.f32.gmra.mxu0 %v4739_v11 }
 0x353   :  { %v3197_v14 = vadd.f32 %v14325_v54, %v3196_v25  ;;  %11366 = vmatpush3.msra.mxu0 %v14271_v49  ;;  %v1944_v24 = vpop.f32.mrf.mxu1  ;;  %10814 = vmatmul.mubr.msk.f32.gmra.mxu1 %vm322_vm1, %v3207_v26 }
 0x354   :  { %v14640_v31 = vadd.f32 %v1944_v24, %v14492_v10  ;;  %11367 = vmatprep.subr.mxu0 %v12135_v1  ;;  %v10787_v57 = vpop.f32.mrf.mxu0  ;;  %11310 = vmatprep.mubr.msk.f32.mxu0 %vm12136_vm0, %v12135_v1  ;;  %v4745_v24 = vld [vmem:[%s17023_s0 + $0x508] sm:$0xff] }
 0x355   :  { %v3208_v56 = vmax.f32 %v3197_v14, 0.0  ;;  %11368 = vmatpush3.msra.mxu0 %v14287_v47  ;;  %v10356_v30 = vpop.f32.mrf.mxu1  ;;  %10816 = vmatprep.mubr.msk.f32.mxu1 %vm12136_vm0, %v12135_v1 }
 0x356   :  { %v3432_v15 = vpop.f32.mrf.mxu0  ;;  %11311 = vmatmul.mubr.f32.gmra.mxu0 %v4740_v36  ;;  %11369 = vmatprep.subr.mxu0 %v12135_v1 }
 0x357   :  { %v3433_v10 = vadd.f32 %v14325_v54, %v3432_v15  ;;  %v1949_v34 = vpop.f32.mrf.mxu1  ;;  %10817 = vmatmul.mubr.msk.f32.gmra.mxu1 %vm322_vm1, %v3208_v56  ;;  %11370 = vmatpush3.msra.mxu0 %v14298_v45 }
 0x358   :  { %v14656_v38 = vadd.f32 %v1949_v34, %v14508_v41  ;;  %v10853_v48 = vpop.f32.mrf.mxu0  ;;  %11371 = vmatprep.subr.mxu0 %v12135_v1  ;;  %11313 = vmatprep.mubr.msk.f32.mxu0 %vm12136_vm0, %v12135_v1  ;;  %v3761_v34 = vld [vmem:[%s17026_s3 + $0xd0] sm:$0xff] }
 0x359   :  { %v3476_v18 = vmax.f32 %v3433_v10, 0.0  ;;  %v10359_v42 = vpop.f32.mrf.mxu1  ;;  %11372 = vmatpush3.msra.mxu0 %v14313_v32  ;;  %10882 = vmatprep.mubr.msk.f32.mxu1 %vm12136_vm0, %v12135_v1 }
 0x35a   :  { %v3437_v52 = vpop.f32.mrf.mxu0  ;;  %11314 = vmatmul.mubr.f32.gmra.mxu0 %v4741_v19  ;;  %11373 = vmatprep.subr.mxu0 %v12135_v1  ;;  %v5013_v19 = vld [vmem:[%s17023_s0 + $0x510] sm:$0xff] }
 0x35b   :  { %v3438_v41 = vadd.f32 %v14325_v54, %v3437_v52  ;;  %v1954_v37 = vpop.f32.mrf.mxu1  ;;  %10883 = vmatmul.mubr.msk.f32.vlgmr.msra.gmra.mxu1 %vm322_vm1, %v3476_v18  ;;  %11374 = vmatpush3.msra.mxu0 %v14332_v62 }
 0x35c   :  { %v14675_v55 = vadd.f32 %v1954_v37, %v14527_v13  ;;  %v10856_v20 = vpop.f32.mrf.mxu0  ;;  %10969 = vmatpush3.msra.mxu1 %v3762_v22  ;;  %11375 = vmatprep.subr.mxu0 %v12135_v1  ;;  %v5014_v37 = vld [vmem:[%s17023_s0 + $0x518] sm:$0xff] }
 0x35d   :  { %v3477_v33 = vmax.f32 %v3438_v41, 0.0  ;;  %v10362_v17 = vpop.f32.mrf.mxu1  ;;  %11316 = vmatprep.mubr.msk.f32.mxu0 %vm12136_vm0, %v12135_v1  ;;  %11376 = vmatpush3.msra.mxu0 %v14347_v44 }
 0x35e   :  { %v3442_v0 = vpop.f32.mrf.mxu0  ;;  %10885 = vmatprep.mubr.msk.f32.mxu1 %vm12136_vm0, %v12135_v1  ;;  %11317 = vmatmul.mubr.f32.gmra.mxu0 %v4742_v39 }
 0x35f   :  { %v3443_v6 = vadd.f32 %v14325_v54, %v3442_v0  ;;  %v1959_v13 = vpop.f32.mrf.mxu1  ;;  %10886 = vmatmul.mubr.msk.f32.gmra.mxu1 %vm322_vm1, %v3477_v33  ;;  %11377 = vmatprep.subr.mxu0 %v12135_v1 }
 0x360   :  { %v14690_v9 = vadd.f32 %v1959_v13, %v14542_v8  ;;  %v10859_v29 = vpop.f32.mrf.mxu0  ;;  %11378 = vmatpush3.msra.mxu0 %v14364_v35  ;;  %11319 = vmatprep.mubr.msk.f32.mxu0 %vm12136_vm0, %v12135_v1 }
 0x361   :  { %v3478_v58 = vmax.f32 %v3443_v6, 0.0  ;;  %v10365_v7 = vpop.f32.mrf.mxu1  ;;  %11379 = vmatprep.subr.mxu0 %v12135_v1  ;;  %10888 = vmatprep.mubr.msk.f32.mxu1 %vm12136_vm0, %v12135_v1  ;;  %v5015_v6 = vld [vmem:[%s17023_s0 + $0x520] sm:$0xff] }
 0x362   :  { %v3447_v28 = vpop.f32.mrf.mxu0  ;;  %11320 = vmatmul.mubr.f32.gmra.mxu0 %v4743_v5  ;;  %10970 = vmatprep.subr.mxu1 %v12135_v1 }
 0x363   :  { %v3448_v8 = vadd.f32 %v14325_v54, %v3447_v28  ;;  %11380 = vmatpush3.msra.mxu0 %v14377_v51  ;;  %v1964_v23 = vpop.f32.mrf.mxu1  ;;  %10889 = vmatmul.mubr.msk.f32.gmra.mxu1 %vm322_vm1, %v3478_v58  ;;  %v5016_v28 = vld [vmem:[%s17023_s0 + $0x528] sm:$0xff] }
 0x364   :  { %v14706_v11 = vadd.f32 %v1964_v23, %v14558_v3  ;;  %11381 = vmatprep.subr.mxu0 %v12135_v1  ;;  %v10862_v12 = vpop.f32.mrf.mxu0  ;;  %11322 = vmatprep.mubr.msk.f32.mxu0 %vm12136_vm0, %v12135_v1 }
 0x365   :  { %v3479_v26 = vmax.f32 %v3448_v8, 0.0  ;;  %11382 = vmatpush3.msra.mxu0 %v14393_v61  ;;  %v10368_v53 = vpop.f32.mrf.mxu1  ;;  %10891 = vmatprep.mubr.msk.f32.mxu1 %vm12136_vm0, %v12135_v1 }
 0x366   :  { %11383 = vmatprep.subr.mxu0 %v12135_v1  ;;  %v3452_v25 = vpop.f32.mrf.mxu0  ;;  %11323 = vmatmul.mubr.f32.gmra.mxu0 %v4744_v4 }
 0x367   :  { %v3453_v3 = vadd.f32 %v14325_v54, %v3452_v25  ;;  %11384 = vmatpush3.msra.mxu0 %v14403_v21  ;;  %v2200_v14 = vpop.f32.mrf.mxu1  ;;  %10892 = vmatmul.mubr.msk.f32.gmra.mxu1 %vm322_vm1, %v3479_v26  ;;  %v5017_v26 = vld [vmem:[%s17023_s0 + $0x530] sm:$0xff] }
 0x368   :  { %v14722_v36 = vadd.f32 %v2200_v14, %v14574_v16  ;;  %v10865_v57 = vpop.f32.mrf.mxu0  ;;  %11385 = vmatprep.subr.mxu0 %v12135_v1  ;;  %11325 = vmatprep.mubr.msk.f32.mxu0 %vm12136_vm0, %v12135_v1 }
 0x369   :  { %v3480_v56 = vmax.f32 %v3453_v3, 0.0  ;;  %v10434_v30 = vpop.f32.mrf.mxu1  ;;  %11386 = vmatpush3.msra.mxu0 %v14419_v40  ;;  %10894 = vmatprep.mubr.msk.f32.mxu1 %vm12136_vm0, %v12135_v1 }
 0x36a   :  { %v3457_v15 = vpop.f32.mrf.mxu0  ;;  %11326 = vmatmul.mubr.f32.gmra.mxu0 %v4745_v24  ;;  %11387 = vmatprep.subr.mxu0 %v12135_v1 }
 0x36b   :  { %v3458_v16 = vadd.f32 %v14325_v54, %v3457_v15  ;;  %v2205_v10 = vpop.f32.mrf.mxu1  ;;  %10895 = vmatmul.mubr.msk.f32.gmra.mxu1 %vm322_vm1, %v3480_v56  ;;  %11388 = vmatpush3.msra.mxu0 %v14430_v43 }
 0x36c   :  { %v14741_v48 = vadd.f32 %v2205_v10, %v14593_v50  ;;  %v10868_v18 = vpop.f32.mrf.mxu0  ;;  %11389 = vmatprep.subr.mxu0 %v12135_v1  ;;  %11391 = vmatprep.mubr.msk.f32.mxu0 %vm12136_vm0, %v12135_v1  ;;  %v5019_v10 = vld [vmem:[%s17023_s0 + $0x540] sm:$0xff] }
 0x36d   :  { %v3481_v42 = vmax.f32 %v3458_v16, 0.0  ;;  %v10437_v22 = vpop.f32.mrf.mxu1  ;;  %11390 = vmatpush3.msra.mxu0 %v14448_v60  ;;  %10897 = vmatprep.mubr.msk.f32.mxu1 %vm12136_vm0, %v12135_v1 }
 0x36e   :  { %v3462_v52 = vpop.f32.mrf.mxu0  ;;  %10971 = vmatpush3.msra.mxu1 %v3761_v34  ;;  %11392 = vmatmul.mubr.f32.vlgmr.msra.gmra.mxu0 %v5013_v19 }
 0x36f   :  { %v3463_v41 = vadd.f32 %v14325_v54, %v3462_v52  ;;  %11449 = vmatprep.subr.mxu0 %v12135_v1  ;;  %v2210_v50 = vpop.f32.mrf.mxu1  ;;  %10898 = vmatmul.mubr.msk.f32.gmra.mxu1 %vm322_vm1, %v3481_v42 }
 0x370   :  { %v14756_v39 = vadd.f32 %v2210_v50, %v14608_v46  ;;  %11450 = vmatpush3.msra.mxu0 %v14232_v2  ;;  %v10871_v20 = vpop.f32.mrf.mxu0  ;;  %11394 = vmatprep.mubr.msk.f32.mxu0 %vm12136_vm0, %v12135_v1 }
 0x371   :  { %v3482_v33 = vmax.f32 %v3463_v41, 0.0  ;;  %v10440_v17 = vpop.f32.mrf.mxu1  ;;  %11451 = vmatprep.subr.mxu0 %v12135_v1  ;;  %10900 = vmatprep.mubr.msk.f32.mxu1 %vm12136_vm0, %v12135_v1 }
 0x372   :  { %v3467_v0 = vpop.f32.mrf.mxu0  ;;  %11395 = vmatmul.mubr.f32.gmra.mxu0 %v5014_v37  ;;  %11058 = vmatprep.subr.mxu1 %v12135_v1 }
 0x373   :  { %v3468_v46 = vadd.f32 %v14325_v54, %v3467_v0  ;;  %11452 = vmatpush3.msra.mxu0 %v14245_v27  ;;  %v2215_v2 = vpop.f32.mrf.mxu1  ;;  %10901 = vmatmul.mubr.msk.f32.gmra.mxu1 %vm322_vm1, %v3482_v33  ;;  %v5021_v33 = vld [vmem:[%s17023_s0 + $0x550] sm:$0xff] }
 0x374   :  { %v14772_v13 = vadd.f32 %v2215_v2, %v14624_v59  ;;  %11453 = vmatprep.subr.mxu0 %v12135_v1  ;;  %v10874_v5 = vpop.f32.mrf.mxu0  ;;  %11397 = vmatprep.mubr.msk.f32.mxu0 %vm12136_vm0, %v12135_v1 }
 0x375   :  { %v3483_v29 = vmax.f32 %v3468_v46, 0.0  ;;  %11454 = vmatpush3.msra.mxu0 %v14261_v63  ;;  %v10443_v27 = vpop.f32.mrf.mxu1  ;;  %10903 = vmatprep.mubr.msk.f32.mxu1 %vm12136_vm0, %v12135_v1 }
 0x376   :  { %11455 = vmatprep.subr.mxu0 %v12135_v1  ;;  %v3472_v58 = vpop.f32.mrf.mxu0  ;;  %11398 = vmatmul.mubr.f32.gmra.mxu0 %v5015_v6  ;;  %v4037_v6 = vld [vmem:[%s17026_s3 + $0xe0] sm:$0xff] }
 0x377   :  { %v3473_v59 = vadd.f32 %v14325_v54, %v3472_v58  ;;  %11456 = vmatpush3.msra.mxu0 %v14271_v49  ;;  %v2220_v7 = vpop.f32.mrf.mxu1  ;;  %10904 = vmatmul.mubr.msk.f32.gmra.mxu1 %vm322_vm1, %v3483_v29 }
 0x378   :  { %v14788_v63 = vadd.f32 %v2220_v7, %v14640_v31  ;;  %11457 = vmatprep.subr.mxu0 %v12135_v1  ;;  %v10877_v8 = vpop.f32.mrf.mxu0  ;;  %11400 = vmatprep.mubr.msk.f32.mxu0 %vm12136_vm0, %v12135_v1 }
 0x379   :  { %v3484_v23 = vmax.f32 %v3473_v59, 0.0  ;;  %11458 = vmatpush3.msra.mxu0 %v14287_v47  ;;  %v10446_v49 = vpop.f32.mrf.mxu1  ;;  %10906 = vmatprep.mubr.msk.f32.mxu1 %vm12136_vm0, %v12135_v1 }
 0x37a   :  { %v3708_v4 = vpop.f32.mrf.mxu0  ;;  %11401 = vmatmul.mubr.f32.gmra.mxu0 %v5016_v28  ;;  %11459 = vmatprep.subr.mxu0 %v12135_v1  ;;  %v14914_v28 = vld [vmem:[%s17024_s1 + $0x78] sm:$0xff] }
 0x37b   :  { %v3709_v31 = vadd.f32 %v14325_v54, %v3708_v4  ;;  %v2225_v12 = vpop.f32.mrf.mxu1  ;;  %10907 = vmatmul.mubr.msk.f32.gmra.mxu1 %vm322_vm1, %v3484_v23  ;;  %11460 = vmatpush3.msra.mxu0 %v14298_v45  ;;  %v4038_v45 = vld [vmem:[%s17026_s3 + $0xe8] sm:$0xff] }
 0x37c   :  { %v14804_v47 = vadd.f32 %v2225_v12, %v14656_v38  ;;  %v10943_v53 = vpop.f32.mrf.mxu0  ;;  %11461 = vmatprep.subr.mxu0 %v12135_v1  ;;  %11403 = vmatprep.mubr.msk.f32.mxu0 %vm12136_vm0, %v12135_v1 }
 0x37d   :  { %v3752_v25 = vmax.f32 %v3709_v31, 0.0  ;;  %v10449_v3 = vpop.f32.mrf.mxu1  ;;  %11462 = vmatpush3.msra.mxu0 %v14313_v32  ;;  %10972 = vmatprep.mubr.msk.f32.mxu1 %vm12136_vm0, %v12135_v1  ;;  %v5018_v32 = vld [vmem:[%s17023_s0 + $0x538] sm:$0xff]  ;;  %v14927_v31 = vld [vmem:[%s17024_s1 + $0x70] sm:$0xff] }
 0x37e   :  { %v3713_v14 = vpop.f32.mrf.mxu0  ;;  %11404 = vmatmul.mubr.f32.gmra.mxu0 %v5017_v26  ;;  %11463 = vmatprep.subr.mxu0 %v12135_v1  ;;  %v5291_v26 = vld [vmem:[%s17023_s0 + $0x568] sm:$0xff] }
 0x37f   :  { %v3714_v38 = vadd.f32 %v14325_v54, %v3713_v14  ;;  %v2230_v24 = vpop.f32.mrf.mxu1  ;;  %10973 = vmatmul.mubr.msk.f32.vlgmr.msra.gmra.mxu1 %vm322_vm1, %v3752_v25  ;;  %11464 = vmatpush3.msra.mxu0 %v14332_v62 }
 0x380   :  { %v14823_v57 = vadd.f32 %v2230_v24, %v14675_v55  ;;  %v10946_v56 = vpop.f32.mrf.mxu0  ;;  %11059 = vmatpush3.msra.mxu1 %v4038_v45  ;;  %11465 = vmatprep.subr.mxu0 %v12135_v1  ;;  %v14943_v45 = vld [vmem:[%s17024_s1 + $0x68] sm:$0xff]  ;;  %v14953_v24 = vld [vmem:[%s17024_s1 + $0x60] sm:$0xff] }
 0x381   :  { %v3753_v30 = vmax.f32 %v3714_v38, 0.0  ;;  %v10452_v15 = vpop.f32.mrf.mxu1  ;;  %11406 = vmatprep.mubr.msk.f32.mxu0 %vm12136_vm0, %v12135_v1  ;;  %11466 = vmatpush3.msra.mxu0 %v14347_v44  ;;  %v5292_v56 = vld [vmem:[%s17023_s0 + $0x570] sm:$0xff] }
 0x382   :  { %v3718_v16 = vpop.f32.mrf.mxu0  ;;  %10975 = vmatprep.mubr.msk.f32.mxu1 %vm12136_vm0, %v12135_v1  ;;  %11407 = vmatmul.mubr.f32.gmra.mxu0 %v5018_v32 }
 0x383   :  { %v3719_v62 = vadd.f32 %v14325_v54, %v3718_v16  ;;  %v2235_v55 = vpop.f32.mrf.mxu1  ;;  %10976 = vmatmul.mubr.msk.f32.gmra.mxu1 %vm322_vm1, %v3753_v30  ;;  %11467 = vmatprep.subr.mxu0 %v12135_v1 }
 0x384   :  { %v14838_v34 = vadd.f32 %v2235_v55, %v14690_v9  ;;  %v10949_v44 = vpop.f32.mrf.mxu0  ;;  %11468 = vmatpush3.msra.mxu0 %v14364_v35  ;;  %11409 = vmatprep.mubr.msk.f32.mxu0 %vm12136_vm0, %v12135_v1  ;;  %v5020_v35 = vld [vmem:[%s17023_s0 + $0x548] sm:$0xff] }
 0x385   :  { %v3754_v19 = vmax.f32 %v3719_v62, 0.0  ;;  %v10455_v18 = vpop.f32.mrf.mxu1  ;;  %11469 = vmatprep.subr.mxu0 %v12135_v1  ;;  %10978 = vmatprep.mubr.msk.f32.mxu1 %vm12136_vm0, %v12135_v1  ;;  %v14969_v62 = vld [vmem:[%s17024_s1 + $0x58] sm:$0xff] }
 0x386   :  { %v3723_v42 = vpop.f32.mrf.mxu0  ;;  %11410 = vmatmul.mubr.f32.gmra.mxu0 %v5019_v10  ;;  %11060 = vmatprep.subr.mxu1 %v12135_v1  ;;  %v5293_v18 = vld [vmem:[%s17023_s0 + $0x578] sm:$0xff] }
 0x387   :  { %v3724_v9 = vadd.f32 %v14325_v54, %v3723_v42  ;;  %11470 = vmatpush3.msra.mxu0 %v14377_v51  ;;  %v2240_v22 = vpop.f32.mrf.mxu1  ;;  %10979 = vmatmul.mubr.msk.f32.gmra.mxu1 %vm322_vm1, %v3754_v19  ;;  %v14980_v19 = vld [vmem:[%s17024_s1 + $0x50] sm:$0xff] }
 0x388   :  { %v14854_v52 = vadd.f32 %v2240_v22, %v14706_v11  ;;  %11471 = vmatprep.subr.mxu0 %v12135_v1  ;;  %v10952_v41 = vpop.f32.mrf.mxu0  ;;  %11412 = vmatprep.mubr.msk.f32.mxu0 %vm12136_vm0, %v12135_v1 }
 0x389   :  { %v3755_v50 = vmax.f32 %v3724_v9, 0.0  ;;  %11472 = vmatpush3.msra.mxu0 %v14393_v61  ;;  %v10458_v51 = vpop.f32.mrf.mxu1  ;;  %10981 = vmatprep.mubr.msk.f32.mxu1 %vm12136_vm0, %v12135_v1  ;;  %v14995_v41 = vld [vmem:[%s17024_s1 + $0x48] sm:$0xff] }
 0x38a   :  { %11473 = vmatprep.subr.mxu0 %v12135_v1  ;;  %v3728_v37 = vpop.f32.mrf.mxu0  ;;  %11413 = vmatmul.mubr.f32.gmra.mxu0 %v5020_v35 }
 0x38b   :  { %v3729_v11 = vadd.f32 %v14325_v54, %v3728_v37  ;;  %11474 = vmatpush3.msra.mxu0 %v14403_v21  ;;  %v2476_v20 = vpop.f32.mrf.mxu1  ;;  %10982 = vmatmul.mubr.msk.f32.gmra.mxu1 %vm322_vm1, %v3755_v50 }
 0x38c   :  { %v14870_v61 = vadd.f32 %v2476_v20, %v14722_v36  ;;  %v10955_v17 = vpop.f32.mrf.mxu0  ;;  %11475 = vmatprep.subr.mxu0 %v12135_v1  ;;  %11415 = vmatprep.mubr.msk.f32.mxu0 %vm12136_vm0, %v12135_v1  ;;  %v5294_v20 = vld [vmem:[%s17023_s0 + $0x580] sm:$0xff] }
 0x38d   :  { %v3756_v0 = vmax.f32 %v3729_v11, 0.0  ;;  %v10524_v46 = vpop.f32.mrf.mxu1  ;;  %11476 = vmatpush3.msra.mxu0 %v14419_v40  ;;  %10984 = vmatprep.mubr.msk.f32.mxu1 %vm12136_vm0, %v12135_v1  ;;  %v5289_v40 = vld [vmem:[%s17023_s0 + $0x558] sm:$0xff]  ;;  %v15009_v11 = vld [vmem:[%s17024_s1 + $0x40] sm:$0xff] }
 0x38e   :  { %v3733_v21 = vpop.f32.mrf.mxu0  ;;  %11416 = vmatmul.mubr.f32.gmra.mxu0 %v5021_v33  ;;  %11477 = vmatprep.subr.mxu0 %v12135_v1 }
 0x38f   :  { %v3734_v36 = vadd.f32 %v14325_v54, %v3733_v21  ;;  %v2481_v2 = vpop.f32.mrf.mxu1  ;;  %10985 = vmatmul.mubr.msk.f32.gmra.mxu1 %vm322_vm1, %v3756_v0  ;;  %11478 = vmatpush3.msra.mxu0 %v14430_v43  ;;  %v15024_v21 = vld [vmem:[%s17024_s1 + $0x38] sm:$0xff] }
 0x390   :  { %v14889_v5 = vadd.f32 %v2481_v2, %v14741_v48  ;;  %v10958_v29 = vpop.f32.mrf.mxu0  ;;  %11479 = vmatprep.subr.mxu0 %v12135_v1  ;;  %11481 = vmatprep.mubr.msk.f32.mxu0 %vm12136_vm0, %v12135_v1  ;;  %v14900_v48 = vld [vmem:[%s17025_s2] ss:$0 sm:$0xff] }
 0x391   :  { %v3757_v54 = vmax.f32 %v3734_v36, 0.0  ;;  %v10527_v27 = vpop.f32.mrf.mxu1  ;;  %11480 = vmatpush3.msra.mxu0 %v14448_v60  ;;  %10987 = vmatprep.mubr.msk.f32.mxu1 %vm12136_vm0, %v12135_v1  ;;  %v5290_v60 = vld [vmem:[%s17023_s0 + $0x560] sm:$0xff] }
 0x392   :  { %v3738_v43 = vpop.f32.mrf.mxu0  ;;  %11061 = vmatpush3.msra.mxu1 %v4037_v6  ;;  %11482 = vmatmul.mubr.f32.vlgmr.msra.gmra.mxu0 %v5289_v40  ;;  %v5295_v6 = vld [vmem:[%s17023_s0 + $0x588] sm:$0xff] }
 0x393   :  { %v3739_v58 = vadd.f32 %v14900_v48, %v3738_v43  ;;  %11539 = vmatprep.subr.mxu0 %v12135_v1  ;;  %v2486_v59 = vpop.f32.mrf.mxu1  ;;  %10988 = vmatmul.mubr.msk.f32.gmra.mxu1 %vm322_vm1, %v3757_v54  ;;  %v15041_v54 = vld [vmem:[%s17024_s1 + $0x30] sm:$0xff] }
 0x394   :  { %v14909_v7 = vadd.f32 %v2486_v59, %v14756_v39  ;;  %11540 = vmatpush3.msra.mxu0 %v14914_v28  ;;  %v10961_v8 = vpop.f32.mrf.mxu0  ;;  %11484 = vmatprep.mubr.msk.f32.mxu0 %vm12136_vm0, %v12135_v1  ;;  %v15054_v59 = vld [vmem:[%s17024_s1 + $0x28] sm:$0xff] }
 0x395   :  { %v3758_v23 = vmax.f32 %v3739_v58, 0.0  ;;  %v10530_v49 = vpop.f32.mrf.mxu1  ;;  %11541 = vmatprep.subr.mxu0 %v12135_v1  ;;  %10990 = vmatprep.mubr.msk.f32.mxu1 %vm12136_vm0, %v12135_v1  ;;  %v5296_v8 = vld [vmem:[%s17023_s0 + $0x590] sm:$0xff] }
 0x396   :  { %v3743_v39 = vpop.f32.mrf.mxu0  ;;  %11485 = vmatmul.mubr.f32.gmra.mxu0 %v5290_v60  ;;  %11148 = vmatprep.subr.mxu1 %v12135_v1 }
 0x397   :  { %v3744_v4 = vadd.f32 %v14900_v48, %v3743_v39  ;;  %11542 = vmatpush3.msra.mxu0 %v14927_v31  ;;  %v2491_v12 = vpop.f32.mrf.mxu1  ;;  %10991 = vmatmul.mubr.msk.f32.gmra.mxu1 %vm322_vm1, %v3758_v23 }
 0x398   :  { %v14935_v53 = vadd.f32 %v2491_v12, %v14772_v13  ;;  %11543 = vmatprep.subr.mxu0 %v12135_v1  ;;  %v10964_v25 = vpop.f32.mrf.mxu0  ;;  %11487 = vmatprep.mubr.msk.f32.mxu0 %vm12136_vm0, %v12135_v1 }
 0x399   :  { %v3759_v3 = vmax.f32 %v3744_v4, 0.0  ;;  %11544 = vmatpush3.msra.mxu0 %v14943_v45  ;;  %v10533_v14 = vpop.f32.mrf.mxu1  ;;  %10993 = vmatprep.mubr.msk.f32.mxu1 %vm12136_vm0, %v12135_v1  ;;  %v15070_v4 = vld [vmem:[%s17024_s1 + $0x20] sm:$0xff]  ;;  %v15080_v25 = vld [vmem:[%s17024_s1 + $0x18] sm:$0xff] }
 0x39a   :  { %11545 = vmatprep.subr.mxu0 %v12135_v1  ;;  %v3748_v13 = vpop.f32.mrf.mxu0  ;;  %11488 = vmatmul.mubr.f32.gmra.mxu0 %v5291_v26  ;;  %v5297_v14 = vld [vmem:[%s17023_s0 + $0x598] sm:$0xff] }
 0x39b   :  { %v3749_v38 = vadd.f32 %v14900_v48, %v3748_v13  ;;  %11546 = vmatpush3.msra.mxu0 %v14953_v24  ;;  %v2496_v32 = vpop.f32.mrf.mxu1  ;;  %10994 = vmatmul.mubr.msk.f32.gmra.mxu1 %vm322_vm1, %v3759_v3 }
 0x39c   :  { %v14961_v30 = vadd.f32 %v2496_v32, %v14788_v63  ;;  %11547 = vmatprep.subr.mxu0 %v12135_v1  ;;  %v10967_v15 = vpop.f32.mrf.mxu0  ;;  %11490 = vmatprep.mubr.msk.f32.mxu0 %vm12136_vm0, %v12135_v1 }
 0x39d   :  { %v3760_v16 = vmax.f32 %v3749_v38, 0.0  ;;  %11548 = vmatpush3.msra.mxu0 %v14969_v62  ;;  %v10536_v55 = vpop.f32.mrf.mxu1  ;;  %10996 = vmatprep.mubr.msk.f32.mxu1 %vm12136_vm0, %v12135_v1  ;;  %v15096_v15 = vld [vmem:[%s17024_s1 + $0x10] sm:$0xff] }
 0x39e   :  { %v3984_v63 = vpop.f32.mrf.mxu0  ;;  %11491 = vmatmul.mubr.f32.gmra.mxu0 %v5292_v56  ;;  %11549 = vmatprep.subr.mxu0 %v12135_v1 }
 0x39f   :  { %v3985_v10 = vadd.f32 %v14900_v48, %v3984_v63  ;;  %v2501_v44 = vpop.f32.mrf.mxu1  ;;  %10997 = vmatmul.mubr.msk.f32.gmra.mxu1 %vm322_vm1, %v3760_v16  ;;  %11550 = vmatpush3.msra.mxu0 %v14980_v19  ;;  %v15107_v63 = vld [vmem:[%s17024_s1 + $0x8] sm:$0xff] }
 0x3a0   :  { %v14987_v42 = vadd.f32 %v2501_v44, %v14804_v47  ;;  %v11033_v9 = vpop.f32.mrf.mxu0  ;;  %11551 = vmatprep.subr.mxu0 %v12135_v1  ;;  %11493 = vmatprep.mubr.msk.f32.mxu0 %vm12136_vm0, %v12135_v1  ;;  %v4314_v47 = vld [vmem:[%s17026_s3 + $0xf8] sm:$0xff]  ;;  %v5565_v44 = vld [vmem:[%s17023_s0 + $0x5a0] sm:$0xff] }
 0x3a1   :  { %v4028_v22 = vmax.f32 %v3985_v10, 0.0  ;;  %v10539_v35 = vpop.f32.mrf.mxu1  ;;  %11552 = vmatpush3.msra.mxu0 %v14995_v41  ;;  %11062 = vmatprep.mubr.msk.f32.mxu1 %vm12136_vm0, %v12135_v1  ;;  %v4313_v10 = vld [vmem:[%s17026_s3 + $0xf0] sm:$0xff] }
 0x3a2   :  { %v3989_v50 = vpop.f32.mrf.mxu0  ;;  %11494 = vmatmul.mubr.f32.gmra.mxu0 %v5293_v18  ;;  %11553 = vmatprep.subr.mxu0 %v12135_v1 }
 0x3a3   :  { %v3990_v51 = vadd.f32 %v14900_v48, %v3989_v50  ;;  %v2506_v37 = vpop.f32.mrf.mxu1  ;;  %11063 = vmatmul.mubr.msk.f32.vlgmr.msra.gmra.mxu1 %vm322_vm1, %v4028_v22  ;;  %11554 = vmatpush3.msra.mxu0 %v15009_v11 }
 0x3a4   :  { %v15016_v33 = vadd.f32 %v2506_v37, %v14823_v57  ;;  %v11036_v17 = vpop.f32.mrf.mxu0  ;;  %11149 = vmatpush3.msra.mxu1 %v4314_v47  ;;  %11555 = vmatprep.subr.mxu0 %v12135_v1  ;;  %v15125_v47 = vld [vmem:[%s17024_s1] sm:$0xff]  ;;  %v5566_v37 = vld [vmem:[%s17023_s0 + $0x5a8] sm:$0xff] }
 0x3a5   :  { %v4029_v0 = vmax.f32 %v3990_v51, 0.0  ;;  %v10542_v46 = vpop.f32.mrf.mxu1  ;;  %11496 = vmatprep.mubr.msk.f32.mxu0 %vm12136_vm0, %v12135_v1  ;;  %11556 = vmatpush3.msra.mxu0 %v15024_v21 }
 0x3a6   :  { %v3994_v36 = vpop.f32.mrf.mxu0  ;;  %11065 = vmatprep.mubr.msk.f32.mxu1 %vm12136_vm0, %v12135_v1  ;;  %11497 = vmatmul.mubr.f32.gmra.mxu0 %v5294_v20 }
 0x3a7   :  { %v3995_v57 = vadd.f32 %v14900_v48, %v3994_v36  ;;  %v2511_v2 = vpop.f32.mrf.mxu1  ;;  %11066 = vmatmul.mubr.msk.f32.gmra.mxu1 %vm322_vm1, %v4029_v0  ;;  %11557 = vmatprep.subr.mxu0 %v12135_v1 }
 0x3a8   :  { %v15036_v40 = vadd.f32 %v2511_v2, %v14838_v34  ;;  %v11039_v29 = vpop.f32.mrf.mxu0  ;;  %11558 = vmatpush3.msra.mxu0 %v15041_v54  ;;  %11499 = vmatprep.mubr.msk.f32.mxu0 %vm12136_vm0, %v12135_v1  ;;  %v5567_v2 = vld [vmem:[%s17023_s0 + $0x5b0] sm:$0xff] }
 0x3a9   :  { %v4030_v27 = vmax.f32 %v3995_v57, 0.0  ;;  %v10545_v43 = vpop.f32.mrf.mxu1  ;;  %11559 = vmatprep.subr.mxu0 %v12135_v1  ;;  %11068 = vmatprep.mubr.msk.f32.mxu1 %vm12136_vm0, %v12135_v1 }
 0x3aa   :  { %v3999_v34 = vpop.f32.mrf.mxu0  ;;  %11500 = vmatmul.mubr.f32.gmra.mxu0 %v5295_v6  ;;  %11150 = vmatprep.subr.mxu1 %v12135_v1 }
 0x3ab   :  { %v4000_v58 = vadd.f32 %v14900_v48, %v3999_v34  ;;  %11560 = vmatpush3.msra.mxu0 %v15054_v59  ;;  %v2516_v60 = vpop.f32.mrf.mxu1  ;;  %11069 = vmatmul.mubr.msk.f32.gmra.mxu1 %vm322_vm1, %v4030_v27 }
 0x3ac   :  { %v15062_v23 = vadd.f32 %v2516_v60, %v14854_v52  ;;  %11561 = vmatprep.subr.mxu0 %v12135_v1  ;;  %v11042_v49 = vpop.f32.mrf.mxu0  ;;  %11502 = vmatprep.mubr.msk.f32.mxu0 %vm12136_vm0, %v12135_v1  ;;  %v5568_v60 = vld [vmem:[%s17023_s0 + $0x5b8] sm:$0xff] }
 0x3ad   :  { %v4031_v39 = vmax.f32 %v4000_v58, 0.0  ;;  %11562 = vmatpush3.msra.mxu0 %v15070_v4  ;;  %v10548_v12 = vpop.f32.mrf.mxu1  ;;  %11071 = vmatprep.mubr.msk.f32.mxu1 %vm12136_vm0, %v12135_v1 }
 0x3ae   :  { %11563 = vmatprep.subr.mxu0 %v12135_v1  ;;  %v4004_v52 = vpop.f32.mrf.mxu0  ;;  %11503 = vmatmul.mubr.f32.gmra.mxu0 %v5296_v8 }
 0x3af   :  { %v4005_v26 = vadd.f32 %v14900_v48, %v4004_v52  ;;  %11564 = vmatpush3.msra.mxu0 %v15080_v25  ;;  %v2752_v3 = vpop.f32.mrf.mxu1  ;;  %11072 = vmatmul.mubr.msk.f32.gmra.mxu1 %vm322_vm1, %v4031_v39 }
 0x3b0   :  { %v15088_v13 = vadd.f32 %v2752_v3, %v14870_v61  ;;  %v11045_v38 = vpop.f32.mrf.mxu0  ;;  %11565 = vmatprep.subr.mxu0 %v12135_v1  ;;  %11505 = vmatprep.mubr.msk.f32.mxu0 %vm12136_vm0, %v12135_v1  ;;  %v5569_v3 = vld [vmem:[%s17023_s0 + $0x5c0] sm:$0xff] }
 0x3b1   :  { %v4032_v32 = vmax.f32 %v4005_v26, 0.0  ;;  %v10614_v56 = vpop.f32.mrf.mxu1  ;;  %11566 = vmatpush3.msra.mxu0 %v15096_v15  ;;  %11074 = vmatprep.mubr.msk.f32.mxu1 %vm12136_vm0, %v12135_v1 }
 0x3b2   :  { %v4009_v61 = vpop.f32.mrf.mxu0  ;;  %11506 = vmatmul.mubr.f32.gmra.mxu0 %v5297_v14  ;;  %11567 = vmatprep.subr.mxu0 %v12135_v1 }
 0x3b3   :  { %v4010_v16 = vadd.f32 %v14900_v48, %v4009_v61  ;;  %v2757_v55 = vpop.f32.mrf.mxu1  ;;  %11075 = vmatmul.mubr.msk.f32.gmra.mxu1 %vm322_vm1, %v4032_v32  ;;  %11568 = vmatpush3.msra.mxu0 %v15107_v63  ;;  %v4590_v61 = vld [vmem:[%s17026_s3 + $0x108] sm:$0xff] }
 0x3b4   :  { %v15117_v18 = vadd.f32 %v2757_v55, %v14889_v5  ;;  %v11048_v9 = vpop.f32.mrf.mxu0  ;;  %11569 = vmatprep.subr.mxu0 %v12135_v1  ;;  %11571 = vmatprep.mubr.msk.f32.mxu0 %vm12136_vm0, %v12135_v1 }
 0x3b5   :  { %v4033_v22 = vmax.f32 %v4010_v16, 0.0  ;;  %v10617_v35 = vpop.f32.mrf.mxu1  ;;  %11570 = vmatpush3.msra.mxu0 %v15125_v47  ;;  %11077 = vmatprep.mubr.msk.f32.mxu1 %vm12136_vm0, %v12135_v1 }
 0x3b6   :  { %v4014_v5 = vpop.f32.mrf.mxu0  ;;  %11151 = vmatpush3.msra.mxu1 %v4313_v10  ;;  %11572 = vmatmul.mubr.f32.vlgmr.msra.gmra.mxu0 %v5565_v44  ;;  %v5570_v10 = vld [vmem:[%s17023_s0 + $0x5c8] sm:$0xff] }
 0x3b7   :  { %v4015_v50 = vadd.f32 %v14900_v48, %v4014_v5  ;;  %11629 = vmatprep.subr.mxu0 %v12135_v1  ;;  %v2762_v51 = vpop.f32.mrf.mxu1  ;;  %11078 = vmatmul.mubr.msk.f32.gmra.mxu1 %vm322_vm1, %v4033_v22 }
 0x3b8   :  { %v15137_v20 = vadd.f32 %v2762_v51, %v14909_v7  ;;  %11630 = vmatpush3.msra.mxu0 %v14914_v28  ;;  %v11051_v17 = vpop.f32.mrf.mxu0  ;;  %11574 = vmatprep.mubr.msk.f32.mxu0 %vm12136_vm0, %v12135_v1  ;;  %v5571_v51 = vld [vmem:[%s17023_s0 + $0x5d0] sm:$0xff] }
 0x3b9   :  { %v4034_v0 = vmax.f32 %v4015_v50, 0.0  ;;  %v10620_v46 = vpop.f32.mrf.mxu1  ;;  %11631 = vmatprep.subr.mxu0 %v12135_v1  ;;  %11080 = vmatprep.mubr.msk.f32.mxu1 %vm12136_vm0, %v12135_v1 }
 0x3ba   :  { %v4019_v36 = vpop.f32.mrf.mxu0  ;;  %11575 = vmatmul.mubr.f32.gmra.mxu0 %v5566_v37  ;;  %11238 = vmatprep.subr.mxu1 %v12135_v1 }
 0x3bb   :  { %v4020_v7 = vadd.f32 %v14900_v48, %v4019_v36  ;;  %11632 = vmatpush3.msra.mxu0 %v14927_v31  ;;  %v2767_v57 = vpop.f32.mrf.mxu1  ;;  %11081 = vmatmul.mubr.msk.f32.gmra.mxu1 %vm322_vm1, %v4034_v0 }
 0x3bc   :  { %v15153_v6 = vadd.f32 %v2767_v57, %v14935_v53  ;;  %11633 = vmatprep.subr.mxu0 %v12135_v1  ;;  %v11054_v29 = vpop.f32.mrf.mxu0  ;;  %11577 = vmatprep.mubr.msk.f32.mxu0 %vm12136_vm0, %v12135_v1  ;;  %v5572_v57 = vld [vmem:[%s17023_s0 + $0x5d8] sm:$0xff] }
 0x3bd   :  { %v4035_v27 = vmax.f32 %v4020_v7, 0.0  ;;  %11634 = vmatpush3.msra.mxu0 %v14943_v45  ;;  %v10623_v43 = vpop.f32.mrf.mxu1  ;;  %11083 = vmatprep.mubr.msk.f32.mxu1 %vm12136_vm0, %v12135_v1 }
 0x3be   :  { %11635 = vmatprep.subr.mxu0 %v12135_v1  ;;  %v4024_v34 = vpop.f32.mrf.mxu0  ;;  %11578 = vmatmul.mubr.f32.gmra.mxu0 %v5567_v2 }
 0x3bf   :  { %v4025_v53 = vadd.f32 %v14900_v48, %v4024_v34  ;;  %11636 = vmatpush3.msra.mxu0 %v14953_v24  ;;  %v2772_v58 = vpop.f32.mrf.mxu1  ;;  %11084 = vmatmul.mubr.msk.f32.gmra.mxu1 %vm322_vm1, %v4035_v27 }
 0x3c0   :  { %v15169_v8 = vadd.f32 %v2772_v58, %v14961_v30  ;;  %11637 = vmatprep.subr.mxu0 %v12135_v1  ;;  %v11057_v49 = vpop.f32.mrf.mxu0  ;;  %11580 = vmatprep.mubr.msk.f32.mxu0 %vm12136_vm0, %v12135_v1  ;;  %v5573_v58 = vld [vmem:[%s17023_s0 + $0x5e0] sm:$0xff] }
 0x3c1   :  { %v4036_v39 = vmax.f32 %v4025_v53, 0.0  ;;  %11638 = vmatpush3.msra.mxu0 %v14969_v62  ;;  %v10626_v12 = vpop.f32.mrf.mxu1  ;;  %11086 = vmatprep.mubr.msk.f32.mxu1 %vm12136_vm0, %v12135_v1 }
 0x3c2   :  { %v4260_v52 = vpop.f32.mrf.mxu0  ;;  %11581 = vmatmul.mubr.f32.gmra.mxu0 %v5568_v60  ;;  %11639 = vmatprep.subr.mxu0 %v12135_v1 }
 0x3c3   :  { %v4261_v30 = vadd.f32 %v14900_v48, %v4260_v52  ;;  %v2777_v26 = vpop.f32.mrf.mxu1  ;;  %11087 = vmatmul.mubr.msk.f32.gmra.mxu1 %vm322_vm1, %v4036_v39  ;;  %11640 = vmatpush3.msra.mxu0 %v14980_v19 }
 0x3c4   :  { %v15185_v14 = vadd.f32 %v2777_v26, %v14987_v42  ;;  %v11123_v38 = vpop.f32.mrf.mxu0  ;;  %11641 = vmatprep.subr.mxu0 %v12135_v1  ;;  %11583 = vmatprep.mubr.msk.f32.mxu0 %vm12136_vm0, %v12135_v1  ;;  %v4589_v26 = vld [vmem:[%s17026_s3 + $0x100] sm:$0xff] }
 0x3c5   :  { %v4304_v32 = vmax.f32 %v4261_v30, 0.0  ;;  %v10629_v56 = vpop.f32.mrf.mxu1  ;;  %11642 = vmatpush3.msra.mxu0 %v14995_v41  ;;  %11152 = vmatprep.mubr.msk.f32.mxu1 %vm12136_vm0, %v12135_v1 }
 0x3c6   :  { %v4265_v16 = vpop.f32.mrf.mxu0  ;;  %11584 = vmatmul.mubr.f32.gmra.mxu0 %v5569_v3  ;;  %11643 = vmatprep.subr.mxu0 %v12135_v1  ;;  %v5841_v3 = vld [vmem:[%s17023_s0 + $0x5e8] sm:$0xff] }
 0x3c7   :  { %v4266_v42 = vadd.f32 %v14900_v48, %v4265_v16  ;;  %v2782_v55 = vpop.f32.mrf.mxu1  ;;  %11153 = vmatmul.mubr.msk.f32.vlgmr.msra.gmra.mxu1 %vm322_vm1, %v4304_v32  ;;  %11644 = vmatpush3.msra.mxu0 %v15009_v11 }
 0x3c8   :  { %v15204_v44 = vadd.f32 %v2782_v55, %v15016_v33  ;;  %v11126_v9 = vpop.f32.mrf.mxu0  ;;  %11239 = vmatpush3.msra.mxu1 %v4590_v61  ;;  %11645 = vmatprep.subr.mxu0 %v12135_v1  ;;  %v5842_v55 = vld [vmem:[%s17023_s0 + $0x5f0] sm:$0xff] }
 0x3c9   :  { %v4305_v22 = vmax.f32 %v4266_v42, 0.0  ;;  %v10632_v35 = vpop.f32.mrf.mxu1  ;;  %11586 = vmatprep.mubr.msk.f32.mxu0 %vm12136_vm0, %v12135_v1  ;;  %11646 = vmatpush3.msra.mxu0 %v15024_v21 }
 0x3ca   :  { %v4270_v5 = vpop.f32.mrf.mxu0  ;;  %11155 = vmatprep.mubr.msk.f32.mxu1 %vm12136_vm0, %v12135_v1  ;;  %11587 = vmatmul.mubr.f32.gmra.mxu0 %v5570_v10 }
 0x3cb   :  { %v4271_v50 = vadd.f32 %v14900_v48, %v4270_v5  ;;  %v2787_v33 = vpop.f32.mrf.mxu1  ;;  %11156 = vmatmul.mubr.msk.f32.gmra.mxu1 %vm322_vm1, %v4305_v22  ;;  %11647 = vmatprep.subr.mxu0 %v12135_v1 }
 0x3cc   :  { %v15219_v37 = vadd.f32 %v2787_v33, %v15036_v40  ;;  %v11129_v17 = vpop.f32.mrf.mxu0  ;;  %11648 = vmatpush3.msra.mxu0 %v15041_v54  ;;  %11589 = vmatprep.mubr.msk.f32.mxu0 %vm12136_vm0, %v12135_v1  ;;  %v5843_v33 = vld [vmem:[%s17023_s0 + $0x5f8] sm:$0xff] }
 0x3cd   :  { %v4306_v0 = vmax.f32 %v4271_v50, 0.0  ;;  %v10635_v46 = vpop.f32.mrf.mxu1  ;;  %11649 = vmatprep.subr.mxu0 %v12135_v1  ;;  %11158 = vmatprep.mubr.msk.f32.mxu1 %vm12136_vm0, %v12135_v1 }
 0x3ce   :  { %v4275_v36 = vpop.f32.mrf.mxu0  ;;  %11590 = vmatmul.mubr.f32.gmra.mxu0 %v5571_v51  ;;  %11240 = vmatprep.subr.mxu1 %v12135_v1 }
 0x3cf   :  { %v4276_v40 = vadd.f32 %v14900_v48, %v4275_v36  ;;  %11650 = vmatpush3.msra.mxu0 %v15054_v59  ;;  %v2792_v7 = vpop.f32.mrf.mxu1  ;;  %11159 = vmatmul.mubr.msk.f32.gmra.mxu1 %vm322_vm1, %v4306_v0 }
 0x3d0   :  { %v15235_v2 = vadd.f32 %v2792_v7, %v15062_v23  ;;  %11651 = vmatprep.subr.mxu0 %v12135_v1  ;;  %v11132_v29 = vpop.f32.mrf.mxu0  ;;  %11592 = vmatprep.mubr.msk.f32.mxu0 %vm12136_vm0, %v12135_v1  ;;  %v5844_v7 = vld [vmem:[%s17023_s0 + $0x600] sm:$0xff] }
 0x3d1   :  { %v4307_v27 = vmax.f32 %v4276_v40, 0.0  ;;  %11652 = vmatpush3.msra.mxu0 %v15070_v4  ;;  %v10638_v43 = vpop.f32.mrf.mxu1  ;;  %11161 = vmatprep.mubr.msk.f32.mxu1 %vm12136_vm0, %v12135_v1 }
 0x3d2   :  { %11653 = vmatprep.subr.mxu0 %v12135_v1  ;;  %v4280_v34 = vpop.f32.mrf.mxu0  ;;  %11593 = vmatmul.mubr.f32.gmra.mxu0 %v5572_v57 }
 0x3d3   :  { %v4281_v23 = vadd.f32 %v14900_v48, %v4280_v34  ;;  %11654 = vmatpush3.msra.mxu0 %v15080_v25  ;;  %v3028_v53 = vpop.f32.mrf.mxu1  ;;  %11162 = vmatmul.mubr.msk.f32.gmra.mxu1 %vm322_vm1, %v4307_v27 }
 0x3d4   :  { %v15251_v60 = vadd.f32 %v3028_v53, %v15088_v13  ;;  %v11135_v49 = vpop.f32.mrf.mxu0  ;;  %11655 = vmatprep.subr.mxu0 %v12135_v1  ;;  %11595 = vmatprep.mubr.msk.f32.mxu0 %vm12136_vm0, %v12135_v1  ;;  %v5845_v53 = vld [vmem:[%s17023_s0 + $0x608] sm:$0xff] }
 0x3d5   :  { %v4308_v39 = vmax.f32 %v4281_v23, 0.0  ;;  %v10704_v12 = vpop.f32.mrf.mxu1  ;;  %11656 = vmatpush3.msra.mxu0 %v15096_v15  ;;  %11164 = vmatprep.mubr.msk.f32.mxu1 %vm12136_vm0, %v12135_v1 }
 0x3d6   :  { %v4285_v52 = vpop.f32.mrf.mxu0  ;;  %11596 = vmatmul.mubr.f32.gmra.mxu0 %v5573_v58  ;;  %11657 = vmatprep.subr.mxu0 %v12135_v1 }
 0x3d7   :  { %v4286_v13 = vadd.f32 %v14900_v48, %v4285_v52  ;;  %v3033_v30 = vpop.f32.mrf.mxu1  ;;  %11165 = vmatmul.mubr.msk.f32.gmra.mxu1 %vm322_vm1, %v4308_v39  ;;  %11658 = vmatpush3.msra.mxu0 %v15107_v63  ;;  %v4866_v52 = vld [vmem:[%s17026_s3 + $0x118] sm:$0xff] }
 0x3d8   :  { %v15270_v38 = vadd.f32 %v3033_v30, %v15117_v18  ;;  %v11138_v32 = vpop.f32.mrf.mxu0  ;;  %11659 = vmatprep.subr.mxu0 %v12135_v1  ;;  %11661 = vmatprep.mubr.msk.f32.mxu0 %vm12136_vm0, %v12135_v1 }
 0x3d9   :  { %v4309_v56 = vmax.f32 %v4286_v13, 0.0  ;;  %v10707_v61 = vpop.f32.mrf.mxu1  ;;  %11660 = vmatpush3.msra.mxu0 %v15125_v47  ;;  %11167 = vmatprep.mubr.msk.f32.mxu1 %vm12136_vm0, %v12135_v1 }
 0x3da   :  { %v4290_v16 = vpop.f32.mrf.mxu0  ;;  %11241 = vmatpush3.msra.mxu1 %v4589_v26  ;;  %11662 = vmatmul.mubr.f32.vlgmr.msra.gmra.mxu0 %v5841_v3  ;;  %v5846_v26 = vld [vmem:[%s17023_s0 + $0x610] sm:$0xff] }
 0x3db   :  { %v4291_v42 = vadd.f32 %v14900_v48, %v4290_v16  ;;  %11719 = vmatprep.subr.mxu0 %v12135_v1  ;;  %v3038_v18 = vpop.f32.mrf.mxu1  ;;  %11168 = vmatmul.mubr.msk.f32.gmra.mxu1 %vm322_vm1, %v4309_v56 }
 0x3dc   :  { %v15285_v10 = vadd.f32 %v3038_v18, %v15137_v20  ;;  %11720 = vmatpush3.msra.mxu0 %v14914_v28  ;;  %v11141_v9 = vpop.f32.mrf.mxu0  ;;  %11664 = vmatprep.mubr.msk.f32.mxu0 %vm12136_vm0, %v12135_v1  ;;  %v5847_v18 = vld [vmem:[%s17023_s0 + $0x618] sm:$0xff] }
 0x3dd   :  { %v4310_v22 = vmax.f32 %v4291_v42, 0.0  ;;  %v10710_v35 = vpop.f32.mrf.mxu1  ;;  %11721 = vmatprep.subr.mxu0 %v12135_v1  ;;  %11170 = vmatprep.mubr.msk.f32.mxu1 %vm12136_vm0, %v12135_v1 }
 0x3de   :  { %v4295_v5 = vpop.f32.mrf.mxu0  ;;  %11665 = vmatmul.mubr.f32.gmra.mxu0 %v5842_v55  ;;  %11328 = vmatprep.subr.mxu1 %v12135_v1 }
 0x3df   :  { %v4296_v20 = vadd.f32 %v14900_v48, %v4295_v5  ;;  %11722 = vmatpush3.msra.mxu0 %v14927_v31  ;;  %v3043_v50 = vpop.f32.mrf.mxu1  ;;  %11171 = vmatmul.mubr.msk.f32.gmra.mxu1 %vm322_vm1, %v4310_v22 }
 0x3e0   :  { %v15301_v51 = vadd.f32 %v3043_v50, %v15153_v6  ;;  %11723 = vmatprep.subr.mxu0 %v12135_v1  ;;  %v11144_v17 = vpop.f32.mrf.mxu0  ;;  %11667 = vmatprep.mubr.msk.f32.mxu0 %vm12136_vm0, %v12135_v1  ;;  %v5848_v50 = vld [vmem:[%s17023_s0 + $0x620] sm:$0xff] }
 0x3e1   :  { %v4311_v0 = vmax.f32 %v4296_v20, 0.0  ;;  %11724 = vmatpush3.msra.mxu0 %v14943_v45  ;;  %v10713_v46 = vpop.f32.mrf.mxu1  ;;  %11173 = vmatprep.mubr.msk.f32.mxu1 %vm12136_vm0, %v12135_v1 }
 0x3e2   :  { %11725 = vmatprep.subr.mxu0 %v12135_v1  ;;  %v4300_v36 = vpop.f32.mrf.mxu0  ;;  %11668 = vmatmul.mubr.f32.gmra.mxu0 %v5843_v33 }
 0x3e3   :  { %v4301_v6 = vadd.f32 %v14900_v48, %v4300_v36  ;;  %11726 = vmatpush3.msra.mxu0 %v14953_v24  ;;  %v3048_v40 = vpop.f32.mrf.mxu1  ;;  %11174 = vmatmul.mubr.msk.f32.gmra.mxu1 %vm322_vm1, %v4311_v0 }
 0x3e4   :  { %v15317_v57 = vadd.f32 %v3048_v40, %v15169_v8  ;;  %11727 = vmatprep.subr.mxu0 %v12135_v1  ;;  %v11147_v29 = vpop.f32.mrf.mxu0  ;;  %11670 = vmatprep.mubr.msk.f32.mxu0 %vm12136_vm0, %v12135_v1  ;;  %v5849_v40 = vld [vmem:[%s17023_s0 + $0x628] sm:$0xff] }
 0x3e5   :  { %v4312_v27 = vmax.f32 %v4301_v6, 0.0  ;;  %11728 = vmatpush3.msra.mxu0 %v14969_v62  ;;  %v10716_v43 = vpop.f32.mrf.mxu1  ;;  %11176 = vmatprep.mubr.msk.f32.mxu1 %vm12136_vm0, %v12135_v1 }
 0x3e6   :  { %v4536_v34 = vpop.f32.mrf.mxu0  ;;  %11671 = vmatmul.mubr.f32.gmra.mxu0 %v5844_v7  ;;  %11729 = vmatprep.subr.mxu0 %v12135_v1 }
 0x3e7   :  { %v4537_v8 = vadd.f32 %v14900_v48, %v4536_v34  ;;  %v3053_v23 = vpop.f32.mrf.mxu1  ;;  %11177 = vmatmul.mubr.msk.f32.gmra.mxu1 %vm322_vm1, %v4312_v27  ;;  %11730 = vmatpush3.msra.mxu0 %v14980_v19 }
 0x3e8   :  { %v15333_v58 = vadd.f32 %v3053_v23, %v15185_v14  ;;  %v11213_v49 = vpop.f32.mrf.mxu0  ;;  %11731 = vmatprep.subr.mxu0 %v12135_v1  ;;  %11673 = vmatprep.mubr.msk.f32.mxu0 %vm12136_vm0, %v12135_v1  ;;  %v4865_v23 = vld [vmem:[%s17026_s3 + $0x110] sm:$0xff] }
 0x3e9   :  { %v4580_v39 = vmax.f32 %v4537_v8, 0.0  ;;  %v10719_v12 = vpop.f32.mrf.mxu1  ;;  %11732 = vmatpush3.msra.mxu0 %v14995_v41  ;;  %11242 = vmatprep.mubr.msk.f32.mxu1 %vm12136_vm0, %v12135_v1 }
 0x3ea   :  { %v4541_v13 = vpop.f32.mrf.mxu0  ;;  %11674 = vmatmul.mubr.f32.gmra.mxu0 %v5845_v53  ;;  %11733 = vmatprep.subr.mxu0 %v12135_v1  ;;  %v6117_v53 = vld [vmem:[%s17023_s0 + $0x630] sm:$0xff] }
 0x3eb   :  { %v4542_v14 = vadd.f32 %v14900_v48, %v4541_v13  ;;  %v3058_v30 = vpop.f32.mrf.mxu1  ;;  %11243 = vmatmul.mubr.msk.f32.vlgmr.msra.gmra.mxu1 %vm322_vm1, %v4580_v39  ;;  %11734 = vmatpush3.msra.mxu0 %v15009_v11 }
 0x3ec   :  { %v15352_v3 = vadd.f32 %v3058_v30, %v15204_v44  ;;  %v11216_v32 = vpop.f32.mrf.mxu0  ;;  %11329 = vmatpush3.msra.mxu1 %v4866_v52  ;;  %11735 = vmatprep.subr.mxu0 %v12135_v1  ;;  %v6118_v30 = vld [vmem:[%s17023_s0 + $0x638] sm:$0xff] }
 0x3ed   :  { %v4581_v56 = vmax.f32 %v4542_v14, 0.0  ;;  %v10722_v61 = vpop.f32.mrf.mxu1  ;;  %11676 = vmatprep.mubr.msk.f32.mxu0 %vm12136_vm0, %v12135_v1  ;;  %11736 = vmatpush3.msra.mxu0 %v15024_v21 }
 0x3ee   :  { %v4546_v16 = vpop.f32.mrf.mxu0  ;;  %11245 = vmatprep.mubr.msk.f32.mxu1 %vm12136_vm0, %v12135_v1  ;;  %11677 = vmatmul.mubr.f32.gmra.mxu0 %v5846_v26 }
 0x3ef   :  { %v4547_v42 = vadd.f32 %v14900_v48, %v4546_v16  ;;  %v3063_v44 = vpop.f32.mrf.mxu1  ;;  %11246 = vmatmul.mubr.msk.f32.gmra.mxu1 %vm322_vm1, %v4581_v56  ;;  %11737 = vmatprep.subr.mxu0 %v12135_v1 }
 0x3f0   :  { %v15367_v55 = vadd.f32 %v3063_v44, %v15219_v37  ;;  %v11219_v9 = vpop.f32.mrf.mxu0  ;;  %11738 = vmatpush3.msra.mxu0 %v15041_v54  ;;  %11679 = vmatprep.mubr.msk.f32.mxu0 %vm12136_vm0, %v12135_v1 }
 0x3f1   :  { %v4582_v22 = vmax.f32 %v4547_v42, 0.0  ;;  %v10725_v35 = vpop.f32.mrf.mxu1  ;;  %11739 = vmatprep.subr.mxu0 %v12135_v1  ;;  %11248 = vmatprep.mubr.msk.f32.mxu1 %vm12136_vm0, %v12135_v1  ;;  %v6119_v42 = vld [vmem:[%s17023_s0 + $0x640] sm:$0xff] }
 0x3f2   :  { %v4551_v5 = vpop.f32.mrf.mxu0  ;;  %11680 = vmatmul.mubr.f32.gmra.mxu0 %v5847_v18  ;;  %11330 = vmatprep.subr.mxu1 %v12135_v1 }
 0x3f3   :  { %v4552_v37 = vadd.f32 %v14900_v48, %v4551_v5  ;;  %11740 = vmatpush3.msra.mxu0 %v15054_v59  ;;  %v3068_v20 = vpop.f32.mrf.mxu1  ;;  %11249 = vmatmul.mubr.msk.f32.gmra.mxu1 %vm322_vm1, %v4582_v22  ;;  %v6120_v5 = vld [vmem:[%s17023_s0 + $0x648] sm:$0xff] }
 0x3f4   :  { %v15383_v33 = vadd.f32 %v3068_v20, %v15235_v2  ;;  %11741 = vmatprep.subr.mxu0 %v12135_v1  ;;  %v11222_v17 = vpop.f32.mrf.mxu0  ;;  %11682 = vmatprep.mubr.msk.f32.mxu0 %vm12136_vm0, %v12135_v1 }
 0x3f5   :  { %v4583_v0 = vmax.f32 %v4552_v37, 0.0  ;;  %11742 = vmatpush3.msra.mxu0 %v15070_v4  ;;  %v10728_v46 = vpop.f32.mrf.mxu1  ;;  %11251 = vmatprep.mubr.msk.f32.mxu1 %vm12136_vm0, %v12135_v1 }
 0x3f6   :  { %11743 = vmatprep.subr.mxu0 %v12135_v1  ;;  %v4556_v36 = vpop.f32.mrf.mxu0  ;;  %11683 = vmatmul.mubr.f32.gmra.mxu0 %v5848_v50 }
 0x3f7   :  { %v4557_v2 = vadd.f32 %v14900_v48, %v4556_v36  ;;  %11744 = vmatpush3.msra.mxu0 %v15080_v25  ;;  %v3304_v6 = vpop.f32.mrf.mxu1  ;;  %11252 = vmatmul.mubr.msk.f32.gmra.mxu1 %vm322_vm1, %v4583_v0  ;;  %v6121_v0 = vld [vmem:[%s17023_s0 + $0x650] sm:$0xff] }
 0x3f8   :  { %v15399_v7 = vadd.f32 %v3304_v6, %v15251_v60  ;;  %v11225_v29 = vpop.f32.mrf.mxu0  ;;  %11745 = vmatprep.subr.mxu0 %v12135_v1  ;;  %11685 = vmatprep.mubr.msk.f32.mxu0 %vm12136_vm0, %v12135_v1 }
 0x3f9   :  { %v4584_v27 = vmax.f32 %v4557_v2, 0.0  ;;  %v10794_v43 = vpop.f32.mrf.mxu1  ;;  %11746 = vmatpush3.msra.mxu0 %v15096_v15  ;;  %11254 = vmatprep.mubr.msk.f32.mxu1 %vm12136_vm0, %v12135_v1 }
 0x3fa   :  { %v4561_v34 = vpop.f32.mrf.mxu0  ;;  %11686 = vmatmul.mubr.f32.gmra.mxu0 %v5849_v40  ;;  %11747 = vmatprep.subr.mxu0 %v12135_v1 }
 0x3fb   :  { %v4562_v60 = vadd.f32 %v14900_v48, %v4561_v34  ;;  %v3309_v8 = vpop.f32.mrf.mxu1  ;;  %11255 = vmatmul.mubr.msk.f32.gmra.mxu1 %vm322_vm1, %v4584_v27  ;;  %11748 = vmatpush3.msra.mxu0 %v15107_v63 }
 0x3fc   :  { %v15418_v49 = vadd.f32 %v3309_v8, %v15270_v38  ;;  %v11228_v39 = vpop.f32.mrf.mxu0  ;;  %11749 = vmatprep.subr.mxu0 %v12135_v1  ;;  %11751 = vmatprep.mubr.msk.f32.mxu0 %vm12136_vm0, %v12135_v1 }
 0x3fd   :  { %v4585_v12 = vmax.f32 %v4562_v60, 0.0  ;;  %v10797_v52 = vpop.f32.mrf.mxu1  ;;  %11750 = vmatpush3.msra.mxu0 %v15125_v47  ;;  %11257 = vmatprep.mubr.msk.f32.mxu1 %vm12136_vm0, %v12135_v1 }
 0x3fe   :  { %v4566_v13 = vpop.f32.mrf.mxu0  ;;  %11331 = vmatpush3.msra.mxu1 %v4865_v23  ;;  %11752 = vmatmul.mubr.f32.vlgmr.msra.gmra.mxu0 %v6117_v53 }
 0x3ff   :  { %v4567_v14 = vadd.f32 %v14900_v48, %v4566_v13  ;;  %11809 = vmatprep.subr.mxu0 %v12135_v1  ;;  %v3314_v38 = vpop.f32.mrf.mxu1  ;;  %11258 = vmatmul.mubr.msk.f32.gmra.mxu1 %vm322_vm1, %v4585_v12 }
 0x400   :  { %v15433_v26 = vadd.f32 %v3314_v38, %v15285_v10  ;;  %11810 = vmatpush3.msra.mxu0 %v14914_v28  ;;  %v11231_v32 = vpop.f32.mrf.mxu0  ;;  %11754 = vmatprep.mubr.msk.f32.mxu0 %vm12136_vm0, %v12135_v1 }
 0x401   :  { %v4586_v56 = vmax.f32 %v4567_v14, 0.0  ;;  %v10800_v61 = vpop.f32.mrf.mxu1  ;;  %11811 = vmatprep.subr.mxu0 %v12135_v1  ;;  %11260 = vmatprep.mubr.msk.f32.mxu1 %vm12136_vm0, %v12135_v1 }
 0x402   :  { %v4571_v16 = vpop.f32.mrf.mxu0  ;;  %11755 = vmatmul.mubr.f32.gmra.mxu0 %v6118_v30  ;;  %11418 = vmatprep.subr.mxu1 %v12135_v1 }
 0x403   :  { %v4572_v10 = vadd.f32 %v14900_v48, %v4571_v16  ;;  %11812 = vmatpush3.msra.mxu0 %v14927_v31  ;;  %v3319_v28 = vpop.f32.mrf.mxu1  ;;  %11261 = vmatmul.mubr.msk.f32.gmra.mxu1 %vm322_vm1, %v4586_v56  ;;  %v6125_v56 = vld [vmem:[%s17023_s0 + $0x670] sm:$0xff] }
 0x404   :  { %v15449_v44 = vadd.f32 %v3319_v28, %v15301_v51  ;;  %11813 = vmatprep.subr.mxu0 %v12135_v1  ;;  %v11234_v18 = vpop.f32.mrf.mxu0  ;;  %11757 = vmatprep.mubr.msk.f32.mxu0 %vm12136_vm0, %v12135_v1 }
 0x405   :  { %v4587_v9 = vmax.f32 %v4572_v10, 0.0  ;;  %11814 = vmatpush3.msra.mxu0 %v14943_v45  ;;  %v10803_v31 = vpop.f32.mrf.mxu1  ;;  %11263 = vmatprep.mubr.msk.f32.mxu1 %vm12136_vm0, %v12135_v1 }
 0x406   :  { %11815 = vmatprep.subr.mxu0 %v12135_v1  ;;  %v4576_v22 = vpop.f32.mrf.mxu0  ;;  %11758 = vmatmul.mubr.f32.gmra.mxu0 %v6119_v42  ;;  %v5141_v42 = vld [vmem:[%s17026_s3 + $0x120] sm:$0xff] }
 0x407   :  { %v4577_v51 = vadd.f32 %v14900_v48, %v4576_v22  ;;  %11816 = vmatpush3.msra.mxu0 %v14953_v24  ;;  %v3324_v35 = vpop.f32.mrf.mxu1  ;;  %11264 = vmatmul.mubr.msk.f32.gmra.mxu1 %vm322_vm1, %v4587_v9 }
 0x408   :  { %v15465_v45 = vadd.f32 %v3324_v35, %v15317_v57  ;;  %11817 = vmatprep.subr.mxu0 %v12135_v1  ;;  %v11237_v37 = vpop.f32.mrf.mxu0  ;;  %11760 = vmatprep.mubr.msk.f32.mxu0 %vm12136_vm0, %v12135_v1  ;;  %v6394_v35 = vld [vmem:[%s17023_s0 + $0x680] sm:$0xff] }
 0x409   :  { %v4588_v20 = vmax.f32 %v4577_v51, 0.0  ;;  %11818 = vmatpush3.msra.mxu0 %v14969_v62  ;;  %v10806_v24 = vpop.f32.mrf.mxu1  ;;  %11266 = vmatprep.mubr.msk.f32.mxu1 %vm12136_vm0, %v12135_v1 }
 0x40a   :  { %v4812_v50 = vpop.f32.mrf.mxu0  ;;  %11761 = vmatmul.mubr.f32.gmra.mxu0 %v6120_v5  ;;  %11819 = vmatprep.subr.mxu0 %v12135_v1 }
 0x40b   :  { %v4813_v57 = vadd.f32 %v14900_v48, %v4812_v50  ;;  %v3329_v17 = vpop.f32.mrf.mxu1  ;;  %11267 = vmatmul.mubr.msk.f32.gmra.mxu1 %vm322_vm1, %v4588_v20  ;;  %11820 = vmatpush3.msra.mxu0 %v14980_v19  ;;  %v5142_v19 = vld [vmem:[%s17026_s3 + $0x128] sm:$0xff] }
 0x40c   :  { %v15481_v62 = vadd.f32 %v3329_v17, %v15333_v58  ;;  %v11303_v46 = vpop.f32.mrf.mxu0  ;;  %11821 = vmatprep.subr.mxu0 %v12135_v1  ;;  %11763 = vmatprep.mubr.msk.f32.mxu0 %vm12136_vm0, %v12135_v1 }
 0x40d   :  { %v4856_v36 = vmax.f32 %v4813_v57, 0.0  ;;  %v10809_v2 = vpop.f32.mrf.mxu1  ;;  %11822 = vmatpush3.msra.mxu0 %v14995_v41  ;;  %11332 = vmatprep.mubr.msk.f32.mxu1 %vm12136_vm0, %v12135_v1  ;;  %v6122_v41 = vld [vmem:[%s17023_s0 + $0x658] sm:$0xff]  ;;  %v12097_v57 = vld [vmem:[%s17024_s1 + $0x70] sm:$0xff] }
 0x40e   :  { %v4817_v6 = vpop.f32.mrf.mxu0  ;;  %11764 = vmatmul.mubr.f32.gmra.mxu0 %v6121_v0  ;;  %11823 = vmatprep.subr.mxu0 %v12135_v1  ;;  %v6395_v0 = vld [vmem:[%s17023_s0 + $0x688] sm:$0xff] }
 0x40f   :  { %v4818_v58 = vadd.f32 %v14900_v48, %v4817_v6  ;;  %v3334_v40 = vpop.f32.mrf.mxu1  ;;  %11333 = vmatmul.mubr.msk.f32.vlgmr.msra.gmra.mxu1 %vm322_vm1, %v4856_v36  ;;  %11824 = vmatpush3.msra.mxu0 %v15009_v11  ;;  %v15511_v11 = vld [vmem:[%s17025_s2] ss:$0 sm:$0xff] }
 0x410   :  { %v15500_v29 = vadd.f32 %v3334_v40, %v15352_v3  ;;  %v11306_v27 = vpop.f32.mrf.mxu0  ;;  %11419 = vmatpush3.msra.mxu1 %v5142_v19  ;;  %11825 = vmatprep.subr.mxu0 %v12135_v1  ;;  %v12098_v19 = vld [vmem:[%s17024_s1 + $0x68] sm:$0xff]  ;;  %v12099_v40 = vld [vmem:[%s17024_s1 + $0x60] sm:$0xff] }
 0x411   :  { %v4857_v43 = vmax.f32 %v4818_v58, 0.0  ;;  %v10812_v34 = vpop.f32.mrf.mxu1  ;;  %11766 = vmatprep.mubr.msk.f32.mxu0 %vm12136_vm0, %v12135_v1  ;;  %11826 = vmatpush3.msra.mxu0 %v15024_v21  ;;  %v6123_v21 = vld [vmem:[%s17023_s0 + $0x660] sm:$0xff]  ;;  %v6396_v27 = vld [vmem:[%s17023_s0 + $0x690] sm:$0xff] }
 0x412   :  { %v4822_v48 = vpop.f32.mrf.mxu0  ;;  %11335 = vmatprep.mubr.msk.f32.mxu1 %vm12136_vm0, %v12135_v1  ;;  %11767 = vmatmul.mubr.f32.gmra.mxu0 %v6122_v41 }
 0x413   :  { %v4823_v3 = vadd.f32 %v15511_v11, %v4822_v48  ;;  %v3339_v60 = vpop.f32.mrf.mxu1  ;;  %11336 = vmatmul.mubr.msk.f32.gmra.mxu1 %vm322_vm1, %v4857_v43  ;;  %11827 = vmatprep.subr.mxu0 %v12135_v1 }
 0x414   :  { %v15520_v8 = vadd.f32 %v3339_v60, %v15367_v55  ;;  %v11309_v23 = vpop.f32.mrf.mxu0  ;;  %11828 = vmatpush3.msra.mxu0 %v15041_v54  ;;  %11769 = vmatprep.mubr.msk.f32.mxu0 %vm12136_vm0, %v12135_v1  ;;  %v6124_v54 = vld [vmem:[%s17023_s0 + $0x668] sm:$0xff] }
 0x415   :  { %v4858_v53 = vmax.f32 %v4823_v3, 0.0  ;;  %v10815_v39 = vpop.f32.mrf.mxu1  ;;  %11829 = vmatprep.subr.mxu0 %v12135_v1  ;;  %11338 = vmatprep.mubr.msk.f32.mxu1 %vm12136_vm0, %v12135_v1  ;;  %v12100_v3 = vld [vmem:[%s17024_s1 + $0x58] sm:$0xff] }
 0x416   :  { %v4827_v12 = vpop.f32.mrf.mxu0  ;;  %11770 = vmatmul.mubr.f32.gmra.mxu0 %v6123_v21  ;;  %11420 = vmatprep.subr.mxu1 %v12135_v1  ;;  %v6397_v39 = vld [vmem:[%s17023_s0 + $0x698] sm:$0xff] }
 0x417   :  { %v4828_v55 = vadd.f32 %v15511_v11, %v4827_v12  ;;  %11830 = vmatpush3.msra.mxu0 %v15054_v59  ;;  %v3344_v52 = vpop.f32.mrf.mxu1  ;;  %11339 = vmatmul.mubr.msk.f32.gmra.mxu1 %vm322_vm1, %v4858_v53  ;;  %v12101_v53 = vld [vmem:[%s17024_s1 + $0x50] sm:$0xff] }
 0x418   :  { %v15536_v13 = vadd.f32 %v3344_v52, %v15383_v33  ;;  %11831 = vmatprep.subr.mxu0 %v12135_v1  ;;  %v11312_v14 = vpop.f32.mrf.mxu0  ;;  %11772 = vmatprep.mubr.msk.f32.mxu0 %vm12136_vm0, %v12135_v1 }
 0x419   :  { %v4859_v38 = vmax.f32 %v4828_v55, 0.0  ;;  %11832 = vmatpush3.msra.mxu0 %v15070_v4  ;;  %v10818_v59 = vpop.f32.mrf.mxu1  ;;  %11341 = vmatprep.mubr.msk.f32.mxu1 %vm12136_vm0, %v12135_v1  ;;  %v12102_v14 = vld [vmem:[%s17024_s1 + $0x48] sm:$0xff] }
 0x41a   :  { %11833 = vmatprep.subr.mxu0 %v12135_v1  ;;  %v4832_v30 = vpop.f32.mrf.mxu0  ;;  %11773 = vmatmul.mubr.f32.gmra.mxu0 %v6124_v54 }
 0x41b   :  { %v4833_v33 = vadd.f32 %v15511_v11, %v4832_v30  ;;  %11834 = vmatpush3.msra.mxu0 %v15080_v25  ;;  %v3580_v32 = vpop.f32.mrf.mxu1  ;;  %11342 = vmatmul.mubr.msk.f32.gmra.mxu1 %vm322_vm1, %v4859_v38 }
 0x41c   :  { %v15552_v4 = vadd.f32 %v3580_v32, %v15399_v7  ;;  %v11315_v61 = vpop.f32.mrf.mxu0  ;;  %11835 = vmatprep.subr.mxu0 %v12135_v1  ;;  %11775 = vmatprep.mubr.msk.f32.mxu0 %vm12136_vm0, %v12135_v1  ;;  %v6398_v32 = vld [vmem:[%s17023_s0 + $0x6a0] sm:$0xff] }
 0x41d   :  { %v4860_v16 = vmax.f32 %v4833_v33, 0.0  ;;  %v10884_v10 = vpop.f32.mrf.mxu1  ;;  %11836 = vmatpush3.msra.mxu0 %v15096_v15  ;;  %11344 = vmatprep.mubr.msk.f32.mxu1 %vm12136_vm0, %v12135_v1  ;;  %v6393_v15 = vld [vmem:[%s17023_s0 + $0x678] sm:$0xff]  ;;  %v12103_v33 = vld [vmem:[%s17024_s1 + $0x40] sm:$0xff] }
 0x41e   :  { %v4837_v25 = vpop.f32.mrf.mxu0  ;;  %11776 = vmatmul.mubr.f32.gmra.mxu0 %v6125_v56  ;;  %11837 = vmatprep.subr.mxu0 %v12135_v1 }
 0x41f   :  { %v4838_v7 = vadd.f32 %v15511_v11, %v4837_v25  ;;  %v3585_v28 = vpop.f32.mrf.mxu1  ;;  %11345 = vmatmul.mubr.msk.f32.gmra.mxu1 %vm322_vm1, %v4860_v16  ;;  %11838 = vmatpush3.msra.mxu0 %v15107_v63  ;;  %v12104_v25 = vld [vmem:[%s17024_s1 + $0x38] sm:$0xff] }
 0x420   :  { %v15571_v18 = vadd.f32 %v3585_v28, %v15418_v49  ;;  %v11318_v9 = vpop.f32.mrf.mxu0  ;;  %11839 = vmatprep.subr.mxu0 %v12135_v1  ;;  %11841 = vmatprep.mubr.msk.f32.mxu0 %vm12136_vm0, %v12135_v1 }
 0x421   :  { %v4861_v31 = vmax.f32 %v4838_v7, 0.0  ;;  %v10887_v22 = vpop.f32.mrf.mxu1  ;;  %11840 = vmatpush3.msra.mxu0 %v15125_v47  ;;  %11347 = vmatprep.mubr.msk.f32.mxu1 %vm12136_vm0, %v12135_v1  ;;  %v12096_v47 = vld [vmem:[%s17024_s1 + $0x78] sm:$0xff] }
 0x422   :  { %v4842_v63 = vpop.f32.mrf.mxu0  ;;  %11421 = vmatpush3.msra.mxu1 %v5141_v42  ;;  %11842 = vmatmul.mubr.f32.vlgmr.msra.gmra.mxu0 %v6393_v15  ;;  %v6399_v42 = vld [vmem:[%s17023_s0 + $0x6a8] sm:$0xff] }
 0x423   :  { %v4843_v51 = vadd.f32 %v15511_v11, %v4842_v63  ;;  %11899 = vmatprep.subr.mxu0 %v12135_v1  ;;  %v3590_v49 = vpop.f32.mrf.mxu1  ;;  %11348 = vmatmul.mubr.msk.f32.gmra.mxu1 %vm322_vm1, %v4861_v31  ;;  %v12105_v31 = vld [vmem:[%s17024_s1 + $0x30] sm:$0xff] }
 0x424   :  { %v15586_v5 = vadd.f32 %v3590_v49, %v15433_v26  ;;  %11900 = vmatpush3.msra.mxu0 %v12096_v47  ;;  %v11321_v37 = vpop.f32.mrf.mxu0  ;;  %11844 = vmatprep.mubr.msk.f32.mxu0 %vm12136_vm0, %v12135_v1  ;;  %v12106_v49 = vld [vmem:[%s17024_s1 + $0x28] sm:$0xff]  ;;  %v6400_v47 = vld [vmem:[%s17023_s0 + $0x6b0] sm:$0xff] }
 0x425   :  { %v4862_v20 = vmax.f32 %v4843_v51, 0.0  ;;  %v10890_v24 = vpop.f32.mrf.mxu1  ;;  %11901 = vmatprep.subr.mxu0 %v12135_v1  ;;  %11350 = vmatprep.mubr.msk.f32.mxu1 %vm12136_vm0, %v12135_v1 }
 0x426   :  { %v4847_v50 = vpop.f32.mrf.mxu0  ;;  %11845 = vmatmul.mubr.f32.gmra.mxu0 %v6394_v35  ;;  %11508 = vmatprep.subr.mxu1 %v12135_v1 }
 0x427   :  { %v4848_v26 = vadd.f32 %v15511_v11, %v4847_v50  ;;  %11902 = vmatpush3.msra.mxu0 %v12097_v57  ;;  %v3595_v17 = vpop.f32.mrf.mxu1  ;;  %11351 = vmatmul.mubr.msk.f32.gmra.mxu1 %vm322_vm1, %v4862_v20  ;;  %v12107_v50 = vld [vmem:[%s17024_s1 + $0x20] sm:$0xff] }
 0x428   :  { %v15606_v46 = vadd.f32 %v3595_v17, %v15449_v44  ;;  %11903 = vmatprep.subr.mxu0 %v12135_v1  ;;  %v11324_v36 = vpop.f32.mrf.mxu0  ;;  %11847 = vmatprep.mubr.msk.f32.mxu0 %vm12136_vm0, %v12135_v1  ;;  %v12108_v17 = vld [vmem:[%s17024_s1 + $0x18] sm:$0xff] }
 0x429   :  { %v4863_v2 = vmax.f32 %v4848_v26, 0.0  ;;  %11904 = vmatpush3.msra.mxu0 %v12098_v19  ;;  %v10893_v6 = vpop.f32.mrf.mxu1  ;;  %11353 = vmatprep.mubr.msk.f32.mxu1 %vm12136_vm0, %v12135_v1  ;;  %v6401_v36 = vld [vmem:[%s17023_s0 + $0x6b8] sm:$0xff] }
 0x42a   :  { %11905 = vmatprep.subr.mxu0 %v12135_v1  ;;  %v4852_v44 = vpop.f32.mrf.mxu0  ;;  %11848 = vmatmul.mubr.f32.gmra.mxu0 %v6395_v0 }
 0x42b   :  { %v4853_v58 = vadd.f32 %v15511_v11, %v4852_v44  ;;  %11906 = vmatpush3.msra.mxu0 %v12099_v40  ;;  %v3600_v41 = vpop.f32.mrf.mxu1  ;;  %11354 = vmatmul.mubr.msk.f32.gmra.mxu1 %vm322_vm1, %v4863_v2 }
 0x42c   :  { %v15626_v43 = vadd.f32 %v3600_v41, %v15465_v45  ;;  %11907 = vmatprep.subr.mxu0 %v12135_v1  ;;  %v11327_v34 = vpop.f32.mrf.mxu0  ;;  %11850 = vmatprep.mubr.msk.f32.mxu0 %vm12136_vm0, %v12135_v1 }
 0x42d   :  { %v4864_v48 = vmax.f32 %v4853_v58, 0.0  ;;  %11908 = vmatpush3.msra.mxu0 %v12100_v3  ;;  %v10896_v60 = vpop.f32.mrf.mxu1  ;;  %11356 = vmatprep.mubr.msk.f32.mxu1 %vm12136_vm0, %v12135_v1  ;;  %v12109_v58 = vld [vmem:[%s17024_s1 + $0x10] sm:$0xff] }
 0x42e   :  { %v5088_v21 = vpop.f32.mrf.mxu0  ;;  %11851 = vmatmul.mubr.f32.gmra.mxu0 %v6396_v27  ;;  %11909 = vmatprep.subr.mxu0 %v12135_v1  ;;  %v12110_v27 = vld [vmem:[%s17024_s1 + $0x8] sm:$0xff]  ;;  %v5417_v34 = vld [vmem:[%s17026_s3 + $0x130] sm:$0xff] }
 0x42f   :  { %v5089_v45 = vadd.f32 %v15511_v11, %v5088_v21  ;;  %v3605_v23 = vpop.f32.mrf.mxu1  ;;  %11357 = vmatmul.mubr.msk.f32.gmra.mxu1 %vm322_vm1, %v4864_v48  ;;  %11910 = vmatpush3.msra.mxu0 %v12101_v53  ;;  %v6669_v48 = vld [vmem:[%s17023_s0 + $0x6c0] sm:$0xff] }
 0x430   :  { %v15646_v12 = vadd.f32 %v3605_v23, %v15481_v62  ;;  %v11393_v55 = vpop.f32.mrf.mxu0  ;;  %11911 = vmatprep.subr.mxu0 %v12135_v1  ;;  %11853 = vmatprep.mubr.msk.f32.mxu0 %vm12136_vm0, %v12135_v1  ;;  %v5418_v62 = vld [vmem:[%s17026_s3 + $0x138] sm:$0xff]  ;;  %v12111_v23 = vld [vmem:[%s17024_s1] sm:$0xff]  ;;  %s12113_s1 = scalar_lea.vmem %s8440_s14, 32 }
 0x431   :  { %v5132_v52 = vmax.f32 %v5089_v45, 0.0  ;;  %v10899_v54 = vpop.f32.mrf.mxu1  ;;  %11912 = vmatpush3.msra.mxu0 %v12102_v14  ;;  %11422 = vmatprep.mubr.msk.f32.mxu1 %vm12136_vm0, %v12135_v1  ;;  %v6670_v55 = vld [vmem:[%s17023_s0 + $0x6c8] sm:$0xff]  ;;  %p12114_p0 = scmp.ne.s32.totalorder %s8440_s14, %s12113_s1  ;;  %p12119_p2 = scmp.lt.s32.totalorder %s12113_s1, %s12113_s1 }
 0x432   :  { %v5093_v38 = vpop.f32.mrf.mxu0  ;;  %11854 = vmatmul.mubr.f32.gmra.mxu0 %v6397_v39  ;;  %11913 = vmatprep.subr.mxu0 %v12135_v1 }
 0x433   :  { %v5094_v59 = vadd.f32 %v15511_v11, %v5093_v38  ;;  %v3610_v30 = vpop.f32.mrf.mxu1  ;;  %11423 = vmatmul.mubr.msk.f32.vlgmr.msra.gmra.mxu1 %vm322_vm1, %v5132_v52  ;;  %11914 = vmatpush3.msra.mxu0 %v12103_v33  ;;  %p12120_p3 = por %p12119_p2, %p12118_p1 }
 0x434   :  { %v15669_v56 = vadd.f32 %v3610_v30, %v15500_v29  ;;  %v11396_v61 = vpop.f32.mrf.mxu0  ;;  %11509 = vmatpush3.msra.mxu1 %v5418_v62  ;;  %11915 = vmatprep.subr.mxu0 %v12135_v1 }
 0x435   :  { %v5133_v16 = vmax.f32 %v5094_v59, 0.0  ;;  %v10902_v10 = vpop.f32.mrf.mxu1  ;;  %11856 = vmatprep.mubr.msk.f32.mxu0 %vm12136_vm0, %v12135_v1  ;;  %11916 = vmatpush3.msra.mxu0 %v12104_v25  ;;  %p12121_p4 = pnand %p12120_p3, %p12114_p0 }
 0x436   :  { %v5098_v7 = vpop.f32.mrf.mxu0  ;;  %11425 = vmatprep.mubr.msk.f32.mxu1 %vm12136_vm0, %v12135_v1  ;;  %11857 = vmatmul.mubr.f32.gmra.mxu0 %v6398_v32 }
 0x437   :  { %v5099_v29 = vadd.f32 %v15511_v11, %v5098_v7  ;;  %v3615_v28 = vpop.f32.mrf.mxu1  ;;  %11426 = vmatmul.mubr.msk.f32.gmra.mxu1 %vm322_vm1, %v5133_v16  ;;  %11917 = vmatprep.subr.mxu0 %v12135_v1 }
 0x438   :  { %v15686_v15 = vadd.f32 %v3615_v28, %v15520_v8  ;;  %v11399_v9 = vpop.f32.mrf.mxu0  ;;  %11918 = vmatpush3.msra.mxu0 %v12105_v31  ;;  %11859 = vmatprep.mubr.msk.f32.mxu0 %vm12136_vm0, %v12135_v1 }
 0x439   :  { %v5134_v22 = vmax.f32 %v5099_v29, 0.0  ;;  %v10905_v63 = vpop.f32.mrf.mxu1  ;;  %11919 = vmatprep.subr.mxu0 %v12135_v1  ;;  %11428 = vmatprep.mubr.msk.f32.mxu1 %vm12136_vm0, %v12135_v1 }
 0x43a   :  { %v5103_v51 = vpop.f32.mrf.mxu0  ;;  %11860 = vmatmul.mubr.f32.gmra.mxu0 %v6399_v42  ;;  %11510 = vmatprep.subr.mxu1 %v12135_v1 }
 0x43b   :  { %v5104_v8 = vadd.f32 %v15511_v11, %v5103_v51  ;;  %11920 = vmatpush3.msra.mxu0 %v12106_v49  ;;  %v3620_v35 = vpop.f32.mrf.mxu1  ;;  %11429 = vmatmul.mubr.msk.f32.gmra.mxu1 %vm322_vm1, %v5134_v22 }
 0x43c   :  { %v15706_v37 = vadd.f32 %v3620_v35, %v15536_v13  ;;  %11921 = vmatprep.subr.mxu0 %v12135_v1  ;;  %v11402_v20 = vpop.f32.mrf.mxu0  ;;  %11862 = vmatprep.mubr.msk.f32.mxu0 %vm12136_vm0, %v12135_v1 }
 0x43d   :  { %v5135_v24 = vmax.f32 %v5104_v8, 0.0  ;;  %11922 = vmatpush3.msra.mxu0 %v12107_v50  ;;  %v10908_v26 = vpop.f32.mrf.mxu1  ;;  %11431 = vmatprep.mubr.msk.f32.mxu1 %vm12136_vm0, %v12135_v1 }
 0x43e   :  { %11923 = vmatprep.subr.mxu0 %v12135_v1  ;;  %v5108_v13 = vpop.f32.mrf.mxu0  ;;  %11863 = vmatmul.mubr.f32.gmra.mxu0 %v6400_v47  ;;  %v5694_v47 = vld [vmem:[%s17026_s3 + $0x148] sm:$0xff]  ;;  %v5693_v26 = vld [vmem:[%s17026_s3 + $0x140] sm:$0xff] }
 0x43f   :  { %v5109_v57 = vadd.f32 %v15511_v11, %v5108_v13  ;;  %11924 = vmatpush3.msra.mxu0 %v12108_v17  ;;  %v3856_v0 = vpop.f32.mrf.mxu1  ;;  %11432 = vmatmul.mubr.msk.f32.gmra.mxu1 %vm322_vm1, %v5135_v24 }
 0x440   :  { %v15726_v2 = vadd.f32 %v3856_v0, %v15552_v4  ;;  %v11405_v19 = vpop.f32.mrf.mxu0  ;;  %11925 = vmatprep.subr.mxu0 %v12135_v1  ;;  %11865 = vmatprep.mubr.msk.f32.mxu0 %vm12136_vm0, %v12135_v1 }
 0x441   :  { %v5136_v6 = vmax.f32 %v5109_v57, 0.0  ;;  %v10974_v44 = vpop.f32.mrf.mxu1  ;;  %11926 = vmatpush3.msra.mxu0 %v12109_v58  ;;  %11434 = vmatprep.mubr.msk.f32.mxu1 %vm12136_vm0, %v12135_v1 }
 0x442   :  { %v5113_v40 = vpop.f32.mrf.mxu0  ;;  %11866 = vmatmul.mubr.f32.gmra.mxu0 %v6401_v36  ;;  %11927 = vmatprep.subr.mxu0 %v12135_v1 }
 0x443   :  { %v5114_v4 = vadd.f32 %v15511_v11, %v5113_v40  ;;  %v3861_v41 = vpop.f32.mrf.mxu1  ;;  %11435 = vmatmul.mubr.msk.f32.gmra.mxu1 %vm322_vm1, %v5136_v6  ;;  %11928 = vmatpush3.msra.mxu0 %v12110_v27 }
 0x444   :  { %v15749_v3 = vadd.f32 %v3861_v41, %v15571_v18  ;;  %v11408_v60 = vpop.f32.mrf.mxu0  ;;  %11929 = vmatprep.subr.mxu0 %v12135_v1  ;;  %11931 = vmatprep.mubr.msk.f32.mxu0 %vm12136_vm0, %v12135_v1 }
 0x445   :  { %v5137_v21 = vmax.f32 %v5114_v4, 0.0  ;;  %v10977_v45 = vpop.f32.mrf.mxu1  ;;  %11930 = vmatpush3.msra.mxu0 %v12111_v23  ;;  %11437 = vmatprep.mubr.msk.f32.mxu1 %vm12136_vm0, %v12135_v1 }
 0x446   :  { %v5118_v53 = vpop.f32.mrf.mxu0  ;;  %11511 = vmatpush3.msra.mxu1 %v5417_v34  ;;  %11932 = vmatmul.mubr.f32.vlgmr.msra.gmra.mxu0 %v6669_v48 }
 0x447   :  { %v5119_v18 = vadd.f32 %v15511_v11, %v5118_v53  ;;  %v3866_v39 = vpop.f32.mrf.mxu1  ;;  %11438 = vmatmul.mubr.msk.f32.gmra.mxu1 %vm322_vm1, %v5137_v21  ;;  %11934 = vmatprep.mubr.msk.f32.mxu0 %vm12136_vm0, %v12135_v1 }
 0x448   :  { %v15767_v52 = vadd.f32 %v3866_v39, %v15586_v5  ;;  %v11411_v54 = vpop.f32.mrf.mxu0  ;;  %11440 = vmatprep.mubr.msk.f32.mxu1 %vm12136_vm0, %v12135_v1  ;;  %11598 = vmatprep.subr.mxu1 %v12135_v1  ;;  %v6671_v5 = vld [vmem:[%s17023_s0 + $0x6d0] sm:$0xff] }
 0x449   :  { %v5138_v14 = vmax.f32 %v5119_v18, 0.0  ;;  %v10980_v62 = vpop.f32.mrf.mxu1 }
 0x44a   :  { %v5123_v38 = vpop.f32.mrf.mxu0  ;;  %11935 = vmatmul.mubr.f32.gmra.mxu0 %v6670_v55 }
 0x44b   :  { %v5124_v59 = vadd.f32 %v15511_v11, %v5123_v38  ;;  %v3871_v30 = vpop.f32.mrf.mxu1  ;;  %11441 = vmatmul.mubr.msk.f32.gmra.mxu1 %vm322_vm1, %v5138_v14  ;;  %11937 = vmatprep.mubr.msk.f32.mxu0 %vm12136_vm0, %v12135_v1 }
 0x44c   :  { %v15780_v33 = vadd.f32 %v3871_v30, %v15606_v46  ;;  %v11414_v32 = vpop.f32.mrf.mxu0  ;;  %11443 = vmatprep.mubr.msk.f32.mxu1 %vm12136_vm0, %v12135_v1  ;;  %v6672_v46 = vld [vmem:[%s17023_s0 + $0x6d8] sm:$0xff] }
 0x44d   :  { %v5139_v61 = vmax.f32 %v5124_v59, 0.0  ;;  %v10983_v16 = vpop.f32.mrf.mxu1 }
 0x44e   :  { %v5128_v10 = vpop.f32.mrf.mxu0  ;;  %11938 = vmatmul.mubr.f32.gmra.mxu0 %v6671_v5 }
 0x44f   :  { %v5129_v25 = vadd.f32 %v15511_v11, %v5128_v10  ;;  %v3876_v7 = vpop.f32.mrf.mxu1  ;;  %11444 = vmatmul.mubr.msk.f32.gmra.mxu1 %vm322_vm1, %v5139_v61  ;;  %11940 = vmatprep.mubr.msk.f32.mxu0 %vm12136_vm0, %v12135_v1 }
 0x450   :  { %v15792_v29 = vadd.f32 %v3876_v7, %v15626_v43  ;;  %v11417_v28 = vpop.f32.mrf.mxu0  ;;  %11446 = vmatprep.mubr.msk.f32.mxu1 %vm12136_vm0, %v12135_v1  ;;  %v6673_v43 = vld [vmem:[%s17023_s0 + $0x6e0] sm:$0xff] }
 0x451   :  { %v5140_v42 = vmax.f32 %v5129_v25, 0.0  ;;  %v10986_v9 = vpop.f32.mrf.mxu1 }
 0x452   :  { %v5364_v31 = vpop.f32.mrf.mxu0  ;;  %11941 = vmatmul.mubr.f32.gmra.mxu0 %v6672_v46 }
 0x453   :  { %v5365_v22 = vadd.f32 %v15511_v11, %v5364_v31  ;;  %v3881_v63 = vpop.f32.mrf.mxu1  ;;  %11447 = vmatmul.mubr.msk.f32.gmra.mxu1 %vm322_vm1, %v5140_v42  ;;  %11943 = vmatprep.mubr.msk.f32.mxu0 %vm12136_vm0, %v12135_v1 }
 0x454   :  { %v15804_v51 = vadd.f32 %v3881_v63, %v15646_v12  ;;  %v11483_v8 = vpop.f32.mrf.mxu0  ;;  %11512 = vmatprep.mubr.msk.f32.mxu1 %vm12136_vm0, %v12135_v1  ;;  %v6674_v12 = vld [vmem:[%s17023_s0 + $0x6e8] sm:$0xff] }
 0x455   :  { %v5408_v49 = vmax.f32 %v5365_v22, 0.0  ;;  %v10989_v35 = vpop.f32.mrf.mxu1 }
 0x456   :  { %v5369_v20 = vpop.f32.mrf.mxu0  ;;  %11944 = vmatmul.mubr.f32.gmra.mxu0 %v6673_v43 }
 0x457   :  { %v5370_v24 = vadd.f32 %v15511_v11, %v5369_v20  ;;  %v3886_v50 = vpop.f32.mrf.mxu1  ;;  %11513 = vmatmul.mubr.msk.f32.vlgmr.msra.gmra.mxu1 %vm322_vm1, %v5408_v49  ;;  %11946 = vmatprep.mubr.msk.f32.mxu0 %vm12136_vm0, %v12135_v1 }
 0x458   :  { %v15822_v13 = vadd.f32 %v3886_v50, %v15669_v56  ;;  %v11486_v57 = vpop.f32.mrf.mxu0  ;;  %11599 = vmatpush3.msra.mxu1 %v5694_v47  ;;  %11515 = vmatprep.mubr.msk.f32.mxu1 %vm12136_vm0, %v12135_v1  ;;  %v6675_v56 = vld [vmem:[%s17023_s0 + $0x6f0] sm:$0xff] }
 0x459   :  { %v5409_v17 = vmax.f32 %v5370_v24, 0.0  ;;  %v10992_v0 = vpop.f32.mrf.mxu1  ;;  %11600 = vmatprep.subr.mxu1 %v12135_v1 }
 0x45a   :  { %v5374_v36 = vpop.f32.mrf.mxu0  ;;  %11947 = vmatmul.mubr.f32.gmra.mxu0 %v6674_v12  ;;  %11601 = vmatpush3.msra.mxu1 %v5693_v26  ;;  %v5970_v0 = vld [vmem:[%s17026_s3 + $0x158] sm:$0xff] }
 0x45b   :  { %v5375_v19 = vadd.f32 %v15511_v11, %v5374_v36  ;;  %v3891_v6 = vpop.f32.mrf.mxu1  ;;  %11516 = vmatmul.mubr.msk.f32.gmra.mxu1 %vm322_vm1, %v5409_v17  ;;  %11949 = vmatprep.mubr.msk.f32.mxu0 %vm12136_vm0, %v12135_v1 }
 0x45c   :  { %v15835_v44 = vadd.f32 %v3891_v6, %v15686_v15  ;;  %v11489_v58 = vpop.f32.mrf.mxu0  ;;  %11518 = vmatprep.mubr.msk.f32.mxu1 %vm12136_vm0, %v12135_v1  ;;  %11688 = vmatprep.subr.mxu1 %v12135_v1  ;;  %v6676_v15 = vld [vmem:[%s17023_s0 + $0x6f8] sm:$0xff] }
 0x45d   :  { %v5410_v40 = vmax.f32 %v5375_v19, 0.0  ;;  %v10995_v4 = vpop.f32.mrf.mxu1 }
 0x45e   :  { %v5379_v41 = vpop.f32.mrf.mxu0  ;;  %11950 = vmatmul.mubr.f32.gmra.mxu0 %v6675_v56 }
 0x45f   :  { %v5380_v27 = vadd.f32 %v15511_v11, %v5379_v41  ;;  %v3896_v34 = vpop.f32.mrf.mxu1  ;;  %11519 = vmatmul.mubr.msk.f32.gmra.mxu1 %vm322_vm1, %v5410_v40  ;;  %11952 = vmatprep.mubr.msk.f32.mxu0 %vm12136_vm0, %v12135_v1 }
 0x460   :  { %v15848_v48 = vadd.f32 %v3896_v34, %v15706_v37  ;;  %v11492_v60 = vpop.f32.mrf.mxu0  ;;  %11521 = vmatprep.mubr.msk.f32.mxu1 %vm12136_vm0, %v12135_v1  ;;  %v6677_v37 = vld [vmem:[%s17023_s0 + $0x700] sm:$0xff] }
 0x461   :  { %v5411_v21 = vmax.f32 %v5380_v27, 0.0  ;;  %v10998_v45 = vpop.f32.mrf.mxu1 }
 0x462   :  { %v5384_v23 = vpop.f32.mrf.mxu0  ;;  %11953 = vmatmul.mubr.f32.gmra.mxu0 %v6676_v15 }
 0x463   :  { %v5385_v53 = vadd.f32 %v15511_v11, %v5384_v23  ;;  %v4132_v18 = vpop.f32.mrf.mxu1  ;;  %11522 = vmatmul.mubr.msk.f32.gmra.mxu1 %vm322_vm1, %v5411_v21  ;;  %11955 = vmatprep.mubr.msk.f32.mxu0 %vm12136_vm0, %v12135_v1 }
 0x464   :  { %v15860_v39 = vadd.f32 %v4132_v18, %v15726_v2  ;;  %v11495_v55 = vpop.f32.mrf.mxu0  ;;  %11524 = vmatprep.mubr.msk.f32.mxu1 %vm12136_vm0, %v12135_v1 }
 0x465   :  { %v5412_v54 = vmax.f32 %v5385_v53, 0.0  ;;  %v11064_v14 = vpop.f32.mrf.mxu1 }
 0x466   :  { %v5389_v62 = vpop.f32.mrf.mxu0  ;;  %11956 = vmatmul.mubr.f32.gmra.mxu0 %v6677_v37 }
 0x467   :  { %v5390_v38 = vadd.f32 %v15511_v11, %v5389_v62  ;;  %v4137_v59 = vpop.f32.mrf.mxu1  ;;  %11525 = vmatmul.mubr.msk.f32.gmra.mxu1 %vm322_vm1, %v5412_v54  ;;  %7166 = vmatprep.mubr.f32.mxu0 %v12135_v1 }
 0x468   :  { %v15868_v30 = vadd.f32 %v4137_v59, %v15749_v3  ;;  %v11498_v2 = vpop.f32.mrf.mxu0  ;;  %11527 = vmatprep.mubr.msk.f32.mxu1 %vm12136_vm0, %v12135_v1 }
 0x469   :  { %v5413_v5 = vmax.f32 %v5390_v38, 0.0  ;;  %v11067_v32 = vpop.f32.mrf.mxu1 }
 0x46a   :  { %v5394_v61 = vpop.f32.mrf.mxu0 }
 0x46b   :  { %v5395_v16 = vadd.f32 %v15511_v11, %v5394_v61  ;;  %v4142_v10 = vpop.f32.mrf.mxu1  ;;  %11528 = vmatmul.mubr.msk.f32.gmra.mxu1 %vm322_vm1, %v5413_v5 }
 0x46c   :  { %v15875_v25 = vadd.f32 %v4142_v10, %v15767_v52  ;;  %v11501_v7 = vpop.f32.mrf.mxu0  ;;  %11530 = vmatprep.mubr.msk.f32.mxu1 %vm12136_vm0, %v12135_v1 }
 0x46d   :  { %v5414_v3 = vmax.f32 %v5395_v16, 0.0  ;;  %v11070_v46 = vpop.f32.mrf.mxu1 }
 0x46e   :  { %v5399_v28 = vpop.f32.mrf.mxu0 }
 0x46f   :  { %v5400_v42 = vadd.f32 %v15511_v11, %v5399_v28  ;;  %v4147_v9 = vpop.f32.mrf.mxu1  ;;  %11531 = vmatmul.mubr.msk.f32.gmra.mxu1 %vm322_vm1, %v5414_v3 }
 0x470   :  { %v15882_v31 = vadd.f32 %v4147_v9, %v15780_v33  ;;  %v11504_v22 = vpop.f32.mrf.mxu0  ;;  %11533 = vmatprep.mubr.msk.f32.mxu1 %vm12136_vm0, %v12135_v1 }
 0x471   :  { %v5415_v52 = vmax.f32 %v5400_v42, 0.0  ;;  %v11073_v63 = vpop.f32.mrf.mxu1 }
 0x472   :  { %v5404_v43 = vpop.f32.mrf.mxu0 }
 0x473   :  { %v5405_v8 = vadd.f32 %v15511_v11, %v5404_v43  ;;  %v4152_v49 = vpop.f32.mrf.mxu1  ;;  %11534 = vmatmul.mubr.msk.f32.gmra.mxu1 %vm322_vm1, %v5415_v52 }
 0x474   :  { %v15889_v35 = vadd.f32 %v4152_v49, %v15792_v29  ;;  %v11507_v47 = vpop.f32.mrf.mxu0  ;;  %11536 = vmatprep.mubr.msk.f32.mxu1 %vm12136_vm0, %v12135_v1 }
 0x475   :  { %v5416_v33 = vmax.f32 %v5405_v8, 0.0  ;;  %v11076_v20 = vpop.f32.mrf.mxu1 }
 0x476   :  { %v5640_v24 = vpop.f32.mrf.mxu0 }
 0x477   :  { %v5641_v50 = vadd.f32 %v15511_v11, %v5640_v24  ;;  %v4157_v12 = vpop.f32.mrf.mxu1  ;;  %11537 = vmatmul.mubr.msk.f32.gmra.mxu1 %vm322_vm1, %v5416_v33 }
 0x478   :  { %v15896_v26 = vadd.f32 %v4157_v12, %v15804_v51  ;;  %v11573_v57 = vpop.f32.mrf.mxu0  ;;  %11602 = vmatprep.mubr.msk.f32.mxu1 %vm12136_vm0, %v12135_v1  ;;  %v5969_v51 = vld [vmem:[%s17026_s3 + $0x150] sm:$0xff] }
 0x479   :  { %v5684_v29 = vmax.f32 %v5641_v50, 0.0  ;;  %v11079_v17 = vpop.f32.mrf.mxu1 }
 0x47a   :  { %v5645_v36 = vpop.f32.mrf.mxu0 }
 0x47b   :  { %v5646_v19 = vadd.f32 %v15511_v11, %v5645_v36  ;;  %v4162_v6 = vpop.f32.mrf.mxu1  ;;  %11603 = vmatmul.mubr.msk.f32.vlgmr.msra.gmra.mxu1 %vm322_vm1, %v5684_v29 }
 0x47c   :  { %v15909_v56 = vadd.f32 %v4162_v6, %v15822_v13  ;;  %v11576_v58 = vpop.f32.mrf.mxu0  ;;  %11689 = vmatpush3.msra.mxu1 %v5970_v0  ;;  %11605 = vmatprep.mubr.msk.f32.mxu1 %vm12136_vm0, %v12135_v1 }
 0x47d   :  { %v5685_v40 = vmax.f32 %v5646_v19, 0.0  ;;  %v11082_v4 = vpop.f32.mrf.mxu1  ;;  %11690 = vmatprep.subr.mxu1 %v12135_v1 }
 0x47e   :  { %v5650_v41 = vpop.f32.mrf.mxu0  ;;  %11691 = vmatpush3.msra.mxu1 %v5969_v51  ;;  %v6246_v51 = vld [vmem:[%s17026_s3 + $0x168] sm:$0xff] }
 0x47f   :  { %v5651_v27 = vadd.f32 %v15511_v11, %v5650_v41  ;;  %v4167_v34 = vpop.f32.mrf.mxu1  ;;  %11606 = vmatmul.mubr.msk.f32.gmra.mxu1 %vm322_vm1, %v5685_v40  ;;  %11778 = vmatprep.subr.mxu1 %v12135_v1 }
 0x480   :  { %v15918_v13 = vadd.f32 %v4167_v34, %v15835_v44  ;;  %v11579_v15 = vpop.f32.mrf.mxu0  ;;  %11608 = vmatprep.mubr.msk.f32.mxu1 %vm12136_vm0, %v12135_v1 }
 0x481   :  { %v5686_v60 = vmax.f32 %v5651_v27, 0.0  ;;  %v11085_v21 = vpop.f32.mrf.mxu1 }
 0x482   :  { %v5655_v45 = vpop.f32.mrf.mxu0 }
 0x483   :  { %v5656_v23 = vadd.f32 %v15511_v11, %v5655_v45  ;;  %v4172_v53 = vpop.f32.mrf.mxu1  ;;  %11609 = vmatmul.mubr.msk.f32.gmra.mxu1 %vm322_vm1, %v5686_v60 }
 0x484   :  { %v15925_v18 = vadd.f32 %v4172_v53, %v15848_v48  ;;  %v11582_v37 = vpop.f32.mrf.mxu0  ;;  %11611 = vmatprep.mubr.msk.f32.mxu1 %vm12136_vm0, %v12135_v1 }
 0x485   :  { %v5687_v44 = vmax.f32 %v5656_v23, 0.0  ;;  %v11088_v55 = vpop.f32.mrf.mxu1 }
 0x486   :  { %v5660_v54 = vpop.f32.mrf.mxu0 }
 0x487   :  { %v5661_v14 = vadd.f32 %v15511_v11, %v5660_v54  ;;  %v4408_v62 = vpop.f32.mrf.mxu1  ;;  %11612 = vmatmul.mubr.msk.f32.gmra.mxu1 %vm322_vm1, %v5687_v44 }
 0x488   :  { %v15932_v38 = vadd.f32 %v4408_v62, %v15860_v39  ;;  %v11585_v59 = vpop.f32.mrf.mxu0  ;;  %11614 = vmatprep.mubr.msk.f32.mxu1 %vm12136_vm0, %v12135_v1 }
 0x489   :  { %v5688_v48 = vmax.f32 %v5661_v14, 0.0  ;;  %v11154_v2 = vpop.f32.mrf.mxu1 }
 0x48a   :  { %v5665_v5 = vpop.f32.mrf.mxu0 }
 0x48b   :  { %v5666_v32 = vadd.f32 %v15511_v11, %v5665_v5  ;;  %v4413_v61 = vpop.f32.mrf.mxu1  ;;  %11615 = vmatmul.mubr.msk.f32.gmra.mxu1 %vm322_vm1, %v5688_v48 }
 0x48c   :  { %v15939_v16 = vadd.f32 %v4413_v61, %v15868_v30  ;;  %v11588_v10 = vpop.f32.mrf.mxu0  ;;  %11617 = vmatprep.mubr.msk.f32.mxu1 %vm12136_vm0, %v12135_v1 }
 0x48d   :  { %v5689_v39 = vmax.f32 %v5666_v32, 0.0  ;;  %v11157_v7 = vpop.f32.mrf.mxu1 }
 0x48e   :  { %v5670_v3 = vpop.f32.mrf.mxu0 }
 0x48f   :  { %v5671_v46 = vadd.f32 %v15511_v11, %v5670_v3  ;;  %v4418_v28 = vpop.f32.mrf.mxu1  ;;  %11618 = vmatmul.mubr.msk.f32.gmra.mxu1 %vm322_vm1, %v5689_v39 }
 0x490   :  { %v15946_v42 = vadd.f32 %v4418_v28, %v15875_v25  ;;  %v11591_v9 = vpop.f32.mrf.mxu0  ;;  %11620 = vmatprep.mubr.msk.f32.mxu1 %vm12136_vm0, %v12135_v1 }
 0x491   :  { %v5690_v30 = vmax.f32 %v5671_v46, 0.0  ;;  %v11160_v22 = vpop.f32.mrf.mxu1 }
 0x492   :  { %v5675_v52 = vpop.f32.mrf.mxu0 }
 0x493   :  { %v5676_v63 = vadd.f32 %v15511_v11, %v5675_v52  ;;  %v4423_v43 = vpop.f32.mrf.mxu1  ;;  %11621 = vmatmul.mubr.msk.f32.gmra.mxu1 %vm322_vm1, %v5690_v30 }
 0x494   :  { %v15953_v8 = vadd.f32 %v4423_v43, %v15882_v31  ;;  %v11594_v49 = vpop.f32.mrf.mxu0  ;;  %11623 = vmatprep.mubr.msk.f32.mxu1 %vm12136_vm0, %v12135_v1 }
 0x495   :  { %v5691_v25 = vmax.f32 %v5676_v63, 0.0  ;;  %v11163_v47 = vpop.f32.mrf.mxu1 }
 0x496   :  { %v5680_v33 = vpop.f32.mrf.mxu0 }
 0x497   :  { %v5681_v20 = vadd.f32 %v15511_v11, %v5680_v33  ;;  %v4428_v24 = vpop.f32.mrf.mxu1  ;;  %11624 = vmatmul.mubr.msk.f32.gmra.mxu1 %vm322_vm1, %v5691_v25 }
 0x498   :  { %v15960_v50 = vadd.f32 %v4428_v24, %v15889_v35  ;;  %v11597_v12 = vpop.f32.mrf.mxu0  ;;  %11626 = vmatprep.mubr.msk.f32.mxu1 %vm12136_vm0, %v12135_v1 }
 0x499   :  { %v5692_v31 = vmax.f32 %v5681_v20, 0.0  ;;  %v11166_v57 = vpop.f32.mrf.mxu1 }
 0x49a   :  { %v5916_v29 = vpop.f32.mrf.mxu0  ;;  %v16031_v57 = vld [vmem:[%s17025_s2] ss:$0 sm:$0xff] }
 0x49b   :  { %v5917_v17 = vadd.f32 %v15511_v11, %v5916_v29  ;;  %v4433_v0 = vpop.f32.mrf.mxu1  ;;  %11627 = vmatmul.mubr.msk.f32.gmra.mxu1 %vm322_vm1, %v5692_v31 }
 0x49c   :  { %v15967_v36 = vadd.f32 %v4433_v0, %v15896_v26  ;;  %v11663_v19 = vpop.f32.mrf.mxu0  ;;  %11692 = vmatprep.mubr.msk.f32.mxu1 %vm12136_vm0, %v12135_v1  ;;  %v6245_v26 = vld [vmem:[%s17026_s3 + $0x160] sm:$0xff] }
 0x49d   :  { %v5960_v35 = vmax.f32 %v5917_v17, 0.0  ;;  %v11169_v6 = vpop.f32.mrf.mxu1 }
 0x49e   :  { %v5921_v58 = vpop.f32.mrf.mxu0 }
 0x49f   :  { %v5922_v40 = vadd.f32 %v15511_v11, %v5921_v58  ;;  %v4438_v4 = vpop.f32.mrf.mxu1  ;;  %11693 = vmatmul.mubr.msk.f32.vlgmr.msra.gmra.mxu1 %vm322_vm1, %v5960_v35 }
 0x4a0   :  { %v15980_v41 = vadd.f32 %v4438_v4, %v15909_v56  ;;  %v11666_v27 = vpop.f32.mrf.mxu0  ;;  %11779 = vmatpush3.msra.mxu1 %v6246_v51  ;;  %11695 = vmatprep.mubr.msk.f32.mxu1 %vm12136_vm0, %v12135_v1 }
 0x4a1   :  { %v5961_v34 = vmax.f32 %v5922_v40, 0.0  ;;  %v11172_v15 = vpop.f32.mrf.mxu1  ;;  %11780 = vmatprep.subr.mxu1 %v12135_v1 }
 0x4a2   :  { %v5926_v60 = vpop.f32.mrf.mxu0  ;;  %11781 = vmatpush3.msra.mxu1 %v6245_v26  ;;  %v6522_v26 = vld [vmem:[%s17026_s3 + $0x178] sm:$0xff] }
 0x4a3   :  { %v5927_v21 = vadd.f32 %v15511_v11, %v5926_v60  ;;  %v4443_v45 = vpop.f32.mrf.mxu1  ;;  %11696 = vmatmul.mubr.msk.f32.gmra.mxu1 %vm322_vm1, %v5961_v34  ;;  %11868 = vmatprep.subr.mxu1 %v12135_v1 }
 0x4a4   :  { %v15989_v56 = vadd.f32 %v4443_v45, %v15918_v13  ;;  %v11669_v23 = vpop.f32.mrf.mxu0  ;;  %11698 = vmatprep.mubr.msk.f32.mxu1 %vm12136_vm0, %v12135_v1 }
 0x4a5   :  { %v5962_v53 = vmax.f32 %v5927_v21, 0.0  ;;  %v11175_v37 = vpop.f32.mrf.mxu1 }
 0x4a6   :  { %v5931_v44 = vpop.f32.mrf.mxu0 }
 0x4a7   :  { %v5932_v55 = vadd.f32 %v15511_v11, %v5931_v44  ;;  %v4448_v54 = vpop.f32.mrf.mxu1  ;;  %11699 = vmatmul.mubr.msk.f32.gmra.mxu1 %vm322_vm1, %v5962_v53 }
 0x4a8   :  { %v15996_v14 = vadd.f32 %v4448_v54, %v15925_v18  ;;  %v11672_v62 = vpop.f32.mrf.mxu0  ;;  %11701 = vmatprep.mubr.msk.f32.mxu1 %vm12136_vm0, %v12135_v1 }
 0x4a9   :  { %v5963_v13 = vmax.f32 %v5932_v55, 0.0  ;;  %v11178_v59 = vpop.f32.mrf.mxu1 }
 0x4aa   :  { %v5936_v48 = vpop.f32.mrf.mxu0 }
 0x4ab   :  { %v5937_v2 = vadd.f32 %v15511_v11, %v5936_v48  ;;  %v4684_v5 = vpop.f32.mrf.mxu1  ;;  %11702 = vmatmul.mubr.msk.f32.gmra.mxu1 %vm322_vm1, %v5963_v13 }
 0x4ac   :  { %v16003_v32 = vadd.f32 %v4684_v5, %v15932_v38  ;;  %v11675_v61 = vpop.f32.mrf.mxu0  ;;  %11704 = vmatprep.mubr.msk.f32.mxu1 %vm12136_vm0, %v12135_v1 }
 0x4ad   :  { %v5964_v18 = vmax.f32 %v5937_v2, 0.0  ;;  %v11244_v10 = vpop.f32.mrf.mxu1 }
 0x4ae   :  { %v5941_v39 = vpop.f32.mrf.mxu0 }
 0x4af   :  { %v5942_v7 = vadd.f32 %v15511_v11, %v5941_v39  ;;  %v4689_v3 = vpop.f32.mrf.mxu1  ;;  %11705 = vmatmul.mubr.msk.f32.gmra.mxu1 %vm322_vm1, %v5964_v18 }
 0x4b0   :  { %v16010_v46 = vadd.f32 %v4689_v3, %v15939_v16  ;;  %v11678_v28 = vpop.f32.mrf.mxu0  ;;  %11707 = vmatprep.mubr.msk.f32.mxu1 %vm12136_vm0, %v12135_v1 }
 0x4b1   :  { %v5965_v38 = vmax.f32 %v5942_v7, 0.0  ;;  %v11247_v9 = vpop.f32.mrf.mxu1 }
 0x4b2   :  { %v5946_v30 = vpop.f32.mrf.mxu0 }
 0x4b3   :  { %v5947_v22 = vadd.f32 %v15511_v11, %v5946_v30  ;;  %v4694_v52 = vpop.f32.mrf.mxu1  ;;  %11708 = vmatmul.mubr.msk.f32.gmra.mxu1 %vm322_vm1, %v5965_v38 }
 0x4b4   :  { %v16017_v63 = vadd.f32 %v4694_v52, %v15946_v42  ;;  %v11681_v43 = vpop.f32.mrf.mxu0  ;;  %11710 = vmatprep.mubr.msk.f32.mxu1 %vm12136_vm0, %v12135_v1 }
 0x4b5   :  { %v5966_v16 = vmax.f32 %v5947_v22, 0.0  ;;  %v11250_v49 = vpop.f32.mrf.mxu1 }
 0x4b6   :  { %v5951_v25 = vpop.f32.mrf.mxu0 }
 0x4b7   :  { %v5952_v47 = vadd.f32 %v15511_v11, %v5951_v25  ;;  %v4699_v33 = vpop.f32.mrf.mxu1  ;;  %11711 = vmatmul.mubr.msk.f32.gmra.mxu1 %vm322_vm1, %v5966_v16 }
 0x4b8   :  { %v16024_v20 = vadd.f32 %v4699_v33, %v15953_v8  ;;  %v11684_v24 = vpop.f32.mrf.mxu0  ;;  %11713 = vmatprep.mubr.msk.f32.mxu1 %vm12136_vm0, %v12135_v1 }
 0x4b9   :  { %v5967_v42 = vmax.f32 %v5952_v47, 0.0  ;;  %v11253_v12 = vpop.f32.mrf.mxu1 }
 0x4ba   :  { %v5956_v31 = vpop.f32.mrf.mxu0 }
 0x4bb   :  { %v5957_v11 = vadd.f32 %v16031_v57, %v5956_v31  ;;  %v4704_v29 = vpop.f32.mrf.mxu1  ;;  %11714 = vmatmul.mubr.msk.f32.gmra.mxu1 %vm322_vm1, %v5967_v42 }
 0x4bc   :  { %v16036_v8 = vadd.f32 %v4704_v29, %v15960_v50  ;;  %v11687_v17 = vpop.f32.mrf.mxu0  ;;  %11716 = vmatprep.mubr.msk.f32.mxu1 %vm12136_vm0, %v12135_v1 }
 0x4bd   :  { %v5968_v0 = vmax.f32 %v5957_v11, 0.0  ;;  %v11256_v19 = vpop.f32.mrf.mxu1 }
 0x4be   :  { %v6192_v35 = vpop.f32.mrf.mxu0 }
 0x4bf   :  { %v6193_v6 = vadd.f32 %v16031_v57, %v6192_v35  ;;  %v4709_v51 = vpop.f32.mrf.mxu1  ;;  %11717 = vmatmul.mubr.msk.f32.gmra.mxu1 %vm322_vm1, %v5968_v0 }
 0x4c0   :  { %v16043_v58 = vadd.f32 %v4709_v51, %v15967_v36  ;;  %v11753_v40 = vpop.f32.mrf.mxu0  ;;  %11782 = vmatprep.mubr.msk.f32.mxu1 %vm12136_vm0, %v12135_v1  ;;  %v6521_v36 = vld [vmem:[%s17026_s3 + $0x170] sm:$0xff] }
 0x4c1   :  { %v6236_v50 = vmax.f32 %v6193_v6, 0.0  ;;  %v11259_v4 = vpop.f32.mrf.mxu1 }
 0x4c2   :  { %v6197_v27 = vpop.f32.mrf.mxu0 }
 0x4c3   :  { %v6198_v34 = vadd.f32 %v16031_v57, %v6197_v27  ;;  %v4714_v15 = vpop.f32.mrf.mxu1  ;;  %11783 = vmatmul.mubr.msk.f32.vlgmr.msra.gmra.mxu1 %vm322_vm1, %v6236_v50 }
 0x4c4   :  { %v16056_v60 = vadd.f32 %v4714_v15, %v15980_v41  ;;  %v11756_v21 = vpop.f32.mrf.mxu0  ;;  %11869 = vmatpush3.msra.mxu1 %v6522_v26  ;;  %11785 = vmatprep.mubr.msk.f32.mxu1 %vm12136_vm0, %v12135_v1 }
 0x4c5   :  { %v6237_v45 = vmax.f32 %v6198_v34, 0.0  ;;  %v11262_v23 = vpop.f32.mrf.mxu1  ;;  %11870 = vmatprep.subr.mxu1 %v12135_v1 }
 0x4c6   :  { %v6202_v53 = vpop.f32.mrf.mxu0  ;;  %11871 = vmatpush3.msra.mxu1 %v6521_v36  ;;  %v6798_v36 = vld [vmem:[%s17026_s3 + $0x188] sm:$0xff] }
 0x4c7   :  { %v6203_v37 = vadd.f32 %v16031_v57, %v6202_v53  ;;  %v4719_v44 = vpop.f32.mrf.mxu1  ;;  %11786 = vmatmul.mubr.msk.f32.gmra.mxu1 %vm322_vm1, %v6237_v45  ;;  %11958 = vmatprep.subr.mxu1 %v12135_v1 }
 0x4c8   :  { %v16065_v41 = vadd.f32 %v4719_v44, %v15989_v56  ;;  %v11759_v55 = vpop.f32.mrf.mxu0  ;;  %11788 = vmatprep.mubr.msk.f32.mxu1 %vm12136_vm0, %v12135_v1 }
 0x4c9   :  { %v6238_v54 = vmax.f32 %v6203_v37, 0.0  ;;  %v11265_v62 = vpop.f32.mrf.mxu1 }
 0x4ca   :  { %v6207_v13 = vpop.f32.mrf.mxu0 }
 0x4cb   :  { %v6208_v59 = vadd.f32 %v16031_v57, %v6207_v13  ;;  %v4724_v48 = vpop.f32.mrf.mxu1  ;;  %11789 = vmatmul.mubr.msk.f32.gmra.mxu1 %vm322_vm1, %v6238_v54 }
 0x4cc   :  { %v16072_v2 = vadd.f32 %v4724_v48, %v15996_v14  ;;  %v11762_v5 = vpop.f32.mrf.mxu0  ;;  %11791 = vmatprep.mubr.msk.f32.mxu1 %vm12136_vm0, %v12135_v1 }
 0x4cd   :  { %v6239_v56 = vmax.f32 %v6208_v59, 0.0  ;;  %v11268_v61 = vpop.f32.mrf.mxu1 }
 0x4ce   :  { %v6212_v18 = vpop.f32.mrf.mxu0 }
 0x4cf   :  { %v6213_v10 = vadd.f32 %v16031_v57, %v6212_v18  ;;  %v4960_v39 = vpop.f32.mrf.mxu1  ;;  %11792 = vmatmul.mubr.msk.f32.gmra.mxu1 %vm322_vm1, %v6239_v56 }
 0x4d0   :  { %v16079_v7 = vadd.f32 %v4960_v39, %v16003_v32  ;;  %v11765_v3 = vpop.f32.mrf.mxu0  ;;  %11794 = vmatprep.mubr.msk.f32.mxu1 %vm12136_vm0, %v12135_v1 }
 0x4d1   :  { %v6240_v14 = vmax.f32 %v6213_v10, 0.0  ;;  %v11334_v28 = vpop.f32.mrf.mxu1 }
 0x4d2   :  { %v6217_v38 = vpop.f32.mrf.mxu0 }
 0x4d3   :  { %v6218_v9 = vadd.f32 %v16031_v57, %v6217_v38  ;;  %v4965_v30 = vpop.f32.mrf.mxu1  ;;  %11795 = vmatmul.mubr.msk.f32.gmra.mxu1 %vm322_vm1, %v6240_v14 }
 0x4d4   :  { %v16086_v22 = vadd.f32 %v4965_v30, %v16010_v46  ;;  %v11768_v52 = vpop.f32.mrf.mxu0  ;;  %11797 = vmatprep.mubr.msk.f32.mxu1 %vm12136_vm0, %v12135_v1 }
 0x4d5   :  { %v6241_v32 = vmax.f32 %v6218_v9, 0.0  ;;  %v11337_v43 = vpop.f32.mrf.mxu1 }
 0x4d6   :  { %v6222_v16 = vpop.f32.mrf.mxu0 }
 0x4d7   :  { %v6223_v49 = vadd.f32 %v16031_v57, %v6222_v16  ;;  %v4970_v25 = vpop.f32.mrf.mxu1  ;;  %11798 = vmatmul.mubr.msk.f32.gmra.mxu1 %vm322_vm1, %v6241_v32 }
 0x4d8   :  { %v16093_v47 = vadd.f32 %v4970_v25, %v16017_v63  ;;  %v11771_v33 = vpop.f32.mrf.mxu0  ;;  %11800 = vmatprep.mubr.msk.f32.mxu1 %vm12136_vm0, %v12135_v1 }
 0x4d9   :  { %v6242_v46 = vmax.f32 %v6223_v49, 0.0  ;;  %v11340_v24 = vpop.f32.mrf.mxu1 }
 0x4da   :  { %v6227_v42 = vpop.f32.mrf.mxu0 }
 0x4db   :  { %v6228_v12 = vadd.f32 %v16031_v57, %v6227_v42  ;;  %v4975_v31 = vpop.f32.mrf.mxu1  ;;  %11801 = vmatmul.mubr.msk.f32.gmra.mxu1 %vm322_vm1, %v6242_v46 }
 0x4dc   :  { %v16100_v11 = vadd.f32 %v4975_v31, %v16024_v20  ;;  %v11774_v29 = vpop.f32.mrf.mxu0  ;;  %11803 = vmatprep.mubr.msk.f32.mxu1 %vm12136_vm0, %v12135_v1 }
 0x4dd   :  { %v6243_v63 = vmax.f32 %v6228_v12, 0.0  ;;  %v11343_v17 = vpop.f32.mrf.mxu1 }
 0x4de   :  { %v6232_v0 = vpop.f32.mrf.mxu0 }
 0x4df   :  { %v6233_v19 = vadd.f32 %v16031_v57, %v6232_v0  ;;  %v4980_v35 = vpop.f32.mrf.mxu1  ;;  %11804 = vmatmul.mubr.msk.f32.gmra.mxu1 %vm322_vm1, %v6243_v63 }
 0x4e0   :  { %v16107_v6 = vadd.f32 %v4980_v35, %v16036_v8  ;;  %v11777_v51 = vpop.f32.mrf.mxu0  ;;  %11806 = vmatprep.mubr.msk.f32.mxu1 %vm12136_vm0, %v12135_v1 }
 0x4e1   :  { %v6244_v20 = vmax.f32 %v6233_v19, 0.0  ;;  %v11346_v40 = vpop.f32.mrf.mxu1 }
 0x4e2   :  { %v6468_v50 = vpop.f32.mrf.mxu0 }
 0x4e3   :  { %v6469_v4 = vadd.f32 %v16031_v57, %v6468_v50  ;;  %v4985_v26 = vpop.f32.mrf.mxu1  ;;  %11807 = vmatmul.mubr.msk.f32.gmra.mxu1 %vm322_vm1, %v6244_v20 }
 0x4e4   :  { %v16114_v27 = vadd.f32 %v4985_v26, %v16043_v58  ;;  %v11843_v34 = vpop.f32.mrf.mxu0  ;;  %11872 = vmatprep.mubr.msk.f32.mxu1 %vm12136_vm0, %v12135_v1  ;;  %v6797_v58 = vld [vmem:[%s17026_s3 + $0x180] sm:$0xff]  ;;  %s12137_s3 = smov 96  }
 0x4e5   :  { %v6512_v8 = vmax.f32 %v6469_v4, 0.0  ;;  %v11349_v15 = vpop.f32.mrf.mxu1 }
 0x4e6   :  { %v6473_v21 = vpop.f32.mrf.mxu0 }
 0x4e7   :  { %v6474_v45 = vadd.f32 %v16031_v57, %v6473_v21  ;;  %v4990_v23 = vpop.f32.mrf.mxu1  ;;  %11873 = vmatmul.mubr.msk.f32.vlgmr.msra.gmra.mxu1 %vm322_vm1, %v6512_v8 }
 0x4e8   :  { %v16127_v53 = vadd.f32 %v4990_v23, %v16056_v60  ;;  %v11846_v37 = vpop.f32.mrf.mxu0  ;;  %11959 = vmatpush3.msra.mxu1 %v6798_v36  ;;  %11875 = vmatprep.mubr.msk.f32.mxu1 %vm12136_vm0, %v12135_v1 }
 0x4e9   :  { %v6513_v44 = vmax.f32 %v6474_v45, 0.0  ;;  %v11352_v55 = vpop.f32.mrf.mxu1  ;;  %11960 = vmatprep.subr.mxu1 %v12135_v1 }
 0x4ea   :  { %v6478_v54 = vpop.f32.mrf.mxu0  ;;  %11961 = vmatpush3.msra.mxu1 %v6797_v58 }
 0x4eb   :  { %v6479_v62 = vadd.f32 %v16031_v57, %v6478_v54  ;;  %v4995_v13 = vpop.f32.mrf.mxu1  ;;  %11876 = vmatmul.mubr.msk.f32.gmra.mxu1 %vm322_vm1, %v6513_v44 }
 0x4ec   :  { %v16135_v59 = vadd.f32 %v4995_v13, %v16065_v41  ;;  %v11849_v60 = vpop.f32.mrf.mxu0  ;;  %11878 = vmatprep.mubr.msk.f32.mxu1 %vm12136_vm0, %v12135_v1 }
 0x4ed   :  { %v6514_v48 = vmax.f32 %v6479_v62, 0.0  ;;  %v11355_v5 = vpop.f32.mrf.mxu1 }
 0x4ee   :  { %v6483_v56 = vpop.f32.mrf.mxu0 }
 0x4ef   :  { %v6484_v61 = vadd.f32 %v16031_v57, %v6483_v56  ;;  %v5000_v18 = vpop.f32.mrf.mxu1  ;;  %11879 = vmatmul.mubr.msk.f32.gmra.mxu1 %vm322_vm1, %v6514_v48 }
 0x4f0   :  { %v16142_v10 = vadd.f32 %v5000_v18, %v16072_v2  ;;  %v11852_v39 = vpop.f32.mrf.mxu0  ;;  %11881 = vmatprep.mubr.msk.f32.mxu1 %vm12136_vm0, %v12135_v1 }
 0x4f1   :  { %v6515_v41 = vmax.f32 %v6484_v61, 0.0  ;;  %v11358_v3 = vpop.f32.mrf.mxu1 }
 0x4f2   :  { %v6488_v14 = vpop.f32.mrf.mxu0 }
 0x4f3   :  { %v6489_v28 = vadd.f32 %v16031_v57, %v6488_v14  ;;  %v5236_v38 = vpop.f32.mrf.mxu1  ;;  %11882 = vmatmul.mubr.msk.f32.gmra.mxu1 %vm322_vm1, %v6515_v41 }
 0x4f4   :  { %v16149_v9 = vadd.f32 %v5236_v38, %v16079_v7  ;;  %v11855_v30 = vpop.f32.mrf.mxu0  ;;  %11884 = vmatprep.mubr.msk.f32.mxu1 %vm12136_vm0, %v12135_v1 }
 0x4f5   :  { %v6516_v2 = vmax.f32 %v6489_v28, 0.0  ;;  %v11424_v52 = vpop.f32.mrf.mxu1 }
 0x4f6   :  { %v6493_v32 = vpop.f32.mrf.mxu0 }
 0x4f7   :  { %v6494_v43 = vadd.f32 %v16031_v57, %v6493_v32  ;;  %v5241_v16 = vpop.f32.mrf.mxu1  ;;  %11885 = vmatmul.mubr.msk.f32.gmra.mxu1 %vm322_vm1, %v6516_v2 }
 0x4f8   :  { %v16156_v49 = vadd.f32 %v5241_v16, %v16086_v22  ;;  %v11858_v25 = vpop.f32.mrf.mxu0  ;;  %11887 = vmatprep.mubr.msk.f32.mxu1 %vm12136_vm0, %v12135_v1 }
 0x4f9   :  { %v6517_v7 = vmax.f32 %v6494_v43, 0.0  ;;  %v11427_v33 = vpop.f32.mrf.mxu1 }
 0x4fa   :  { %v6498_v46 = vpop.f32.mrf.mxu0 }
 0x4fb   :  { %v6499_v24 = vadd.f32 %v16031_v57, %v6498_v46  ;;  %v5246_v42 = vpop.f32.mrf.mxu1  ;;  %11888 = vmatmul.mubr.msk.f32.gmra.mxu1 %vm322_vm1, %v6517_v7 }
 0x4fc   :  { %v16163_v12 = vadd.f32 %v5246_v42, %v16093_v47  ;;  %v11861_v31 = vpop.f32.mrf.mxu0  ;;  %11890 = vmatprep.mubr.msk.f32.mxu1 %vm12136_vm0, %v12135_v1 }
 0x4fd   :  { %v6518_v22 = vmax.f32 %v6499_v24, 0.0  ;;  %v11430_v29 = vpop.f32.mrf.mxu1 }
 0x4fe   :  { %v6503_v63 = vpop.f32.mrf.mxu0 }
 0x4ff   :  { %v6504_v17 = vadd.f32 %v16031_v57, %v6503_v63  ;;  %v5251_v0 = vpop.f32.mrf.mxu1  ;;  %11891 = vmatmul.mubr.msk.f32.gmra.mxu1 %vm322_vm1, %v6518_v22 }
 0x500   :  { %v16170_v19 = vadd.f32 %v5251_v0, %v16100_v11  ;;  %v11864_v35 = vpop.f32.mrf.mxu0  ;;  %11893 = vmatprep.mubr.msk.f32.mxu1 %vm12136_vm0, %v12135_v1 }
 0x501   :  { %v6519_v47 = vmax.f32 %v6504_v17, 0.0  ;;  %v11433_v51 = vpop.f32.mrf.mxu1 }
 0x502   :  { %v6508_v20 = vpop.f32.mrf.mxu0 }
 0x503   :  { %v6509_v40 = vadd.f32 %v16031_v57, %v6508_v20  ;;  %v5256_v50 = vpop.f32.mrf.mxu1  ;;  %11894 = vmatmul.mubr.msk.f32.gmra.mxu1 %vm322_vm1, %v6519_v47 }
 0x504   :  { %v16177_v4 = vadd.f32 %v5256_v50, %v16107_v6  ;;  %v11867_v26 = vpop.f32.mrf.mxu0  ;;  %11896 = vmatprep.mubr.msk.f32.mxu1 %vm12136_vm0, %v12135_v1 }
 0x505   :  { %v6520_v11 = vmax.f32 %v6509_v40, 0.0  ;;  %v11436_v34 = vpop.f32.mrf.mxu1 }
 0x506   :  { %v6744_v8 = vpop.f32.mrf.mxu0 }
 0x507   :  { %v6745_v15 = vadd.f32 %v16031_v57, %v6744_v8  ;;  %v5261_v36 = vpop.f32.mrf.mxu1  ;;  %11897 = vmatmul.mubr.msk.f32.gmra.mxu1 %vm322_vm1, %v6520_v11 }
 0x508   :  { %v16184_v21 = vadd.f32 %v5261_v36, %v16114_v27  ;;  %v11933_v45 = vpop.f32.mrf.mxu0  ;;  %11962 = vmatprep.mubr.msk.f32.mxu1 %vm12136_vm0, %v12135_v1 }
 0x509   :  { %v6788_v6 = vmax.f32 %v6745_v15, 0.0  ;;  %v11439_v23 = vpop.f32.mrf.mxu1 }
 0x50a   :  { %v6749_v58 = vpop.f32.mrf.mxu0 }
 0x50b   :  { %v6750_v37 = vadd.f32 %v16031_v57, %v6749_v58  ;;  %v5266_v44 = vpop.f32.mrf.mxu1  ;;  %11963 = vmatmul.mubr.msk.f32.vlgmr.msra.gmra.mxu1 %vm322_vm1, %v6788_v6 }
 0x50c   :  { %v16191_v55 = vadd.f32 %v5266_v44, %v16127_v53  ;;  %v11936_v54 = vpop.f32.mrf.mxu0  ;;  %11965 = vmatprep.mubr.msk.f32.mxu1 %vm12136_vm0, %v12135_v1 }
 0x50d   :  { %v6789_v27 = vmax.f32 %v6750_v37, 0.0  ;;  %v11442_v62 = vpop.f32.mrf.mxu1 }
 0x50e   :  { %v6754_v13 = vpop.f32.mrf.mxu0 }
 0x50f   :  { %v6755_v60 = vadd.f32 %v16031_v57, %v6754_v13  ;;  %v5271_v48 = vpop.f32.mrf.mxu1  ;;  %11966 = vmatmul.mubr.msk.f32.gmra.mxu1 %vm322_vm1, %v6789_v27 }
 0x510   :  { %v16198_v5 = vadd.f32 %v5271_v48, %v16135_v59  ;;  %v11939_v56 = vpop.f32.mrf.mxu0  ;;  %11968 = vmatprep.mubr.msk.f32.mxu1 %vm12136_vm0, %v12135_v1 }
 0x511   :  { %v6790_v53 = vmax.f32 %v6755_v60, 0.0  ;;  %v11445_v61 = vpop.f32.mrf.mxu1 }
 0x512   :  { %v6759_v18 = vpop.f32.mrf.mxu0 }
 0x513   :  { %v6760_v39 = vadd.f32 %v16031_v57, %v6759_v18  ;;  %v5276_v41 = vpop.f32.mrf.mxu1  ;;  %11969 = vmatmul.mubr.msk.f32.gmra.mxu1 %vm322_vm1, %v6790_v53 }
 0x514   :  { %v5288_v3 = vadd.f32 %v5276_v41, %v16142_v10  ;;  %v11942_v14 = vpop.f32.mrf.mxu0  ;;  %11971 = vmatprep.mubr.msk.f32.mxu1 %vm12136_vm0, %v12135_v1 }
 0x515   :  { %v6791_v59 = vmax.f32 %v6760_v39, 0.0  ;;  %v11448_v28 = vpop.f32.mrf.mxu1 }
 0x516   :  { %v6764_v38 = vpop.f32.mrf.mxu0 }
 0x517   :  { %v6765_v30 = vadd.f32 %v16031_v57, %v6764_v38  ;;  %v5512_v2 = vpop.f32.mrf.mxu1  ;;  %11972 = vmatmul.mubr.msk.f32.gmra.mxu1 %vm322_vm1, %v6791_v59 }
 0x518   :  { %v5556_v52 = vadd.f32 %v5512_v2, %v16149_v9  ;;  %v11945_v32 = vpop.f32.mrf.mxu0  ;;  %11974 = vmatprep.mubr.msk.f32.mxu1 %vm12136_vm0, %v12135_v1 }
 0x519   :  { %v6792_v43 = vmax.f32 %v6765_v30, 0.0  ;;  %v11514_v10 = vpop.f32.mrf.mxu1 }
 0x51a   :  { %v6769_v16 = vpop.f32.mrf.mxu0 }
 0x51b   :  { %v6770_v25 = vadd.f32 %v16031_v57, %v6769_v16  ;;  %v5517_v7 = vpop.f32.mrf.mxu1  ;;  %11975 = vmatmul.mubr.msk.f32.gmra.mxu1 %vm322_vm1, %v6792_v43 }
 0x51c   :  { %v5557_v33 = vadd.f32 %v5517_v7, %v16156_v49  ;;  %v11948_v46 = vpop.f32.mrf.mxu0  ;;  %11977 = vmatprep.mubr.msk.f32.mxu1 %vm12136_vm0, %v12135_v1 }
 0x51d   :  { %v6793_v24 = vmax.f32 %v6770_v25, 0.0  ;;  %v11517_v9 = vpop.f32.mrf.mxu1 }
 0x51e   :  { %v6774_v42 = vpop.f32.mrf.mxu0 }
 0x51f   :  { %v6775_v31 = vadd.f32 %v16031_v57, %v6774_v42  ;;  %v5522_v22 = vpop.f32.mrf.mxu1  ;;  %11978 = vmatmul.mubr.msk.f32.gmra.mxu1 %vm322_vm1, %v6793_v24 }
 0x520   :  { %v5558_v29 = vadd.f32 %v5522_v22, %v16163_v12  ;;  %v11951_v63 = vpop.f32.mrf.mxu0  ;;  %11980 = vmatprep.mubr.msk.f32.mxu1 %vm12136_vm0, %v12135_v1 }
 0x521   :  { %v6794_v17 = vmax.f32 %v6775_v31, 0.0  ;;  %v11520_v49 = vpop.f32.mrf.mxu1 }
 0x522   :  { %v6779_v0 = vpop.f32.mrf.mxu0 }
 0x523   :  { %v6780_v35 = vadd.f32 %v16031_v57, %v6779_v0  ;;  %v5527_v47 = vpop.f32.mrf.mxu1  ;;  %11981 = vmatmul.mubr.msk.f32.gmra.mxu1 %vm322_vm1, %v6794_v17 }
 0x524   :  { %v5559_v51 = vadd.f32 %v5527_v47, %v16170_v19  ;;  %v11954_v20 = vpop.f32.mrf.mxu0  ;;  %11983 = vmatprep.mubr.msk.f32.mxu1 %vm12136_vm0, %v12135_v1 }
 0x525   :  { %v6795_v40 = vmax.f32 %v6780_v35, 0.0  ;;  %v11523_v12 = vpop.f32.mrf.mxu1 }
 0x526   :  { %v6784_v50 = vpop.f32.mrf.mxu0 }
 0x527   :  { %v6785_v26 = vadd.f32 %v16031_v57, %v6784_v50  ;;  %v5532_v11 = vpop.f32.mrf.mxu1  ;;  %11984 = vmatmul.mubr.msk.f32.gmra.mxu1 %vm322_vm1, %v6795_v40 }
 0x528   :  { %v5560_v34 = vadd.f32 %v5532_v11, %v16177_v4  ;;  %11986 = vmatprep.mubr.msk.f32.mxu1 %vm12136_vm0, %v12135_v1  ;;  %v11957_v8 = vpop.f32.mrf.mxu0 }
 0x529   :  { %v6796_v15 = vmax.f32 %v6785_v26, 0.0  ;;  %v11526_v19 = vpop.f32.mrf.mxu1 }
 0x52b   :  { %v5537_v36 = vpop.f32.mrf.mxu1  ;;  %11987 = vmatmul.mubr.msk.f32.gmra.mxu1 %vm322_vm1, %v6796_v15 }
 0x52c   :  { %v5561_v45 = vadd.f32 %v5537_v36, %v16184_v21  ;;  %7237 = vmatprep.mubr.f32.mxu1 %v12135_v1 }
 0x52d   :  { %v11529_v6 = vpop.f32.mrf.mxu1 }
 0x52f   :  { %v5542_v57 = vpop.f32.mrf.mxu1 }
 0x530   :  { %v5562_v23 = vadd.f32 %v5542_v57, %v16191_v55 }
 0x531   :  { %v11532_v58 = vpop.f32.mrf.mxu1 }
 0x533   :  { %v5547_v37 = vpop.f32.mrf.mxu1 }
 0x534   :  { %v5563_v4 = vadd.f32 %v5547_v37, %v16198_v5 }
 0x535   :  { %v11535_v44 = vpop.f32.mrf.mxu1 }
 0x537   :  { %v5552_v54 = vpop.f32.mrf.mxu1 }
 0x538   :  { %v5564_v27 = vadd.f32 %v5552_v54, %v5288_v3 }
 0x539   :  { %v11538_v62 = vpop.f32.mrf.mxu1 }
 0x53a   :  { %v8689_v62 = vld [vmem:[%s17029_s6 + $0xf8] sm:$0xff] }
 0x53b   :  { %v5788_v13 = vpop.f32.mrf.mxu1 }
 0x53c   :  { %v5832_v60 = vadd.f32 %v5788_v13, %v5556_v52  ;;  %v8688_v13 = vld [vmem:[%s17029_s6 + $0xf0] sm:$0xff] }
 0x53d   :  { %v11604_v48 = vpop.f32.mrf.mxu1 }
 0x53f   :  { %v5793_v56 = vpop.f32.mrf.mxu1 }
 0x540   :  { %v5833_v53 = vadd.f32 %v5793_v56, %v5557_v33  ;;  %v7100_v56 = vunpack.c.l.bf16 %v8689_v62 }
 0x541   :  { %v11607_v21 = vpop.f32.mrf.mxu1 }
 0x542   :  { %v7099_v21 = vunpack.c.h.bf16 %v8688_v13 }
 0x543   :  { %v5798_v61 = vpop.f32.mrf.mxu1 }
 0x544   :  { %v5834_v18 = vadd.f32 %v5798_v61, %v5558_v29  ;;  %v7004_v61 = vld [vmem:[%s17029_s6 + $0x78] sm:$0xff] }
 0x545   :  { %v11610_v39 = vpop.f32.mrf.mxu1 }
 0x546   :  { %v8686_v39 = vld [vmem:[%s17029_s6 + $0xe0] sm:$0xff] }
 0x547   :  { %v5803_v41 = vpop.f32.mrf.mxu1 }
 0x548   :  { %v5835_v14 = vadd.f32 %v5803_v41, %v5559_v51  ;;  %v7003_v41 = vld [vmem:[%s17029_s6 + $0x70] sm:$0xff] }
 0x549   :  { %v11613_v55 = vpop.f32.mrf.mxu1 }
 0x54b   :  { %v5808_v59 = vpop.f32.mrf.mxu1 }
 0x54c   :  { %v5836_v28 = vadd.f32 %v5808_v59, %v5560_v34 }
 0x54d   :  { %v11616_v38 = vpop.f32.mrf.mxu1 }
 0x54e   :  { %v7036_v38 = vunpack.c.h.bf16 %v7004_v61 }
 0x54f   :  { %v5813_v5 = vpop.f32.mrf.mxu1 }
 0x550   :  { %v5837_v30 = vadd.f32 %v5813_v5, %v5561_v45  ;;  %7173 = vmatprep.subr.mxu1 %v7036_v38  ;;  %v6994_v38 = vld [vmem:[%s17029_s6 + $0x28] sm:$0xff] }
 0x551   :  { %v11619_v2 = vpop.f32.mrf.mxu1 }
 0x552   :  { %v8685_v2 = vld [vmem:[%s17029_s6 + $0xd8] sm:$0xff] }
 0x553   :  { %v5818_v3 = vpop.f32.mrf.mxu1 }
 0x554   :  { %v5838_v32 = vadd.f32 %v5818_v3, %v5562_v23  ;;  %v7033_v3 = vunpack.c.l.bf16 %v7003_v41 }
 0x555   :  { %v11622_v43 = vpop.f32.mrf.mxu1 }
 0x556   :  { %v7001_v43 = vld [vmem:[%s17029_s6 + $0x60] sm:$0xff] }
 0x557   :  { %v5823_v52 = vpop.f32.mrf.mxu1 }
 0x558   :  { %v5839_v10 = vadd.f32 %v5823_v52, %v5563_v4 }
 0x559   :  { %v11625_v16 = vpop.f32.mrf.mxu1 }
 0x55b   :  { %v5828_v25 = vpop.f32.mrf.mxu1 }
 0x55c   :  { %v5840_v7 = vadd.f32 %v5828_v25, %v5564_v27  ;;  %v7094_v25 = vunpack.c.l.bf16 %v8686_v39 }
 0x55d   :  { %v11628_v33 = vpop.f32.mrf.mxu1 }
 0x55e   :  { %v8684_v33 = vld [vmem:[%s17029_s6 + $0xd0] sm:$0xff] }
 0x55f   :  { %v6064_v46 = vpop.f32.mrf.mxu1 }
 0x560   :  { %v6108_v24 = vadd.f32 %v6064_v46, %v5832_v60  ;;  %v8687_v60 = vld [vmem:[%s17029_s6 + $0xe8] sm:$0xff]  ;;  %v7000_v46 = vld [vmem:[%s17029_s6 + $0x58] sm:$0xff] }
 0x561   :  { %v11694_v9 = vpop.f32.mrf.mxu1  ;;  %v7097_v59 = vunpack.c.h.bf16 %v8687_v60 }
 0x562   :  { %v7093_v9 = vunpack.c.h.bf16 %v8685_v2 }
 0x563   :  { %v6069_v42 = vpop.f32.mrf.mxu1 }
 0x564   :  { %v6109_v31 = vadd.f32 %v6069_v42, %v5833_v53  ;;  %v7101_v53 = vunpack.c.h.bf16 %v8689_v62  ;;  %v7030_v42 = vunpack.c.h.bf16 %v7001_v43  ;;  %v8680_v62 = vld [vmem:[%s17029_s6 + $0xb0] sm:$0xff] }
 0x565   :  { %v11697_v22 = vpop.f32.mrf.mxu1 }
 0x566   :  { %7102 = vmatprep.subr.mxu0 %v7101_v53  ;;  %v7092_v22 = vunpack.c.l.bf16 %v8685_v2 }
 0x567   :  { %v6074_v29 = vpop.f32.mrf.mxu1  ;;  %7103 = vmatpush1.msra.mxu0 %v7100_v56 }
 0x568   :  { %v6110_v63 = vadd.f32 %v6074_v29, %v5834_v18  ;;  %v7098_v18 = vunpack.c.l.bf16 %v8688_v13  ;;  %7104 = vmatprep.subr.mxu0 %v7099_v21  ;;  %v7029_v29 = vunpack.c.l.bf16 %v7001_v43  ;;  %v6996_v13 = vld [vmem:[%s17029_s6 + $0x38] sm:$0xff] }
 0x569   :  { %v11700_v17 = vpop.f32.mrf.mxu1 }
 0x56a   :  { %7105 = vmatpush1.msra.mxu0 %v7098_v18  ;;  %v6999_v17 = vld [vmem:[%s17029_s6 + $0x50] sm:$0xff]  ;;  %v8679_v18 = vld [vmem:[%s17029_s6 + $0xa8] sm:$0xff] }
 0x56b   :  { %v6079_v49 = vpop.f32.mrf.mxu1  ;;  %7106 = vmatprep.subr.mxu0 %v7097_v59  ;;  %v7019_v59 = vunpack.c.l.bf16 %v6996_v13  ;;  %v7081_v2 = vunpack.c.h.bf16 %v8679_v18  ;;  %v7080_v43 = vunpack.c.l.bf16 %v8679_v18 }
 0x56c   :  { %v6111_v0 = vadd.f32 %v6079_v49, %v5835_v14  ;;  %v7002_v14 = vld [vmem:[%s17029_s6 + $0x68] sm:$0xff] }
 0x56d   :  { %v11703_v35 = vpop.f32.mrf.mxu1  ;;  %v7032_v16 = vunpack.c.h.bf16 %v7002_v14 }
 0x56e   :  { %v7028_v35 = vunpack.c.h.bf16 %v7000_v46 }
 0x56f   :  { %v6084_v47 = vpop.f32.mrf.mxu1 }
 0x570   :  { %v6112_v51 = vadd.f32 %v6084_v47, %v5836_v28  ;;  %v7035_v28 = vunpack.c.l.bf16 %v7004_v61  ;;  %v7090_v47 = vunpack.c.l.bf16 %v8684_v33 }
 0x571   :  { %v11706_v20 = vpop.f32.mrf.mxu1 }
 0x572   :  { %7174 = vmatpush1.msra.mxu1 %v7035_v28  ;;  %v8682_v20 = vld [vmem:[%s17029_s6 + $0xc0] sm:$0xff] }
 0x573   :  { %v6089_v40 = vpop.f32.mrf.mxu1  ;;  %v8678_v28 = vld [vmem:[%s17029_s6 + $0xa0] sm:$0xff] }
 0x574   :  { %v16237_v12 = vadd.f32 %v6089_v40, %v5837_v30  ;;  %v7096_v30 = vunpack.c.l.bf16 %v8687_v60  ;;  %v6998_v40 = vld [vmem:[%s17029_s6 + $0x48] sm:$0xff] }
 0x575   :  { %v11709_v50 = vpop.f32.mrf.mxu1 }
 0x576   :  { %7107 = vmatpush1.msra.mxu0 %v7096_v30 }
 0x577   :  { %v6094_v26 = vpop.f32.mrf.mxu1 }
 0x578   :  { %v16239_v11 = vadd.f32 %v6094_v26, %v5838_v32  ;;  %v7034_v32 = vunpack.c.h.bf16 %v7003_v41 }
 0x579   :  { %v11712_v34 = vpop.f32.mrf.mxu1 }
 0x57a   :  { %7175 = vmatprep.subr.mxu1 %v7034_v32  ;;  %v7026_v34 = vunpack.c.h.bf16 %v6999_v17 }
 0x57b   :  { %v6099_v8 = vpop.f32.mrf.mxu1  ;;  %7176 = vmatpush1.msra.mxu1 %v7033_v3 }
 0x57c   :  { %v16241_v15 = vadd.f32 %v6099_v8, %v5839_v10  ;;  %v7095_v10 = vunpack.c.h.bf16 %v8686_v39  ;;  %7177 = vmatprep.subr.mxu1 %v7032_v16  ;;  %v6995_v39 = vld [vmem:[%s17029_s6 + $0x30] sm:$0xff]  ;;  %v6993_v16 = vld [vmem:[%s17029_s6 + $0x20] sm:$0xff] }
 0x57d   :  { %v11715_v19 = vpop.f32.mrf.mxu1  ;;  %v7018_v3 = vunpack.c.h.bf16 %v6995_v39 }
 0x57e   :  { %7108 = vmatprep.subr.mxu0 %v7095_v10  ;;  %v8677_v10 = vld [vmem:[%s17029_s6 + $0x98] sm:$0xff] }
 0x57f   :  { %v6104_v36 = vpop.f32.mrf.mxu1  ;;  %7109 = vmatpush1.msra.mxu0 %v7094_v25 }
 0x580   :  { %v16243_v45 = vadd.f32 %v6104_v36, %v5840_v7  ;;  %v7031_v7 = vunpack.c.l.bf16 %v7002_v14  ;;  %7110 = vmatprep.subr.mxu0 %v7093_v9  ;;  %v7025_v36 = vunpack.c.l.bf16 %v6999_v17  ;;  %v7083_v14 = vunpack.c.h.bf16 %v8680_v62 }
 0x581   :  { %v11718_v6 = vpop.f32.mrf.mxu1  ;;  %7111 = vmatpush1.msra.mxu0 %v7092_v22  ;;  %v7014_v22 = vunpack.c.h.bf16 %v6993_v16  ;;  %v7013_v17 = vunpack.c.l.bf16 %v6993_v16 }
 0x582   :  { %7178 = vmatpush1.msra.mxu1 %v7031_v7  ;;  %v8681_v6 = vld [vmem:[%s17029_s6 + $0xb8] sm:$0xff]  ;;  %v7079_v7 = vunpack.c.h.bf16 %v8678_v28 }
 0x583   :  { %v6340_v57 = vpop.f32.mrf.mxu1  ;;  %7179 = vmatprep.subr.mxu1 %v7030_v42  ;;  %v7084_v21 = vunpack.c.l.bf16 %v8681_v6  ;;  %v7077_v42 = vunpack.c.h.bf16 %v8677_v10 }
 0x584   :  { %v16245_v23 = vadd.f32 %v6340_v57, %v6108_v24  ;;  %7180 = vmatpush1.msra.mxu1 %v7029_v29  ;;  %v6997_v57 = vld [vmem:[%s17029_s6 + $0x40] sm:$0xff] }
 0x585   :  { %v11784_v58 = vpop.f32.mrf.mxu1  ;;  %7181 = vmatprep.subr.mxu1 %v7028_v35  ;;  %v7022_v56 = vunpack.c.h.bf16 %v6997_v57  ;;  %v7021_v61 = vunpack.c.l.bf16 %v6997_v57 }
 0x587   :  { %v6345_v37 = vpop.f32.mrf.mxu1 }
 0x588   :  { %v16247_v4 = vadd.f32 %v6345_v37, %v6109_v31  ;;  %v7087_v37 = vunpack.c.h.bf16 %v8682_v20 }
 0x589   :  { %v11787_v44 = vpop.f32.mrf.mxu1 }
 0x58a   :  { %v7024_v44 = vunpack.c.h.bf16 %v6998_v40 }
 0x58b   :  { %v6350_v54 = vpop.f32.mrf.mxu1 }
 0x58c   :  { %v16249_v27 = vadd.f32 %v6350_v54, %v6110_v63  ;;  %v8683_v63 = vld [vmem:[%s17029_s6 + $0xc8] sm:$0xff]  ;;  %v7023_v54 = vunpack.c.l.bf16 %v6998_v40 }
 0x58d   :  { %v11790_v48 = vpop.f32.mrf.mxu1  ;;  %v7089_v26 = vunpack.c.h.bf16 %v8683_v63  ;;  %v7088_v19 = vunpack.c.l.bf16 %v8683_v63  ;;  %v7076_v63 = vunpack.c.l.bf16 %v8677_v10  ;;  %v16383_v10 = vld [vmem:[%s17027_s4] ss:$0 sm:$0xff] }
 0x58e   :  { %v7085_v48 = vunpack.c.h.bf16 %v8681_v6 }
 0x58f   :  { %v6355_v55 = vpop.f32.mrf.mxu1 }
 0x590   :  { %v16272_v5 = vadd.f32 %v6355_v55, %v6111_v0  ;;  %v7091_v0 = vunpack.c.h.bf16 %v8684_v33  ;;  %v7020_v55 = vunpack.c.h.bf16 %v6996_v13  ;;  %v7016_v33 = vunpack.c.h.bf16 %v6994_v38  ;;  %v8675_v13 = vld [vmem:[%s17029_s6 + $0x88] sm:$0xff] }
 0x591   :  { %v11793_v52 = vpop.f32.mrf.mxu1 }
 0x592   :  { %7112 = vmatprep.subr.mxu0 %v7091_v0  ;;  %v7017_v52 = vunpack.c.l.bf16 %v6995_v39  ;;  %v8674_v39 = vld [vmem:[%s17029_s6 + $0x80] sm:$0xff] }
 0x593   :  { %v6360_v24 = vpop.f32.mrf.mxu1  ;;  %7113 = vmatpush1.msra.mxu0 %v7090_v47 }
 0x594   :  { %v16286_v31 = vadd.f32 %v6360_v24, %v6112_v51  ;;  %v7027_v51 = vunpack.c.l.bf16 %v7000_v46  ;;  %7114 = vmatprep.subr.mxu0 %v7089_v26  ;;  %v7015_v46 = vunpack.c.l.bf16 %v6994_v38  ;;  %v8676_v24 = vld [vmem:[%s17029_s6 + $0x90] sm:$0xff] }
 0x595   :  { %v11796_v49 = vpop.f32.mrf.mxu1  ;;  %7115 = vmatpush1.msra.mxu0 %v7088_v19  ;;  %v7075_v0 = vunpack.c.h.bf16 %v8676_v24  ;;  %v7074_v35 = vunpack.c.l.bf16 %v8676_v24 }
 0x596   :  { %7182 = vmatpush1.msra.mxu1 %v7027_v51  ;;  %7116 = vmatprep.subr.mxu0 %v7087_v37 }
 0x597   :  { %v6365_v50 = vpop.f32.mrf.mxu1  ;;  %7183 = vmatprep.subr.mxu1 %v7026_v34 }
 0x598   :  { %v16301_v8 = vadd.f32 %v6365_v50, %v16237_v12  ;;  %v7086_v12 = vunpack.c.l.bf16 %v8682_v20  ;;  %7184 = vmatpush1.msra.mxu1 %v7025_v36 }
 0x599   :  { %v11799_v58 = vpop.f32.mrf.mxu1  ;;  %7185 = vmatprep.subr.mxu1 %v7024_v44 }
 0x59a   :  { %7117 = vmatpush1.msra.mxu0 %v7086_v12  ;;  %7186 = vmatpush1.msra.mxu1 %v7023_v54 }
 0x59b   :  { %v6370_v60 = vpop.f32.mrf.mxu1  ;;  %7118 = vmatprep.subr.mxu0 %v7085_v48  ;;  %7187 = vmatprep.subr.mxu1 %v7022_v56  ;;  %v7073_v48 = vunpack.c.h.bf16 %v8675_v13 }
 0x59c   :  { %v16316_v53 = vadd.f32 %v6370_v60, %v16239_v11  ;;  %v7082_v11 = vunpack.c.l.bf16 %v8680_v62  ;;  %7119 = vmatpush1.msra.mxu0 %v7084_v21  ;;  %7188 = vmatpush1.msra.mxu1 %v7021_v61  ;;  %v6992_v60 = vld [vmem:[%s17029_s6 + $0x18] sm:$0xff]  ;;  %v7072_v61 = vunpack.c.l.bf16 %v8675_v13 }
 0x59d   :  { %v11802_v41 = vpop.f32.mrf.mxu1  ;;  %7120 = vmatprep.subr.mxu0 %v7083_v14  ;;  %7189 = vmatprep.subr.mxu1 %v7020_v55  ;;  %v7012_v56 = vunpack.c.h.bf16 %v6992_v60  ;;  %v7011_v18 = vunpack.c.l.bf16 %v6992_v60  ;;  %v7070_v55 = vunpack.c.l.bf16 %v8674_v39 }
 0x59e   :  { %7121 = vmatpush1.msra.mxu0 %v7082_v11  ;;  %7190 = vmatpush1.msra.mxu1 %v7019_v59  ;;  %v6991_v41 = vld [vmem:[%s17029_s6 + $0x10] sm:$0xff]  ;;  %v7071_v11 = vunpack.c.h.bf16 %v8674_v39 }
 0x59f   :  { %v6375_v30 = vpop.f32.mrf.mxu1  ;;  %7122 = vmatprep.subr.mxu0 %v7081_v2  ;;  %7191 = vmatprep.subr.mxu1 %v7018_v3  ;;  %v7009_v59 = vunpack.c.l.bf16 %v6991_v41  ;;  %v7010_v38 = vunpack.c.h.bf16 %v6991_v41  ;;  %v16376_v2 = vld [vmem:[%s17029_s6 + $0x178] sm:$0xff] }
 0x5a0   :  { %v16331_v32 = vadd.f32 %v6375_v30, %v16241_v15  ;;  %v7078_v15 = vunpack.c.l.bf16 %v8678_v28  ;;  %7123 = vmatpush1.msra.mxu0 %v7080_v43  ;;  %7192 = vmatpush1.msra.mxu1 %v7017_v52  ;;  %v6990_v30 = vld [vmem:[%s17029_s6 + $0x8] sm:$0xff]  ;;  %v7308_v52 = vunpack.c.h.bf16 %v16376_v2 }
 0x5a1   :  { %v11805_v25 = vpop.f32.mrf.mxu1  ;;  %7124 = vmatprep.subr.mxu0 %v7079_v7  ;;  %7193 = vmatprep.subr.mxu1 %v7016_v33  ;;  %v7008_v43 = vunpack.c.h.bf16 %v6990_v30 }
 0x5a2   :  { %7125 = vmatpush1.msra.mxu0 %v7078_v15  ;;  %7194 = vmatpush1.msra.mxu1 %v7015_v46  ;;  %v7007_v25 = vunpack.c.l.bf16 %v6990_v30 }
 0x5a3   :  { %v6380_v9 = vpop.f32.mrf.mxu1  ;;  %7126 = vmatprep.subr.mxu0 %v7077_v42  ;;  %7195 = vmatprep.subr.mxu1 %v7014_v22 }
 0x5a4   :  { %v16343_v29 = vadd.f32 %v6380_v9, %v16243_v45  ;;  %7127 = vmatpush1.msra.mxu0 %v7076_v63  ;;  %7196 = vmatpush1.msra.mxu1 %v7013_v17  ;;  %v16393_v9 = vld [vmem:[%s17029_s6 + $0x1f8] sm:$0xff] }
 0x5a5   :  { %v11808_v49 = vpop.f32.mrf.mxu1  ;;  %7128 = vmatprep.subr.mxu0 %v7075_v0  ;;  %7197 = vmatprep.subr.mxu1 %v7012_v56  ;;  %v7446_v63 = vunpack.c.h.bf16 %v16393_v9 }
 0x5a6   :  { %7129 = vmatpush1.msra.mxu0 %v7074_v35  ;;  %7198 = vmatpush1.msra.mxu1 %v7011_v18 }
 0x5a7   :  { %v6616_v47 = vpop.f32.mrf.mxu1  ;;  %7130 = vmatprep.subr.mxu0 %v7073_v48  ;;  %7199 = vmatprep.subr.mxu1 %v7010_v38 }
 0x5a8   :  { %v6660_v14 = vadd.f32 %v6616_v47, %v16245_v23  ;;  %7131 = vmatpush1.msra.mxu0 %v7072_v61  ;;  %7200 = vmatpush1.msra.mxu1 %v7009_v59 }
 0x5a9   :  { %v11874_v51 = vpop.f32.mrf.mxu1  ;;  %7132 = vmatprep.subr.mxu0 %v7071_v11  ;;  %7201 = vmatprep.subr.mxu1 %v7008_v43 }
 0x5aa   :  { %7133 = vmatpush1.msra.mxu0 %v7070_v55  ;;  %7202 = vmatpush1.msra.mxu1 %v7007_v25 }
 0x5ab   :  { %v6621_v45 = vpop.f32.mrf.mxu1  ;;  %7309 = vmatprep.subr.mxu0 %v7308_v52 }
 0x5ac   :  { %v6661_v23 = vadd.f32 %v6621_v45, %v16247_v4  ;;  %v6989_v4 = vld [vmem:[%s17029_s6] sm:$0xff] }
 0x5ad   :  { %v11877_v20 = vpop.f32.mrf.mxu1  ;;  %v7006_v15 = vunpack.c.h.bf16 %v6989_v4  ;;  %v7005_v22 = vunpack.c.l.bf16 %v6989_v4 }
 0x5af   :  { %v6626_v40 = vpop.f32.mrf.mxu1  ;;  %7203 = vmatprep.subr.mxu1 %v7006_v15 }
 0x5b0   :  { %v6662_v17 = vadd.f32 %v6626_v40, %v16249_v27  ;;  %7204 = vmatpush1.msra.mxu1 %v7005_v22 }
 0x5b1   :  { %v11880_v50 = vpop.f32.mrf.mxu1  ;;  %7447 = vmatprep.subr.mxu1 %v7446_v63 }
 0x5b3   :  { %v16345_v26 = vpop.f32.mrf.mxu1 }
 0x5b4   :  { %v6663_v50 = vadd.f32 %v16345_v26, %v16272_v5 }
 0x5b5   :  { %v11883_v34 = vpop.f32.mrf.mxu1 }
 0x5b7   :  { %v16347_v19 = vpop.f32.mrf.mxu1 }
 0x5b8   :  { %v6664_v48 = vadd.f32 %v16347_v19, %v16286_v31 }
 0x5b9   :  { %v11886_v36 = vpop.f32.mrf.mxu1 }
 0x5bb   :  { %v16349_v6 = vpop.f32.mrf.mxu1 }
 0x5bd   :  { %v11889_v57 = vpop.f32.mrf.mxu1 }
 0x5bf   :  { %v16351_v58 = vpop.f32.mrf.mxu1 }
 0x5c0   :  { %v6666_v43 = vadd.f32 %v16351_v58, %v16316_v53 }
 0x5c1   :  { %v11892_v37 = vpop.f32.mrf.mxu1 }
 0x5c3   :  { %v16353_v44 = vpop.f32.mrf.mxu1 }
 0x5c5   :  { %v11895_v12 = vpop.f32.mrf.mxu1 }
 0x5c7   :  { %v16355_v54 = vpop.f32.mrf.mxu1 }
 0x5c8   :  { %v6668_v22 = vadd.f32 %v16355_v54, %v16343_v29 }
 0x5c9   :  { %v11898_v62 = vpop.f32.mrf.mxu1 }
 0x5cb   :  { %v6892_v21 = vpop.f32.mrf.mxu1 }
 0x5cc   :  { %v6936_v3 = vadd.f32 %v6892_v21, %v6660_v14  ;;  %v6665_v14 = vadd.f32 %v16349_v6, %v16301_v8 }
 0x5cd   :  { %v11964_v28 = vpop.f32.mrf.mxu1 }
 0x5ce   :  { %v6952_v46 = vadd.f32 %v16383_v10, %v6936_v3 }
 0x5cf   :  { %v6897_v16 = vpop.f32.mrf.mxu1 }
 0x5d0   :  { %v6937_v7 = vadd.f32 %v6897_v16, %v6661_v23  ;;  %v16399_v35 = vmax.f32 %v6952_v46, 0.0 }
 0x5d1   :  { %v11967_v33 = vpop.f32.mrf.mxu1 }
 0x5d2   :  { %v6953_v24 = vadd.f32 %v16383_v10, %v6937_v7  ;;  %v6971_v36 = vrot.slane %v16399_v35, 2  ;;  %v6979_v62 = vrot.slane %v16399_v35, 6  ;;  %v6975_v13 = vrot.slane %v16399_v35, 4 }
 0x5d3   :  { %v6902_v42 = vpop.f32.mrf.mxu1  ;;  %v6667_v33 = vadd.f32 %v16353_v44, %v16331_v32 }
 0x5d4   :  { %v16397_v49 = vmax.f32 %v6953_v24, 0.0  ;;  %v6938_v47 = vadd.f32 %v6902_v42, %v6662_v17 }
 0x5d5   :  { %v11970_v0 = vpop.f32.mrf.mxu1 }
 0x5d6   :  { %v7046_v51 = vrot.slane %v16397_v49, 6  ;;  %v7038_v45 = vrot.slane %v16397_v49, 2  ;;  %v6954_v40 = vadd.f32 %v16383_v10, %v6938_v47  ;;  %v7042_v57 = vrot.slane %v16397_v49, 4 }
 0x5d7   :  { %v6907_v20 = vpop.f32.mrf.mxu1 }
 0x5d8   :  { %7047 = vrot.lane.b32.xlu1 %v7046_v51, %s12137_s3  ;;  %7039 = vrot.lane.b32.xlu0 %v7038_v45, %s12138_s28  ;;  %v6939_v34 = vadd.f32 %v6907_v20, %v6663_v50  ;;  %v16412_v26 = vmax.f32 %v6954_v40, 0.0 }
 0x5d9   :  { %v11973_v27 = vpop.f32.mrf.mxu1 }
 0x5da   :  { %v6955_v12 = vadd.f32 %v16383_v10, %v6939_v34  ;;  %v7249_v18 = vrot.slane %v16412_v26, 4  ;;  %v7245_v39 = vrot.slane %v16412_v26, 2  ;;  %v7253_v11 = vrot.slane %v16412_v26, 6 }
 0x5db   :  { %v6912_v37 = vpop.f32.mrf.mxu1 }
 0x5dc   :  { %6972 = vrot.lane.b32.xlu1 %v6971_v36, %s12138_s28  ;;  %7043 = vrot.lane.b32.xlu0 %v7042_v57, %s12139_s29  ;;  %v16421_v21 = vmax.f32 %v6955_v12, 0.0  ;;  %v6940_v61 = vadd.f32 %v6912_v37, %v6664_v48  ;;  %v8704_v57 = vld [vmem:[%s17029_s6 + $0x170] sm:$0xff] }
 0x5dd   :  { %v11976_v5 = vpop.f32.mrf.mxu1  ;;  %v7306_v48 = vunpack.c.h.bf16 %v8704_v57 }
 0x5de   :  { %v6956_v19 = vadd.f32 %v16383_v10, %v6940_v61  ;;  %v7383_v59 = vrot.slane %v16421_v21, 2  ;;  %v7387_v6 = vrot.slane %v16421_v21, 4  ;;  %v7391_v23 = vrot.slane %v16421_v21, 6 }
 0x5df   :  { %v6917_v60 = vpop.f32.mrf.mxu1  ;;  %v7305_v61 = vunpack.c.l.bf16 %v8704_v57 }
 0x5e0   :  { %6980 = vrot.lane.b32.xlu1 %v6979_v62, %s12137_s3  ;;  %6976 = vrot.lane.b32.xlu0 %v6975_v13, %s12139_s29  ;;  %v6941_v55 = vadd.f32 %v6917_v60, %v6665_v14  ;;  %v16434_v30 = vmax.f32 %v6956_v19, 0.0  ;;  %v7307_v62 = vunpack.c.l.bf16 %v16376_v2  ;;  %v8703_v13 = vld [vmem:[%s17029_s6 + $0x168] sm:$0xff]  ;;  %v7445_v19 = vunpack.c.l.bf16 %v16393_v9 }
 0x5e1   :  { %v11979_v56 = vpop.f32.mrf.mxu1  ;;  %v7304_v2 = vunpack.c.h.bf16 %v8703_v13 }
 0x5e2   :  { %v6957_v8 = vadd.f32 %v16383_v10, %v6941_v55  ;;  %v7525_v7 = vrot.slane %v16434_v30, 4  ;;  %v7521_v4 = vrot.slane %v16434_v30, 2  ;;  %v7529_v15 = vrot.slane %v16434_v30, 6  ;;  %v8701_v55 = vld [vmem:[%s17029_s6 + $0x158] sm:$0xff] }
 0x5e3   :  { %v6922_v41 = vpop.f32.mrf.mxu1 }
 0x5e4   :  { %7250 = vrot.lane.b32.xlu1 %v7249_v18, %s12139_s29  ;;  %7246 = vrot.lane.b32.xlu0 %v7245_v39, %s12138_s28  ;;  %v16443_v16 = vmax.f32 %v6957_v8, 0.0  ;;  %v6942_v25 = vadd.f32 %v6922_v41, %v6666_v43  ;;  %v8702_v18 = vld [vmem:[%s17029_s6 + $0x160] sm:$0xff] }
 0x5e5   :  { %v11982_v31 = vpop.f32.mrf.mxu1  ;;  %v7301_v8 = vunpack.c.l.bf16 %v8702_v18 }
 0x5e6   :  { %v6958_v53 = vadd.f32 %v16383_v10, %v6942_v25  ;;  %v7659_v46 = vrot.slane %v16443_v16, 2  ;;  %v7663_v32 = vrot.slane %v16443_v16, 4  ;;  %v7667_v44 = vrot.slane %v16443_v16, 6 }
 0x5e7   :  { %v6927_v28 = vpop.f32.mrf.mxu1  ;;  %v7303_v31 = vunpack.c.l.bf16 %v8703_v13 }
 0x5e8   :  { %7254 = vrot.lane.b32.xlu0 %v7253_v11, %s12137_s3  ;;  %7384 = vrot.lane.b32.xlu1 %v7383_v59, %s12138_s28  ;;  %v6943_v58 = vadd.f32 %v6927_v28, %v6667_v33  ;;  %v16456_v24 = vmax.f32 %v6958_v53, 0.0  ;;  %v8719_v11 = vld [vmem:[%s17029_s6 + $0x1e8] sm:$0xff]  ;;  %v8717_v53 = vld [vmem:[%s17029_s6 + $0x1d8] sm:$0xff] }
 0x5e9   :  { %v11985_v38 = vpop.f32.mrf.mxu1  ;;  %v7442_v43 = vunpack.c.h.bf16 %v8719_v11  ;;  %v8699_v33 = vld [vmem:[%s17029_s6 + $0x148] sm:$0xff] }
 0x5ea   :  { %v6959_v42 = vadd.f32 %v16383_v10, %v6943_v58  ;;  %v7801_v0 = vrot.slane %v16456_v24, 4  ;;  %v7797_v47 = vrot.slane %v16456_v24, 2  ;;  %v7805_v45 = vrot.slane %v16456_v24, 6 }
 0x5eb   :  { %v6932_v3 = vpop.f32.mrf.mxu1 }
 0x5ec   :  { %7388 = vrot.lane.b32.xlu0 %v7387_v6, %s12139_s29  ;;  %7392 = vrot.lane.b32.xlu1 %v7391_v23, %s12137_s3  ;;  %v16465_v63 = vmax.f32 %v6959_v42, 0.0  ;;  %v6944_v17 = vadd.f32 %v6932_v3, %v6668_v22  ;;  %v8700_v6 = vld [vmem:[%s17029_s6 + $0x150] sm:$0xff]  ;;  %v8718_v23 = vld [vmem:[%s17029_s6 + $0x1e0] sm:$0xff]  ;;  %v7300_v3 = vunpack.c.h.bf16 %v8701_v55  ;;  %v7296_v22 = vunpack.c.h.bf16 %v8699_v33 }
 0x5ed   :  { %v11988_v52 = vpop.f32.mrf.mxu1  ;;  %v7298_v58 = vunpack.c.h.bf16 %v8700_v6  ;;  %v7439_v42 = vunpack.c.l.bf16 %v8718_v23 }
 0x5ee   :  { %v6960_v51 = vadd.f32 %v16383_v10, %v6944_v17  ;;  %v7935_v29 = vrot.slane %v16465_v63, 2  ;;  %v7939_v20 = vrot.slane %v16465_v63, 4  ;;  %v7943_v50 = vrot.slane %v16465_v63, 6 }
 0x5ef   :  { %v7438_v17 = vunpack.c.h.bf16 %v8717_v53 }
 0x5f0   :  { %7526 = vrot.lane.b32.xlu1 %v7525_v7, %s12139_s29  ;;  %7522 = vrot.lane.b32.xlu0 %v7521_v4, %s12138_s28  ;;  %v16476_v54 = vmax.f32 %v6960_v51, 0.0  ;;  %v7299_v7 = vunpack.c.l.bf16 %v8701_v55  ;;  %v7441_v4 = vunpack.c.l.bf16 %v8719_v11  ;;  %v7295_v51 = vunpack.c.l.bf16 %v8699_v33 }
 0x5f2   :  { %v8077_v10 = vrot.slane %v16476_v54, 4  ;;  %v8073_v27 = vrot.slane %v16476_v54, 2  ;;  %v8081_v40 = vrot.slane %v16476_v54, 6 }
 0x5f4   :  { %7530 = vrot.lane.b32.xlu0 %v7529_v15, %s12137_s3  ;;  %7660 = vrot.lane.b32.xlu1 %v7659_v46, %s12138_s28  ;;  %v7440_v15 = vunpack.c.h.bf16 %v8718_v23  ;;  %v7297_v46 = vunpack.c.l.bf16 %v8700_v6 }
 0x5f8   :  { %7664 = vrot.lane.b32.xlu0 %v7663_v32, %s12139_s29  ;;  %7668 = vrot.lane.b32.xlu1 %v7667_v44, %s12137_s3  ;;  %v8698_v32 = vld [vmem:[%s17029_s6 + $0x140] sm:$0xff]  ;;  %v8716_v44 = vld [vmem:[%s17029_s6 + $0x1d0] sm:$0xff] }
 0x5fc   :  { %7802 = vrot.lane.b32.xlu1 %v7801_v0, %s12139_s29  ;;  %7798 = vrot.lane.b32.xlu0 %v7797_v47, %s12138_s28 }
 0x600   :  { %7806 = vrot.lane.b32.xlu0 %v7805_v45, %s12137_s3  ;;  %7936 = vrot.lane.b32.xlu1 %v7935_v29, %s12138_s28  ;;  %v7437_v45 = vunpack.c.l.bf16 %v8717_v53  ;;  %v8697_v29 = vld [vmem:[%s17029_s6 + $0x138] sm:$0xff] }
 0x601   :  { %v7292_v57 = vunpack.c.h.bf16 %v8697_v29 }
 0x604   :  { %7940 = vrot.lane.b32.xlu0 %v7939_v20, %s12139_s29  ;;  %7944 = vrot.lane.b32.xlu1 %v7943_v50, %s12137_s3  ;;  %v8715_v20 = vld [vmem:[%s17029_s6 + $0x1c8] sm:$0xff]  ;;  %v7294_v50 = vunpack.c.h.bf16 %v8698_v32 }
 0x605   :  { %v7433_v13 = vunpack.c.l.bf16 %v8715_v20 }
 0x608   :  { %8078 = vrot.lane.b32.xlu1 %v8077_v10, %s12139_s29  ;;  %8074 = vrot.lane.b32.xlu0 %v8073_v27, %s12138_s28  ;;  %v7436_v10 = vunpack.c.h.bf16 %v8716_v44  ;;  %v7293_v27 = vunpack.c.l.bf16 %v8698_v32 }
 0x60c   :  { %8082 = vrot.lane.b32.xlu0 %v8081_v40, %s12137_s3  ;;  %v7435_v40 = vunpack.c.l.bf16 %v8716_v44 }
 0x64a   :  { %v7048_v34 = vpop.permute.xlu1 %7047  ;;  %v7040_v36 = vpop.permute.xlu0 %7039 }
 0x64b   :  { %v7050_v37 = vsel %vm6983_vm2, %v16397_v49, %v7040_v36  ;;  %v8720_v49 = vld [vmem:[%s17029_s6 + $0x1f0] sm:$0xff]  ;;  %v8714_v36 = vld [vmem:[%s17029_s6 + $0x1c0] sm:$0xff] }
 0x64c   :  { %v7444_v28 = vunpack.c.h.bf16 %v8720_v49  ;;  %v7443_v9 = vunpack.c.l.bf16 %v8720_v49  ;;  %v7431_v49 = vunpack.c.l.bf16 %v8714_v36 }
 0x64e   :  { %v6973_v5 = vpop.permute.xlu1 %6972  ;;  %v7044_v12 = vpop.permute.xlu0 %7043 }
 0x64f   :  { %v7051_v60 = vsel %vm6985_vm3, %v7050_v37, %v7044_v12  ;;  %v6984_v39 = vsel %vm6983_vm2, %v16399_v35, %v6973_v5  ;;  %v7302_v35 = vunpack.c.h.bf16 %v8702_v18  ;;  %v7434_v37 = vunpack.c.h.bf16 %v8715_v20 }
 0x650   :  { %v7052_v56 = vsel %vm6987_vm4, %v7051_v60, %v7048_v34  ;;  %v8696_v34 = vld [vmem:[%s17029_s6 + $0x130] sm:$0xff]  ;;  %v8695_v60 = vld [vmem:[%s17029_s6 + $0x128] sm:$0xff] }
 0x651   :  { %7167 = vmatmul.mubr.f32.vlgmr.msra.gmra.mxu0 %v7052_v56  ;;  %v7290_v56 = vunpack.c.h.bf16 %v8696_v34  ;;  %v7289_v18 = vunpack.c.l.bf16 %v8696_v34  ;;  %v7287_v55 = vunpack.c.l.bf16 %v8695_v60 }
 0x652   :  { %7310 = vmatpush1.msra.mxu0 %v7307_v62  ;;  %v6981_v41 = vpop.permute.xlu1 %6980  ;;  %v6977_v14 = vpop.permute.xlu0 %6976  ;;  %7373 = vmatprep.mubr.f32.mxu0 %v12135_v1  ;;  %v7291_v62 = vunpack.c.l.bf16 %v8697_v29 }
 0x653   :  { %7311 = vmatprep.subr.mxu0 %v7306_v48  ;;  %v6986_v59 = vsel %vm6985_vm3, %v6984_v39, %v6977_v14  ;;  %v8713_v48 = vld [vmem:[%s17029_s6 + $0x1b8] sm:$0xff]  ;;  %v8712_v39 = vld [vmem:[%s17029_s6 + $0x1b0] sm:$0xff] }
 0x654   :  { %v6988_v38 = vsel %vm6987_vm4, %v6986_v59, %v6981_v41  ;;  %7312 = vmatpush1.msra.mxu0 %v7305_v61  ;;  %v7432_v61 = vunpack.c.h.bf16 %v8714_v36  ;;  %v7288_v41 = vunpack.c.h.bf16 %v8695_v60  ;;  %v7430_v14 = vunpack.c.h.bf16 %v8713_v48  ;;  %v8693_v59 = vld [vmem:[%s17029_s6 + $0x118] sm:$0xff]  ;;  %v8707_v36 = vld [vmem:[%s17029_s6 + $0x188] sm:$0xff] }
 0x655   :  { %7313 = vmatprep.subr.mxu0 %v7304_v2  ;;  %7238 = vmatmul.mubr.f32.vlgmr.msra.gmra.mxu1 %v6988_v38  ;;  %v8694_v2 = vld [vmem:[%s17029_s6 + $0x120] sm:$0xff]  ;;  %v7429_v11 = vunpack.c.l.bf16 %v8713_v48  ;;  %v7427_v23 = vunpack.c.l.bf16 %v8712_v39  ;;  %v7283_v53 = vunpack.c.l.bf16 %v8693_v59 }
 0x656   :  { %7314 = vmatpush1.msra.mxu0 %v7303_v31  ;;  %7448 = vmatpush1.msra.mxu1 %v7445_v19  ;;  %v16523_v52 = vpop.permute.xlu1 %7250  ;;  %v16525_v25 = vpop.permute.xlu0 %7246  ;;  %v7286_v38 = vunpack.c.h.bf16 %v8694_v2 }
 0x657   :  { %7315 = vmatprep.subr.mxu0 %v7302_v35  ;;  %7449 = vmatprep.subr.mxu1 %v7444_v28  ;;  %v8711_v35 = vld [vmem:[%s17029_s6 + $0x1a8] sm:$0xff] }
 0x658   :  { %7316 = vmatpush1.msra.mxu0 %v7301_v8  ;;  %7450 = vmatpush1.msra.mxu1 %v7443_v9  ;;  %v7428_v8 = vunpack.c.h.bf16 %v8712_v39  ;;  %v7285_v9 = vunpack.c.l.bf16 %v8694_v2  ;;  %v7417_v2 = vunpack.c.l.bf16 %v8707_v36 }
 0x659   :  { %7317 = vmatprep.subr.mxu0 %v7300_v3  ;;  %7451 = vmatprep.subr.mxu1 %v7442_v43  ;;  %v8692_v3 = vld [vmem:[%s17029_s6 + $0x110] sm:$0xff]  ;;  %v8710_v43 = vld [vmem:[%s17029_s6 + $0x1a0] sm:$0xff] }
 0x65a   :  { %7318 = vmatpush1.msra.mxu0 %v7299_v7  ;;  %7452 = vmatpush1.msra.mxu1 %v7441_v4  ;;  %v16539_v0 = vpop.permute.xlu0 %7254  ;;  %v16541_v47 = vpop.permute.xlu1 %7384  ;;  %v7426_v7 = vunpack.c.h.bf16 %v8711_v35  ;;  %v7282_v32 = vunpack.c.h.bf16 %v8692_v3  ;;  %v7424_v44 = vunpack.c.h.bf16 %v8710_v43 }
 0x65b   :  { %7319 = vmatprep.subr.mxu0 %v7298_v58  ;;  %7453 = vmatprep.subr.mxu1 %v7440_v15  ;;  %v7425_v58 = vunpack.c.l.bf16 %v8711_v35  ;;  %v8691_v15 = vld [vmem:[%s17029_s6 + $0x108] sm:$0xff] }
 0x65c   :  { %7320 = vmatpush1.msra.mxu0 %v7297_v46  ;;  %7454 = vmatpush1.msra.mxu1 %v7439_v42  ;;  %v8709_v46 = vld [vmem:[%s17029_s6 + $0x198] sm:$0xff]  ;;  %v7280_v29 = vunpack.c.h.bf16 %v8691_v15 }
 0x65d   :  { %7321 = vmatprep.subr.mxu0 %v7296_v22  ;;  %7455 = vmatprep.subr.mxu1 %v7438_v17  ;;  %v7281_v22 = vunpack.c.l.bf16 %v8692_v3  ;;  %v7423_v17 = vunpack.c.l.bf16 %v8710_v43  ;;  %v7422_v20 = vunpack.c.h.bf16 %v8709_v46  ;;  %v7421_v34 = vunpack.c.l.bf16 %v8709_v46  ;;  %v8752_v3 = vld [vmem:[%s17029_s6 + $0x2f0] sm:$0xff] }
 0x65e   :  { %7322 = vmatpush1.msra.mxu0 %v7295_v51  ;;  %7456 = vmatpush1.msra.mxu1 %v7437_v45  ;;  %v16555_v5 = vpop.permute.xlu0 %7388  ;;  %v16557_v12 = vpop.permute.xlu1 %7392  ;;  %v8690_v51 = vld [vmem:[%s17029_s6 + $0x100] sm:$0xff]  ;;  %v8708_v45 = vld [vmem:[%s17029_s6 + $0x190] sm:$0xff] }
 0x65f   :  { %7323 = vmatprep.subr.mxu0 %v7294_v50  ;;  %7457 = vmatprep.subr.mxu1 %v7436_v10  ;;  %v7277_v48 = vunpack.c.l.bf16 %v8690_v51 }
 0x660   :  { %7324 = vmatpush1.msra.mxu0 %v7293_v27  ;;  %7458 = vmatpush1.msra.mxu1 %v7435_v40  ;;  %v7279_v40 = vunpack.c.l.bf16 %v8691_v15  ;;  %v8732_v15 = vld [vmem:[%s17029_s6 + $0x250] sm:$0xff] }
 0x661   :  { %7325 = vmatprep.subr.mxu0 %v7292_v57  ;;  %7459 = vmatprep.subr.mxu1 %v7434_v37  ;;  %v7278_v37 = vunpack.c.h.bf16 %v8690_v51 }
 0x662   :  { %7326 = vmatpush1.msra.mxu0 %v7291_v62  ;;  %7460 = vmatpush1.msra.mxu1 %v7433_v13  ;;  %v7527_v31 = vpop.permute.xlu1 %7526  ;;  %v7523_v19 = vpop.permute.xlu0 %7522  ;;  %v7420_v62 = vunpack.c.h.bf16 %v8708_v45  ;;  %v7257_v13 = vsel %vm6983_vm2, %v16412_v26, %v16525_v25 }
 0x663   :  { %7327 = vmatprep.subr.mxu0 %v7290_v56  ;;  %v7533_v28 = vsel %vm6983_vm2, %v16434_v30, %v7523_v19  ;;  %7461 = vmatprep.subr.mxu1 %v7432_v61  ;;  %v7284_v30 = vunpack.c.h.bf16 %v8693_v59  ;;  %v7419_v56 = vunpack.c.l.bf16 %v8708_v45  ;;  %v8706_v61 = vld [vmem:[%s17029_s6 + $0x180] sm:$0xff] }
 0x664   :  { %7328 = vmatpush1.msra.mxu0 %v7289_v18  ;;  %7462 = vmatpush1.msra.mxu1 %v7431_v49  ;;  %v7534_v6 = vsel %vm6985_vm3, %v7533_v28, %v7527_v31  ;;  %v7418_v18 = vunpack.c.h.bf16 %v8707_v36  ;;  %v8736_v49 = vld [vmem:[%s17029_s6 + $0x270] sm:$0xff]  ;;  %v7416_v19 = vunpack.c.h.bf16 %v8706_v61  ;;  %v7395_v28 = vsel %vm6983_vm2, %v16421_v21, %v16541_v47  ;;  %v8730_v36 = vld [vmem:[%s17029_s6 + $0x240] sm:$0xff] }
 0x665   :  { %7329 = vmatprep.subr.mxu0 %v7288_v41  ;;  %7463 = vmatprep.subr.mxu1 %v7430_v14  ;;  %v7258_v41 = vsel %vm6985_vm3, %v7257_v13, %v16523_v52  ;;  %v7582_v59 = vunpack.c.h.bf16 %v8736_v49  ;;  %v7415_v52 = vunpack.c.l.bf16 %v8706_v61  ;;  %v8748_v13 = vld [vmem:[%s17029_s6 + $0x2d0] sm:$0xff] }
 0x666   :  { %7330 = vmatpush1.msra.mxu0 %v7287_v55  ;;  %7464 = vmatpush1.msra.mxu1 %v7429_v11  ;;  %v7531_v4 = vpop.permute.xlu0 %7530  ;;  %v7661_v33 = vpop.permute.xlu1 %7660  ;;  %v8735_v55 = vld [vmem:[%s17029_s6 + $0x268] sm:$0xff]  ;;  %v7259_v11 = vsel %vm6987_vm4, %v7258_v41, %v16539_v0  ;;  %v8734_v0 = vld [vmem:[%s17029_s6 + $0x260] sm:$0xff]  ;;  %v8728_v41 = vld [vmem:[%s17029_s6 + $0x230] sm:$0xff] }
 0x667   :  { %7331 = vmatprep.subr.mxu0 %v7286_v38  ;;  %v16593_v42 = vsel %vm6987_vm4, %v7534_v6, %v7531_v4  ;;  %7465 = vmatprep.subr.mxu1 %v7428_v8  ;;  %v7671_v50 = vsel %vm6983_vm2, %v16443_v16, %v7661_v33  ;;  %v8737_v16 = vld [vmem:[%s17029_s6 + $0x278] sm:$0xff]  ;;  %v7581_v38 = vunpack.c.l.bf16 %v8736_v49  ;;  %v7396_v8 = vsel %vm6985_vm3, %v7395_v28, %v16555_v5  ;;  %v8751_v4 = vld [vmem:[%s17029_s6 + $0x2e8] sm:$0xff] }
 0x668   :  { %7332 = vmatpush1.msra.mxu0 %v7285_v9  ;;  %7466 = vmatpush1.msra.mxu1 %v7427_v23  ;;  %v7584_v39 = vunpack.c.h.bf16 %v8737_v16  ;;  %v7583_v31 = vunpack.c.l.bf16 %v8737_v16  ;;  %v7580_v23 = vunpack.c.h.bf16 %v8735_v55  ;;  %v7579_v47 = vunpack.c.l.bf16 %v8735_v55  ;;  %v8733_v5 = vld [vmem:[%s17029_s6 + $0x258] sm:$0xff]  ;;  %v8746_v55 = vld [vmem:[%s17029_s6 + $0x2c0] sm:$0xff] }
 0x669   :  { %7333 = vmatprep.subr.mxu0 %v7284_v30  ;;  %7467 = vmatprep.subr.mxu1 %v7426_v7  ;;  %v7578_v7 = vunpack.c.h.bf16 %v8734_v0  ;;  %v7397_v33 = vsel %vm6987_vm4, %v7396_v8, %v16557_v12  ;;  %v8750_v12 = vld [vmem:[%s17029_s6 + $0x2e0] sm:$0xff]  ;;  %v7575_v45 = vunpack.c.l.bf16 %v8733_v5  ;;  %v7566_v28 = vunpack.c.h.bf16 %v8728_v41 }
 0x66a   :  { %7334 = vmatpush1.msra.mxu0 %v7283_v53  ;;  %7468 = vmatpush1.msra.mxu1 %v7425_v58  ;;  %v7665_v10 = vpop.permute.xlu0 %7664  ;;  %v7669_v27 = vpop.permute.xlu1 %7668  ;;  %v7577_v53 = vunpack.c.l.bf16 %v8734_v0  ;;  %v7720_v58 = vunpack.c.h.bf16 %v8752_v3  ;;  %v7565_v0 = vunpack.c.l.bf16 %v8728_v41  ;;  %v7708_v8 = vunpack.c.h.bf16 %v8746_v55 }
 0x66b   :  { %7335 = vmatprep.subr.mxu0 %v7282_v32  ;;  %v7672_v57 = vsel %vm6985_vm3, %v7671_v50, %v7665_v10  ;;  %7469 = vmatprep.subr.mxu1 %v7424_v44  ;;  %v7717_v50 = vunpack.c.l.bf16 %v8751_v4  ;;  %v7574_v10 = vunpack.c.h.bf16 %v8732_v15 }
 0x66c   :  { %v16614_v60 = vsel %vm6987_vm4, %v7672_v57, %v7669_v27  ;;  %7336 = vmatpush1.msra.mxu0 %v7281_v22  ;;  %7470 = vmatpush1.msra.mxu1 %v7423_v17  ;;  %v7719_v22 = vunpack.c.l.bf16 %v8752_v3  ;;  %v7576_v17 = vunpack.c.h.bf16 %v8733_v5  ;;  %v8749_v27 = vld [vmem:[%s17029_s6 + $0x2d8] sm:$0xff]  ;;  %v7715_v57 = vunpack.c.l.bf16 %v8750_v12  ;;  %v8744_v3 = vld [vmem:[%s17029_s6 + $0x2b0] sm:$0xff] }
 0x66d   :  { %7337 = vmatprep.subr.mxu0 %v7280_v29  ;;  %7471 = vmatprep.subr.mxu1 %v7422_v20  ;;  %v7718_v29 = vunpack.c.h.bf16 %v8751_v4  ;;  %v7714_v61 = vunpack.c.h.bf16 %v8749_v27  ;;  %v7713_v49 = vunpack.c.l.bf16 %v8749_v27  ;;  %v8725_v5 = vld [vmem:[%s17029_s6 + $0x218] sm:$0xff]  ;;  %v8743_v4 = vld [vmem:[%s17029_s6 + $0x2a8] sm:$0xff] }
 0x66e   :  { %7338 = vmatpush1.msra.mxu0 %v7279_v40  ;;  %7472 = vmatpush1.msra.mxu1 %v7421_v34  ;;  %v7803_v26 = vpop.permute.xlu1 %7802  ;;  %v7799_v25 = vpop.permute.xlu0 %7798  ;;  %v7573_v40 = vunpack.c.l.bf16 %v8732_v15  ;;  %v7716_v34 = vunpack.c.h.bf16 %v8750_v12  ;;  %v7703_v15 = vunpack.c.l.bf16 %v8744_v3  ;;  %v7701_v12 = vunpack.c.l.bf16 %v8743_v4 }
 0x66f   :  { %7339 = vmatprep.subr.mxu0 %v7278_v37  ;;  %v7809_v14 = vsel %vm6983_vm2, %v16456_v24, %v7799_v25  ;;  %7473 = vmatprep.subr.mxu1 %v7420_v62  ;;  %v8753_v24 = vld [vmem:[%s17029_s6 + $0x2f8] sm:$0xff] }
 0x670   :  { %7340 = vmatpush1.msra.mxu0 %v7277_v48  ;;  %7474 = vmatpush1.msra.mxu1 %v7419_v56  ;;  %v7810_v35 = vsel %vm6985_vm3, %v7809_v14, %v7803_v26  ;;  %v7722_v43 = vunpack.c.h.bf16 %v8753_v24  ;;  %v7721_v30 = vunpack.c.l.bf16 %v8753_v24  ;;  %v7570_v26 = vunpack.c.h.bf16 %v8730_v36 }
 0x671   :  { %7374 = vmatmul.mubr.f32.vlgmr.msra.gmra.mxu0 %v7259_v11  ;;  %7475 = vmatprep.subr.mxu1 %v7418_v18  ;;  %v8729_v18 = vld [vmem:[%s17029_s6 + $0x238] sm:$0xff]  ;;  %v7711_v14 = vunpack.c.l.bf16 %v8748_v13 }
 0x672   :  { %7585 = vmatprep.subr.mxu0 %v7584_v39  ;;  %7476 = vmatpush1.msra.mxu1 %v7417_v2  ;;  %v7807_v9 = vpop.permute.xlu0 %7806  ;;  %v7937_v6 = vpop.permute.xlu1 %7936  ;;  %v8747_v2 = vld [vmem:[%s17029_s6 + $0x2c8] sm:$0xff]  ;;  %v7569_v39 = vunpack.c.l.bf16 %v8730_v36 }
 0x673   :  { %7586 = vmatpush1.msra.mxu0 %v7583_v31  ;;  %v16647_v21 = vsel %vm6987_vm4, %v7810_v35, %v7807_v9  ;;  %7477 = vmatprep.subr.mxu1 %v7416_v19  ;;  %v7947_v46 = vsel %vm6983_vm2, %v16465_v63, %v7937_v6  ;;  %v8731_v63 = vld [vmem:[%s17029_s6 + $0x248] sm:$0xff]  ;;  %v7568_v19 = vunpack.c.h.bf16 %v8729_v18  ;;  %v7710_v35 = vunpack.c.h.bf16 %v8747_v2  ;;  %v8726_v9 = vld [vmem:[%s17029_s6 + $0x220] sm:$0xff] }
 0x674   :  { %7587 = vmatprep.subr.mxu0 %v7582_v59  ;;  %7478 = vmatpush1.msra.mxu1 %v7415_v52  ;;  %v7572_v16 = vunpack.c.h.bf16 %v8731_v63  ;;  %v7571_v56 = vunpack.c.l.bf16 %v8731_v63  ;;  %v7567_v59 = vunpack.c.l.bf16 %v8729_v18  ;;  %v8727_v52 = vld [vmem:[%s17029_s6 + $0x228] sm:$0xff]  ;;  %v7709_v24 = vunpack.c.l.bf16 %v8747_v2 }
 0x675   :  { %7511 = vmatprep.mubr.f32.mxu1 %v12135_v1  ;;  %7588 = vmatpush1.msra.mxu0 %v7581_v38  ;;  %v8745_v38 = vld [vmem:[%s17029_s6 + $0x2b8] sm:$0xff]  ;;  %v7707_v6 = vunpack.c.l.bf16 %v8746_v55  ;;  %v8766_v55 = vld [vmem:[%s17029_s6 + $0x360] sm:$0xff] }
 0x676   :  { %7512 = vmatmul.mubr.f32.vlgmr.msra.gmra.mxu1 %v7397_v33  ;;  %7589 = vmatprep.subr.mxu0 %v7580_v23  ;;  %v7941_v32 = vpop.permute.xlu0 %7940  ;;  %v7945_v44 = vpop.permute.xlu1 %7944  ;;  %v7564_v23 = vunpack.c.h.bf16 %v8727_v52  ;;  %v7561_v33 = vunpack.c.l.bf16 %v8726_v9 }
 0x677   :  { %7723 = vmatprep.subr.mxu1 %v7722_v43  ;;  %7590 = vmatpush1.msra.mxu0 %v7579_v47  ;;  %v7948_v51 = vsel %vm6985_vm3, %v7947_v46, %v7941_v32  ;;  %v7563_v47 = vunpack.c.l.bf16 %v8727_v52  ;;  %v7706_v43 = vunpack.c.h.bf16 %v8745_v38  ;;  %v7560_v46 = vunpack.c.h.bf16 %v8725_v5  ;;  %v8742_v32 = vld [vmem:[%s17029_s6 + $0x2a0] sm:$0xff] }
 0x678   :  { %7724 = vmatpush1.msra.mxu1 %v7721_v30  ;;  %7591 = vmatprep.subr.mxu0 %v7578_v7  ;;  %v16671_v20 = vsel %vm6987_vm4, %v7948_v51, %v7945_v44  ;;  %v7705_v30 = vunpack.c.l.bf16 %v8745_v38  ;;  %v7562_v7 = vunpack.c.h.bf16 %v8726_v9  ;;  %v7559_v44 = vunpack.c.l.bf16 %v8725_v5 }
 0x679   :  { %7725 = vmatprep.subr.mxu1 %v7720_v58  ;;  %7592 = vmatpush1.msra.mxu0 %v7577_v53  ;;  %v7704_v53 = vunpack.c.h.bf16 %v8744_v3  ;;  %v8724_v58 = vld [vmem:[%s17029_s6 + $0x210] sm:$0xff]  ;;  %v7700_v63 = vunpack.c.h.bf16 %v8742_v32  ;;  %v7854_v38 = vunpack.c.h.bf16 %v8766_v55 }
 0x67a   :  { %7726 = vmatpush1.msra.mxu1 %v7719_v22  ;;  %7593 = vmatprep.subr.mxu0 %v7576_v17  ;;  %v8079_v37 = vpop.permute.xlu1 %8078  ;;  %v8075_v62 = vpop.permute.xlu0 %8074  ;;  %v7702_v22 = vunpack.c.h.bf16 %v8743_v4  ;;  %v8723_v17 = vld [vmem:[%s17029_s6 + $0x208] sm:$0xff]  ;;  %v7558_v51 = vunpack.c.h.bf16 %v8724_v58 }
 0x67b   :  { %7727 = vmatprep.subr.mxu1 %v7718_v29  ;;  %7594 = vmatpush1.msra.mxu0 %v7575_v45  ;;  %v8085_v48 = vsel %vm6983_vm2, %v16476_v54, %v8075_v62  ;;  %v7712_v54 = vunpack.c.h.bf16 %v8748_v13  ;;  %v8741_v45 = vld [vmem:[%s17029_s6 + $0x298] sm:$0xff]  ;;  %v7557_v29 = vunpack.c.l.bf16 %v8724_v58  ;;  %v7556_v27 = vunpack.c.h.bf16 %v8723_v17  ;;  %v8739_v62 = vld [vmem:[%s17029_s6 + $0x288] sm:$0xff]  ;;  %v8762_v58 = vld [vmem:[%s17029_s6 + $0x340] sm:$0xff] }
 0x67c   :  { %7728 = vmatpush1.msra.mxu1 %v7717_v50  ;;  %7595 = vmatprep.subr.mxu0 %v7574_v10  ;;  %v8086_v25 = vsel %vm6985_vm3, %v8085_v48, %v8079_v37  ;;  %v8722_v50 = vld [vmem:[%s17029_s6 + $0x200] sm:$0xff]  ;;  %v7699_v10 = vunpack.c.l.bf16 %v8742_v32  ;;  %v7698_v36 = vunpack.c.h.bf16 %v8741_v45  ;;  %v8769_v48 = vld [vmem:[%s17029_s6 + $0x378] sm:$0xff]  ;;  %v7694_v18 = vunpack.c.h.bf16 %v8739_v62  ;;  %v8780_v32 = vld [vmem:[%s17029_s6 + $0x3d0] sm:$0xff] }
 0x67d   :  { %7729 = vmatprep.subr.mxu1 %v7716_v34  ;;  %7596 = vmatpush1.msra.mxu0 %v7573_v40  ;;  %v8740_v40 = vld [vmem:[%s17029_s6 + $0x290] sm:$0xff]  ;;  %v7555_v34 = vunpack.c.l.bf16 %v8723_v17  ;;  %v7554_v37 = vunpack.c.h.bf16 %v8722_v50  ;;  %v7859_v2 = vunpack.c.l.bf16 %v8769_v48  ;;  %v8761_v17 = vld [vmem:[%s17029_s6 + $0x338] sm:$0xff] }
 0x67e   :  { %7730 = vmatpush1.msra.mxu1 %v7715_v57  ;;  %7597 = vmatprep.subr.mxu0 %v7572_v16  ;;  %v8083_v31 = vpop.permute.xlu0 %8082  ;;  %v7697_v57 = vunpack.c.l.bf16 %v8741_v45  ;;  %v7553_v16 = vunpack.c.l.bf16 %v8722_v50  ;;  %v7696_v13 = vunpack.c.h.bf16 %v8740_v40  ;;  %v8779_v45 = vld [vmem:[%s17029_s6 + $0x3c8] sm:$0xff]  ;;  %v8760_v50 = vld [vmem:[%s17029_s6 + $0x330] sm:$0xff] }
 0x67f   :  { %7731 = vmatprep.subr.mxu1 %v7714_v61  ;;  %7598 = vmatpush1.msra.mxu0 %v7571_v56  ;;  %v16698_v11 = vsel %vm6987_vm4, %v8086_v25, %v8083_v31  ;;  %v7695_v56 = vunpack.c.l.bf16 %v8740_v40  ;;  %v8738_v61 = vld [vmem:[%s17029_s6 + $0x280] sm:$0xff]  ;;  %v7860_v25 = vunpack.c.h.bf16 %v8769_v48  ;;  %v8785_v31 = vld [vmem:[%s17029_s6 + $0x3f8] sm:$0xff] }
 0x680   :  { %7732 = vmatpush1.msra.mxu1 %v7713_v49  ;;  %7599 = vmatprep.subr.mxu0 %v7570_v26  ;;  %v8768_v49 = vld [vmem:[%s17029_s6 + $0x370] sm:$0xff]  ;;  %v7693_v26 = vunpack.c.l.bf16 %v8739_v62  ;;  %v7691_v41 = vunpack.c.l.bf16 %v8738_v61  ;;  %v8778_v40 = vld [vmem:[%s17029_s6 + $0x3c0] sm:$0xff]  ;;  %v7842_v62 = vunpack.c.h.bf16 %v8760_v50 }
 0x681   :  { %7733 = vmatprep.subr.mxu1 %v7712_v54  ;;  %7600 = vmatpush1.msra.mxu0 %v7569_v39  ;;  %v7692_v39 = vunpack.c.h.bf16 %v8738_v61  ;;  %v8767_v54 = vld [vmem:[%s17029_s6 + $0x368] sm:$0xff]  ;;  %v7984_v48 = vunpack.c.h.bf16 %v8778_v40  ;;  %v7983_v61 = vunpack.c.l.bf16 %v8778_v40  ;;  %v8215_v40 = vld [vmem:[%s17030_s7 + $0x20] sm:$0xff] }
 0x682   :  { %7734 = vmatpush1.msra.mxu1 %v7711_v14  ;;  %7601 = vmatprep.subr.mxu0 %v7568_v19  ;;  %v7858_v14 = vunpack.c.h.bf16 %v8768_v49  ;;  %v7857_v19 = vunpack.c.l.bf16 %v8768_v49  ;;  %v7855_v52 = vunpack.c.l.bf16 %v8767_v54  ;;  %v8776_v49 = vld [vmem:[%s17029_s6 + $0x3b0] sm:$0xff] }
 0x683   :  { %7735 = vmatprep.subr.mxu1 %v7710_v35  ;;  %7602 = vmatpush1.msra.mxu0 %v7567_v59  ;;  %v7856_v59 = vunpack.c.h.bf16 %v8767_v54  ;;  %v8784_v35 = vld [vmem:[%s17029_s6 + $0x3f0] sm:$0xff] }
 0x684   :  { %7736 = vmatpush1.msra.mxu1 %v7709_v24  ;;  %7603 = vmatprep.subr.mxu0 %v7566_v28  ;;  %v7998_v24 = vunpack.c.h.bf16 %v8785_v31  ;;  %v7997_v28 = vunpack.c.l.bf16 %v8785_v31  ;;  %v7996_v9 = vunpack.c.h.bf16 %v8784_v35  ;;  %v7980_v31 = vunpack.c.h.bf16 %v8776_v49 }
 0x685   :  { %7737 = vmatprep.subr.mxu1 %v7708_v8  ;;  %7604 = vmatpush1.msra.mxu0 %v7565_v0  ;;  %v8783_v0 = vld [vmem:[%s17029_s6 + $0x3e8] sm:$0xff]  ;;  %v7853_v8 = vunpack.c.l.bf16 %v8766_v55  ;;  %v7979_v55 = vunpack.c.l.bf16 %v8776_v49 }
 0x686   :  { %7738 = vmatpush1.msra.mxu1 %v7707_v6  ;;  %7605 = vmatprep.subr.mxu0 %v7564_v23  ;;  %v8764_v6 = vld [vmem:[%s17029_s6 + $0x350] sm:$0xff]  ;;  %v7995_v23 = vunpack.c.l.bf16 %v8784_v35  ;;  %v7994_v5 = vunpack.c.h.bf16 %v8783_v0  ;;  %v8774_v35 = vld [vmem:[%s17029_s6 + $0x3a0] sm:$0xff] }
 0x687   :  { %7739 = vmatprep.subr.mxu1 %v7706_v43  ;;  %7606 = vmatpush1.msra.mxu0 %v7563_v47  ;;  %v8782_v47 = vld [vmem:[%s17029_s6 + $0x3e0] sm:$0xff]  ;;  %v7850_v4 = vunpack.c.h.bf16 %v8764_v6 }
 0x688   :  { %7740 = vmatpush1.msra.mxu1 %v7705_v30  ;;  %7607 = vmatprep.subr.mxu0 %v7562_v7  ;;  %v8763_v30 = vld [vmem:[%s17029_s6 + $0x348] sm:$0xff]  ;;  %v7993_v7 = vunpack.c.l.bf16 %v8783_v0  ;;  %v8773_v0 = vld [vmem:[%s17029_s6 + $0x398] sm:$0xff] }
 0x689   :  { %7741 = vmatprep.subr.mxu1 %v7704_v53  ;;  %7608 = vmatpush1.msra.mxu0 %v7561_v33  ;;  %v7849_v33 = vunpack.c.l.bf16 %v8764_v6  ;;  %v7992_v53 = vunpack.c.h.bf16 %v8782_v47  ;;  %v8754_v6 = vld [vmem:[%s17029_s6 + $0x300] sm:$0xff] }
 0x68a   :  { %7742 = vmatpush1.msra.mxu1 %v7703_v15  ;;  %7609 = vmatprep.subr.mxu0 %v7560_v46  ;;  %v7991_v15 = vunpack.c.l.bf16 %v8782_v47  ;;  %v7848_v46 = vunpack.c.h.bf16 %v8763_v30  ;;  %v8772_v47 = vld [vmem:[%s17029_s6 + $0x390] sm:$0xff] }
 0x68b   :  { %7743 = vmatprep.subr.mxu1 %v7702_v22  ;;  %7610 = vmatpush1.msra.mxu0 %v7559_v44  ;;  %v7847_v44 = vunpack.c.l.bf16 %v8763_v30  ;;  %v7973_v30 = vunpack.c.l.bf16 %v8773_v0 }
 0x68c   :  { %7744 = vmatpush1.msra.mxu1 %v7701_v12  ;;  %7611 = vmatprep.subr.mxu0 %v7558_v51  ;;  %v7846_v51 = vunpack.c.h.bf16 %v8762_v58 }
 0x68d   :  { %7745 = vmatprep.subr.mxu1 %v7700_v63  ;;  %7612 = vmatpush1.msra.mxu0 %v7557_v29  ;;  %v7845_v29 = vunpack.c.l.bf16 %v8762_v58  ;;  %v7988_v63 = vunpack.c.h.bf16 %v8780_v32  ;;  %v7971_v58 = vunpack.c.l.bf16 %v8772_v47 }
 0x68e   :  { %7746 = vmatpush1.msra.mxu1 %v7699_v10  ;;  %7613 = vmatprep.subr.mxu0 %v7556_v27  ;;  %v7987_v10 = vunpack.c.l.bf16 %v8780_v32  ;;  %v7844_v27 = vunpack.c.h.bf16 %v8761_v17  ;;  %v8800_v32 = vld [vmem:[%s17029_s6 + $0x470] sm:$0xff] }
 0x68f   :  { %7747 = vmatprep.subr.mxu1 %v7698_v36  ;;  %7614 = vmatpush1.msra.mxu0 %v7555_v34  ;;  %v7843_v34 = vunpack.c.l.bf16 %v8761_v17  ;;  %v7986_v36 = vunpack.c.h.bf16 %v8779_v45 }
 0x690   :  { %7748 = vmatpush1.msra.mxu1 %v7697_v57  ;;  %7615 = vmatprep.subr.mxu0 %v7554_v37  ;;  %v8759_v57 = vld [vmem:[%s17029_s6 + $0x328] sm:$0xff]  ;;  %v7985_v37 = vunpack.c.l.bf16 %v8779_v45 }
 0x691   :  { %7749 = vmatprep.subr.mxu1 %v7696_v13  ;;  %7616 = vmatpush1.msra.mxu0 %v7553_v16  ;;  %v8777_v16 = vld [vmem:[%s17029_s6 + $0x3b8] sm:$0xff]  ;;  %v7841_v13 = vunpack.c.l.bf16 %v8760_v50  ;;  %v8133_v50 = vunpack.c.l.bf16 %v8800_v32 }
 0x692   :  { %7649 = vmatprep.mubr.f32.mxu0 %v12135_v1  ;;  %7750 = vmatpush1.msra.mxu1 %v7695_v56  ;;  %v8758_v56 = vld [vmem:[%s17029_s6 + $0x320] sm:$0xff] }
 0x693   :  { %7650 = vmatmul.mubr.f32.vlgmr.msra.gmra.mxu0 %v16593_v42  ;;  %7751 = vmatprep.subr.mxu1 %v7694_v18  ;;  %v8765_v42 = vld [vmem:[%s17029_s6 + $0x358] sm:$0xff]  ;;  %v7840_v18 = vunpack.c.h.bf16 %v8759_v57  ;;  %v7838_v54 = vunpack.c.h.bf16 %v8758_v56 }
 0x694   :  { %7861 = vmatprep.subr.mxu0 %v7860_v25  ;;  %7752 = vmatpush1.msra.mxu1 %v7693_v26  ;;  %v7852_v3 = vunpack.c.h.bf16 %v8765_v42  ;;  %v7851_v43 = vunpack.c.l.bf16 %v8765_v42  ;;  %v7839_v26 = vunpack.c.l.bf16 %v8759_v57  ;;  %v7982_v25 = vunpack.c.h.bf16 %v8777_v16  ;;  %v8755_v42 = vld [vmem:[%s17029_s6 + $0x308] sm:$0xff] }
 0x695   :  { %7862 = vmatpush1.msra.mxu0 %v7859_v2  ;;  %7753 = vmatprep.subr.mxu1 %v7692_v39  ;;  %v8757_v2 = vld [vmem:[%s17029_s6 + $0x318] sm:$0xff]  ;;  %v7981_v39 = vunpack.c.l.bf16 %v8777_v16 }
 0x696   :  { %7863 = vmatprep.subr.mxu0 %v7858_v14  ;;  %7754 = vmatpush1.msra.mxu1 %v7691_v41  ;;  %v8775_v41 = vld [vmem:[%s17029_s6 + $0x3a8] sm:$0xff]  ;;  %v7837_v14 = vunpack.c.l.bf16 %v8758_v56 }
 0x697   :  { %7787 = vmatprep.mubr.f32.mxu1 %v12135_v1  ;;  %7864 = vmatpush1.msra.mxu0 %v7857_v19  ;;  %v8756_v19 = vld [vmem:[%s17029_s6 + $0x310] sm:$0xff] }
 0x698   :  { %7788 = vmatmul.mubr.f32.vlgmr.msra.gmra.mxu1 %v16614_v60  ;;  %7865 = vmatprep.subr.mxu0 %v7856_v59  ;;  %v8781_v60 = vld [vmem:[%s17029_s6 + $0x3d8] sm:$0xff]  ;;  %v7836_v59 = vunpack.c.h.bf16 %v8757_v2 }
 0x699   :  { %7999 = vmatprep.subr.mxu1 %v7998_v24  ;;  %7866 = vmatpush1.msra.mxu0 %v7855_v52  ;;  %v7990_v22 = vunpack.c.h.bf16 %v8781_v60  ;;  %v7989_v12 = vunpack.c.l.bf16 %v8781_v60  ;;  %v7835_v52 = vunpack.c.l.bf16 %v8757_v2  ;;  %v7978_v24 = vunpack.c.h.bf16 %v8775_v41 }
 0x69a   :  { %8000 = vmatpush1.msra.mxu1 %v7997_v28  ;;  %7867 = vmatprep.subr.mxu0 %v7854_v38  ;;  %v7977_v28 = vunpack.c.l.bf16 %v8775_v41  ;;  %v7834_v38 = vunpack.c.h.bf16 %v8756_v19  ;;  %v7829_v60 = vunpack.c.l.bf16 %v8754_v6  ;;  %v8794_v41 = vld [vmem:[%s17029_s6 + $0x440] sm:$0xff] }
 0x69b   :  { %8001 = vmatprep.subr.mxu1 %v7996_v9  ;;  %7868 = vmatpush1.msra.mxu0 %v7853_v8  ;;  %v7833_v8 = vunpack.c.l.bf16 %v8756_v19  ;;  %v7976_v9 = vunpack.c.h.bf16 %v8774_v35 }
 0x69c   :  { %8002 = vmatpush1.msra.mxu1 %v7995_v23  ;;  %7869 = vmatprep.subr.mxu0 %v7852_v3  ;;  %v7975_v23 = vunpack.c.l.bf16 %v8774_v35  ;;  %v7832_v3 = vunpack.c.h.bf16 %v8755_v42 }
 0x69d   :  { %8003 = vmatprep.subr.mxu1 %v7994_v5  ;;  %7870 = vmatpush1.msra.mxu0 %v7851_v43  ;;  %v7831_v43 = vunpack.c.l.bf16 %v8755_v42  ;;  %v7974_v5 = vunpack.c.h.bf16 %v8773_v0 }
 0x69e   :  { %8004 = vmatpush1.msra.mxu1 %v7993_v7  ;;  %7871 = vmatprep.subr.mxu0 %v7850_v4  ;;  %v7830_v7 = vunpack.c.h.bf16 %v8754_v6  ;;  %v8771_v4 = vld [vmem:[%s17029_s6 + $0x388] sm:$0xff] }
 0x69f   :  { %8005 = vmatprep.subr.mxu1 %v7992_v53  ;;  %7872 = vmatpush1.msra.mxu0 %v7849_v33  ;;  %v7972_v33 = vunpack.c.h.bf16 %v8772_v47  ;;  %v8801_v53 = vld [vmem:[%s17029_s6 + $0x478] sm:$0xff]  ;;  %v8791_v6 = vld [vmem:[%s17029_s6 + $0x428] sm:$0xff] }
 0x6a0   :  { %8006 = vmatpush1.msra.mxu1 %v7991_v15  ;;  %7873 = vmatprep.subr.mxu0 %v7848_v46  ;;  %v8770_v15 = vld [vmem:[%s17029_s6 + $0x380] sm:$0xff]  ;;  %v7970_v46 = vunpack.c.h.bf16 %v8771_v4  ;;  %v8135_v17 = vunpack.c.l.bf16 %v8801_v53 }
 0x6a1   :  { %8007 = vmatprep.subr.mxu1 %v7990_v22  ;;  %7874 = vmatpush1.msra.mxu0 %v7847_v44  ;;  %v7969_v44 = vunpack.c.l.bf16 %v8771_v4  ;;  %v8136_v22 = vunpack.c.h.bf16 %v8801_v53  ;;  %v7967_v45 = vunpack.c.l.bf16 %v8770_v15  ;;  %v8789_v4 = vld [vmem:[%s17029_s6 + $0x418] sm:$0xff]  ;;  %v8788_v53 = vld [vmem:[%s17029_s6 + $0x410] sm:$0xff] }
 0x6a2   :  { %8008 = vmatpush1.msra.mxu1 %v7989_v12  ;;  %7875 = vmatprep.subr.mxu0 %v7846_v51  ;;  %v7968_v12 = vunpack.c.h.bf16 %v8770_v15  ;;  %v8799_v51 = vld [vmem:[%s17029_s6 + $0x468] sm:$0xff]  ;;  %v8111_v15 = vunpack.c.l.bf16 %v8789_v4 }
 0x6a3   :  { %8009 = vmatprep.subr.mxu1 %v7988_v63  ;;  %7876 = vmatpush1.msra.mxu0 %v7845_v29  ;;  %v8134_v29 = vunpack.c.h.bf16 %v8800_v32  ;;  %v8216_v63 = vld [vmem:[%s17030_s7 + $0x28] sm:$0xff]  ;;  %v8110_v32 = vunpack.c.h.bf16 %v8788_v53 }
 0x6a4   :  { %8010 = vmatpush1.msra.mxu1 %v7987_v10  ;;  %7877 = vmatprep.subr.mxu0 %v7844_v27  ;;  %v8798_v10 = vld [vmem:[%s17029_s6 + $0x460] sm:$0xff]  ;;  %v8132_v27 = vunpack.c.h.bf16 %v8799_v51 }
 0x6a5   :  { %8011 = vmatprep.subr.mxu1 %v7986_v36  ;;  %7878 = vmatpush1.msra.mxu0 %v7843_v34  ;;  %v8131_v34 = vunpack.c.l.bf16 %v8799_v51  ;;  %v8228_v36 = vunpack.c.h.bf16 %v8216_v63  ;;  %v8130_v57 = vunpack.c.h.bf16 %v8798_v10  ;;  %v8129_v16 = vunpack.c.l.bf16 %v8798_v10  ;;  %v8335_v10 = vld [vmem:[%s17032_s9 + $0x68] sm:$0xff] }
 0x6a6   :  { %8012 = vmatpush1.msra.mxu1 %v7985_v37  ;;  %7879 = vmatprep.subr.mxu0 %v7842_v62  ;;  %v8227_v37 = vunpack.c.l.bf16 %v8216_v63  ;;  %v8214_v62 = vld [vmem:[%s17030_s7 + $0x18] sm:$0xff]  ;;  %v8352_v63 = vld [vmem:[%s17032_s9 + $0xf0] sm:$0xff] }
 0x6a7   :  { %8013 = vmatprep.subr.mxu1 %v7984_v48  ;;  %7880 = vmatpush1.msra.mxu0 %v7841_v13  ;;  %v8796_v13 = vld [vmem:[%s17029_s6 + $0x450] sm:$0xff]  ;;  %v8226_v48 = vunpack.c.h.bf16 %v8215_v40 }
 0x6a8   :  { %8014 = vmatpush1.msra.mxu1 %v7983_v61  ;;  %7881 = vmatprep.subr.mxu0 %v7840_v18  ;;  %v8225_v61 = vunpack.c.l.bf16 %v8215_v40  ;;  %v8213_v18 = vld [vmem:[%s17030_s7 + $0x10] sm:$0xff]  ;;  %v8126_v2 = vunpack.c.h.bf16 %v8796_v13  ;;  %v8334_v40 = vld [vmem:[%s17032_s9 + $0x60] sm:$0xff] }
 0x6a9   :  { %8015 = vmatprep.subr.mxu1 %v7982_v25  ;;  %7882 = vmatpush1.msra.mxu0 %v7839_v26  ;;  %v8795_v26 = vld [vmem:[%s17029_s6 + $0x448] sm:$0xff]  ;;  %v8224_v25 = vunpack.c.h.bf16 %v8214_v62  ;;  %v8221_v19 = vunpack.c.l.bf16 %v8213_v18 }
 0x6aa   :  { %8016 = vmatpush1.msra.mxu1 %v7981_v39  ;;  %7883 = vmatprep.subr.mxu0 %v7838_v54  ;;  %v8223_v39 = vunpack.c.l.bf16 %v8214_v62  ;;  %v8125_v54 = vunpack.c.l.bf16 %v8796_v13  ;;  %v8331_v62 = vld [vmem:[%s17032_s9 + $0x48] sm:$0xff]  ;;  %v8330_v13 = vld [vmem:[%s17032_s9 + $0x40] sm:$0xff] }
 0x6ab   :  { %8017 = vmatprep.subr.mxu1 %v7980_v31  ;;  %7884 = vmatpush1.msra.mxu0 %v7837_v14  ;;  %v8222_v14 = vunpack.c.h.bf16 %v8213_v18  ;;  %v8124_v31 = vunpack.c.h.bf16 %v8795_v26  ;;  %v8328_v18 = vld [vmem:[%s17032_s9 + $0x30] sm:$0xff] }
 0x6ac   :  { %8018 = vmatpush1.msra.mxu1 %v7979_v55  ;;  %7885 = vmatprep.subr.mxu0 %v7836_v59  ;;  %v8123_v55 = vunpack.c.l.bf16 %v8795_v26  ;;  %v8793_v59 = vld [vmem:[%s17029_s6 + $0x438] sm:$0xff]  ;;  %v8327_v26 = vld [vmem:[%s17032_s9 + $0x28] sm:$0xff] }
 0x6ad   :  { %8019 = vmatprep.subr.mxu1 %v7978_v24  ;;  %7886 = vmatpush1.msra.mxu0 %v7835_v52  ;;  %v8211_v52 = vld [vmem:[%s17030_s7] sm:$0xff]  ;;  %v8122_v24 = vunpack.c.h.bf16 %v8794_v41  ;;  %v8120_v0 = vunpack.c.h.bf16 %v8793_v59 }
 0x6ae   :  { %8020 = vmatpush1.msra.mxu1 %v7977_v28  ;;  %7887 = vmatprep.subr.mxu0 %v7834_v38  ;;  %v8121_v28 = vunpack.c.l.bf16 %v8794_v41  ;;  %v8792_v38 = vld [vmem:[%s17029_s6 + $0x430] sm:$0xff] }
 0x6af   :  { %8021 = vmatprep.subr.mxu1 %v7976_v9  ;;  %7888 = vmatpush1.msra.mxu0 %v7833_v8  ;;  %v8218_v8 = vunpack.c.h.bf16 %v8211_v52  ;;  %v8119_v9 = vunpack.c.l.bf16 %v8793_v59  ;;  %v8117_v47 = vunpack.c.l.bf16 %v8792_v38  ;;  %v8324_v41 = vld [vmem:[%s17032_s9 + $0x10] sm:$0xff] }
 0x6b0   :  { %8022 = vmatpush1.msra.mxu1 %v7975_v23  ;;  %7889 = vmatprep.subr.mxu0 %v7832_v3  ;;  %v8217_v23 = vunpack.c.l.bf16 %v8211_v52  ;;  %v8118_v3 = vunpack.c.h.bf16 %v8792_v38 }
 0x6b1   :  { %8023 = vmatprep.subr.mxu1 %v7974_v5  ;;  %7890 = vmatpush1.msra.mxu0 %v7831_v43  ;;  %v8790_v43 = vld [vmem:[%s17029_s6 + $0x420] sm:$0xff]  ;;  %v8116_v5 = vunpack.c.h.bf16 %v8791_v6 }
 0x6b2   :  { %8024 = vmatpush1.msra.mxu1 %v7973_v30  ;;  %7891 = vmatprep.subr.mxu0 %v7830_v7  ;;  %v8210_v30 = vld [vmem:[%s17028_s5] sm:$0x3]  ;;  %v8115_v7 = vunpack.c.l.bf16 %v8791_v6 }
 0x6b3   :  { %8025 = vmatprep.subr.mxu1 %v7972_v33  ;;  %7892 = vmatpush1.msra.mxu0 %v7829_v60  ;;  %v8114_v60 = vunpack.c.h.bf16 %v8790_v43  ;;  %v8113_v33 = vunpack.c.l.bf16 %v8790_v43  ;;  %v8308_v43 = vlaneseq }
 0x6b4   :  { %7925 = vmatprep.mubr.f32.mxu0 %v12135_v1  ;;  %8026 = vmatpush1.msra.mxu1 %v7971_v58  ;;  %v8112_v58 = vunpack.c.h.bf16 %v8789_v4 }
 0x6b5   :  { %7926 = vmatmul.mubr.f32.vlgmr.msra.gmra.mxu0 %v16647_v21  ;;  %8027 = vmatprep.subr.mxu1 %v7970_v46  ;;  %v8797_v21 = vld [vmem:[%s17029_s6 + $0x458] sm:$0xff]  ;;  %v8787_v46 = vld [vmem:[%s17029_s6 + $0x408] sm:$0xff] }
 0x6b6   :  { %8137 = vmatprep.subr.mxu0 %v8136_v22  ;;  %8028 = vmatpush1.msra.mxu1 %v7969_v44  ;;  %v8128_v56 = vunpack.c.h.bf16 %v8797_v21  ;;  %v8127_v49 = vunpack.c.l.bf16 %v8797_v21  ;;  %v8109_v44 = vunpack.c.l.bf16 %v8788_v53  ;;  %v8108_v22 = vunpack.c.h.bf16 %v8787_v46  ;;  %v8333_v21 = vld [vmem:[%s17032_s9 + $0x58] sm:$0xff] }
 0x6b7   :  { %8138 = vmatpush1.msra.mxu0 %v8135_v17  ;;  %8029 = vmatprep.subr.mxu1 %v7968_v12  ;;  %v8107_v17 = vunpack.c.l.bf16 %v8787_v46 }
 0x6b8   :  { %8139 = vmatprep.subr.mxu0 %v8134_v29  ;;  %8030 = vmatpush1.msra.mxu1 %v7967_v45  ;;  %v8353_v45 = vld [vmem:[%s17032_s9 + $0xf8] sm:$0xff] }
 0x6b9   :  { %8063 = vmatprep.mubr.f32.mxu1 %v12135_v1  ;;  %8140 = vmatpush1.msra.mxu0 %v8133_v50  ;;  %v8337_v29 = vld [vmem:[%s17032_s9 + $0x78] sm:$0xff]  ;;  %v8336_v50 = vld [vmem:[%s17032_s9 + $0x70] sm:$0xff] }
 0x6ba   :  { %8064 = vmatmul.mubr.f32.vlgmr.msra.gmra.mxu1 %v16671_v20  ;;  %8141 = vmatprep.subr.mxu0 %v8132_v27  ;;  %v8212_v20 = vld [vmem:[%s17030_s7 + $0x8] sm:$0xff]  ;;  %v8350_v27 = vld [vmem:[%s17032_s9 + $0xe0] sm:$0xff] }
 0x6bb   :  { %8142 = vmatpush1.msra.mxu0 %v8131_v34  ;;  %8253 = vmatprep.subr.mxu1 %v8228_v36  ;;  %v8220_v35 = vunpack.c.h.bf16 %v8212_v20  ;;  %v8219_v42 = vunpack.c.l.bf16 %v8212_v20  ;;  %v8349_v34 = vld [vmem:[%s17032_s9 + $0xd8] sm:$0xff]  ;;  %v8348_v36 = vld [vmem:[%s17032_s9 + $0xd0] sm:$0xff] }
 0x6bc   :  { %8143 = vmatprep.subr.mxu0 %v8130_v57  ;;  %8254 = vmatpush1.msra.mxu1 %v8227_v37  ;;  %v8332_v57 = vld [vmem:[%s17032_s9 + $0x50] sm:$0xff]  ;;  %v8347_v37 = vld [vmem:[%s17032_s9 + $0xc8] sm:$0xff]  ;;  %v8325_v20 = vld [vmem:[%s17032_s9 + $0x18] sm:$0xff] }
 0x6bd   :  { %8144 = vmatpush1.msra.mxu0 %v8129_v16  ;;  %8255 = vmatprep.subr.mxu1 %v8226_v48  ;;  %v8346_v16 = vld [vmem:[%s17032_s9 + $0xc0] sm:$0xff]  ;;  %v8345_v48 = vld [vmem:[%s17032_s9 + $0xb8] sm:$0xff] }
 0x6be   :  { %8145 = vmatprep.subr.mxu0 %v8128_v56  ;;  %8256 = vmatpush1.msra.mxu1 %v8225_v61  ;;  %v8329_v56 = vld [vmem:[%s17032_s9 + $0x38] sm:$0xff]  ;;  %v8344_v61 = vld [vmem:[%s17032_s9 + $0xb0] sm:$0xff] }
 0x6bf   :  { %8146 = vmatpush1.msra.mxu0 %v8127_v49  ;;  %8257 = vmatprep.subr.mxu1 %v8224_v25  ;;  %v8343_v49 = vld [vmem:[%s17032_s9 + $0xa8] sm:$0xff]  ;;  %v8342_v25 = vld [vmem:[%s17032_s9 + $0xa0] sm:$0xff] }
 0x6c0   :  { %8147 = vmatprep.subr.mxu0 %v8126_v2  ;;  %8258 = vmatpush1.msra.mxu1 %v8223_v39  ;;  %v8326_v2 = vld [vmem:[%s17032_s9 + $0x20] sm:$0xff]  ;;  %v8341_v39 = vld [vmem:[%s17032_s9 + $0x98] sm:$0xff] }
 0x6c1   :  { %8148 = vmatpush1.msra.mxu0 %v8125_v54  ;;  %8259 = vmatprep.subr.mxu1 %v8222_v14  ;;  %v8340_v54 = vld [vmem:[%s17032_s9 + $0x90] sm:$0xff]  ;;  %v8339_v14 = vld [vmem:[%s17032_s9 + $0x88] sm:$0xff] }
 0x6c2   :  { %8149 = vmatprep.subr.mxu0 %v8124_v31  ;;  %8260 = vmatpush1.msra.mxu1 %v8221_v19  ;;  %v8323_v31 = vld [vmem:[%s17032_s9 + $0x8] sm:$0xff]  ;;  %v8338_v19 = vld [vmem:[%s17032_s9 + $0x80] sm:$0xff] }
 0x6c3   :  { %8150 = vmatpush1.msra.mxu0 %v8123_v55  ;;  %8261 = vmatprep.subr.mxu1 %v8220_v35  ;;  %v8322_v55 = vld [vmem:[%s17032_s9] sm:$0xff] }
 0x6c4   :  { %8151 = vmatprep.subr.mxu0 %v8122_v24  ;;  %8262 = vmatpush1.msra.mxu1 %v8219_v42 }
 0x6c5   :  { %8152 = vmatpush1.msra.mxu0 %v8121_v28  ;;  %8201 = vmatprep.mubr.f32.mxu0 %v12135_v1 }
 0x6c6   :  { %8153 = vmatprep.subr.mxu0 %v8120_v0  ;;  %8263 = vmatprep.subr.mxu1 %v8218_v8 }
 0x6c7   :  { %8154 = vmatpush1.msra.mxu0 %v8119_v9  ;;  %8264 = vmatpush1.msra.mxu1 %v8217_v23 }
 0x6c8   :  { %8155 = vmatprep.subr.mxu0 %v8118_v3  ;;  %8297 = vmatprep.mubr.f32.mxu1 %v12135_v1  ;;  %v8786_v1 = vld [vmem:[%s17029_s6 + $0x400] sm:$0xff] }
 0x6c9   :  { %8156 = vmatpush1.msra.mxu0 %v8117_v47  ;;  %8802 = vmatmul.mubr.msk.f32.vlgmr.msra.gmra.mxu1 %vm8229_vm5, %v8210_v30  ;;  %v8106_v12 = vunpack.c.h.bf16 %v8786_v1  ;;  %v8105_v51 = vunpack.c.l.bf16 %v8786_v1 }
 0x6ca   :  { %8157 = vmatprep.subr.mxu0 %v8116_v5  ;;  %9704 = vmatprep.subr.mxu1 %v8353_v45  ;;  %v8306_v45 = vld [vmem:[%s17031_s8] sm:$0x3] }
 0x6cb   :  { %8158 = vmatpush1.msra.mxu0 %v8115_v7  ;;  %9705 = vmatpush3.msra.mxu1 %v8337_v29 }
 0x6cc   :  { %8159 = vmatprep.subr.mxu0 %v8114_v60  ;;  %9706 = vmatprep.subr.mxu1 %v8352_v63 }
 0x6cd   :  { %8160 = vmatpush1.msra.mxu0 %v8113_v33  ;;  %9707 = vmatpush3.msra.mxu1 %v8336_v50 }
 0x6ce   :  { %8161 = vmatprep.subr.mxu0 %v8112_v58  ;;  %v8309_v58 = vshrl.u32 %v8308_v43, 7 }
 0x6cf   :  { %8162 = vmatpush1.msra.mxu0 %v8111_v15 }
 0x6d0   :  { %8163 = vmatprep.subr.mxu0 %v8110_v32  ;;  %v8314_v29 = vsub.s32 1, %v8309_v58 }
 0x6d1   :  { %8164 = vmatpush1.msra.mxu0 %v8109_v44 }
 0x6d2   :  { %8165 = vmatprep.subr.mxu0 %v8108_v22 }
 0x6d3   :  { %8166 = vmatpush1.msra.mxu0 %v8107_v17  ;;  %v8310_v17 = vsub.s32 0, %v8309_v58 }
 0x6d4   :  { %8167 = vmatprep.subr.mxu0 %v8106_v12 }
 0x6d5   :  { %8168 = vmatpush1.msra.mxu0 %v8105_v51 }
 0x6d6   :  { %8202 = vmatmul.mubr.f32.vlgmr.msra.gmra.mxu0 %v16698_v11  ;;  %v8351_v11 = vld [vmem:[%s17032_s9 + $0xe8] sm:$0xff] }
 0x6d7   :  { %9708 = vmatprep.subr.mxu1 %v8351_v11 }
 0x6d8   :  { %9709 = vmatpush3.msra.mxu1 %v8335_v10 }
 0x6d9   :  { %9710 = vmatprep.subr.mxu1 %v8350_v27  ;;  %v8311_v27 = vrot.slane %v8306_v45, %v8310_v17 }
 0x6da   :  { %9711 = vmatpush3.msra.mxu1 %v8334_v40 }
 0x6db   :  { %9712 = vmatprep.subr.mxu1 %v8349_v34 }
 0x6dc   :  { %9713 = vmatpush3.msra.mxu1 %v8333_v21 }
 0x6dd   :  { %9714 = vmatprep.subr.mxu1 %v8348_v36  ;;  %v8315_v36 = vrot.slane %v8306_v45, %v8314_v29 }
 0x6de   :  { %9715 = vmatpush3.msra.mxu1 %v8332_v57 }
 0x6df   :  { %9716 = vmatprep.subr.mxu1 %v8347_v37 }
 0x6e0   :  { %9717 = vmatpush3.msra.mxu1 %v8331_v62 }
 0x6e1   :  { %9718 = vmatprep.subr.mxu1 %v8346_v16 }
 0x6e2   :  { %9719 = vmatpush3.msra.mxu1 %v8330_v13 }
 0x6e3   :  { %9720 = vmatprep.subr.mxu1 %v8345_v48 }
 0x6e4   :  { %9721 = vmatpush3.msra.mxu1 %v8329_v56 }
 0x6e5   :  { %9722 = vmatprep.subr.mxu1 %v8344_v61  ;;  %v8803_v61 = vld [vmem:[%s17033_s10] ss:$0 sm:$0xff] }
 0x6e6   :  { %9723 = vmatpush3.msra.mxu1 %v8328_v18 }
 0x6e7   :  { %9724 = vmatprep.subr.mxu1 %v8343_v49 }
 0x6e8   :  { %9725 = vmatpush3.msra.mxu1 %v8327_v26 }
 0x6e9   :  { %9726 = vmatprep.subr.mxu1 %v8342_v25 }
 0x6ea   :  { %9727 = vmatpush3.msra.mxu1 %v8326_v2 }
 0x6eb   :  { %9728 = vmatprep.subr.mxu1 %v8341_v39 }
 0x6ec   :  { %9729 = vmatpush3.msra.mxu1 %v8325_v20 }
 0x6ed   :  { %9730 = vmatprep.subr.mxu1 %v8340_v54 }
 0x6ee   :  { %9731 = vmatpush3.msra.mxu1 %v8324_v41 }
 0x6ef   :  { %9732 = vmatprep.subr.mxu1 %v8339_v14 }
 0x6f0   :  { %9733 = vmatpush3.msra.mxu1 %v8323_v31 }
 0x6f1   :  { %9734 = vmatprep.subr.mxu1 %v8338_v19 }
 0x6f2   :  { %9735 = vmatpush3.msra.mxu1 %v8322_v55 }
 0x711   :  { %v7168_v59 = vpop.f32.mrf.mxu0 }
 0x713   :  { %v7170_v52 = vpop.f32.mrf.mxu0 }
 0x715   :  { %v7239_v35 = vpop.f32.mrf.mxu1 }
 0x716   :  { %v7240_v9 = vadd.f32 %v7239_v35, %v7168_v59 }
 0x717   :  { %v7241_v24 = vpop.f32.mrf.mxu1 }
 0x718   :  { %v7242_v23 = vadd.f32 %v7241_v24, %v7170_v52 }
 0x731   :  { %v7375_v42 = vpop.f32.mrf.mxu0 }
 0x732   :  { %v7380_v3 = vadd.f32 %v7375_v42, %v7240_v9 }
 0x733   :  { %v7377_v38 = vpop.f32.mrf.mxu0 }
 0x734   :  { %v7381_v5 = vadd.f32 %v7377_v38, %v7242_v23 }
 0x736   :  { %v7513_v28 = vpop.f32.mrf.mxu1 }
 0x737   :  { %v7518_v30 = vadd.f32 %v7513_v28, %v7380_v3 }
 0x738   :  { %v7515_v0 = vpop.f32.mrf.mxu1 }
 0x739   :  { %v7519_v60 = vadd.f32 %v7515_v0, %v7381_v5 }
 0x753   :  { %v7651_v8 = vpop.f32.mrf.mxu0 }
 0x754   :  { %v7656_v33 = vadd.f32 %v7651_v8, %v7518_v30 }
 0x755   :  { %v7653_v47 = vpop.f32.mrf.mxu0 }
 0x756   :  { %v7657_v15 = vadd.f32 %v7653_v47, %v7519_v60 }
 0x758   :  { %v7789_v6 = vpop.f32.mrf.mxu1 }
 0x759   :  { %v7794_v46 = vadd.f32 %v7789_v6, %v7656_v33 }
 0x75a   :  { %v7791_v7 = vpop.f32.mrf.mxu1 }
 0x75b   :  { %v7795_v44 = vadd.f32 %v7791_v7, %v7657_v15 }
 0x775   :  { %v7927_v4 = vpop.f32.mrf.mxu0 }
 0x776   :  { %v7932_v1 = vadd.f32 %v7927_v4, %v7794_v46 }
 0x777   :  { %v7929_v32 = vpop.f32.mrf.mxu0 }
 0x778   :  { %v7933_v12 = vadd.f32 %v7929_v32, %v7795_v44 }
 0x77a   :  { %v8065_v53 = vpop.f32.mrf.mxu1 }
 0x77b   :  { %v8070_v51 = vadd.f32 %v8065_v53, %v7932_v1 }
 0x77c   :  { %v8067_v22 = vpop.f32.mrf.mxu1 }
 0x77d   :  { %v8071_v11 = vadd.f32 %v8067_v22, %v7933_v12 }
 0x789   :  { %v8299_v50 = vpop.f32.mrf.mxu1 }
 0x78b   :  { %v8301_v57 = vpop.f32.mrf.mxu1 }
 0x796   :  { %v8203_v63 = vpop.f32.mrf.mxu0 }
 0x797   :  { %v8208_v10 = vadd.f32 %v8203_v63, %v8070_v51 }
 0x798   :  { %v8205_v40 = vpop.f32.mrf.mxu0 }
 0x799   :  { %v8304_v34 = vadd.f32 %v8299_v50, %v8208_v10  ;;  %v8209_v21 = vadd.f32 %v8205_v40, %v8071_v11 }
 0x79b   :  { %v8305_v37 = vadd.f32 %v8301_v57, %v8209_v21  ;;  %v8318_v62 = vadd.f32 %v8311_v27, %v8304_v34 }
 0x79d   :  { %v8319_v16 = vadd.f32 %v8315_v36, %v8305_v37  ;;  %v8320_v48 = vmax.f32 %v8318_v62, 0.0 }
 0x79f   :  { %v8321_v13 = vmax.f32 %v8319_v16, 0.0 }
 0x7a1   :  { %8425 = vmatprep.mubr.f32.mxu1 %v8321_v13 }
 0x7a2   :  { %8426 = vmatmul.mubr.f32.vlgmr.msra.gmra.mxu1 %v8320_v48 }
 0x862   :  { %v9736_v56 = vpop.f32.mrf.mxu1 }
 0x864   :  { %v9737_v18 = vpop.f32.mrf.mxu1 }
 0x865   :  { %v9738_v49 = vadd.f32 %v9737_v18, %v9736_v56 }
 0x867   :  { %v8428_v26 = vadd.f32 %v9738_v49, %v8803_v61 }
 0x869   :  { %8432 = vst.msk [vmem:[#allocation2] sm:$0x3] %vm8431_vm6, %v8428_v26 }
 0x86a   :  { %12124 = shalt.err (!%p12121_p4)
}
 0x86b   :  { %8442 = dma.vmem_to_hbm [thread:$0]  %s8440_s14, 32, %s17034_s11, [#allocation3]  }
 0x86c   :  { %12133 = dma.done.wait [#allocation3], 32  }
 0x86d   :  { %12134 = vsyncadd [#allocation3], 4294967264 }
 0x86e   :  { %8446 = vsyncpa [#allocation3], 1 }

</bundles_post_ra>
